<compile_context>
chip_gen: v7x
topology: tpu7x:2x2x1
jax: 0.10.0
libtpu: 0.0.40
codegen_flags: <defaults>
</compile_context>

<pallas_src>
import functools

import jax
import jax.numpy as jnp
from jax import lax
from jax.experimental import pallas as pl
from jax.experimental.pallas import tpu as pltpu

LN_EPS = 1e-6
NEG_INF = -1e9


# ---------------- shared math (used inside the kernel and for the reference) --------------
def _rope(x, cos, sin_rot, roll_fn):
    # rotate-half RoPE written as  x*cos + roll(x, dh/2) * sin_signed
    # (the [-1, ..., +1] sign is folded into sin_rot ahead of time).
    return x * cos + roll_fn(x) * sin_rot


def _layernorm(x, g, b):
    mu = jnp.mean(x, axis=-1, keepdims=True)
    xc = x - mu
    var = jnp.mean(xc * xc, axis=-1, keepdims=True)
    return g[:, :] * (xc * lax.rsqrt(var + LN_EPS)) + b[:, :]


def _mha(x_q, x_kv, bias, wq, bq, wk, bk, wv, bv, wo, bo,
         cos, sin_rot, n_heads, use_rope, in_kernel):
    """Multi-head attention over one (L, d) slab.

    Per-head work is a static loop, but all slicing is done on the *weight*
    blocks (static ref/array slices -> plain loads) rather than on computed
    activations, and each head's output is accumulated straight through the Wo
    projection -- no lane-wise concat, only one head live at a time.
    """
    Lq, d = x_q.shape
    Lk = x_kv.shape[0]
    dh = d // n_heads
    scale = float(dh) ** -0.5
    bf16 = jnp.bfloat16

    xq_b = x_q.astype(bf16)                          # hoisted bf16 casts (MXU inputs)
    xkv_b = x_kv.astype(bf16)
    bias_full = jnp.broadcast_to(bias, (Lq, Lk))     # hoisted out of the head loop

    if in_kernel:
        roll_fn = lambda t: pltpu.roll(t, shift=dh // 2, axis=1)   # XLU slot
    else:
        roll_fn = lambda t: jnp.roll(t, shift=dh // 2, axis=1)

    acc = jnp.zeros((Lq, d), jnp.float32)
    for h in range(n_heads):
        sl = slice(h * dh, (h + 1) * dh)
        qh = jnp.dot(xq_b, wq[:, sl].astype(bf16),
                     preferred_element_type=jnp.float32) + bq[:, sl]
        kh = jnp.dot(xkv_b, wk[:, sl].astype(bf16),
                     preferred_element_type=jnp.float32) + bk[:, sl]
        vh = jnp.dot(xkv_b, wv[:, sl].astype(bf16),
                     preferred_element_type=jnp.float32) + bv[:, sl]
        if use_rope:
            qh = _rope(qh, cos, sin_rot, roll_fn)
            kh = _rope(kh, cos, sin_rot, roll_fn)
        qh = qh * scale
        # q @ k^T without materializing a transpose: contract the last dims.
        s = lax.dot_general(qh.astype(bf16), kh.astype(bf16),
                            dimension_numbers=(((1,), (1,)), ((), ())),
                            preferred_element_type=jnp.float32)
        s = s + bias_full
        s = s - jnp.max(s, axis=-1, keepdims=True)
        p = jnp.exp(s)
        denom = jnp.sum(p, axis=-1, keepdims=True)
        if in_kernel:
            p = p * pl.reciprocal(denom, approx=True)              # EUP slot
        else:
            p = p / denom
        oh = jnp.dot(p.astype(bf16), vh.astype(bf16),
                     preferred_element_type=jnp.float32)
        # fold this head's context straight into the output projection (no concat)
        acc = acc + jnp.dot(oh.astype(bf16), wo[sl, :].astype(bf16),
                            preferred_element_type=jnp.float32)
    return acc + bo[:, :]


def _ffn(x, w1, b1, w2, b2):
    bf16 = jnp.bfloat16
    h = jnp.dot(x.astype(bf16), w1[:, :].astype(bf16),
                preferred_element_type=jnp.float32) + b1[:, :]
    h = jnp.maximum(h, 0.0)
    return jnp.dot(h.astype(bf16), w2[:, :].astype(bf16),
                   preferred_element_type=jnp.float32) + b2[:, :]


def _decoder_layer_math(y, m, ybias, mbias, cos, sin_rot, params, n_heads, use_rope,
                        in_kernel):
    (wq1, bq1, wk1, bk1, wv1, bv1, wo1, bo1,
     wq2, bq2, wk2, bk2, wv2, bv2, wo2, bo2,
     g0, be0, g1, be1, g2, be2,
     w1, b1, w2, b2) = params
    # TODO(synk): nn.Dropout is identity here (eval-mode semantics); no RNG dropout in kernel.
    f1 = _mha(y, y, ybias, wq1, bq1, wk1, bk1, wv1, bv1, wo1, bo1,
              cos, sin_rot, n_heads, use_rope, in_kernel)
    x2 = _layernorm(f1 + y, g0, be0)
    f2 = _mha(x2, m, mbias, wq2, bq2, wk2, bk2, wv2, bv2, wo2, bo2,
              cos, sin_rot, n_heads, use_rope, in_kernel)
    x3 = _layernorm(f2 + x2, g1, be1)
    f3 = _ffn(x3, w1, b1, w2, b2)
    x = _layernorm(f3 + x3, g2, be2)
    return x


def _signed_sin(sin):
    # fold the rotate-half sign into the sin table once (outside the kernel):
    # rot_half(x)*sin == roll(x, dh/2) * concat([-sin_half, +sin_half])
    half = sin.shape[-1] // 2
    return jnp.concatenate([-sin[..., :half], sin[..., half:]], axis=-1)


# ---------------- Pallas kernel --------------------------------------------------------
def _decoder_kernel(n_heads, use_rope, *refs):
    out_ref = refs[-1]
    y_ref, m_ref, ybias_ref, mbias_ref, cos_ref, sinrot_ref = refs[:6]
    param_refs = refs[6:-1]          # weight/bias/LN refs are sliced lazily inside the math

    y = y_ref[0]              # (L, d)
    m = m_ref[0]              # (L, d)
    ybias = ybias_ref[0]      # (1, L)
    mbias = mbias_ref[0]      # (1, L)
    cos = cos_ref[:, :]       # (L, dh)
    sin_rot = sinrot_ref[:, :]  # (L, dh), sign already folded in

    out_ref[0] = _decoder_layer_math(y, m, ybias, mbias, cos, sin_rot, param_refs,
                                     n_heads, use_rope, in_kernel=True)


def decoder_layer_pallas(y, m, y_mask, m_mask, params, cos, sin, n_heads, use_rope=True):
    b, L, d = y.shape
    # key-padding masks -> additive biases, shaped (b, 1, L) so blocks obey tiling rules
    ybias = ((1.0 - y_mask.astype(jnp.float32)) * NEG_INF).reshape(b, 1, L)
    mbias = ((1.0 - m_mask.astype(jnp.float32)) * NEG_INF).reshape(b, 1, L)

    # fold the rotate-half sign into the sin table once (hoisted out of the kernel)
    sin_rot = _signed_sin(sin)

    # Pre-cast 2-D weight matrices to bf16 (MXU inputs); biases / LN params stay f32.
    params = tuple(
        p.astype(jnp.bfloat16) if (p.ndim == 2 and p.shape[0] > 1 and p.shape[1] > 1) else p
        for p in params)

    inputs = (y, m, ybias, mbias, cos, sin_rot) + params
    kernel = functools.partial(_decoder_kernel, n_heads, use_rope)

    def build(weight_mode):
        def batched_spec(shape):
            nd = len(shape)
            return pl.BlockSpec((1,) + tuple(shape[1:]),
                                lambda i, _nd=nd: (i,) + (0,) * (_nd - 1))

        def invariant_spec(shape):
            nd = len(shape)
            kw = {} if weight_mode is None else {"pipeline_mode": weight_mode}
            return pl.BlockSpec(tuple(shape), lambda i, _nd=nd: (0,) * _nd, **kw)

        in_specs = [batched_spec(y.shape), batched_spec(m.shape),
                    batched_spec(ybias.shape), batched_spec(mbias.shape),
                    invariant_spec(cos.shape), invariant_spec(sin_rot.shape)]
        in_specs += [invariant_spec(p.shape) for p in params]
        out_spec = batched_spec((b, L, d))

        return pl.pallas_call(
            kernel,
            out_shape=jax.ShapeDtypeStruct((b, L, d), jnp.float32),
            grid=(b,),
            in_specs=in_specs,
            out_specs=out_spec,
            # batch elements are independent -> let megacore (v7x) split them
            compiler_params=pltpu.CompilerParams(dimension_semantics=("parallel",)),
        )

    try:
        # grid-invariant operands (weights / RoPE tables) don't need double-buffering;
        # single-buffering them roughly halves weight VMEM residency.
        return build(pl.Buffered(1))(*inputs)
    except Exception:
        # Fallback for Pallas versions that reject single-buffered pipeline_mode.
        return build(None)(*inputs)


# ---------------- deterministic parameter construction ----------------------------------
def make_params(key, d, d_ff):
    keys = jax.random.split(key, 30)
    ki = 0

    def nrm(shape, scale):
        nonlocal ki
        k = keys[ki]
        ki += 1
        return jax.random.normal(k, shape, dtype=jnp.float32) * scale

    params = []
    for _ in range(2):                       # self-attn then cross-attn: (Wq,bq,Wk,bk,Wv,bv,Wo,bo)
        for _ in range(4):
            params.append(nrm((d, d), 0.05))
            params.append(nrm((1, d), 0.02))
    for _ in range(3):                       # 3 layer norms: (gamma, beta)
        params.append(1.0 + nrm((1, d), 0.01))
        params.append(nrm((1, d), 0.01))
    params.append(nrm((d, d_ff), 0.05))      # FFN
    params.append(nrm((1, d_ff), 0.02))
    params.append(nrm((d_ff, d), 0.05))
    params.append(nrm((1, d), 0.02))
    return tuple(params)


def make_rope_tables(L, dh):
    pos = jnp.arange(L, dtype=jnp.float32)
    inv_freq = 1.0 / (10000.0 ** (jnp.arange(0, dh, 2, dtype=jnp.float32) / dh))
    ang = pos[:, None] * inv_freq[None, :]               # (L, dh//2)
    cos = jnp.concatenate([jnp.cos(ang), jnp.cos(ang)], axis=-1)
    sin = jnp.concatenate([jnp.sin(ang), jnp.sin(ang)], axis=-1)
    return cos, sin


if __name__ == "__main__":
    b, L, d, n_heads, d_ff = 2, 8, 32, 4, 64
    dh = d // n_heads

    key = jax.random.PRNGKey(0)
    k_y, k_m, k_p = jax.random.split(key, 3)

    y = jax.random.normal(k_y, (b, L, d), dtype=jnp.float32)
    m = jax.random.normal(k_m, (b, L, d), dtype=jnp.float32)
    y_mask = jnp.ones((b, L), jnp.float32).at[1, -2:].set(0.0)   # pad last 2 of batch 1
    m_mask = jnp.ones((b, L), jnp.float32).at[0, -3:].set(0.0)   # pad last 3 of batch 0

    params = make_params(k_p, d, d_ff)
    cos, sin = make_rope_tables(L, dh)

    out = decoder_layer_pallas(y, m, y_mask, m_mask, params, cos, sin, n_heads, use_rope=True)
    out = jax.block_until_ready(out)

    # pure-JAX reference (same math incl. bf16 matmul rounding), vmapped over batch
    ybias = ((1.0 - y_mask) * NEG_INF).reshape(b, 1, L)
    mbias = ((1.0 - m_mask) * NEG_INF).reshape(b, 1, L)
    sin_rot = _signed_sin(sin)
    ref = jax.vmap(
        lambda yy, mm, yb, mb: _decoder_layer_math(
            yy, mm, yb, mb, cos, sin_rot, params, n_heads, True, in_kernel=False)
    )(y, m, ybias, mbias)
    ref = jax.block_until_ready(ref)

    assert out.shape == (b, L, d)
    assert jnp.all(jnp.isfinite(out))
    # tolerance accounts for approx-reciprocal softmax + bf16 MXU rounding
    assert jnp.allclose(out, ref, atol=2e-2, rtol=2e-2), float(jnp.max(jnp.abs(out - ref)))
    print("KERNEL_OK")
</pallas_src>

<mosaic_0001>
module attributes {stable_mosaic.version = 11 : i64} {
  func.func @_decoder_kernel(%arg0: i32, %arg1: memref<1x8x32xf32, #tpu.memory_space<vmem>>, %arg2: memref<1x8x32xf32, #tpu.memory_space<vmem>>, %arg3: memref<1x1x8xf32, #tpu.memory_space<vmem>>, %arg4: memref<1x1x8xf32, #tpu.memory_space<vmem>>, %arg5: memref<8x8xf32, #tpu.memory_space<vmem>>, %arg6: memref<8x8xf32, #tpu.memory_space<vmem>>, %arg7: memref<32x32xbf16, #tpu.memory_space<vmem>>, %arg8: memref<1x32xf32, #tpu.memory_space<vmem>>, %arg9: memref<32x32xbf16, #tpu.memory_space<vmem>>, %arg10: memref<1x32xf32, #tpu.memory_space<vmem>>, %arg11: memref<32x32xbf16, #tpu.memory_space<vmem>>, %arg12: memref<1x32xf32, #tpu.memory_space<vmem>>, %arg13: memref<32x32xbf16, #tpu.memory_space<vmem>>, %arg14: memref<1x32xf32, #tpu.memory_space<vmem>>, %arg15: memref<32x32xbf16, #tpu.memory_space<vmem>>, %arg16: memref<1x32xf32, #tpu.memory_space<vmem>>, %arg17: memref<32x32xbf16, #tpu.memory_space<vmem>>, %arg18: memref<1x32xf32, #tpu.memory_space<vmem>>, %arg19: memref<32x32xbf16, #tpu.memory_space<vmem>>, %arg20: memref<1x32xf32, #tpu.memory_space<vmem>>, %arg21: memref<32x32xbf16, #tpu.memory_space<vmem>>, %arg22: memref<1x32xf32, #tpu.memory_space<vmem>>, %arg23: memref<1x32xf32, #tpu.memory_space<vmem>>, %arg24: memref<1x32xf32, #tpu.memory_space<vmem>>, %arg25: memref<1x32xf32, #tpu.memory_space<vmem>>, %arg26: memref<1x32xf32, #tpu.memory_space<vmem>>, %arg27: memref<1x32xf32, #tpu.memory_space<vmem>>, %arg28: memref<1x32xf32, #tpu.memory_space<vmem>>, %arg29: memref<32x64xbf16, #tpu.memory_space<vmem>>, %arg30: memref<1x64xf32, #tpu.memory_space<vmem>>, %arg31: memref<64x32xbf16, #tpu.memory_space<vmem>>, %arg32: memref<1x32xf32, #tpu.memory_space<vmem>>, %arg33: memref<1x8x32xf32, #tpu.memory_space<vmem>>) attributes {dimension_semantics = [#tpu.dimension_semantics<parallel>], iteration_bounds = array<i64: 2>, scalar_prefetch = 0 : i64, scratch_operands = 0 : i64, tpu.core_type = #tpu.core_type<tc>, window_params = [{transform_indices = @transform_0, window_bounds = array<i64: 1, 8, 32>}, {transform_indices = @transform_1, window_bounds = array<i64: 1, 8, 32>}, {transform_indices = @transform_2, window_bounds = array<i64: 1, 1, 8>}, {transform_indices = @transform_3, window_bounds = array<i64: 1, 1, 8>}, {pipeline_mode = #tpu.pipeline_mode<synchronous>, transform_indices = @transform_4, window_bounds = array<i64: 8, 8>}, {pipeline_mode = #tpu.pipeline_mode<synchronous>, transform_indices = @transform_5, window_bounds = array<i64: 8, 8>}, {pipeline_mode = #tpu.pipeline_mode<synchronous>, transform_indices = @transform_6, window_bounds = array<i64: 32, 32>}, {pipeline_mode = #tpu.pipeline_mode<synchronous>, transform_indices = @transform_7, window_bounds = array<i64: 1, 32>}, {pipeline_mode = #tpu.pipeline_mode<synchronous>, transform_indices = @transform_8, window_bounds = array<i64: 32, 32>}, {pipeline_mode = #tpu.pipeline_mode<synchronous>, transform_indices = @transform_9, window_bounds = array<i64: 1, 32>}, {pipeline_mode = #tpu.pipeline_mode<synchronous>, transform_indices = @transform_10, window_bounds = array<i64: 32, 32>}, {pipeline_mode = #tpu.pipeline_mode<synchronous>, transform_indices = @transform_11, window_bounds = array<i64: 1, 32>}, {pipeline_mode = #tpu.pipeline_mode<synchronous>, transform_indices = @transform_12, window_bounds = array<i64: 32, 32>}, {pipeline_mode = #tpu.pipeline_mode<synchronous>, transform_indices = @transform_13, window_bounds = array<i64: 1, 32>}, {pipeline_mode = #tpu.pipeline_mode<synchronous>, transform_indices = @transform_14, window_bounds = array<i64: 32, 32>}, {pipeline_mode = #tpu.pipeline_mode<synchronous>, transform_indices = @transform_15, window_bounds = array<i64: 1, 32>}, {pipeline_mode = #tpu.pipeline_mode<synchronous>, transform_indices = @transform_16, window_bounds = array<i64: 32, 32>}, {pipeline_mode = #tpu.pipeline_mode<synchronous>, transform_indices = @transform_17, window_bounds = array<i64: 1, 32>}, {pipeline_mode = #tpu.pipeline_mode<synchronous>, transform_indices = @transform_18, window_bounds = array<i64: 32, 32>}, {pipeline_mode = #tpu.pipeline_mode<synchronous>, transform_indices = @transform_19, window_bounds = array<i64: 1, 32>}, {pipeline_mode = #tpu.pipeline_mode<synchronous>, transform_indices = @transform_20, window_bounds = array<i64: 32, 32>}, {pipeline_mode = #tpu.pipeline_mode<synchronous>, transform_indices = @transform_21, window_bounds = array<i64: 1, 32>}, {pipeline_mode = #tpu.pipeline_mode<synchronous>, transform_indices = @transform_22, window_bounds = array<i64: 1, 32>}, {pipeline_mode = #tpu.pipeline_mode<synchronous>, transform_indices = @transform_23, window_bounds = array<i64: 1, 32>}, {pipeline_mode = #tpu.pipeline_mode<synchronous>, transform_indices = @transform_24, window_bounds = array<i64: 1, 32>}, {pipeline_mode = #tpu.pipeline_mode<synchronous>, transform_indices = @transform_25, window_bounds = array<i64: 1, 32>}, {pipeline_mode = #tpu.pipeline_mode<synchronous>, transform_indices = @transform_26, window_bounds = array<i64: 1, 32>}, {pipeline_mode = #tpu.pipeline_mode<synchronous>, transform_indices = @transform_27, window_bounds = array<i64: 1, 32>}, {pipeline_mode = #tpu.pipeline_mode<synchronous>, transform_indices = @transform_28, window_bounds = array<i64: 32, 64>}, {pipeline_mode = #tpu.pipeline_mode<synchronous>, transform_indices = @transform_29, window_bounds = array<i64: 1, 64>}, {pipeline_mode = #tpu.pipeline_mode<synchronous>, transform_indices = @transform_30, window_bounds = array<i64: 64, 32>}, {pipeline_mode = #tpu.pipeline_mode<synchronous>, transform_indices = @transform_31, window_bounds = array<i64: 1, 32>}, {transform_indices = @transform_32, window_bounds = array<i64: 1, 8, 32>}]} {
    %c0 = arith.constant 0 : index
    %c0_0 = arith.constant 0 : index
    %c0_1 = arith.constant 0 : index
    %0 = vector.load %arg1[%c0, %c0_0, %c0_1] : memref<1x8x32xf32, #tpu.memory_space<vmem>>, vector<1x8x32xf32>
    %1 = vector.shape_cast %0 : vector<1x8x32xf32> to vector<8x32xf32>
    %c0_2 = arith.constant 0 : index
    %c0_3 = arith.constant 0 : index
    %c0_4 = arith.constant 0 : index
    %2 = vector.load %arg2[%c0_2, %c0_3, %c0_4] : memref<1x8x32xf32, #tpu.memory_space<vmem>>, vector<1x8x32xf32>
    %3 = vector.shape_cast %2 : vector<1x8x32xf32> to vector<8x32xf32>
    %c0_5 = arith.constant 0 : index
    %c0_6 = arith.constant 0 : index
    %c0_7 = arith.constant 0 : index
    %4 = vector.load %arg3[%c0_5, %c0_6, %c0_7] : memref<1x1x8xf32, #tpu.memory_space<vmem>>, vector<1x1x8xf32>
    %5 = vector.shape_cast %4 : vector<1x1x8xf32> to vector<1x8xf32>
    %c0_8 = arith.constant 0 : index
    %c0_9 = arith.constant 0 : index
    %c0_10 = arith.constant 0 : index
    %6 = vector.load %arg4[%c0_8, %c0_9, %c0_10] : memref<1x1x8xf32, #tpu.memory_space<vmem>>, vector<1x1x8xf32>
    %7 = vector.shape_cast %6 : vector<1x1x8xf32> to vector<1x8xf32>
    %c0_11 = arith.constant 0 : index
    %c0_12 = arith.constant 0 : index
    %8 = vector.load %arg5[%c0_11, %c0_12] : memref<8x8xf32, #tpu.memory_space<vmem>>, vector<8x8xf32>
    %c0_13 = arith.constant 0 : index
    %c0_14 = arith.constant 0 : index
    %9 = vector.load %arg6[%c0_13, %c0_14] : memref<8x8xf32, #tpu.memory_space<vmem>>, vector<8x8xf32>
    %10 = arith.truncf %1 : vector<8x32xf32> to vector<8x32xbf16>
    %11 = arith.truncf %1 : vector<8x32xf32> to vector<8x32xbf16>
    %12 = vector.shape_cast %5 : vector<1x8xf32> to vector<1x8xf32>
    %13 = vector.broadcast %12 : vector<1x8xf32> to vector<8x8xf32>
    %cst = arith.constant 0.000000e+00 : f32
    %14 = vector.broadcast %cst : f32 to vector<8x32xf32>
    %c0_15 = arith.constant 0 : index
    %c0_16 = arith.constant 0 : index
    %15 = vector.load %arg7[%c0_15, %c0_16] : memref<32x32xbf16, #tpu.memory_space<vmem>>, vector<32x8xbf16>
    %cst_17 = arith.constant dense<0.000000e+00> : vector<8x8xf32>
    %16 = tpu.matmul %10, %15, %cst_17 {dimension_numbers = #tpu.dot_dimension_numbers<[1], [0], [0], [1], [0, 0, 1, 1], [], []>} : vector<8x32xbf16>, vector<32x8xbf16>, vector<8x8xf32> -> vector<8x8xf32>
    %c0_18 = arith.constant 0 : index
    %c0_19 = arith.constant 0 : index
    %17 = vector.load %arg8[%c0_18, %c0_19] : memref<1x32xf32, #tpu.memory_space<vmem>>, vector<1x8xf32>
    %18 = vector.broadcast %17 : vector<1x8xf32> to vector<8x8xf32>
    %19 = arith.addf %16, %18 : vector<8x8xf32>
    %c0_20 = arith.constant 0 : index
    %c0_21 = arith.constant 0 : index
    %20 = vector.load %arg9[%c0_20, %c0_21] : memref<32x32xbf16, #tpu.memory_space<vmem>>, vector<32x8xbf16>
    %cst_22 = arith.constant dense<0.000000e+00> : vector<8x8xf32>
    %21 = tpu.matmul %11, %20, %cst_22 {dimension_numbers = #tpu.dot_dimension_numbers<[1], [0], [0], [1], [0, 0, 1, 1], [], []>} : vector<8x32xbf16>, vector<32x8xbf16>, vector<8x8xf32> -> vector<8x8xf32>
    %c0_23 = arith.constant 0 : index
    %c0_24 = arith.constant 0 : index
    %22 = vector.load %arg10[%c0_23, %c0_24] : memref<1x32xf32, #tpu.memory_space<vmem>>, vector<1x8xf32>
    %23 = vector.broadcast %22 : vector<1x8xf32> to vector<8x8xf32>
    %24 = arith.addf %21, %23 : vector<8x8xf32>
    %c0_25 = arith.constant 0 : index
    %c0_26 = arith.constant 0 : index
    %25 = vector.load %arg11[%c0_25, %c0_26] : memref<32x32xbf16, #tpu.memory_space<vmem>>, vector<32x8xbf16>
    %cst_27 = arith.constant dense<0.000000e+00> : vector<8x8xf32>
    %26 = tpu.matmul %11, %25, %cst_27 {dimension_numbers = #tpu.dot_dimension_numbers<[1], [0], [0], [1], [0, 0, 1, 1], [], []>} : vector<8x32xbf16>, vector<32x8xbf16>, vector<8x8xf32> -> vector<8x8xf32>
    %c0_28 = arith.constant 0 : index
    %c0_29 = arith.constant 0 : index
    %27 = vector.load %arg12[%c0_28, %c0_29] : memref<1x32xf32, #tpu.memory_space<vmem>>, vector<1x8xf32>
    %28 = vector.broadcast %27 : vector<1x8xf32> to vector<8x8xf32>
    %29 = arith.addf %26, %28 : vector<8x8xf32>
    %30 = arith.mulf %19, %8 : vector<8x8xf32>
    %c4_i32 = arith.constant 4 : i32
    %31 = tpu.dynamic_rotate %19 by %c4_i32 dim 1 : vector<8x8xf32>, i32 -> vector<8x8xf32>
    %32 = arith.mulf %31, %9 : vector<8x8xf32>
    %33 = arith.addf %30, %32 : vector<8x8xf32>
    %34 = arith.mulf %24, %8 : vector<8x8xf32>
    %c4_i32_30 = arith.constant 4 : i32
    %35 = tpu.dynamic_rotate %24 by %c4_i32_30 dim 1 : vector<8x8xf32>, i32 -> vector<8x8xf32>
    %36 = arith.mulf %35, %9 : vector<8x8xf32>
    %37 = arith.addf %34, %36 : vector<8x8xf32>
    %cst_31 = arith.constant 0.353553385 : f32
    %38 = vector.broadcast %cst_31 : f32 to vector<8x8xf32>
    %39 = arith.mulf %33, %38 : vector<8x8xf32>
    %40 = arith.truncf %39 : vector<8x8xf32> to vector<8x8xbf16>
    %41 = arith.truncf %37 : vector<8x8xf32> to vector<8x8xbf16>
    %cst_32 = arith.constant dense<0.000000e+00> : vector<8x8xf32>
    %42 = tpu.matmul %40, %41, %cst_32 {dimension_numbers = #tpu.dot_dimension_numbers<[1], [1], [0], [0], [0, 0, 1, 0], [], []>} : vector<8x8xbf16>, vector<8x8xbf16>, vector<8x8xf32> -> vector<8x8xf32>
    %43 = arith.addf %42, %13 : vector<8x8xf32>
    %cst_33 = arith.constant dense<0xFF800000> : vector<8xf32>
    %44 = vector.multi_reduction <maximumf>, %43, %cst_33 [1] : vector<8x8xf32> to vector<8xf32>
    %45 = vector.shape_cast %44 : vector<8xf32> to vector<8x1xf32>
    %46 = vector.broadcast %45 : vector<8x1xf32> to vector<8x8xf32>
    %47 = arith.subf %43, %46 : vector<8x8xf32>
    %48 = math.exp %47 : vector<8x8xf32>
    %cst_34 = arith.constant dense<0.000000e+00> : vector<8xf32>
    %49 = vector.multi_reduction <add>, %48, %cst_34 [1] : vector<8x8xf32> to vector<8xf32>
    %50 = vector.shape_cast %49 : vector<8xf32> to vector<8x1xf32>
    %51 = tpu.reciprocal %50 {approx = true} : vector<8x1xf32> -> vector<8x1xf32>
    %52 = vector.broadcast %51 : vector<8x1xf32> to vector<8x8xf32>
    %53 = arith.mulf %48, %52 : vector<8x8xf32>
    %54 = arith.truncf %53 : vector<8x8xf32> to vector<8x8xbf16>
    %55 = arith.truncf %29 : vector<8x8xf32> to vector<8x8xbf16>
    %cst_35 = arith.constant dense<0.000000e+00> : vector<8x8xf32>
    %56 = tpu.matmul %54, %55, %cst_35 {dimension_numbers = #tpu.dot_dimension_numbers<[1], [0], [0], [1], [0, 0, 1, 1], [], []>} : vector<8x8xbf16>, vector<8x8xbf16>, vector<8x8xf32> -> vector<8x8xf32>
    %57 = arith.truncf %56 : vector<8x8xf32> to vector<8x8xbf16>
    %c0_36 = arith.constant 0 : index
    %c0_37 = arith.constant 0 : index
    %58 = vector.load %arg13[%c0_36, %c0_37] : memref<32x32xbf16, #tpu.memory_space<vmem>>, vector<8x32xbf16>
    %cst_38 = arith.constant dense<0.000000e+00> : vector<8x32xf32>
    %59 = tpu.matmul %57, %58, %cst_38 {dimension_numbers = #tpu.dot_dimension_numbers<[1], [0], [0], [1], [0, 0, 1, 1], [], []>} : vector<8x8xbf16>, vector<8x32xbf16>, vector<8x32xf32> -> vector<8x32xf32>
    %60 = arith.addf %14, %59 : vector<8x32xf32>
    %c0_39 = arith.constant 0 : index
    %c8 = arith.constant 8 : index
    %61 = vector.load %arg7[%c0_39, %c8] : memref<32x32xbf16, #tpu.memory_space<vmem>>, vector<32x8xbf16>
    %cst_40 = arith.constant dense<0.000000e+00> : vector<8x8xf32>
    %62 = tpu.matmul %10, %61, %cst_40 {dimension_numbers = #tpu.dot_dimension_numbers<[1], [0], [0], [1], [0, 0, 1, 1], [], []>} : vector<8x32xbf16>, vector<32x8xbf16>, vector<8x8xf32> -> vector<8x8xf32>
    %c0_41 = arith.constant 0 : index
    %c8_42 = arith.constant 8 : index
    %63 = vector.load %arg8[%c0_41, %c8_42] : memref<1x32xf32, #tpu.memory_space<vmem>>, vector<1x8xf32>
    %64 = vector.broadcast %63 : vector<1x8xf32> to vector<8x8xf32>
    %65 = arith.addf %62, %64 : vector<8x8xf32>
    %c0_43 = arith.constant 0 : index
    %c8_44 = arith.constant 8 : index
    %66 = vector.load %arg9[%c0_43, %c8_44] : memref<32x32xbf16, #tpu.memory_space<vmem>>, vector<32x8xbf16>
    %cst_45 = arith.constant dense<0.000000e+00> : vector<8x8xf32>
    %67 = tpu.matmul %11, %66, %cst_45 {dimension_numbers = #tpu.dot_dimension_numbers<[1], [0], [0], [1], [0, 0, 1, 1], [], []>} : vector<8x32xbf16>, vector<32x8xbf16>, vector<8x8xf32> -> vector<8x8xf32>
    %c0_46 = arith.constant 0 : index
    %c8_47 = arith.constant 8 : index
    %68 = vector.load %arg10[%c0_46, %c8_47] : memref<1x32xf32, #tpu.memory_space<vmem>>, vector<1x8xf32>
    %69 = vector.broadcast %68 : vector<1x8xf32> to vector<8x8xf32>
    %70 = arith.addf %67, %69 : vector<8x8xf32>
    %c0_48 = arith.constant 0 : index
    %c8_49 = arith.constant 8 : index
    %71 = vector.load %arg11[%c0_48, %c8_49] : memref<32x32xbf16, #tpu.memory_space<vmem>>, vector<32x8xbf16>
    %cst_50 = arith.constant dense<0.000000e+00> : vector<8x8xf32>
    %72 = tpu.matmul %11, %71, %cst_50 {dimension_numbers = #tpu.dot_dimension_numbers<[1], [0], [0], [1], [0, 0, 1, 1], [], []>} : vector<8x32xbf16>, vector<32x8xbf16>, vector<8x8xf32> -> vector<8x8xf32>
    %c0_51 = arith.constant 0 : index
    %c8_52 = arith.constant 8 : index
    %73 = vector.load %arg12[%c0_51, %c8_52] : memref<1x32xf32, #tpu.memory_space<vmem>>, vector<1x8xf32>
    %74 = vector.broadcast %73 : vector<1x8xf32> to vector<8x8xf32>
    %75 = arith.addf %72, %74 : vector<8x8xf32>
    %76 = arith.mulf %65, %8 : vector<8x8xf32>
    %c4_i32_53 = arith.constant 4 : i32
    %77 = tpu.dynamic_rotate %65 by %c4_i32_53 dim 1 : vector<8x8xf32>, i32 -> vector<8x8xf32>
    %78 = arith.mulf %77, %9 : vector<8x8xf32>
    %79 = arith.addf %76, %78 : vector<8x8xf32>
    %80 = arith.mulf %70, %8 : vector<8x8xf32>
    %c4_i32_54 = arith.constant 4 : i32
    %81 = tpu.dynamic_rotate %70 by %c4_i32_54 dim 1 : vector<8x8xf32>, i32 -> vector<8x8xf32>
    %82 = arith.mulf %81, %9 : vector<8x8xf32>
    %83 = arith.addf %80, %82 : vector<8x8xf32>
    %cst_55 = arith.constant 0.353553385 : f32
    %84 = vector.broadcast %cst_55 : f32 to vector<8x8xf32>
    %85 = arith.mulf %79, %84 : vector<8x8xf32>
    %86 = arith.truncf %85 : vector<8x8xf32> to vector<8x8xbf16>
    %87 = arith.truncf %83 : vector<8x8xf32> to vector<8x8xbf16>
    %cst_56 = arith.constant dense<0.000000e+00> : vector<8x8xf32>
    %88 = tpu.matmul %86, %87, %cst_56 {dimension_numbers = #tpu.dot_dimension_numbers<[1], [1], [0], [0], [0, 0, 1, 0], [], []>} : vector<8x8xbf16>, vector<8x8xbf16>, vector<8x8xf32> -> vector<8x8xf32>
    %89 = arith.addf %88, %13 : vector<8x8xf32>
    %cst_57 = arith.constant dense<0xFF800000> : vector<8xf32>
    %90 = vector.multi_reduction <maximumf>, %89, %cst_57 [1] : vector<8x8xf32> to vector<8xf32>
    %91 = vector.shape_cast %90 : vector<8xf32> to vector<8x1xf32>
    %92 = vector.broadcast %91 : vector<8x1xf32> to vector<8x8xf32>
    %93 = arith.subf %89, %92 : vector<8x8xf32>
    %94 = math.exp %93 : vector<8x8xf32>
    %cst_58 = arith.constant dense<0.000000e+00> : vector<8xf32>
    %95 = vector.multi_reduction <add>, %94, %cst_58 [1] : vector<8x8xf32> to vector<8xf32>
    %96 = vector.shape_cast %95 : vector<8xf32> to vector<8x1xf32>
    %97 = tpu.reciprocal %96 {approx = true} : vector<8x1xf32> -> vector<8x1xf32>
    %98 = vector.broadcast %97 : vector<8x1xf32> to vector<8x8xf32>
    %99 = arith.mulf %94, %98 : vector<8x8xf32>
    %100 = arith.truncf %99 : vector<8x8xf32> to vector<8x8xbf16>
    %101 = arith.truncf %75 : vector<8x8xf32> to vector<8x8xbf16>
    %cst_59 = arith.constant dense<0.000000e+00> : vector<8x8xf32>
    %102 = tpu.matmul %100, %101, %cst_59 {dimension_numbers = #tpu.dot_dimension_numbers<[1], [0], [0], [1], [0, 0, 1, 1], [], []>} : vector<8x8xbf16>, vector<8x8xbf16>, vector<8x8xf32> -> vector<8x8xf32>
    %103 = arith.truncf %102 : vector<8x8xf32> to vector<8x8xbf16>
    %c8_60 = arith.constant 8 : index
    %c0_61 = arith.constant 0 : index
    %104 = vector.load %arg13[%c8_60, %c0_61] : memref<32x32xbf16, #tpu.memory_space<vmem>>, vector<8x32xbf16>
    %cst_62 = arith.constant dense<0.000000e+00> : vector<8x32xf32>
    %105 = tpu.matmul %103, %104, %cst_62 {dimension_numbers = #tpu.dot_dimension_numbers<[1], [0], [0], [1], [0, 0, 1, 1], [], []>} : vector<8x8xbf16>, vector<8x32xbf16>, vector<8x32xf32> -> vector<8x32xf32>
    %106 = arith.addf %60, %105 : vector<8x32xf32>
    %c0_63 = arith.constant 0 : index
    %c16 = arith.constant 16 : index
    %107 = vector.load %arg7[%c0_63, %c16] : memref<32x32xbf16, #tpu.memory_space<vmem>>, vector<32x8xbf16>
    %cst_64 = arith.constant dense<0.000000e+00> : vector<8x8xf32>
    %108 = tpu.matmul %10, %107, %cst_64 {dimension_numbers = #tpu.dot_dimension_numbers<[1], [0], [0], [1], [0, 0, 1, 1], [], []>} : vector<8x32xbf16>, vector<32x8xbf16>, vector<8x8xf32> -> vector<8x8xf32>
    %c0_65 = arith.constant 0 : index
    %c16_66 = arith.constant 16 : index
    %109 = vector.load %arg8[%c0_65, %c16_66] : memref<1x32xf32, #tpu.memory_space<vmem>>, vector<1x8xf32>
    %110 = vector.broadcast %109 : vector<1x8xf32> to vector<8x8xf32>
    %111 = arith.addf %108, %110 : vector<8x8xf32>
    %c0_67 = arith.constant 0 : index
    %c16_68 = arith.constant 16 : index
    %112 = vector.load %arg9[%c0_67, %c16_68] : memref<32x32xbf16, #tpu.memory_space<vmem>>, vector<32x8xbf16>
    %cst_69 = arith.constant dense<0.000000e+00> : vector<8x8xf32>
    %113 = tpu.matmul %11, %112, %cst_69 {dimension_numbers = #tpu.dot_dimension_numbers<[1], [0], [0], [1], [0, 0, 1, 1], [], []>} : vector<8x32xbf16>, vector<32x8xbf16>, vector<8x8xf32> -> vector<8x8xf32>
    %c0_70 = arith.constant 0 : index
    %c16_71 = arith.constant 16 : index
    %114 = vector.load %arg10[%c0_70, %c16_71] : memref<1x32xf32, #tpu.memory_space<vmem>>, vector<1x8xf32>
    %115 = vector.broadcast %114 : vector<1x8xf32> to vector<8x8xf32>
    %116 = arith.addf %113, %115 : vector<8x8xf32>
    %c0_72 = arith.constant 0 : index
    %c16_73 = arith.constant 16 : index
    %117 = vector.load %arg11[%c0_72, %c16_73] : memref<32x32xbf16, #tpu.memory_space<vmem>>, vector<32x8xbf16>
    %cst_74 = arith.constant dense<0.000000e+00> : vector<8x8xf32>
    %118 = tpu.matmul %11, %117, %cst_74 {dimension_numbers = #tpu.dot_dimension_numbers<[1], [0], [0], [1], [0, 0, 1, 1], [], []>} : vector<8x32xbf16>, vector<32x8xbf16>, vector<8x8xf32> -> vector<8x8xf32>
    %c0_75 = arith.constant 0 : index
    %c16_76 = arith.constant 16 : index
    %119 = vector.load %arg12[%c0_75, %c16_76] : memref<1x32xf32, #tpu.memory_space<vmem>>, vector<1x8xf32>
    %120 = vector.broadcast %119 : vector<1x8xf32> to vector<8x8xf32>
    %121 = arith.addf %118, %120 : vector<8x8xf32>
    %122 = arith.mulf %111, %8 : vector<8x8xf32>
    %c4_i32_77 = arith.constant 4 : i32
    %123 = tpu.dynamic_rotate %111 by %c4_i32_77 dim 1 : vector<8x8xf32>, i32 -> vector<8x8xf32>
    %124 = arith.mulf %123, %9 : vector<8x8xf32>
    %125 = arith.addf %122, %124 : vector<8x8xf32>
    %126 = arith.mulf %116, %8 : vector<8x8xf32>
    %c4_i32_78 = arith.constant 4 : i32
    %127 = tpu.dynamic_rotate %116 by %c4_i32_78 dim 1 : vector<8x8xf32>, i32 -> vector<8x8xf32>
    %128 = arith.mulf %127, %9 : vector<8x8xf32>
    %129 = arith.addf %126, %128 : vector<8x8xf32>
    %cst_79 = arith.constant 0.353553385 : f32
    %130 = vector.broadcast %cst_79 : f32 to vector<8x8xf32>
    %131 = arith.mulf %125, %130 : vector<8x8xf32>
    %132 = arith.truncf %131 : vector<8x8xf32> to vector<8x8xbf16>
    %133 = arith.truncf %129 : vector<8x8xf32> to vector<8x8xbf16>
    %cst_80 = arith.constant dense<0.000000e+00> : vector<8x8xf32>
    %134 = tpu.matmul %132, %133, %cst_80 {dimension_numbers = #tpu.dot_dimension_numbers<[1], [1], [0], [0], [0, 0, 1, 0], [], []>} : vector<8x8xbf16>, vector<8x8xbf16>, vector<8x8xf32> -> vector<8x8xf32>
    %135 = arith.addf %134, %13 : vector<8x8xf32>
    %cst_81 = arith.constant dense<0xFF800000> : vector<8xf32>
    %136 = vector.multi_reduction <maximumf>, %135, %cst_81 [1] : vector<8x8xf32> to vector<8xf32>
    %137 = vector.shape_cast %136 : vector<8xf32> to vector<8x1xf32>
    %138 = vector.broadcast %137 : vector<8x1xf32> to vector<8x8xf32>
    %139 = arith.subf %135, %138 : vector<8x8xf32>
    %140 = math.exp %139 : vector<8x8xf32>
    %cst_82 = arith.constant dense<0.000000e+00> : vector<8xf32>
    %141 = vector.multi_reduction <add>, %140, %cst_82 [1] : vector<8x8xf32> to vector<8xf32>
    %142 = vector.shape_cast %141 : vector<8xf32> to vector<8x1xf32>
    %143 = tpu.reciprocal %142 {approx = true} : vector<8x1xf32> -> vector<8x1xf32>
    %144 = vector.broadcast %143 : vector<8x1xf32> to vector<8x8xf32>
    %145 = arith.mulf %140, %144 : vector<8x8xf32>
    %146 = arith.truncf %145 : vector<8x8xf32> to vector<8x8xbf16>
    %147 = arith.truncf %121 : vector<8x8xf32> to vector<8x8xbf16>
    %cst_83 = arith.constant dense<0.000000e+00> : vector<8x8xf32>
    %148 = tpu.matmul %146, %147, %cst_83 {dimension_numbers = #tpu.dot_dimension_numbers<[1], [0], [0], [1], [0, 0, 1, 1], [], []>} : vector<8x8xbf16>, vector<8x8xbf16>, vector<8x8xf32> -> vector<8x8xf32>
    %149 = arith.truncf %148 : vector<8x8xf32> to vector<8x8xbf16>
    %c16_84 = arith.constant 16 : index
    %c0_85 = arith.constant 0 : index
    %150 = vector.load %arg13[%c16_84, %c0_85] : memref<32x32xbf16, #tpu.memory_space<vmem>>, vector<8x32xbf16>
    %cst_86 = arith.constant dense<0.000000e+00> : vector<8x32xf32>
    %151 = tpu.matmul %149, %150, %cst_86 {dimension_numbers = #tpu.dot_dimension_numbers<[1], [0], [0], [1], [0, 0, 1, 1], [], []>} : vector<8x8xbf16>, vector<8x32xbf16>, vector<8x32xf32> -> vector<8x32xf32>
    %152 = arith.addf %106, %151 : vector<8x32xf32>
    %c0_87 = arith.constant 0 : index
    %c24 = arith.constant 24 : index
    %153 = vector.load %arg7[%c0_87, %c24] : memref<32x32xbf16, #tpu.memory_space<vmem>>, vector<32x8xbf16>
    %cst_88 = arith.constant dense<0.000000e+00> : vector<8x8xf32>
    %154 = tpu.matmul %10, %153, %cst_88 {dimension_numbers = #tpu.dot_dimension_numbers<[1], [0], [0], [1], [0, 0, 1, 1], [], []>} : vector<8x32xbf16>, vector<32x8xbf16>, vector<8x8xf32> -> vector<8x8xf32>
    %c0_89 = arith.constant 0 : index
    %c24_90 = arith.constant 24 : index
    %155 = vector.load %arg8[%c0_89, %c24_90] : memref<1x32xf32, #tpu.memory_space<vmem>>, vector<1x8xf32>
    %156 = vector.broadcast %155 : vector<1x8xf32> to vector<8x8xf32>
    %157 = arith.addf %154, %156 : vector<8x8xf32>
    %c0_91 = arith.constant 0 : index
    %c24_92 = arith.constant 24 : index
    %158 = vector.load %arg9[%c0_91, %c24_92] : memref<32x32xbf16, #tpu.memory_space<vmem>>, vector<32x8xbf16>
    %cst_93 = arith.constant dense<0.000000e+00> : vector<8x8xf32>
    %159 = tpu.matmul %11, %158, %cst_93 {dimension_numbers = #tpu.dot_dimension_numbers<[1], [0], [0], [1], [0, 0, 1, 1], [], []>} : vector<8x32xbf16>, vector<32x8xbf16>, vector<8x8xf32> -> vector<8x8xf32>
    %c0_94 = arith.constant 0 : index
    %c24_95 = arith.constant 24 : index
    %160 = vector.load %arg10[%c0_94, %c24_95] : memref<1x32xf32, #tpu.memory_space<vmem>>, vector<1x8xf32>
    %161 = vector.broadcast %160 : vector<1x8xf32> to vector<8x8xf32>
    %162 = arith.addf %159, %161 : vector<8x8xf32>
    %c0_96 = arith.constant 0 : index
    %c24_97 = arith.constant 24 : index
    %163 = vector.load %arg11[%c0_96, %c24_97] : memref<32x32xbf16, #tpu.memory_space<vmem>>, vector<32x8xbf16>
    %cst_98 = arith.constant dense<0.000000e+00> : vector<8x8xf32>
    %164 = tpu.matmul %11, %163, %cst_98 {dimension_numbers = #tpu.dot_dimension_numbers<[1], [0], [0], [1], [0, 0, 1, 1], [], []>} : vector<8x32xbf16>, vector<32x8xbf16>, vector<8x8xf32> -> vector<8x8xf32>
    %c0_99 = arith.constant 0 : index
    %c24_100 = arith.constant 24 : index
    %165 = vector.load %arg12[%c0_99, %c24_100] : memref<1x32xf32, #tpu.memory_space<vmem>>, vector<1x8xf32>
    %166 = vector.broadcast %165 : vector<1x8xf32> to vector<8x8xf32>
    %167 = arith.addf %164, %166 : vector<8x8xf32>
    %168 = arith.mulf %157, %8 : vector<8x8xf32>
    %c4_i32_101 = arith.constant 4 : i32
    %169 = tpu.dynamic_rotate %157 by %c4_i32_101 dim 1 : vector<8x8xf32>, i32 -> vector<8x8xf32>
    %170 = arith.mulf %169, %9 : vector<8x8xf32>
    %171 = arith.addf %168, %170 : vector<8x8xf32>
    %172 = arith.mulf %162, %8 : vector<8x8xf32>
    %c4_i32_102 = arith.constant 4 : i32
    %173 = tpu.dynamic_rotate %162 by %c4_i32_102 dim 1 : vector<8x8xf32>, i32 -> vector<8x8xf32>
    %174 = arith.mulf %173, %9 : vector<8x8xf32>
    %175 = arith.addf %172, %174 : vector<8x8xf32>
    %cst_103 = arith.constant 0.353553385 : f32
    %176 = vector.broadcast %cst_103 : f32 to vector<8x8xf32>
    %177 = arith.mulf %171, %176 : vector<8x8xf32>
    %178 = arith.truncf %177 : vector<8x8xf32> to vector<8x8xbf16>
    %179 = arith.truncf %175 : vector<8x8xf32> to vector<8x8xbf16>
    %cst_104 = arith.constant dense<0.000000e+00> : vector<8x8xf32>
    %180 = tpu.matmul %178, %179, %cst_104 {dimension_numbers = #tpu.dot_dimension_numbers<[1], [1], [0], [0], [0, 0, 1, 0], [], []>} : vector<8x8xbf16>, vector<8x8xbf16>, vector<8x8xf32> -> vector<8x8xf32>
    %181 = arith.addf %180, %13 : vector<8x8xf32>
    %cst_105 = arith.constant dense<0xFF800000> : vector<8xf32>
    %182 = vector.multi_reduction <maximumf>, %181, %cst_105 [1] : vector<8x8xf32> to vector<8xf32>
    %183 = vector.shape_cast %182 : vector<8xf32> to vector<8x1xf32>
    %184 = vector.broadcast %183 : vector<8x1xf32> to vector<8x8xf32>
    %185 = arith.subf %181, %184 : vector<8x8xf32>
    %186 = math.exp %185 : vector<8x8xf32>
    %cst_106 = arith.constant dense<0.000000e+00> : vector<8xf32>
    %187 = vector.multi_reduction <add>, %186, %cst_106 [1] : vector<8x8xf32> to vector<8xf32>
    %188 = vector.shape_cast %187 : vector<8xf32> to vector<8x1xf32>
    %189 = tpu.reciprocal %188 {approx = true} : vector<8x1xf32> -> vector<8x1xf32>
    %190 = vector.broadcast %189 : vector<8x1xf32> to vector<8x8xf32>
    %191 = arith.mulf %186, %190 : vector<8x8xf32>
    %192 = arith.truncf %191 : vector<8x8xf32> to vector<8x8xbf16>
    %193 = arith.truncf %167 : vector<8x8xf32> to vector<8x8xbf16>
    %cst_107 = arith.constant dense<0.000000e+00> : vector<8x8xf32>
    %194 = tpu.matmul %192, %193, %cst_107 {dimension_numbers = #tpu.dot_dimension_numbers<[1], [0], [0], [1], [0, 0, 1, 1], [], []>} : vector<8x8xbf16>, vector<8x8xbf16>, vector<8x8xf32> -> vector<8x8xf32>
    %195 = arith.truncf %194 : vector<8x8xf32> to vector<8x8xbf16>
    %c24_108 = arith.constant 24 : index
    %c0_109 = arith.constant 0 : index
    %196 = vector.load %arg13[%c24_108, %c0_109] : memref<32x32xbf16, #tpu.memory_space<vmem>>, vector<8x32xbf16>
    %cst_110 = arith.constant dense<0.000000e+00> : vector<8x32xf32>
    %197 = tpu.matmul %195, %196, %cst_110 {dimension_numbers = #tpu.dot_dimension_numbers<[1], [0], [0], [1], [0, 0, 1, 1], [], []>} : vector<8x8xbf16>, vector<8x32xbf16>, vector<8x32xf32> -> vector<8x32xf32>
    %198 = arith.addf %152, %197 : vector<8x32xf32>
    %c0_111 = arith.constant 0 : index
    %c0_112 = arith.constant 0 : index
    %199 = vector.load %arg14[%c0_111, %c0_112] : memref<1x32xf32, #tpu.memory_space<vmem>>, vector<1x32xf32>
    %200 = vector.broadcast %199 : vector<1x32xf32> to vector<8x32xf32>
    %201 = arith.addf %198, %200 : vector<8x32xf32>
    %202 = arith.addf %201, %1 : vector<8x32xf32>
    %cst_113 = arith.constant dense<0.000000e+00> : vector<8xf32>
    %203 = vector.multi_reduction <add>, %202, %cst_113 [1] : vector<8x32xf32> to vector<8xf32>
    %204 = vector.shape_cast %203 : vector<8xf32> to vector<8x1xf32>
    %cst_114 = arith.constant 3.200000e+01 : f32
    %205 = vector.broadcast %cst_114 : f32 to vector<8x1xf32>
    %206 = arith.divf %204, %205 : vector<8x1xf32>
    %207 = vector.broadcast %206 : vector<8x1xf32> to vector<8x32xf32>
    %208 = arith.subf %202, %207 : vector<8x32xf32>
    %209 = arith.mulf %208, %208 : vector<8x32xf32>
    %cst_115 = arith.constant dense<0.000000e+00> : vector<8xf32>
    %210 = vector.multi_reduction <add>, %209, %cst_115 [1] : vector<8x32xf32> to vector<8xf32>
    %211 = vector.shape_cast %210 : vector<8xf32> to vector<8x1xf32>
    %cst_116 = arith.constant 3.200000e+01 : f32
    %212 = vector.broadcast %cst_116 : f32 to vector<8x1xf32>
    %213 = arith.divf %211, %212 : vector<8x1xf32>
    %c0_117 = arith.constant 0 : index
    %c0_118 = arith.constant 0 : index
    %214 = vector.load %arg23[%c0_117, %c0_118] : memref<1x32xf32, #tpu.memory_space<vmem>>, vector<1x32xf32>
    %cst_119 = arith.constant 9.99999997E-7 : f32
    %215 = vector.broadcast %cst_119 : f32 to vector<8x1xf32>
    %216 = arith.addf %213, %215 : vector<8x1xf32>
    %217 = math.rsqrt %216 : vector<8x1xf32>
    %218 = vector.broadcast %217 : vector<8x1xf32> to vector<8x32xf32>
    %219 = arith.mulf %208, %218 : vector<8x32xf32>
    %220 = vector.broadcast %214 : vector<1x32xf32> to vector<8x32xf32>
    %221 = arith.mulf %220, %219 : vector<8x32xf32>
    %c0_120 = arith.constant 0 : index
    %c0_121 = arith.constant 0 : index
    %222 = vector.load %arg24[%c0_120, %c0_121] : memref<1x32xf32, #tpu.memory_space<vmem>>, vector<1x32xf32>
    %223 = vector.broadcast %222 : vector<1x32xf32> to vector<8x32xf32>
    %224 = arith.addf %221, %223 : vector<8x32xf32>
    %225 = arith.truncf %224 : vector<8x32xf32> to vector<8x32xbf16>
    %226 = arith.truncf %3 : vector<8x32xf32> to vector<8x32xbf16>
    %227 = vector.shape_cast %7 : vector<1x8xf32> to vector<1x8xf32>
    %228 = vector.broadcast %227 : vector<1x8xf32> to vector<8x8xf32>
    %cst_122 = arith.constant 0.000000e+00 : f32
    %229 = vector.broadcast %cst_122 : f32 to vector<8x32xf32>
    %c0_123 = arith.constant 0 : index
    %c0_124 = arith.constant 0 : index
    %230 = vector.load %arg15[%c0_123, %c0_124] : memref<32x32xbf16, #tpu.memory_space<vmem>>, vector<32x8xbf16>
    %cst_125 = arith.constant dense<0.000000e+00> : vector<8x8xf32>
    %231 = tpu.matmul %225, %230, %cst_125 {dimension_numbers = #tpu.dot_dimension_numbers<[1], [0], [0], [1], [0, 0, 1, 1], [], []>} : vector<8x32xbf16>, vector<32x8xbf16>, vector<8x8xf32> -> vector<8x8xf32>
    %c0_126 = arith.constant 0 : index
    %c0_127 = arith.constant 0 : index
    %232 = vector.load %arg16[%c0_126, %c0_127] : memref<1x32xf32, #tpu.memory_space<vmem>>, vector<1x8xf32>
    %233 = vector.broadcast %232 : vector<1x8xf32> to vector<8x8xf32>
    %234 = arith.addf %231, %233 : vector<8x8xf32>
    %c0_128 = arith.constant 0 : index
    %c0_129 = arith.constant 0 : index
    %235 = vector.load %arg17[%c0_128, %c0_129] : memref<32x32xbf16, #tpu.memory_space<vmem>>, vector<32x8xbf16>
    %cst_130 = arith.constant dense<0.000000e+00> : vector<8x8xf32>
    %236 = tpu.matmul %226, %235, %cst_130 {dimension_numbers = #tpu.dot_dimension_numbers<[1], [0], [0], [1], [0, 0, 1, 1], [], []>} : vector<8x32xbf16>, vector<32x8xbf16>, vector<8x8xf32> -> vector<8x8xf32>
    %c0_131 = arith.constant 0 : index
    %c0_132 = arith.constant 0 : index
    %237 = vector.load %arg18[%c0_131, %c0_132] : memref<1x32xf32, #tpu.memory_space<vmem>>, vector<1x8xf32>
    %238 = vector.broadcast %237 : vector<1x8xf32> to vector<8x8xf32>
    %239 = arith.addf %236, %238 : vector<8x8xf32>
    %c0_133 = arith.constant 0 : index
    %c0_134 = arith.constant 0 : index
    %240 = vector.load %arg19[%c0_133, %c0_134] : memref<32x32xbf16, #tpu.memory_space<vmem>>, vector<32x8xbf16>
    %cst_135 = arith.constant dense<0.000000e+00> : vector<8x8xf32>
    %241 = tpu.matmul %226, %240, %cst_135 {dimension_numbers = #tpu.dot_dimension_numbers<[1], [0], [0], [1], [0, 0, 1, 1], [], []>} : vector<8x32xbf16>, vector<32x8xbf16>, vector<8x8xf32> -> vector<8x8xf32>
    %c0_136 = arith.constant 0 : index
    %c0_137 = arith.constant 0 : index
    %242 = vector.load %arg20[%c0_136, %c0_137] : memref<1x32xf32, #tpu.memory_space<vmem>>, vector<1x8xf32>
    %243 = vector.broadcast %242 : vector<1x8xf32> to vector<8x8xf32>
    %244 = arith.addf %241, %243 : vector<8x8xf32>
    %245 = arith.mulf %234, %8 : vector<8x8xf32>
    %c4_i32_138 = arith.constant 4 : i32
    %246 = tpu.dynamic_rotate %234 by %c4_i32_138 dim 1 : vector<8x8xf32>, i32 -> vector<8x8xf32>
    %247 = arith.mulf %246, %9 : vector<8x8xf32>
    %248 = arith.addf %245, %247 : vector<8x8xf32>
    %249 = arith.mulf %239, %8 : vector<8x8xf32>
    %c4_i32_139 = arith.constant 4 : i32
    %250 = tpu.dynamic_rotate %239 by %c4_i32_139 dim 1 : vector<8x8xf32>, i32 -> vector<8x8xf32>
    %251 = arith.mulf %250, %9 : vector<8x8xf32>
    %252 = arith.addf %249, %251 : vector<8x8xf32>
    %cst_140 = arith.constant 0.353553385 : f32
    %253 = vector.broadcast %cst_140 : f32 to vector<8x8xf32>
    %254 = arith.mulf %248, %253 : vector<8x8xf32>
    %255 = arith.truncf %254 : vector<8x8xf32> to vector<8x8xbf16>
    %256 = arith.truncf %252 : vector<8x8xf32> to vector<8x8xbf16>
    %cst_141 = arith.constant dense<0.000000e+00> : vector<8x8xf32>
    %257 = tpu.matmul %255, %256, %cst_141 {dimension_numbers = #tpu.dot_dimension_numbers<[1], [1], [0], [0], [0, 0, 1, 0], [], []>} : vector<8x8xbf16>, vector<8x8xbf16>, vector<8x8xf32> -> vector<8x8xf32>
    %258 = arith.addf %257, %228 : vector<8x8xf32>
    %cst_142 = arith.constant dense<0xFF800000> : vector<8xf32>
    %259 = vector.multi_reduction <maximumf>, %258, %cst_142 [1] : vector<8x8xf32> to vector<8xf32>
    %260 = vector.shape_cast %259 : vector<8xf32> to vector<8x1xf32>
    %261 = vector.broadcast %260 : vector<8x1xf32> to vector<8x8xf32>
    %262 = arith.subf %258, %261 : vector<8x8xf32>
    %263 = math.exp %262 : vector<8x8xf32>
    %cst_143 = arith.constant dense<0.000000e+00> : vector<8xf32>
    %264 = vector.multi_reduction <add>, %263, %cst_143 [1] : vector<8x8xf32> to vector<8xf32>
    %265 = vector.shape_cast %264 : vector<8xf32> to vector<8x1xf32>
    %266 = tpu.reciprocal %265 {approx = true} : vector<8x1xf32> -> vector<8x1xf32>
    %267 = vector.broadcast %266 : vector<8x1xf32> to vector<8x8xf32>
    %268 = arith.mulf %263, %267 : vector<8x8xf32>
    %269 = arith.truncf %268 : vector<8x8xf32> to vector<8x8xbf16>
    %270 = arith.truncf %244 : vector<8x8xf32> to vector<8x8xbf16>
    %cst_144 = arith.constant dense<0.000000e+00> : vector<8x8xf32>
    %271 = tpu.matmul %269, %270, %cst_144 {dimension_numbers = #tpu.dot_dimension_numbers<[1], [0], [0], [1], [0, 0, 1, 1], [], []>} : vector<8x8xbf16>, vector<8x8xbf16>, vector<8x8xf32> -> vector<8x8xf32>
    %272 = arith.truncf %271 : vector<8x8xf32> to vector<8x8xbf16>
    %c0_145 = arith.constant 0 : index
    %c0_146 = arith.constant 0 : index
    %273 = vector.load %arg21[%c0_145, %c0_146] : memref<32x32xbf16, #tpu.memory_space<vmem>>, vector<8x32xbf16>
    %cst_147 = arith.constant dense<0.000000e+00> : vector<8x32xf32>
    %274 = tpu.matmul %272, %273, %cst_147 {dimension_numbers = #tpu.dot_dimension_numbers<[1], [0], [0], [1], [0, 0, 1, 1], [], []>} : vector<8x8xbf16>, vector<8x32xbf16>, vector<8x32xf32> -> vector<8x32xf32>
    %275 = arith.addf %229, %274 : vector<8x32xf32>
    %c0_148 = arith.constant 0 : index
    %c8_149 = arith.constant 8 : index
    %276 = vector.load %arg15[%c0_148, %c8_149] : memref<32x32xbf16, #tpu.memory_space<vmem>>, vector<32x8xbf16>
    %cst_150 = arith.constant dense<0.000000e+00> : vector<8x8xf32>
    %277 = tpu.matmul %225, %276, %cst_150 {dimension_numbers = #tpu.dot_dimension_numbers<[1], [0], [0], [1], [0, 0, 1, 1], [], []>} : vector<8x32xbf16>, vector<32x8xbf16>, vector<8x8xf32> -> vector<8x8xf32>
    %c0_151 = arith.constant 0 : index
    %c8_152 = arith.constant 8 : index
    %278 = vector.load %arg16[%c0_151, %c8_152] : memref<1x32xf32, #tpu.memory_space<vmem>>, vector<1x8xf32>
    %279 = vector.broadcast %278 : vector<1x8xf32> to vector<8x8xf32>
    %280 = arith.addf %277, %279 : vector<8x8xf32>
    %c0_153 = arith.constant 0 : index
    %c8_154 = arith.constant 8 : index
    %281 = vector.load %arg17[%c0_153, %c8_154] : memref<32x32xbf16, #tpu.memory_space<vmem>>, vector<32x8xbf16>
    %cst_155 = arith.constant dense<0.000000e+00> : vector<8x8xf32>
    %282 = tpu.matmul %226, %281, %cst_155 {dimension_numbers = #tpu.dot_dimension_numbers<[1], [0], [0], [1], [0, 0, 1, 1], [], []>} : vector<8x32xbf16>, vector<32x8xbf16>, vector<8x8xf32> -> vector<8x8xf32>
    %c0_156 = arith.constant 0 : index
    %c8_157 = arith.constant 8 : index
    %283 = vector.load %arg18[%c0_156, %c8_157] : memref<1x32xf32, #tpu.memory_space<vmem>>, vector<1x8xf32>
    %284 = vector.broadcast %283 : vector<1x8xf32> to vector<8x8xf32>
    %285 = arith.addf %282, %284 : vector<8x8xf32>
    %c0_158 = arith.constant 0 : index
    %c8_159 = arith.constant 8 : index
    %286 = vector.load %arg19[%c0_158, %c8_159] : memref<32x32xbf16, #tpu.memory_space<vmem>>, vector<32x8xbf16>
    %cst_160 = arith.constant dense<0.000000e+00> : vector<8x8xf32>
    %287 = tpu.matmul %226, %286, %cst_160 {dimension_numbers = #tpu.dot_dimension_numbers<[1], [0], [0], [1], [0, 0, 1, 1], [], []>} : vector<8x32xbf16>, vector<32x8xbf16>, vector<8x8xf32> -> vector<8x8xf32>
    %c0_161 = arith.constant 0 : index
    %c8_162 = arith.constant 8 : index
    %288 = vector.load %arg20[%c0_161, %c8_162] : memref<1x32xf32, #tpu.memory_space<vmem>>, vector<1x8xf32>
    %289 = vector.broadcast %288 : vector<1x8xf32> to vector<8x8xf32>
    %290 = arith.addf %287, %289 : vector<8x8xf32>
    %291 = arith.mulf %280, %8 : vector<8x8xf32>
    %c4_i32_163 = arith.constant 4 : i32
    %292 = tpu.dynamic_rotate %280 by %c4_i32_163 dim 1 : vector<8x8xf32>, i32 -> vector<8x8xf32>
    %293 = arith.mulf %292, %9 : vector<8x8xf32>
    %294 = arith.addf %291, %293 : vector<8x8xf32>
    %295 = arith.mulf %285, %8 : vector<8x8xf32>
    %c4_i32_164 = arith.constant 4 : i32
    %296 = tpu.dynamic_rotate %285 by %c4_i32_164 dim 1 : vector<8x8xf32>, i32 -> vector<8x8xf32>
    %297 = arith.mulf %296, %9 : vector<8x8xf32>
    %298 = arith.addf %295, %297 : vector<8x8xf32>
    %cst_165 = arith.constant 0.353553385 : f32
    %299 = vector.broadcast %cst_165 : f32 to vector<8x8xf32>
    %300 = arith.mulf %294, %299 : vector<8x8xf32>
    %301 = arith.truncf %300 : vector<8x8xf32> to vector<8x8xbf16>
    %302 = arith.truncf %298 : vector<8x8xf32> to vector<8x8xbf16>
    %cst_166 = arith.constant dense<0.000000e+00> : vector<8x8xf32>
    %303 = tpu.matmul %301, %302, %cst_166 {dimension_numbers = #tpu.dot_dimension_numbers<[1], [1], [0], [0], [0, 0, 1, 0], [], []>} : vector<8x8xbf16>, vector<8x8xbf16>, vector<8x8xf32> -> vector<8x8xf32>
    %304 = arith.addf %303, %228 : vector<8x8xf32>
    %cst_167 = arith.constant dense<0xFF800000> : vector<8xf32>
    %305 = vector.multi_reduction <maximumf>, %304, %cst_167 [1] : vector<8x8xf32> to vector<8xf32>
    %306 = vector.shape_cast %305 : vector<8xf32> to vector<8x1xf32>
    %307 = vector.broadcast %306 : vector<8x1xf32> to vector<8x8xf32>
    %308 = arith.subf %304, %307 : vector<8x8xf32>
    %309 = math.exp %308 : vector<8x8xf32>
    %cst_168 = arith.constant dense<0.000000e+00> : vector<8xf32>
    %310 = vector.multi_reduction <add>, %309, %cst_168 [1] : vector<8x8xf32> to vector<8xf32>
    %311 = vector.shape_cast %310 : vector<8xf32> to vector<8x1xf32>
    %312 = tpu.reciprocal %311 {approx = true} : vector<8x1xf32> -> vector<8x1xf32>
    %313 = vector.broadcast %312 : vector<8x1xf32> to vector<8x8xf32>
    %314 = arith.mulf %309, %313 : vector<8x8xf32>
    %315 = arith.truncf %314 : vector<8x8xf32> to vector<8x8xbf16>
    %316 = arith.truncf %290 : vector<8x8xf32> to vector<8x8xbf16>
    %cst_169 = arith.constant dense<0.000000e+00> : vector<8x8xf32>
    %317 = tpu.matmul %315, %316, %cst_169 {dimension_numbers = #tpu.dot_dimension_numbers<[1], [0], [0], [1], [0, 0, 1, 1], [], []>} : vector<8x8xbf16>, vector<8x8xbf16>, vector<8x8xf32> -> vector<8x8xf32>
    %318 = arith.truncf %317 : vector<8x8xf32> to vector<8x8xbf16>
    %c8_170 = arith.constant 8 : index
    %c0_171 = arith.constant 0 : index
    %319 = vector.load %arg21[%c8_170, %c0_171] : memref<32x32xbf16, #tpu.memory_space<vmem>>, vector<8x32xbf16>
    %cst_172 = arith.constant dense<0.000000e+00> : vector<8x32xf32>
    %320 = tpu.matmul %318, %319, %cst_172 {dimension_numbers = #tpu.dot_dimension_numbers<[1], [0], [0], [1], [0, 0, 1, 1], [], []>} : vector<8x8xbf16>, vector<8x32xbf16>, vector<8x32xf32> -> vector<8x32xf32>
    %321 = arith.addf %275, %320 : vector<8x32xf32>
    %c0_173 = arith.constant 0 : index
    %c16_174 = arith.constant 16 : index
    %322 = vector.load %arg15[%c0_173, %c16_174] : memref<32x32xbf16, #tpu.memory_space<vmem>>, vector<32x8xbf16>
    %cst_175 = arith.constant dense<0.000000e+00> : vector<8x8xf32>
    %323 = tpu.matmul %225, %322, %cst_175 {dimension_numbers = #tpu.dot_dimension_numbers<[1], [0], [0], [1], [0, 0, 1, 1], [], []>} : vector<8x32xbf16>, vector<32x8xbf16>, vector<8x8xf32> -> vector<8x8xf32>
    %c0_176 = arith.constant 0 : index
    %c16_177 = arith.constant 16 : index
    %324 = vector.load %arg16[%c0_176, %c16_177] : memref<1x32xf32, #tpu.memory_space<vmem>>, vector<1x8xf32>
    %325 = vector.broadcast %324 : vector<1x8xf32> to vector<8x8xf32>
    %326 = arith.addf %323, %325 : vector<8x8xf32>
    %c0_178 = arith.constant 0 : index
    %c16_179 = arith.constant 16 : index
    %327 = vector.load %arg17[%c0_178, %c16_179] : memref<32x32xbf16, #tpu.memory_space<vmem>>, vector<32x8xbf16>
    %cst_180 = arith.constant dense<0.000000e+00> : vector<8x8xf32>
    %328 = tpu.matmul %226, %327, %cst_180 {dimension_numbers = #tpu.dot_dimension_numbers<[1], [0], [0], [1], [0, 0, 1, 1], [], []>} : vector<8x32xbf16>, vector<32x8xbf16>, vector<8x8xf32> -> vector<8x8xf32>
    %c0_181 = arith.constant 0 : index
    %c16_182 = arith.constant 16 : index
    %329 = vector.load %arg18[%c0_181, %c16_182] : memref<1x32xf32, #tpu.memory_space<vmem>>, vector<1x8xf32>
    %330 = vector.broadcast %329 : vector<1x8xf32> to vector<8x8xf32>
    %331 = arith.addf %328, %330 : vector<8x8xf32>
    %c0_183 = arith.constant 0 : index
    %c16_184 = arith.constant 16 : index
    %332 = vector.load %arg19[%c0_183, %c16_184] : memref<32x32xbf16, #tpu.memory_space<vmem>>, vector<32x8xbf16>
    %cst_185 = arith.constant dense<0.000000e+00> : vector<8x8xf32>
    %333 = tpu.matmul %226, %332, %cst_185 {dimension_numbers = #tpu.dot_dimension_numbers<[1], [0], [0], [1], [0, 0, 1, 1], [], []>} : vector<8x32xbf16>, vector<32x8xbf16>, vector<8x8xf32> -> vector<8x8xf32>
    %c0_186 = arith.constant 0 : index
    %c16_187 = arith.constant 16 : index
    %334 = vector.load %arg20[%c0_186, %c16_187] : memref<1x32xf32, #tpu.memory_space<vmem>>, vector<1x8xf32>
    %335 = vector.broadcast %334 : vector<1x8xf32> to vector<8x8xf32>
    %336 = arith.addf %333, %335 : vector<8x8xf32>
    %337 = arith.mulf %326, %8 : vector<8x8xf32>
    %c4_i32_188 = arith.constant 4 : i32
    %338 = tpu.dynamic_rotate %326 by %c4_i32_188 dim 1 : vector<8x8xf32>, i32 -> vector<8x8xf32>
    %339 = arith.mulf %338, %9 : vector<8x8xf32>
    %340 = arith.addf %337, %339 : vector<8x8xf32>
    %341 = arith.mulf %331, %8 : vector<8x8xf32>
    %c4_i32_189 = arith.constant 4 : i32
    %342 = tpu.dynamic_rotate %331 by %c4_i32_189 dim 1 : vector<8x8xf32>, i32 -> vector<8x8xf32>
    %343 = arith.mulf %342, %9 : vector<8x8xf32>
    %344 = arith.addf %341, %343 : vector<8x8xf32>
    %cst_190 = arith.constant 0.353553385 : f32
    %345 = vector.broadcast %cst_190 : f32 to vector<8x8xf32>
    %346 = arith.mulf %340, %345 : vector<8x8xf32>
    %347 = arith.truncf %346 : vector<8x8xf32> to vector<8x8xbf16>
    %348 = arith.truncf %344 : vector<8x8xf32> to vector<8x8xbf16>
    %cst_191 = arith.constant dense<0.000000e+00> : vector<8x8xf32>
    %349 = tpu.matmul %347, %348, %cst_191 {dimension_numbers = #tpu.dot_dimension_numbers<[1], [1], [0], [0], [0, 0, 1, 0], [], []>} : vector<8x8xbf16>, vector<8x8xbf16>, vector<8x8xf32> -> vector<8x8xf32>
    %350 = arith.addf %349, %228 : vector<8x8xf32>
    %cst_192 = arith.constant dense<0xFF800000> : vector<8xf32>
    %351 = vector.multi_reduction <maximumf>, %350, %cst_192 [1] : vector<8x8xf32> to vector<8xf32>
    %352 = vector.shape_cast %351 : vector<8xf32> to vector<8x1xf32>
    %353 = vector.broadcast %352 : vector<8x1xf32> to vector<8x8xf32>
    %354 = arith.subf %350, %353 : vector<8x8xf32>
    %355 = math.exp %354 : vector<8x8xf32>
    %cst_193 = arith.constant dense<0.000000e+00> : vector<8xf32>
    %356 = vector.multi_reduction <add>, %355, %cst_193 [1] : vector<8x8xf32> to vector<8xf32>
    %357 = vector.shape_cast %356 : vector<8xf32> to vector<8x1xf32>
    %358 = tpu.reciprocal %357 {approx = true} : vector<8x1xf32> -> vector<8x1xf32>
    %359 = vector.broadcast %358 : vector<8x1xf32> to vector<8x8xf32>
    %360 = arith.mulf %355, %359 : vector<8x8xf32>
    %361 = arith.truncf %360 : vector<8x8xf32> to vector<8x8xbf16>
    %362 = arith.truncf %336 : vector<8x8xf32> to vector<8x8xbf16>
    %cst_194 = arith.constant dense<0.000000e+00> : vector<8x8xf32>
    %363 = tpu.matmul %361, %362, %cst_194 {dimension_numbers = #tpu.dot_dimension_numbers<[1], [0], [0], [1], [0, 0, 1, 1], [], []>} : vector<8x8xbf16>, vector<8x8xbf16>, vector<8x8xf32> -> vector<8x8xf32>
    %364 = arith.truncf %363 : vector<8x8xf32> to vector<8x8xbf16>
    %c16_195 = arith.constant 16 : index
    %c0_196 = arith.constant 0 : index
    %365 = vector.load %arg21[%c16_195, %c0_196] : memref<32x32xbf16, #tpu.memory_space<vmem>>, vector<8x32xbf16>
    %cst_197 = arith.constant dense<0.000000e+00> : vector<8x32xf32>
    %366 = tpu.matmul %364, %365, %cst_197 {dimension_numbers = #tpu.dot_dimension_numbers<[1], [0], [0], [1], [0, 0, 1, 1], [], []>} : vector<8x8xbf16>, vector<8x32xbf16>, vector<8x32xf32> -> vector<8x32xf32>
    %367 = arith.addf %321, %366 : vector<8x32xf32>
    %c0_198 = arith.constant 0 : index
    %c24_199 = arith.constant 24 : index
    %368 = vector.load %arg15[%c0_198, %c24_199] : memref<32x32xbf16, #tpu.memory_space<vmem>>, vector<32x8xbf16>
    %cst_200 = arith.constant dense<0.000000e+00> : vector<8x8xf32>
    %369 = tpu.matmul %225, %368, %cst_200 {dimension_numbers = #tpu.dot_dimension_numbers<[1], [0], [0], [1], [0, 0, 1, 1], [], []>} : vector<8x32xbf16>, vector<32x8xbf16>, vector<8x8xf32> -> vector<8x8xf32>
    %c0_201 = arith.constant 0 : index
    %c24_202 = arith.constant 24 : index
    %370 = vector.load %arg16[%c0_201, %c24_202] : memref<1x32xf32, #tpu.memory_space<vmem>>, vector<1x8xf32>
    %371 = vector.broadcast %370 : vector<1x8xf32> to vector<8x8xf32>
    %372 = arith.addf %369, %371 : vector<8x8xf32>
    %c0_203 = arith.constant 0 : index
    %c24_204 = arith.constant 24 : index
    %373 = vector.load %arg17[%c0_203, %c24_204] : memref<32x32xbf16, #tpu.memory_space<vmem>>, vector<32x8xbf16>
    %cst_205 = arith.constant dense<0.000000e+00> : vector<8x8xf32>
    %374 = tpu.matmul %226, %373, %cst_205 {dimension_numbers = #tpu.dot_dimension_numbers<[1], [0], [0], [1], [0, 0, 1, 1], [], []>} : vector<8x32xbf16>, vector<32x8xbf16>, vector<8x8xf32> -> vector<8x8xf32>
    %c0_206 = arith.constant 0 : index
    %c24_207 = arith.constant 24 : index
    %375 = vector.load %arg18[%c0_206, %c24_207] : memref<1x32xf32, #tpu.memory_space<vmem>>, vector<1x8xf32>
    %376 = vector.broadcast %375 : vector<1x8xf32> to vector<8x8xf32>
    %377 = arith.addf %374, %376 : vector<8x8xf32>
    %c0_208 = arith.constant 0 : index
    %c24_209 = arith.constant 24 : index
    %378 = vector.load %arg19[%c0_208, %c24_209] : memref<32x32xbf16, #tpu.memory_space<vmem>>, vector<32x8xbf16>
    %cst_210 = arith.constant dense<0.000000e+00> : vector<8x8xf32>
    %379 = tpu.matmul %226, %378, %cst_210 {dimension_numbers = #tpu.dot_dimension_numbers<[1], [0], [0], [1], [0, 0, 1, 1], [], []>} : vector<8x32xbf16>, vector<32x8xbf16>, vector<8x8xf32> -> vector<8x8xf32>
    %c0_211 = arith.constant 0 : index
    %c24_212 = arith.constant 24 : index
    %380 = vector.load %arg20[%c0_211, %c24_212] : memref<1x32xf32, #tpu.memory_space<vmem>>, vector<1x8xf32>
    %381 = vector.broadcast %380 : vector<1x8xf32> to vector<8x8xf32>
    %382 = arith.addf %379, %381 : vector<8x8xf32>
    %383 = arith.mulf %372, %8 : vector<8x8xf32>
    %c4_i32_213 = arith.constant 4 : i32
    %384 = tpu.dynamic_rotate %372 by %c4_i32_213 dim 1 : vector<8x8xf32>, i32 -> vector<8x8xf32>
    %385 = arith.mulf %384, %9 : vector<8x8xf32>
    %386 = arith.addf %383, %385 : vector<8x8xf32>
    %387 = arith.mulf %377, %8 : vector<8x8xf32>
    %c4_i32_214 = arith.constant 4 : i32
    %388 = tpu.dynamic_rotate %377 by %c4_i32_214 dim 1 : vector<8x8xf32>, i32 -> vector<8x8xf32>
    %389 = arith.mulf %388, %9 : vector<8x8xf32>
    %390 = arith.addf %387, %389 : vector<8x8xf32>
    %cst_215 = arith.constant 0.353553385 : f32
    %391 = vector.broadcast %cst_215 : f32 to vector<8x8xf32>
    %392 = arith.mulf %386, %391 : vector<8x8xf32>
    %393 = arith.truncf %392 : vector<8x8xf32> to vector<8x8xbf16>
    %394 = arith.truncf %390 : vector<8x8xf32> to vector<8x8xbf16>
    %cst_216 = arith.constant dense<0.000000e+00> : vector<8x8xf32>
    %395 = tpu.matmul %393, %394, %cst_216 {dimension_numbers = #tpu.dot_dimension_numbers<[1], [1], [0], [0], [0, 0, 1, 0], [], []>} : vector<8x8xbf16>, vector<8x8xbf16>, vector<8x8xf32> -> vector<8x8xf32>
    %396 = arith.addf %395, %228 : vector<8x8xf32>
    %cst_217 = arith.constant dense<0xFF800000> : vector<8xf32>
    %397 = vector.multi_reduction <maximumf>, %396, %cst_217 [1] : vector<8x8xf32> to vector<8xf32>
    %398 = vector.shape_cast %397 : vector<8xf32> to vector<8x1xf32>
    %399 = vector.broadcast %398 : vector<8x1xf32> to vector<8x8xf32>
    %400 = arith.subf %396, %399 : vector<8x8xf32>
    %401 = math.exp %400 : vector<8x8xf32>
    %cst_218 = arith.constant dense<0.000000e+00> : vector<8xf32>
    %402 = vector.multi_reduction <add>, %401, %cst_218 [1] : vector<8x8xf32> to vector<8xf32>
    %403 = vector.shape_cast %402 : vector<8xf32> to vector<8x1xf32>
    %404 = tpu.reciprocal %403 {approx = true} : vector<8x1xf32> -> vector<8x1xf32>
    %405 = vector.broadcast %404 : vector<8x1xf32> to vector<8x8xf32>
    %406 = arith.mulf %401, %405 : vector<8x8xf32>
    %407 = arith.truncf %406 : vector<8x8xf32> to vector<8x8xbf16>
    %408 = arith.truncf %382 : vector<8x8xf32> to vector<8x8xbf16>
    %cst_219 = arith.constant dense<0.000000e+00> : vector<8x8xf32>
    %409 = tpu.matmul %407, %408, %cst_219 {dimension_numbers = #tpu.dot_dimension_numbers<[1], [0], [0], [1], [0, 0, 1, 1], [], []>} : vector<8x8xbf16>, vector<8x8xbf16>, vector<8x8xf32> -> vector<8x8xf32>
    %410 = arith.truncf %409 : vector<8x8xf32> to vector<8x8xbf16>
    %c24_220 = arith.constant 24 : index
    %c0_221 = arith.constant 0 : index
    %411 = vector.load %arg21[%c24_220, %c0_221] : memref<32x32xbf16, #tpu.memory_space<vmem>>, vector<8x32xbf16>
    %cst_222 = arith.constant dense<0.000000e+00> : vector<8x32xf32>
    %412 = tpu.matmul %410, %411, %cst_222 {dimension_numbers = #tpu.dot_dimension_numbers<[1], [0], [0], [1], [0, 0, 1, 1], [], []>} : vector<8x8xbf16>, vector<8x32xbf16>, vector<8x32xf32> -> vector<8x32xf32>
    %413 = arith.addf %367, %412 : vector<8x32xf32>
    %c0_223 = arith.constant 0 : index
    %c0_224 = arith.constant 0 : index
    %414 = vector.load %arg22[%c0_223, %c0_224] : memref<1x32xf32, #tpu.memory_space<vmem>>, vector<1x32xf32>
    %415 = vector.broadcast %414 : vector<1x32xf32> to vector<8x32xf32>
    %416 = arith.addf %413, %415 : vector<8x32xf32>
    %417 = arith.addf %416, %224 : vector<8x32xf32>
    %cst_225 = arith.constant dense<0.000000e+00> : vector<8xf32>
    %418 = vector.multi_reduction <add>, %417, %cst_225 [1] : vector<8x32xf32> to vector<8xf32>
    %419 = vector.shape_cast %418 : vector<8xf32> to vector<8x1xf32>
    %cst_226 = arith.constant 3.200000e+01 : f32
    %420 = vector.broadcast %cst_226 : f32 to vector<8x1xf32>
    %421 = arith.divf %419, %420 : vector<8x1xf32>
    %422 = vector.broadcast %421 : vector<8x1xf32> to vector<8x32xf32>
    %423 = arith.subf %417, %422 : vector<8x32xf32>
    %424 = arith.mulf %423, %423 : vector<8x32xf32>
    %cst_227 = arith.constant dense<0.000000e+00> : vector<8xf32>
    %425 = vector.multi_reduction <add>, %424, %cst_227 [1] : vector<8x32xf32> to vector<8xf32>
    %426 = vector.shape_cast %425 : vector<8xf32> to vector<8x1xf32>
    %cst_228 = arith.constant 3.200000e+01 : f32
    %427 = vector.broadcast %cst_228 : f32 to vector<8x1xf32>
    %428 = arith.divf %426, %427 : vector<8x1xf32>
    %c0_229 = arith.constant 0 : index
    %c0_230 = arith.constant 0 : index
    %429 = vector.load %arg25[%c0_229, %c0_230] : memref<1x32xf32, #tpu.memory_space<vmem>>, vector<1x32xf32>
    %cst_231 = arith.constant 9.99999997E-7 : f32
    %430 = vector.broadcast %cst_231 : f32 to vector<8x1xf32>
    %431 = arith.addf %428, %430 : vector<8x1xf32>
    %432 = math.rsqrt %431 : vector<8x1xf32>
    %433 = vector.broadcast %432 : vector<8x1xf32> to vector<8x32xf32>
    %434 = arith.mulf %423, %433 : vector<8x32xf32>
    %435 = vector.broadcast %429 : vector<1x32xf32> to vector<8x32xf32>
    %436 = arith.mulf %435, %434 : vector<8x32xf32>
    %c0_232 = arith.constant 0 : index
    %c0_233 = arith.constant 0 : index
    %437 = vector.load %arg26[%c0_232, %c0_233] : memref<1x32xf32, #tpu.memory_space<vmem>>, vector<1x32xf32>
    %438 = vector.broadcast %437 : vector<1x32xf32> to vector<8x32xf32>
    %439 = arith.addf %436, %438 : vector<8x32xf32>
    %440 = arith.truncf %439 : vector<8x32xf32> to vector<8x32xbf16>
    %c0_234 = arith.constant 0 : index
    %c0_235 = arith.constant 0 : index
    %441 = vector.load %arg29[%c0_234, %c0_235] : memref<32x64xbf16, #tpu.memory_space<vmem>>, vector<32x64xbf16>
    %cst_236 = arith.constant dense<0.000000e+00> : vector<8x64xf32>
    %442 = tpu.matmul %440, %441, %cst_236 {dimension_numbers = #tpu.dot_dimension_numbers<[1], [0], [0], [1], [0, 0, 1, 1], [], []>} : vector<8x32xbf16>, vector<32x64xbf16>, vector<8x64xf32> -> vector<8x64xf32>
    %c0_237 = arith.constant 0 : index
    %c0_238 = arith.constant 0 : index
    %443 = vector.load %arg30[%c0_237, %c0_238] : memref<1x64xf32, #tpu.memory_space<vmem>>, vector<1x64xf32>
    %444 = vector.broadcast %443 : vector<1x64xf32> to vector<8x64xf32>
    %445 = arith.addf %442, %444 : vector<8x64xf32>
    %cst_239 = arith.constant 0.000000e+00 : f32
    %446 = vector.broadcast %cst_239 : f32 to vector<8x64xf32>
    %447 = arith.maximumf %445, %446 : vector<8x64xf32>
    %448 = arith.truncf %447 : vector<8x64xf32> to vector<8x64xbf16>
    %c0_240 = arith.constant 0 : index
    %c0_241 = arith.constant 0 : index
    %449 = vector.load %arg31[%c0_240, %c0_241] : memref<64x32xbf16, #tpu.memory_space<vmem>>, vector<64x32xbf16>
    %cst_242 = arith.constant dense<0.000000e+00> : vector<8x32xf32>
    %450 = tpu.matmul %448, %449, %cst_242 {dimension_numbers = #tpu.dot_dimension_numbers<[1], [0], [0], [1], [0, 0, 1, 1], [], []>} : vector<8x64xbf16>, vector<64x32xbf16>, vector<8x32xf32> -> vector<8x32xf32>
    %c0_243 = arith.constant 0 : index
    %c0_244 = arith.constant 0 : index
    %451 = vector.load %arg32[%c0_243, %c0_244] : memref<1x32xf32, #tpu.memory_space<vmem>>, vector<1x32xf32>
    %452 = vector.broadcast %451 : vector<1x32xf32> to vector<8x32xf32>
    %453 = arith.addf %450, %452 : vector<8x32xf32>
    %454 = arith.addf %453, %439 : vector<8x32xf32>
    %cst_245 = arith.constant dense<0.000000e+00> : vector<8xf32>
    %455 = vector.multi_reduction <add>, %454, %cst_245 [1] : vector<8x32xf32> to vector<8xf32>
    %456 = vector.shape_cast %455 : vector<8xf32> to vector<8x1xf32>
    %cst_246 = arith.constant 3.200000e+01 : f32
    %457 = vector.broadcast %cst_246 : f32 to vector<8x1xf32>
    %458 = arith.divf %456, %457 : vector<8x1xf32>
    %459 = vector.broadcast %458 : vector<8x1xf32> to vector<8x32xf32>
    %460 = arith.subf %454, %459 : vector<8x32xf32>
    %461 = arith.mulf %460, %460 : vector<8x32xf32>
    %cst_247 = arith.constant dense<0.000000e+00> : vector<8xf32>
    %462 = vector.multi_reduction <add>, %461, %cst_247 [1] : vector<8x32xf32> to vector<8xf32>
    %463 = vector.shape_cast %462 : vector<8xf32> to vector<8x1xf32>
    %cst_248 = arith.constant 3.200000e+01 : f32
    %464 = vector.broadcast %cst_248 : f32 to vector<8x1xf32>
    %465 = arith.divf %463, %464 : vector<8x1xf32>
    %c0_249 = arith.constant 0 : index
    %c0_250 = arith.constant 0 : index
    %466 = vector.load %arg27[%c0_249, %c0_250] : memref<1x32xf32, #tpu.memory_space<vmem>>, vector<1x32xf32>
    %cst_251 = arith.constant 9.99999997E-7 : f32
    %467 = vector.broadcast %cst_251 : f32 to vector<8x1xf32>
    %468 = arith.addf %465, %467 : vector<8x1xf32>
    %469 = math.rsqrt %468 : vector<8x1xf32>
    %470 = vector.broadcast %469 : vector<8x1xf32> to vector<8x32xf32>
    %471 = arith.mulf %460, %470 : vector<8x32xf32>
    %472 = vector.broadcast %466 : vector<1x32xf32> to vector<8x32xf32>
    %473 = arith.mulf %472, %471 : vector<8x32xf32>
    %c0_252 = arith.constant 0 : index
    %c0_253 = arith.constant 0 : index
    %474 = vector.load %arg28[%c0_252, %c0_253] : memref<1x32xf32, #tpu.memory_space<vmem>>, vector<1x32xf32>
    %475 = vector.broadcast %474 : vector<1x32xf32> to vector<8x32xf32>
    %476 = arith.addf %473, %475 : vector<8x32xf32>
    %c0_254 = arith.constant 0 : index
    %c0_255 = arith.constant 0 : index
    %c0_256 = arith.constant 0 : index
    %477 = vector.load %arg33[%c0_254, %c0_255, %c0_256] : memref<1x8x32xf32, #tpu.memory_space<vmem>>, vector<1x8x32xf32>
    %478 = vector.shape_cast %477 : vector<1x8x32xf32> to vector<8x32xf32>
    %479 = vector.shape_cast %476 : vector<8x32xf32> to vector<1x8x32xf32>
    tpu.vector_store %arg33[%c0_254, %c0_255, %c0_256], %479 {strides = array<i32>} : memref<1x8x32xf32, #tpu.memory_space<vmem>>, vector<1x8x32xf32>,
    return
  }
  func.func @transform_0(%arg0: i32) -> (i32, i32, i32) {
    %c0_i32 = arith.constant 0 : i32
    %c0_i32_0 = arith.constant 0 : i32
    %c0_i32_1 = arith.constant 0 : i32
    return %arg0, %c0_i32, %c0_i32_0 : i32, i32, i32
  }
  func.func @transform_1(%arg0: i32) -> (i32, i32, i32) {
    %c0_i32 = arith.constant 0 : i32
    %c0_i32_0 = arith.constant 0 : i32
    %c0_i32_1 = arith.constant 0 : i32
    return %arg0, %c0_i32, %c0_i32_0 : i32, i32, i32
  }
  func.func @transform_2(%arg0: i32) -> (i32, i32, i32) {
    %c0_i32 = arith.constant 0 : i32
    %c0_i32_0 = arith.constant 0 : i32
    %c0_i32_1 = arith.constant 0 : i32
    return %arg0, %c0_i32, %c0_i32_0 : i32, i32, i32
  }
  func.func @transform_3(%arg0: i32) -> (i32, i32, i32) {
    %c0_i32 = arith.constant 0 : i32
    %c0_i32_0 = arith.constant 0 : i32
    %c0_i32_1 = arith.constant 0 : i32
    return %arg0, %c0_i32, %c0_i32_0 : i32, i32, i32
  }
  func.func @transform_4(%arg0: i32) -> (i32, i32) {
    %c0_i32 = arith.constant 0 : i32
    %c0_i32_0 = arith.constant 0 : i32
    %c0_i32_1 = arith.constant 0 : i32
    return %c0_i32, %c0_i32_0 : i32, i32
  }
  func.func @transform_5(%arg0: i32) -> (i32, i32) {
    %c0_i32 = arith.constant 0 : i32
    %c0_i32_0 = arith.constant 0 : i32
    %c0_i32_1 = arith.constant 0 : i32
    return %c0_i32, %c0_i32_0 : i32, i32
  }
  func.func @transform_6(%arg0: i32) -> (i32, i32) {
    %c0_i32 = arith.constant 0 : i32
    %c0_i32_0 = arith.constant 0 : i32
    %c0_i32_1 = arith.constant 0 : i32
    return %c0_i32, %c0_i32_0 : i32, i32
  }
  func.func @transform_7(%arg0: i32) -> (i32, i32) {
    %c0_i32 = arith.constant 0 : i32
    %c0_i32_0 = arith.constant 0 : i32
    %c0_i32_1 = arith.constant 0 : i32
    return %c0_i32, %c0_i32_0 : i32, i32
  }
  func.func @transform_8(%arg0: i32) -> (i32, i32) {
    %c0_i32 = arith.constant 0 : i32
    %c0_i32_0 = arith.constant 0 : i32
    %c0_i32_1 = arith.constant 0 : i32
    return %c0_i32, %c0_i32_0 : i32, i32
  }
  func.func @transform_9(%arg0: i32) -> (i32, i32) {
    %c0_i32 = arith.constant 0 : i32
    %c0_i32_0 = arith.constant 0 : i32
    %c0_i32_1 = arith.constant 0 : i32
    return %c0_i32, %c0_i32_0 : i32, i32
  }
  func.func @transform_10(%arg0: i32) -> (i32, i32) {
    %c0_i32 = arith.constant 0 : i32
    %c0_i32_0 = arith.constant 0 : i32
    %c0_i32_1 = arith.constant 0 : i32
    return %c0_i32, %c0_i32_0 : i32, i32
  }
  func.func @transform_11(%arg0: i32) -> (i32, i32) {
    %c0_i32 = arith.constant 0 : i32
    %c0_i32_0 = arith.constant 0 : i32
    %c0_i32_1 = arith.constant 0 : i32
    return %c0_i32, %c0_i32_0 : i32, i32
  }
  func.func @transform_12(%arg0: i32) -> (i32, i32) {
    %c0_i32 = arith.constant 0 : i32
    %c0_i32_0 = arith.constant 0 : i32
    %c0_i32_1 = arith.constant 0 : i32
    return %c0_i32, %c0_i32_0 : i32, i32
  }
  func.func @transform_13(%arg0: i32) -> (i32, i32) {
    %c0_i32 = arith.constant 0 : i32
    %c0_i32_0 = arith.constant 0 : i32
    %c0_i32_1 = arith.constant 0 : i32
    return %c0_i32, %c0_i32_0 : i32, i32
  }
  func.func @transform_14(%arg0: i32) -> (i32, i32) {
    %c0_i32 = arith.constant 0 : i32
    %c0_i32_0 = arith.constant 0 : i32
    %c0_i32_1 = arith.constant 0 : i32
    return %c0_i32, %c0_i32_0 : i32, i32
  }
  func.func @transform_15(%arg0: i32) -> (i32, i32) {
    %c0_i32 = arith.constant 0 : i32
    %c0_i32_0 = arith.constant 0 : i32
    %c0_i32_1 = arith.constant 0 : i32
    return %c0_i32, %c0_i32_0 : i32, i32
  }
  func.func @transform_16(%arg0: i32) -> (i32, i32) {
    %c0_i32 = arith.constant 0 : i32
    %c0_i32_0 = arith.constant 0 : i32
    %c0_i32_1 = arith.constant 0 : i32
    return %c0_i32, %c0_i32_0 : i32, i32
  }
  func.func @transform_17(%arg0: i32) -> (i32, i32) {
    %c0_i32 = arith.constant 0 : i32
    %c0_i32_0 = arith.constant 0 : i32
    %c0_i32_1 = arith.constant 0 : i32
    return %c0_i32, %c0_i32_0 : i32, i32
  }
  func.func @transform_18(%arg0: i32) -> (i32, i32) {
    %c0_i32 = arith.constant 0 : i32
    %c0_i32_0 = arith.constant 0 : i32
    %c0_i32_1 = arith.constant 0 : i32
    return %c0_i32, %c0_i32_0 : i32, i32
  }
  func.func @transform_19(%arg0: i32) -> (i32, i32) {
    %c0_i32 = arith.constant 0 : i32
    %c0_i32_0 = arith.constant 0 : i32
    %c0_i32_1 = arith.constant 0 : i32
    return %c0_i32, %c0_i32_0 : i32, i32
  }
  func.func @transform_20(%arg0: i32) -> (i32, i32) {
    %c0_i32 = arith.constant 0 : i32
    %c0_i32_0 = arith.constant 0 : i32
    %c0_i32_1 = arith.constant 0 : i32
    return %c0_i32, %c0_i32_0 : i32, i32
  }
  func.func @transform_21(%arg0: i32) -> (i32, i32) {
    %c0_i32 = arith.constant 0 : i32
    %c0_i32_0 = arith.constant 0 : i32
    %c0_i32_1 = arith.constant 0 : i32
    return %c0_i32, %c0_i32_0 : i32, i32
  }
  func.func @transform_22(%arg0: i32) -> (i32, i32) {
    %c0_i32 = arith.constant 0 : i32
    %c0_i32_0 = arith.constant 0 : i32
    %c0_i32_1 = arith.constant 0 : i32
    return %c0_i32, %c0_i32_0 : i32, i32
  }
  func.func @transform_23(%arg0: i32) -> (i32, i32) {
    %c0_i32 = arith.constant 0 : i32
    %c0_i32_0 = arith.constant 0 : i32
    %c0_i32_1 = arith.constant 0 : i32
    return %c0_i32, %c0_i32_0 : i32, i32
  }
  func.func @transform_24(%arg0: i32) -> (i32, i32) {
    %c0_i32 = arith.constant 0 : i32
    %c0_i32_0 = arith.constant 0 : i32
    %c0_i32_1 = arith.constant 0 : i32
    return %c0_i32, %c0_i32_0 : i32, i32
  }
  func.func @transform_25(%arg0: i32) -> (i32, i32) {
    %c0_i32 = arith.constant 0 : i32
    %c0_i32_0 = arith.constant 0 : i32
    %c0_i32_1 = arith.constant 0 : i32
    return %c0_i32, %c0_i32_0 : i32, i32
  }
  func.func @transform_26(%arg0: i32) -> (i32, i32) {
    %c0_i32 = arith.constant 0 : i32
    %c0_i32_0 = arith.constant 0 : i32
    %c0_i32_1 = arith.constant 0 : i32
    return %c0_i32, %c0_i32_0 : i32, i32
  }
  func.func @transform_27(%arg0: i32) -> (i32, i32) {
    %c0_i32 = arith.constant 0 : i32
    %c0_i32_0 = arith.constant 0 : i32
    %c0_i32_1 = arith.constant 0 : i32
    return %c0_i32, %c0_i32_0 : i32, i32
  }
  func.func @transform_28(%arg0: i32) -> (i32, i32) {
    %c0_i32 = arith.constant 0 : i32
    %c0_i32_0 = arith.constant 0 : i32
    %c0_i32_1 = arith.constant 0 : i32
    return %c0_i32, %c0_i32_0 : i32, i32
  }
  func.func @transform_29(%arg0: i32) -> (i32, i32) {
    %c0_i32 = arith.constant 0 : i32
    %c0_i32_0 = arith.constant 0 : i32
    %c0_i32_1 = arith.constant 0 : i32
    return %c0_i32, %c0_i32_0 : i32, i32
  }
  func.func @transform_30(%arg0: i32) -> (i32, i32) {
    %c0_i32 = arith.constant 0 : i32
    %c0_i32_0 = arith.constant 0 : i32
    %c0_i32_1 = arith.constant 0 : i32
    return %c0_i32, %c0_i32_0 : i32, i32
  }
  func.func @transform_31(%arg0: i32) -> (i32, i32) {
    %c0_i32 = arith.constant 0 : i32
    %c0_i32_0 = arith.constant 0 : i32
    %c0_i32_1 = arith.constant 0 : i32
    return %c0_i32, %c0_i32_0 : i32, i32
  }
  func.func @transform_32(%arg0: i32) -> (i32, i32, i32) {
    %c0_i32 = arith.constant 0 : i32
    %c0_i32_0 = arith.constant 0 : i32
    %c0_i32_1 = arith.constant 0 : i32
    return %arg0, %c0_i32, %c0_i32_0 : i32, i32, i32
  }
}

module attributes {stable_mosaic.version = 11 : i64} {
  func.func @_decoder_kernel(%arg0: i32, %arg1: memref<1x8x32xf32, #tpu.memory_space<vmem>>, %arg2: memref<1x8x32xf32, #tpu.memory_space<vmem>>, %arg3: memref<1x1x8xf32, #tpu.memory_space<vmem>>, %arg4: memref<1x1x8xf32, #tpu.memory_space<vmem>>, %arg5: memref<8x8xf32, #tpu.memory_space<vmem>>, %arg6: memref<8x8xf32, #tpu.memory_space<vmem>>, %arg7: memref<32x32xbf16, #tpu.memory_space<vmem>>, %arg8: memref<1x32xf32, #tpu.memory_space<vmem>>, %arg9: memref<32x32xbf16, #tpu.memory_space<vmem>>, %arg10: memref<1x32xf32, #tpu.memory_space<vmem>>, %arg11: memref<32x32xbf16, #tpu.memory_space<vmem>>, %arg12: memref<1x32xf32, #tpu.memory_space<vmem>>, %arg13: memref<32x32xbf16, #tpu.memory_space<vmem>>, %arg14: memref<1x32xf32, #tpu.memory_space<vmem>>, %arg15: memref<32x32xbf16, #tpu.memory_space<vmem>>, %arg16: memref<1x32xf32, #tpu.memory_space<vmem>>, %arg17: memref<32x32xbf16, #tpu.memory_space<vmem>>, %arg18: memref<1x32xf32, #tpu.memory_space<vmem>>, %arg19: memref<32x32xbf16, #tpu.memory_space<vmem>>, %arg20: memref<1x32xf32, #tpu.memory_space<vmem>>, %arg21: memref<32x32xbf16, #tpu.memory_space<vmem>>, %arg22: memref<1x32xf32, #tpu.memory_space<vmem>>, %arg23: memref<1x32xf32, #tpu.memory_space<vmem>>, %arg24: memref<1x32xf32, #tpu.memory_space<vmem>>, %arg25: memref<1x32xf32, #tpu.memory_space<vmem>>, %arg26: memref<1x32xf32, #tpu.memory_space<vmem>>, %arg27: memref<1x32xf32, #tpu.memory_space<vmem>>, %arg28: memref<1x32xf32, #tpu.memory_space<vmem>>, %arg29: memref<32x64xbf16, #tpu.memory_space<vmem>>, %arg30: memref<1x64xf32, #tpu.memory_space<vmem>>, %arg31: memref<64x32xbf16, #tpu.memory_space<vmem>>, %arg32: memref<1x32xf32, #tpu.memory_space<vmem>>, %arg33: memref<1x8x32xf32, #tpu.memory_space<vmem>>) attributes {dimension_semantics = [#tpu.dimension_semantics<parallel>], iteration_bounds = array<i64: 2>, scalar_prefetch = 0 : i64, scratch_operands = 0 : i64, tpu.core_type = #tpu.core_type<tc>, window_params = [{transform_indices = @transform_0, window_bounds = array<i64: 1, 8, 32>}, {transform_indices = @transform_1, window_bounds = array<i64: 1, 8, 32>}, {transform_indices = @transform_2, window_bounds = array<i64: 1, 1, 8>}, {transform_indices = @transform_3, window_bounds = array<i64: 1, 1, 8>}, {pipeline_mode = #tpu.pipeline_mode<synchronous>, transform_indices = @transform_4, window_bounds = array<i64: 8, 8>}, {pipeline_mode = #tpu.pipeline_mode<synchronous>, transform_indices = @transform_5, window_bounds = array<i64: 8, 8>}, {pipeline_mode = #tpu.pipeline_mode<synchronous>, transform_indices = @transform_6, window_bounds = array<i64: 32, 32>}, {pipeline_mode = #tpu.pipeline_mode<synchronous>, transform_indices = @transform_7, window_bounds = array<i64: 1, 32>}, {pipeline_mode = #tpu.pipeline_mode<synchronous>, transform_indices = @transform_8, window_bounds = array<i64: 32, 32>}, {pipeline_mode = #tpu.pipeline_mode<synchronous>, transform_indices = @transform_9, window_bounds = array<i64: 1, 32>}, {pipeline_mode = #tpu.pipeline_mode<synchronous>, transform_indices = @transform_10, window_bounds = array<i64: 32, 32>}, {pipeline_mode = #tpu.pipeline_mode<synchronous>, transform_indices = @transform_11, window_bounds = array<i64: 1, 32>}, {pipeline_mode = #tpu.pipeline_mode<synchronous>, transform_indices = @transform_12, window_bounds = array<i64: 32, 32>}, {pipeline_mode = #tpu.pipeline_mode<synchronous>, transform_indices = @transform_13, window_bounds = array<i64: 1, 32>}, {pipeline_mode = #tpu.pipeline_mode<synchronous>, transform_indices = @transform_14, window_bounds = array<i64: 32, 32>}, {pipeline_mode = #tpu.pipeline_mode<synchronous>, transform_indices = @transform_15, window_bounds = array<i64: 1, 32>}, {pipeline_mode = #tpu.pipeline_mode<synchronous>, transform_indices = @transform_16, window_bounds = array<i64: 32, 32>}, {pipeline_mode = #tpu.pipeline_mode<synchronous>, transform_indices = @transform_17, window_bounds = array<i64: 1, 32>}, {pipeline_mode = #tpu.pipeline_mode<synchronous>, transform_indices = @transform_18, window_bounds = array<i64: 32, 32>}, {pipeline_mode = #tpu.pipeline_mode<synchronous>, transform_indices = @transform_19, window_bounds = array<i64: 1, 32>}, {pipeline_mode = #tpu.pipeline_mode<synchronous>, transform_indices = @transform_20, window_bounds = array<i64: 32, 32>}, {pipeline_mode = #tpu.pipeline_mode<synchronous>, transform_indices = @transform_21, window_bounds = array<i64: 1, 32>}, {pipeline_mode = #tpu.pipeline_mode<synchronous>, transform_indices = @transform_22, window_bounds = array<i64: 1, 32>}, {pipeline_mode = #tpu.pipeline_mode<synchronous>, transform_indices = @transform_23, window_bounds = array<i64: 1, 32>}, {pipeline_mode = #tpu.pipeline_mode<synchronous>, transform_indices = @transform_24, window_bounds = array<i64: 1, 32>}, {pipeline_mode = #tpu.pipeline_mode<synchronous>, transform_indices = @transform_25, window_bounds = array<i64: 1, 32>}, {pipeline_mode = #tpu.pipeline_mode<synchronous>, transform_indices = @transform_26, window_bounds = array<i64: 1, 32>}, {pipeline_mode = #tpu.pipeline_mode<synchronous>, transform_indices = @transform_27, window_bounds = array<i64: 1, 32>}, {pipeline_mode = #tpu.pipeline_mode<synchronous>, transform_indices = @transform_28, window_bounds = array<i64: 32, 64>}, {pipeline_mode = #tpu.pipeline_mode<synchronous>, transform_indices = @transform_29, window_bounds = array<i64: 1, 64>}, {pipeline_mode = #tpu.pipeline_mode<synchronous>, transform_indices = @transform_30, window_bounds = array<i64: 64, 32>}, {pipeline_mode = #tpu.pipeline_mode<synchronous>, transform_indices = @transform_31, window_bounds = array<i64: 1, 32>}, {transform_indices = @transform_32, window_bounds = array<i64: 1, 8, 32>}]} {
    %c0 = arith.constant 0 : index
    %c0_0 = arith.constant 0 : index
    %c0_1 = arith.constant 0 : index
    %0 = vector.load %arg1[%c0, %c0_0, %c0_1] : memref<1x8x32xf32, #tpu.memory_space<vmem>>, vector<1x8x32xf32>
    %1 = vector.shape_cast %0 : vector<1x8x32xf32> to vector<8x32xf32>
    %c0_2 = arith.constant 0 : index
    %c0_3 = arith.constant 0 : index
    %c0_4 = arith.constant 0 : index
    %2 = vector.load %arg2[%c0_2, %c0_3, %c0_4] : memref<1x8x32xf32, #tpu.memory_space<vmem>>, vector<1x8x32xf32>
    %3 = vector.shape_cast %2 : vector<1x8x32xf32> to vector<8x32xf32>
    %c0_5 = arith.constant 0 : index
    %c0_6 = arith.constant 0 : index
    %c0_7 = arith.constant 0 : index
    %4 = vector.load %arg3[%c0_5, %c0_6, %c0_7] : memref<1x1x8xf32, #tpu.memory_space<vmem>>, vector<1x1x8xf32>
    %5 = vector.shape_cast %4 : vector<1x1x8xf32> to vector<1x8xf32>
    %c0_8 = arith.constant 0 : index
    %c0_9 = arith.constant 0 : index
    %c0_10 = arith.constant 0 : index
    %6 = vector.load %arg4[%c0_8, %c0_9, %c0_10] : memref<1x1x8xf32, #tpu.memory_space<vmem>>, vector<1x1x8xf32>
    %7 = vector.shape_cast %6 : vector<1x1x8xf32> to vector<1x8xf32>
    %c0_11 = arith.constant 0 : index
    %c0_12 = arith.constant 0 : index
    %8 = vector.load %arg5[%c0_11, %c0_12] : memref<8x8xf32, #tpu.memory_space<vmem>>, vector<8x8xf32>
    %c0_13 = arith.constant 0 : index
    %c0_14 = arith.constant 0 : index
    %9 = vector.load %arg6[%c0_13, %c0_14] : memref<8x8xf32, #tpu.memory_space<vmem>>, vector<8x8xf32>
    %10 = arith.truncf %1 : vector<8x32xf32> to vector<8x32xbf16>
    %11 = arith.truncf %1 : vector<8x32xf32> to vector<8x32xbf16>
    %12 = vector.shape_cast %5 : vector<1x8xf32> to vector<1x8xf32>
    %13 = vector.broadcast %12 : vector<1x8xf32> to vector<8x8xf32>
    %cst = arith.constant 0.000000e+00 : f32
    %14 = vector.broadcast %cst : f32 to vector<8x32xf32>
    %c0_15 = arith.constant 0 : index
    %c0_16 = arith.constant 0 : index
    %15 = vector.load %arg7[%c0_15, %c0_16] : memref<32x32xbf16, #tpu.memory_space<vmem>>, vector<32x8xbf16>
    %cst_17 = arith.constant dense<0.000000e+00> : vector<8x8xf32>
    %16 = tpu.matmul %10, %15, %cst_17 {dimension_numbers = #tpu.dot_dimension_numbers<[1], [0], [0], [1], [0, 0, 1, 1], [], []>} : vector<8x32xbf16>, vector<32x8xbf16>, vector<8x8xf32> -> vector<8x8xf32>
    %c0_18 = arith.constant 0 : index
    %c0_19 = arith.constant 0 : index
    %17 = vector.load %arg8[%c0_18, %c0_19] : memref<1x32xf32, #tpu.memory_space<vmem>>, vector<1x8xf32>
    %18 = vector.broadcast %17 : vector<1x8xf32> to vector<8x8xf32>
    %19 = arith.addf %16, %18 : vector<8x8xf32>
    %c0_20 = arith.constant 0 : index
    %c0_21 = arith.constant 0 : index
    %20 = vector.load %arg9[%c0_20, %c0_21] : memref<32x32xbf16, #tpu.memory_space<vmem>>, vector<32x8xbf16>
    %cst_22 = arith.constant dense<0.000000e+00> : vector<8x8xf32>
    %21 = tpu.matmul %11, %20, %cst_22 {dimension_numbers = #tpu.dot_dimension_numbers<[1], [0], [0], [1], [0, 0, 1, 1], [], []>} : vector<8x32xbf16>, vector<32x8xbf16>, vector<8x8xf32> -> vector<8x8xf32>
    %c0_23 = arith.constant 0 : index
    %c0_24 = arith.constant 0 : index
    %22 = vector.load %arg10[%c0_23, %c0_24] : memref<1x32xf32, #tpu.memory_space<vmem>>, vector<1x8xf32>
    %23 = vector.broadcast %22 : vector<1x8xf32> to vector<8x8xf32>
    %24 = arith.addf %21, %23 : vector<8x8xf32>
    %c0_25 = arith.constant 0 : index
    %c0_26 = arith.constant 0 : index
    %25 = vector.load %arg11[%c0_25, %c0_26] : memref<32x32xbf16, #tpu.memory_space<vmem>>, vector<32x8xbf16>
    %cst_27 = arith.constant dense<0.000000e+00> : vector<8x8xf32>
    %26 = tpu.matmul %11, %25, %cst_27 {dimension_numbers = #tpu.dot_dimension_numbers<[1], [0], [0], [1], [0, 0, 1, 1], [], []>} : vector<8x32xbf16>, vector<32x8xbf16>, vector<8x8xf32> -> vector<8x8xf32>
    %c0_28 = arith.constant 0 : index
    %c0_29 = arith.constant 0 : index
    %27 = vector.load %arg12[%c0_28, %c0_29] : memref<1x32xf32, #tpu.memory_space<vmem>>, vector<1x8xf32>
    %28 = vector.broadcast %27 : vector<1x8xf32> to vector<8x8xf32>
    %29 = arith.addf %26, %28 : vector<8x8xf32>
    %30 = arith.mulf %19, %8 : vector<8x8xf32>
    %c4_i32 = arith.constant 4 : i32
    %31 = tpu.dynamic_rotate %19 by %c4_i32 dim 1 : vector<8x8xf32>, i32 -> vector<8x8xf32>
    %32 = arith.mulf %31, %9 : vector<8x8xf32>
    %33 = arith.addf %30, %32 : vector<8x8xf32>
    %34 = arith.mulf %24, %8 : vector<8x8xf32>
    %c4_i32_30 = arith.constant 4 : i32
    %35 = tpu.dynamic_rotate %24 by %c4_i32_30 dim 1 : vector<8x8xf32>, i32 -> vector<8x8xf32>
    %36 = arith.mulf %35, %9 : vector<8x8xf32>
    %37 = arith.addf %34, %36 : vector<8x8xf32>
    %cst_31 = arith.constant 0.353553385 : f32
    %38 = vector.broadcast %cst_31 : f32 to vector<8x8xf32>
    %39 = arith.mulf %33, %38 : vector<8x8xf32>
    %40 = arith.truncf %39 : vector<8x8xf32> to vector<8x8xbf16>
    %41 = arith.truncf %37 : vector<8x8xf32> to vector<8x8xbf16>
    %cst_32 = arith.constant dense<0.000000e+00> : vector<8x8xf32>
    %42 = tpu.matmul %40, %41, %cst_32 {dimension_numbers = #tpu.dot_dimension_numbers<[1], [1], [0], [0], [0, 0, 1, 0], [], []>} : vector<8x8xbf16>, vector<8x8xbf16>, vector<8x8xf32> -> vector<8x8xf32>
    %43 = arith.addf %42, %13 : vector<8x8xf32>
    %cst_33 = arith.constant dense<0xFF800000> : vector<8xf32>
    %44 = vector.multi_reduction <maximumf>, %43, %cst_33 [1] : vector<8x8xf32> to vector<8xf32>
    %45 = vector.shape_cast %44 : vector<8xf32> to vector<8x1xf32>
    %46 = vector.broadcast %45 : vector<8x1xf32> to vector<8x8xf32>
    %47 = arith.subf %43, %46 : vector<8x8xf32>
    %48 = math.exp %47 : vector<8x8xf32>
    %cst_34 = arith.constant dense<0.000000e+00> : vector<8xf32>
    %49 = vector.multi_reduction <add>, %48, %cst_34 [1] : vector<8x8xf32> to vector<8xf32>
    %50 = vector.shape_cast %49 : vector<8xf32> to vector<8x1xf32>
    %51 = tpu.reciprocal %50 {approx = true} : vector<8x1xf32> -> vector<8x1xf32>
    %52 = vector.broadcast %51 : vector<8x1xf32> to vector<8x8xf32>
    %53 = arith.mulf %48, %52 : vector<8x8xf32>
    %54 = arith.truncf %53 : vector<8x8xf32> to vector<8x8xbf16>
    %55 = arith.truncf %29 : vector<8x8xf32> to vector<8x8xbf16>
    %cst_35 = arith.constant dense<0.000000e+00> : vector<8x8xf32>
    %56 = tpu.matmul %54, %55, %cst_35 {dimension_numbers = #tpu.dot_dimension_numbers<[1], [0], [0], [1], [0, 0, 1, 1], [], []>} : vector<8x8xbf16>, vector<8x8xbf16>, vector<8x8xf32> -> vector<8x8xf32>
    %57 = arith.truncf %56 : vector<8x8xf32> to vector<8x8xbf16>
    %c0_36 = arith.constant 0 : index
    %c0_37 = arith.constant 0 : index
    %58 = vector.load %arg13[%c0_36, %c0_37] : memref<32x32xbf16, #tpu.memory_space<vmem>>, vector<8x32xbf16>
    %cst_38 = arith.constant dense<0.000000e+00> : vector<8x32xf32>
    %59 = tpu.matmul %57, %58, %cst_38 {dimension_numbers = #tpu.dot_dimension_numbers<[1], [0], [0], [1], [0, 0, 1, 1], [], []>} : vector<8x8xbf16>, vector<8x32xbf16>, vector<8x32xf32> -> vector<8x32xf32>
    %60 = arith.addf %14, %59 : vector<8x32xf32>
    %c0_39 = arith.constant 0 : index
    %c8 = arith.constant 8 : index
    %61 = vector.load %arg7[%c0_39, %c8] : memref<32x32xbf16, #tpu.memory_space<vmem>>, vector<32x8xbf16>
    %cst_40 = arith.constant dense<0.000000e+00> : vector<8x8xf32>
    %62 = tpu.matmul %10, %61, %cst_40 {dimension_numbers = #tpu.dot_dimension_numbers<[1], [0], [0], [1], [0, 0, 1, 1], [], []>} : vector<8x32xbf16>, vector<32x8xbf16>, vector<8x8xf32> -> vector<8x8xf32>
    %c0_41 = arith.constant 0 : index
    %c8_42 = arith.constant 8 : index
    %63 = vector.load %arg8[%c0_41, %c8_42] : memref<1x32xf32, #tpu.memory_space<vmem>>, vector<1x8xf32>
    %64 = vector.broadcast %63 : vector<1x8xf32> to vector<8x8xf32>
    %65 = arith.addf %62, %64 : vector<8x8xf32>
    %c0_43 = arith.constant 0 : index
    %c8_44 = arith.constant 8 : index
    %66 = vector.load %arg9[%c0_43, %c8_44] : memref<32x32xbf16, #tpu.memory_space<vmem>>, vector<32x8xbf16>
    %cst_45 = arith.constant dense<0.000000e+00> : vector<8x8xf32>
    %67 = tpu.matmul %11, %66, %cst_45 {dimension_numbers = #tpu.dot_dimension_numbers<[1], [0], [0], [1], [0, 0, 1, 1], [], []>} : vector<8x32xbf16>, vector<32x8xbf16>, vector<8x8xf32> -> vector<8x8xf32>
    %c0_46 = arith.constant 0 : index
    %c8_47 = arith.constant 8 : index
    %68 = vector.load %arg10[%c0_46, %c8_47] : memref<1x32xf32, #tpu.memory_space<vmem>>, vector<1x8xf32>
    %69 = vector.broadcast %68 : vector<1x8xf32> to vector<8x8xf32>
    %70 = arith.addf %67, %69 : vector<8x8xf32>
    %c0_48 = arith.constant 0 : index
    %c8_49 = arith.constant 8 : index
    %71 = vector.load %arg11[%c0_48, %c8_49] : memref<32x32xbf16, #tpu.memory_space<vmem>>, vector<32x8xbf16>
    %cst_50 = arith.constant dense<0.000000e+00> : vector<8x8xf32>
    %72 = tpu.matmul %11, %71, %cst_50 {dimension_numbers = #tpu.dot_dimension_numbers<[1], [0], [0], [1], [0, 0, 1, 1], [], []>} : vector<8x32xbf16>, vector<32x8xbf16>, vector<8x8xf32> -> vector<8x8xf32>
    %c0_51 = arith.constant 0 : index
    %c8_52 = arith.constant 8 : index
    %73 = vector.load %arg12[%c0_51, %c8_52] : memref<1x32xf32, #tpu.memory_space<vmem>>, vector<1x8xf32>
    %74 = vector.broadcast %73 : vector<1x8xf32> to vector<8x8xf32>
    %75 = arith.addf %72, %74 : vector<8x8xf32>
    %76 = arith.mulf %65, %8 : vector<8x8xf32>
    %c4_i32_53 = arith.constant 4 : i32
    %77 = tpu.dynamic_rotate %65 by %c4_i32_53 dim 1 : vector<8x8xf32>, i32 -> vector<8x8xf32>
    %78 = arith.mulf %77, %9 : vector<8x8xf32>
    %79 = arith.addf %76, %78 : vector<8x8xf32>
    %80 = arith.mulf %70, %8 : vector<8x8xf32>
    %c4_i32_54 = arith.constant 4 : i32
    %81 = tpu.dynamic_rotate %70 by %c4_i32_54 dim 1 : vector<8x8xf32>, i32 -> vector<8x8xf32>
    %82 = arith.mulf %81, %9 : vector<8x8xf32>
    %83 = arith.addf %80, %82 : vector<8x8xf32>
    %cst_55 = arith.constant 0.353553385 : f32
    %84 = vector.broadcast %cst_55 : f32 to vector<8x8xf32>
    %85 = arith.mulf %79, %84 : vector<8x8xf32>
    %86 = arith.truncf %85 : vector<8x8xf32> to vector<8x8xbf16>
    %87 = arith.truncf %83 : vector<8x8xf32> to vector<8x8xbf16>
    %cst_56 = arith.constant dense<0.000000e+00> : vector<8x8xf32>
    %88 = tpu.matmul %86, %87, %cst_56 {dimension_numbers = #tpu.dot_dimension_numbers<[1], [1], [0], [0], [0, 0, 1, 0], [], []>} : vector<8x8xbf16>, vector<8x8xbf16>, vector<8x8xf32> -> vector<8x8xf32>
    %89 = arith.addf %88, %13 : vector<8x8xf32>
    %cst_57 = arith.constant dense<0xFF800000> : vector<8xf32>
    %90 = vector.multi_reduction <maximumf>, %89, %cst_57 [1] : vector<8x8xf32> to vector<8xf32>
    %91 = vector.shape_cast %90 : vector<8xf32> to vector<8x1xf32>
    %92 = vector.broadcast %91 : vector<8x1xf32> to vector<8x8xf32>
    %93 = arith.subf %89, %92 : vector<8x8xf32>
    %94 = math.exp %93 : vector<8x8xf32>
    %cst_58 = arith.constant dense<0.000000e+00> : vector<8xf32>
    %95 = vector.multi_reduction <add>, %94, %cst_58 [1] : vector<8x8xf32> to vector<8xf32>
    %96 = vector.shape_cast %95 : vector<8xf32> to vector<8x1xf32>
    %97 = tpu.reciprocal %96 {approx = true} : vector<8x1xf32> -> vector<8x1xf32>
    %98 = vector.broadcast %97 : vector<8x1xf32> to vector<8x8xf32>
    %99 = arith.mulf %94, %98 : vector<8x8xf32>
    %100 = arith.truncf %99 : vector<8x8xf32> to vector<8x8xbf16>
    %101 = arith.truncf %75 : vector<8x8xf32> to vector<8x8xbf16>
    %cst_59 = arith.constant dense<0.000000e+00> : vector<8x8xf32>
    %102 = tpu.matmul %100, %101, %cst_59 {dimension_numbers = #tpu.dot_dimension_numbers<[1], [0], [0], [1], [0, 0, 1, 1], [], []>} : vector<8x8xbf16>, vector<8x8xbf16>, vector<8x8xf32> -> vector<8x8xf32>
    %103 = arith.truncf %102 : vector<8x8xf32> to vector<8x8xbf16>
    %c8_60 = arith.constant 8 : index
    %c0_61 = arith.constant 0 : index
    %104 = vector.load %arg13[%c8_60, %c0_61] : memref<32x32xbf16, #tpu.memory_space<vmem>>, vector<8x32xbf16>
    %cst_62 = arith.constant dense<0.000000e+00> : vector<8x32xf32>
    %105 = tpu.matmul %103, %104, %cst_62 {dimension_numbers = #tpu.dot_dimension_numbers<[1], [0], [0], [1], [0, 0, 1, 1], [], []>} : vector<8x8xbf16>, vector<8x32xbf16>, vector<8x32xf32> -> vector<8x32xf32>
    %106 = arith.addf %60, %105 : vector<8x32xf32>
    %c0_63 = arith.constant 0 : index
    %c16 = arith.constant 16 : index
    %107 = vector.load %arg7[%c0_63, %c16] : memref<32x32xbf16, #tpu.memory_space<vmem>>, vector<32x8xbf16>
    %cst_64 = arith.constant dense<0.000000e+00> : vector<8x8xf32>
    %108 = tpu.matmul %10, %107, %cst_64 {dimension_numbers = #tpu.dot_dimension_numbers<[1], [0], [0], [1], [0, 0, 1, 1], [], []>} : vector<8x32xbf16>, vector<32x8xbf16>, vector<8x8xf32> -> vector<8x8xf32>
    %c0_65 = arith.constant 0 : index
    %c16_66 = arith.constant 16 : index
    %109 = vector.load %arg8[%c0_65, %c16_66] : memref<1x32xf32, #tpu.memory_space<vmem>>, vector<1x8xf32>
    %110 = vector.broadcast %109 : vector<1x8xf32> to vector<8x8xf32>
    %111 = arith.addf %108, %110 : vector<8x8xf32>
    %c0_67 = arith.constant 0 : index
    %c16_68 = arith.constant 16 : index
    %112 = vector.load %arg9[%c0_67, %c16_68] : memref<32x32xbf16, #tpu.memory_space<vmem>>, vector<32x8xbf16>
    %cst_69 = arith.constant dense<0.000000e+00> : vector<8x8xf32>
    %113 = tpu.matmul %11, %112, %cst_69 {dimension_numbers = #tpu.dot_dimension_numbers<[1], [0], [0], [1], [0, 0, 1, 1], [], []>} : vector<8x32xbf16>, vector<32x8xbf16>, vector<8x8xf32> -> vector<8x8xf32>
    %c0_70 = arith.constant 0 : index
    %c16_71 = arith.constant 16 : index
    %114 = vector.load %arg10[%c0_70, %c16_71] : memref<1x32xf32, #tpu.memory_space<vmem>>, vector<1x8xf32>
    %115 = vector.broadcast %114 : vector<1x8xf32> to vector<8x8xf32>
    %116 = arith.addf %113, %115 : vector<8x8xf32>
    %c0_72 = arith.constant 0 : index
    %c16_73 = arith.constant 16 : index
    %117 = vector.load %arg11[%c0_72, %c16_73] : memref<32x32xbf16, #tpu.memory_space<vmem>>, vector<32x8xbf16>
    %cst_74 = arith.constant dense<0.000000e+00> : vector<8x8xf32>
    %118 = tpu.matmul %11, %117, %cst_74 {dimension_numbers = #tpu.dot_dimension_numbers<[1], [0], [0], [1], [0, 0, 1, 1], [], []>} : vector<8x32xbf16>, vector<32x8xbf16>, vector<8x8xf32> -> vector<8x8xf32>
    %c0_75 = arith.constant 0 : index
    %c16_76 = arith.constant 16 : index
    %119 = vector.load %arg12[%c0_75, %c16_76] : memref<1x32xf32, #tpu.memory_space<vmem>>, vector<1x8xf32>
    %120 = vector.broadcast %119 : vector<1x8xf32> to vector<8x8xf32>
    %121 = arith.addf %118, %120 : vector<8x8xf32>
    %122 = arith.mulf %111, %8 : vector<8x8xf32>
    %c4_i32_77 = arith.constant 4 : i32
    %123 = tpu.dynamic_rotate %111 by %c4_i32_77 dim 1 : vector<8x8xf32>, i32 -> vector<8x8xf32>
    %124 = arith.mulf %123, %9 : vector<8x8xf32>
    %125 = arith.addf %122, %124 : vector<8x8xf32>
    %126 = arith.mulf %116, %8 : vector<8x8xf32>
    %c4_i32_78 = arith.constant 4 : i32
    %127 = tpu.dynamic_rotate %116 by %c4_i32_78 dim 1 : vector<8x8xf32>, i32 -> vector<8x8xf32>
    %128 = arith.mulf %127, %9 : vector<8x8xf32>
    %129 = arith.addf %126, %128 : vector<8x8xf32>
    %cst_79 = arith.constant 0.353553385 : f32
    %130 = vector.broadcast %cst_79 : f32 to vector<8x8xf32>
    %131 = arith.mulf %125, %130 : vector<8x8xf32>
    %132 = arith.truncf %131 : vector<8x8xf32> to vector<8x8xbf16>
    %133 = arith.truncf %129 : vector<8x8xf32> to vector<8x8xbf16>
    %cst_80 = arith.constant dense<0.000000e+00> : vector<8x8xf32>
    %134 = tpu.matmul %132, %133, %cst_80 {dimension_numbers = #tpu.dot_dimension_numbers<[1], [1], [0], [0], [0, 0, 1, 0], [], []>} : vector<8x8xbf16>, vector<8x8xbf16>, vector<8x8xf32> -> vector<8x8xf32>
    %135 = arith.addf %134, %13 : vector<8x8xf32>
    %cst_81 = arith.constant dense<0xFF800000> : vector<8xf32>
    %136 = vector.multi_reduction <maximumf>, %135, %cst_81 [1] : vector<8x8xf32> to vector<8xf32>
    %137 = vector.shape_cast %136 : vector<8xf32> to vector<8x1xf32>
    %138 = vector.broadcast %137 : vector<8x1xf32> to vector<8x8xf32>
    %139 = arith.subf %135, %138 : vector<8x8xf32>
    %140 = math.exp %139 : vector<8x8xf32>
    %cst_82 = arith.constant dense<0.000000e+00> : vector<8xf32>
    %141 = vector.multi_reduction <add>, %140, %cst_82 [1] : vector<8x8xf32> to vector<8xf32>
    %142 = vector.shape_cast %141 : vector<8xf32> to vector<8x1xf32>
    %143 = tpu.reciprocal %142 {approx = true} : vector<8x1xf32> -> vector<8x1xf32>
    %144 = vector.broadcast %143 : vector<8x1xf32> to vector<8x8xf32>
    %145 = arith.mulf %140, %144 : vector<8x8xf32>
    %146 = arith.truncf %145 : vector<8x8xf32> to vector<8x8xbf16>
    %147 = arith.truncf %121 : vector<8x8xf32> to vector<8x8xbf16>
    %cst_83 = arith.constant dense<0.000000e+00> : vector<8x8xf32>
    %148 = tpu.matmul %146, %147, %cst_83 {dimension_numbers = #tpu.dot_dimension_numbers<[1], [0], [0], [1], [0, 0, 1, 1], [], []>} : vector<8x8xbf16>, vector<8x8xbf16>, vector<8x8xf32> -> vector<8x8xf32>
    %149 = arith.truncf %148 : vector<8x8xf32> to vector<8x8xbf16>
    %c16_84 = arith.constant 16 : index
    %c0_85 = arith.constant 0 : index
    %150 = vector.load %arg13[%c16_84, %c0_85] : memref<32x32xbf16, #tpu.memory_space<vmem>>, vector<8x32xbf16>
    %cst_86 = arith.constant dense<0.000000e+00> : vector<8x32xf32>
    %151 = tpu.matmul %149, %150, %cst_86 {dimension_numbers = #tpu.dot_dimension_numbers<[1], [0], [0], [1], [0, 0, 1, 1], [], []>} : vector<8x8xbf16>, vector<8x32xbf16>, vector<8x32xf32> -> vector<8x32xf32>
    %152 = arith.addf %106, %151 : vector<8x32xf32>
    %c0_87 = arith.constant 0 : index
    %c24 = arith.constant 24 : index
    %153 = vector.load %arg7[%c0_87, %c24] : memref<32x32xbf16, #tpu.memory_space<vmem>>, vector<32x8xbf16>
    %cst_88 = arith.constant dense<0.000000e+00> : vector<8x8xf32>
    %154 = tpu.matmul %10, %153, %cst_88 {dimension_numbers = #tpu.dot_dimension_numbers<[1], [0], [0], [1], [0, 0, 1, 1], [], []>} : vector<8x32xbf16>, vector<32x8xbf16>, vector<8x8xf32> -> vector<8x8xf32>
    %c0_89 = arith.constant 0 : index
    %c24_90 = arith.constant 24 : index
    %155 = vector.load %arg8[%c0_89, %c24_90] : memref<1x32xf32, #tpu.memory_space<vmem>>, vector<1x8xf32>
    %156 = vector.broadcast %155 : vector<1x8xf32> to vector<8x8xf32>
    %157 = arith.addf %154, %156 : vector<8x8xf32>
    %c0_91 = arith.constant 0 : index
    %c24_92 = arith.constant 24 : index
    %158 = vector.load %arg9[%c0_91, %c24_92] : memref<32x32xbf16, #tpu.memory_space<vmem>>, vector<32x8xbf16>
    %cst_93 = arith.constant dense<0.000000e+00> : vector<8x8xf32>
    %159 = tpu.matmul %11, %158, %cst_93 {dimension_numbers = #tpu.dot_dimension_numbers<[1], [0], [0], [1], [0, 0, 1, 1], [], []>} : vector<8x32xbf16>, vector<32x8xbf16>, vector<8x8xf32> -> vector<8x8xf32>
    %c0_94 = arith.constant 0 : index
    %c24_95 = arith.constant 24 : index
    %160 = vector.load %arg10[%c0_94, %c24_95] : memref<1x32xf32, #tpu.memory_space<vmem>>, vector<1x8xf32>
    %161 = vector.broadcast %160 : vector<1x8xf32> to vector<8x8xf32>
    %162 = arith.addf %159, %161 : vector<8x8xf32>
    %c0_96 = arith.constant 0 : index
    %c24_97 = arith.constant 24 : index
    %163 = vector.load %arg11[%c0_96, %c24_97] : memref<32x32xbf16, #tpu.memory_space<vmem>>, vector<32x8xbf16>
    %cst_98 = arith.constant dense<0.000000e+00> : vector<8x8xf32>
    %164 = tpu.matmul %11, %163, %cst_98 {dimension_numbers = #tpu.dot_dimension_numbers<[1], [0], [0], [1], [0, 0, 1, 1], [], []>} : vector<8x32xbf16>, vector<32x8xbf16>, vector<8x8xf32> -> vector<8x8xf32>
    %c0_99 = arith.constant 0 : index
    %c24_100 = arith.constant 24 : index
    %165 = vector.load %arg12[%c0_99, %c24_100] : memref<1x32xf32, #tpu.memory_space<vmem>>, vector<1x8xf32>
    %166 = vector.broadcast %165 : vector<1x8xf32> to vector<8x8xf32>
    %167 = arith.addf %164, %166 : vector<8x8xf32>
    %168 = arith.mulf %157, %8 : vector<8x8xf32>
    %c4_i32_101 = arith.constant 4 : i32
    %169 = tpu.dynamic_rotate %157 by %c4_i32_101 dim 1 : vector<8x8xf32>, i32 -> vector<8x8xf32>
    %170 = arith.mulf %169, %9 : vector<8x8xf32>
    %171 = arith.addf %168, %170 : vector<8x8xf32>
    %172 = arith.mulf %162, %8 : vector<8x8xf32>
    %c4_i32_102 = arith.constant 4 : i32
    %173 = tpu.dynamic_rotate %162 by %c4_i32_102 dim 1 : vector<8x8xf32>, i32 -> vector<8x8xf32>
    %174 = arith.mulf %173, %9 : vector<8x8xf32>
    %175 = arith.addf %172, %174 : vector<8x8xf32>
    %cst_103 = arith.constant 0.353553385 : f32
    %176 = vector.broadcast %cst_103 : f32 to vector<8x8xf32>
    %177 = arith.mulf %171, %176 : vector<8x8xf32>
    %178 = arith.truncf %177 : vector<8x8xf32> to vector<8x8xbf16>
    %179 = arith.truncf %175 : vector<8x8xf32> to vector<8x8xbf16>
    %cst_104 = arith.constant dense<0.000000e+00> : vector<8x8xf32>
    %180 = tpu.matmul %178, %179, %cst_104 {dimension_numbers = #tpu.dot_dimension_numbers<[1], [1], [0], [0], [0, 0, 1, 0], [], []>} : vector<8x8xbf16>, vector<8x8xbf16>, vector<8x8xf32> -> vector<8x8xf32>
    %181 = arith.addf %180, %13 : vector<8x8xf32>
    %cst_105 = arith.constant dense<0xFF800000> : vector<8xf32>
    %182 = vector.multi_reduction <maximumf>, %181, %cst_105 [1] : vector<8x8xf32> to vector<8xf32>
    %183 = vector.shape_cast %182 : vector<8xf32> to vector<8x1xf32>
    %184 = vector.broadcast %183 : vector<8x1xf32> to vector<8x8xf32>
    %185 = arith.subf %181, %184 : vector<8x8xf32>
    %186 = math.exp %185 : vector<8x8xf32>
    %cst_106 = arith.constant dense<0.000000e+00> : vector<8xf32>
    %187 = vector.multi_reduction <add>, %186, %cst_106 [1] : vector<8x8xf32> to vector<8xf32>
    %188 = vector.shape_cast %187 : vector<8xf32> to vector<8x1xf32>
    %189 = tpu.reciprocal %188 {approx = true} : vector<8x1xf32> -> vector<8x1xf32>
    %190 = vector.broadcast %189 : vector<8x1xf32> to vector<8x8xf32>
    %191 = arith.mulf %186, %190 : vector<8x8xf32>
    %192 = arith.truncf %191 : vector<8x8xf32> to vector<8x8xbf16>
    %193 = arith.truncf %167 : vector<8x8xf32> to vector<8x8xbf16>
    %cst_107 = arith.constant dense<0.000000e+00> : vector<8x8xf32>
    %194 = tpu.matmul %192, %193, %cst_107 {dimension_numbers = #tpu.dot_dimension_numbers<[1], [0], [0], [1], [0, 0, 1, 1], [], []>} : vector<8x8xbf16>, vector<8x8xbf16>, vector<8x8xf32> -> vector<8x8xf32>
    %195 = arith.truncf %194 : vector<8x8xf32> to vector<8x8xbf16>
    %c24_108 = arith.constant 24 : index
    %c0_109 = arith.constant 0 : index
    %196 = vector.load %arg13[%c24_108, %c0_109] : memref<32x32xbf16, #tpu.memory_space<vmem>>, vector<8x32xbf16>
    %cst_110 = arith.constant dense<0.000000e+00> : vector<8x32xf32>
    %197 = tpu.matmul %195, %196, %cst_110 {dimension_numbers = #tpu.dot_dimension_numbers<[1], [0], [0], [1], [0, 0, 1, 1], [], []>} : vector<8x8xbf16>, vector<8x32xbf16>, vector<8x32xf32> -> vector<8x32xf32>
    %198 = arith.addf %152, %197 : vector<8x32xf32>
    %c0_111 = arith.constant 0 : index
    %c0_112 = arith.constant 0 : index
    %199 = vector.load %arg14[%c0_111, %c0_112] : memref<1x32xf32, #tpu.memory_space<vmem>>, vector<1x32xf32>
    %200 = vector.broadcast %199 : vector<1x32xf32> to vector<8x32xf32>
    %201 = arith.addf %198, %200 : vector<8x32xf32>
    %202 = arith.addf %201, %1 : vector<8x32xf32>
    %cst_113 = arith.constant dense<0.000000e+00> : vector<8xf32>
    %203 = vector.multi_reduction <add>, %202, %cst_113 [1] : vector<8x32xf32> to vector<8xf32>
    %204 = vector.shape_cast %203 : vector<8xf32> to vector<8x1xf32>
    %cst_114 = arith.constant 3.200000e+01 : f32
    %205 = vector.broadcast %cst_114 : f32 to vector<8x1xf32>
    %206 = arith.divf %204, %205 : vector<8x1xf32>
    %207 = vector.broadcast %206 : vector<8x1xf32> to vector<8x32xf32>
    %208 = arith.subf %202, %207 : vector<8x32xf32>
    %209 = arith.mulf %208, %208 : vector<8x32xf32>
    %cst_115 = arith.constant dense<0.000000e+00> : vector<8xf32>
    %210 = vector.multi_reduction <add>, %209, %cst_115 [1] : vector<8x32xf32> to vector<8xf32>
    %211 = vector.shape_cast %210 : vector<8xf32> to vector<8x1xf32>
    %cst_116 = arith.constant 3.200000e+01 : f32
    %212 = vector.broadcast %cst_116 : f32 to vector<8x1xf32>
    %213 = arith.divf %211, %212 : vector<8x1xf32>
    %c0_117 = arith.constant 0 : index
    %c0_118 = arith.constant 0 : index
    %214 = vector.load %arg23[%c0_117, %c0_118] : memref<1x32xf32, #tpu.memory_space<vmem>>, vector<1x32xf32>
    %cst_119 = arith.constant 9.99999997E-7 : f32
    %215 = vector.broadcast %cst_119 : f32 to vector<8x1xf32>
    %216 = arith.addf %213, %215 : vector<8x1xf32>
    %217 = math.rsqrt %216 : vector<8x1xf32>
    %218 = vector.broadcast %217 : vector<8x1xf32> to vector<8x32xf32>
    %219 = arith.mulf %208, %218 : vector<8x32xf32>
    %220 = vector.broadcast %214 : vector<1x32xf32> to vector<8x32xf32>
    %221 = arith.mulf %220, %219 : vector<8x32xf32>
    %c0_120 = arith.constant 0 : index
    %c0_121 = arith.constant 0 : index
    %222 = vector.load %arg24[%c0_120, %c0_121] : memref<1x32xf32, #tpu.memory_space<vmem>>, vector<1x32xf32>
    %223 = vector.broadcast %222 : vector<1x32xf32> to vector<8x32xf32>
    %224 = arith.addf %221, %223 : vector<8x32xf32>
    %225 = arith.truncf %224 : vector<8x32xf32> to vector<8x32xbf16>
    %226 = arith.truncf %3 : vector<8x32xf32> to vector<8x32xbf16>
    %227 = vector.shape_cast %7 : vector<1x8xf32> to vector<1x8xf32>
    %228 = vector.broadcast %227 : vector<1x8xf32> to vector<8x8xf32>
    %cst_122 = arith.constant 0.000000e+00 : f32
    %229 = vector.broadcast %cst_122 : f32 to vector<8x32xf32>
    %c0_123 = arith.constant 0 : index
    %c0_124 = arith.constant 0 : index
    %230 = vector.load %arg15[%c0_123, %c0_124] : memref<32x32xbf16, #tpu.memory_space<vmem>>, vector<32x8xbf16>
    %cst_125 = arith.constant dense<0.000000e+00> : vector<8x8xf32>
    %231 = tpu.matmul %225, %230, %cst_125 {dimension_numbers = #tpu.dot_dimension_numbers<[1], [0], [0], [1], [0, 0, 1, 1], [], []>} : vector<8x32xbf16>, vector<32x8xbf16>, vector<8x8xf32> -> vector<8x8xf32>
    %c0_126 = arith.constant 0 : index
    %c0_127 = arith.constant 0 : index
    %232 = vector.load %arg16[%c0_126, %c0_127] : memref<1x32xf32, #tpu.memory_space<vmem>>, vector<1x8xf32>
    %233 = vector.broadcast %232 : vector<1x8xf32> to vector<8x8xf32>
    %234 = arith.addf %231, %233 : vector<8x8xf32>
    %c0_128 = arith.constant 0 : index
    %c0_129 = arith.constant 0 : index
    %235 = vector.load %arg17[%c0_128, %c0_129] : memref<32x32xbf16, #tpu.memory_space<vmem>>, vector<32x8xbf16>
    %cst_130 = arith.constant dense<0.000000e+00> : vector<8x8xf32>
    %236 = tpu.matmul %226, %235, %cst_130 {dimension_numbers = #tpu.dot_dimension_numbers<[1], [0], [0], [1], [0, 0, 1, 1], [], []>} : vector<8x32xbf16>, vector<32x8xbf16>, vector<8x8xf32> -> vector<8x8xf32>
    %c0_131 = arith.constant 0 : index
    %c0_132 = arith.constant 0 : index
    %237 = vector.load %arg18[%c0_131, %c0_132] : memref<1x32xf32, #tpu.memory_space<vmem>>, vector<1x8xf32>
    %238 = vector.broadcast %237 : vector<1x8xf32> to vector<8x8xf32>
    %239 = arith.addf %236, %238 : vector<8x8xf32>
    %c0_133 = arith.constant 0 : index
    %c0_134 = arith.constant 0 : index
    %240 = vector.load %arg19[%c0_133, %c0_134] : memref<32x32xbf16, #tpu.memory_space<vmem>>, vector<32x8xbf16>
    %cst_135 = arith.constant dense<0.000000e+00> : vector<8x8xf32>
    %241 = tpu.matmul %226, %240, %cst_135 {dimension_numbers = #tpu.dot_dimension_numbers<[1], [0], [0], [1], [0, 0, 1, 1], [], []>} : vector<8x32xbf16>, vector<32x8xbf16>, vector<8x8xf32> -> vector<8x8xf32>
    %c0_136 = arith.constant 0 : index
    %c0_137 = arith.constant 0 : index
    %242 = vector.load %arg20[%c0_136, %c0_137] : memref<1x32xf32, #tpu.memory_space<vmem>>, vector<1x8xf32>
    %243 = vector.broadcast %242 : vector<1x8xf32> to vector<8x8xf32>
    %244 = arith.addf %241, %243 : vector<8x8xf32>
    %245 = arith.mulf %234, %8 : vector<8x8xf32>
    %c4_i32_138 = arith.constant 4 : i32
    %246 = tpu.dynamic_rotate %234 by %c4_i32_138 dim 1 : vector<8x8xf32>, i32 -> vector<8x8xf32>
    %247 = arith.mulf %246, %9 : vector<8x8xf32>
    %248 = arith.addf %245, %247 : vector<8x8xf32>
    %249 = arith.mulf %239, %8 : vector<8x8xf32>
    %c4_i32_139 = arith.constant 4 : i32
    %250 = tpu.dynamic_rotate %239 by %c4_i32_139 dim 1 : vector<8x8xf32>, i32 -> vector<8x8xf32>
    %251 = arith.mulf %250, %9 : vector<8x8xf32>
    %252 = arith.addf %249, %251 : vector<8x8xf32>
    %cst_140 = arith.constant 0.353553385 : f32
    %253 = vector.broadcast %cst_140 : f32 to vector<8x8xf32>
    %254 = arith.mulf %248, %253 : vector<8x8xf32>
    %255 = arith.truncf %254 : vector<8x8xf32> to vector<8x8xbf16>
    %256 = arith.truncf %252 : vector<8x8xf32> to vector<8x8xbf16>
    %cst_141 = arith.constant dense<0.000000e+00> : vector<8x8xf32>
    %257 = tpu.matmul %255, %256, %cst_141 {dimension_numbers = #tpu.dot_dimension_numbers<[1], [1], [0], [0], [0, 0, 1, 0], [], []>} : vector<8x8xbf16>, vector<8x8xbf16>, vector<8x8xf32> -> vector<8x8xf32>
    %258 = arith.addf %257, %228 : vector<8x8xf32>
    %cst_142 = arith.constant dense<0xFF800000> : vector<8xf32>
    %259 = vector.multi_reduction <maximumf>, %258, %cst_142 [1] : vector<8x8xf32> to vector<8xf32>
    %260 = vector.shape_cast %259 : vector<8xf32> to vector<8x1xf32>
    %261 = vector.broadcast %260 : vector<8x1xf32> to vector<8x8xf32>
    %262 = arith.subf %258, %261 : vector<8x8xf32>
    %263 = math.exp %262 : vector<8x8xf32>
    %cst_143 = arith.constant dense<0.000000e+00> : vector<8xf32>
    %264 = vector.multi_reduction <add>, %263, %cst_143 [1] : vector<8x8xf32> to vector<8xf32>
    %265 = vector.shape_cast %264 : vector<8xf32> to vector<8x1xf32>
    %266 = tpu.reciprocal %265 {approx = true} : vector<8x1xf32> -> vector<8x1xf32>
    %267 = vector.broadcast %266 : vector<8x1xf32> to vector<8x8xf32>
    %268 = arith.mulf %263, %267 : vector<8x8xf32>
    %269 = arith.truncf %268 : vector<8x8xf32> to vector<8x8xbf16>
    %270 = arith.truncf %244 : vector<8x8xf32> to vector<8x8xbf16>
    %cst_144 = arith.constant dense<0.000000e+00> : vector<8x8xf32>
    %271 = tpu.matmul %269, %270, %cst_144 {dimension_numbers = #tpu.dot_dimension_numbers<[1], [0], [0], [1], [0, 0, 1, 1], [], []>} : vector<8x8xbf16>, vector<8x8xbf16>, vector<8x8xf32> -> vector<8x8xf32>
    %272 = arith.truncf %271 : vector<8x8xf32> to vector<8x8xbf16>
    %c0_145 = arith.constant 0 : index
    %c0_146 = arith.constant 0 : index
    %273 = vector.load %arg21[%c0_145, %c0_146] : memref<32x32xbf16, #tpu.memory_space<vmem>>, vector<8x32xbf16>
    %cst_147 = arith.constant dense<0.000000e+00> : vector<8x32xf32>
    %274 = tpu.matmul %272, %273, %cst_147 {dimension_numbers = #tpu.dot_dimension_numbers<[1], [0], [0], [1], [0, 0, 1, 1], [], []>} : vector<8x8xbf16>, vector<8x32xbf16>, vector<8x32xf32> -> vector<8x32xf32>
    %275 = arith.addf %229, %274 : vector<8x32xf32>
    %c0_148 = arith.constant 0 : index
    %c8_149 = arith.constant 8 : index
    %276 = vector.load %arg15[%c0_148, %c8_149] : memref<32x32xbf16, #tpu.memory_space<vmem>>, vector<32x8xbf16>
    %cst_150 = arith.constant dense<0.000000e+00> : vector<8x8xf32>
    %277 = tpu.matmul %225, %276, %cst_150 {dimension_numbers = #tpu.dot_dimension_numbers<[1], [0], [0], [1], [0, 0, 1, 1], [], []>} : vector<8x32xbf16>, vector<32x8xbf16>, vector<8x8xf32> -> vector<8x8xf32>
    %c0_151 = arith.constant 0 : index
    %c8_152 = arith.constant 8 : index
    %278 = vector.load %arg16[%c0_151, %c8_152] : memref<1x32xf32, #tpu.memory_space<vmem>>, vector<1x8xf32>
    %279 = vector.broadcast %278 : vector<1x8xf32> to vector<8x8xf32>
    %280 = arith.addf %277, %279 : vector<8x8xf32>
    %c0_153 = arith.constant 0 : index
    %c8_154 = arith.constant 8 : index
    %281 = vector.load %arg17[%c0_153, %c8_154] : memref<32x32xbf16, #tpu.memory_space<vmem>>, vector<32x8xbf16>
    %cst_155 = arith.constant dense<0.000000e+00> : vector<8x8xf32>
    %282 = tpu.matmul %226, %281, %cst_155 {dimension_numbers = #tpu.dot_dimension_numbers<[1], [0], [0], [1], [0, 0, 1, 1], [], []>} : vector<8x32xbf16>, vector<32x8xbf16>, vector<8x8xf32> -> vector<8x8xf32>
    %c0_156 = arith.constant 0 : index
    %c8_157 = arith.constant 8 : index
    %283 = vector.load %arg18[%c0_156, %c8_157] : memref<1x32xf32, #tpu.memory_space<vmem>>, vector<1x8xf32>
    %284 = vector.broadcast %283 : vector<1x8xf32> to vector<8x8xf32>
    %285 = arith.addf %282, %284 : vector<8x8xf32>
    %c0_158 = arith.constant 0 : index
    %c8_159 = arith.constant 8 : index
    %286 = vector.load %arg19[%c0_158, %c8_159] : memref<32x32xbf16, #tpu.memory_space<vmem>>, vector<32x8xbf16>
    %cst_160 = arith.constant dense<0.000000e+00> : vector<8x8xf32>
    %287 = tpu.matmul %226, %286, %cst_160 {dimension_numbers = #tpu.dot_dimension_numbers<[1], [0], [0], [1], [0, 0, 1, 1], [], []>} : vector<8x32xbf16>, vector<32x8xbf16>, vector<8x8xf32> -> vector<8x8xf32>
    %c0_161 = arith.constant 0 : index
    %c8_162 = arith.constant 8 : index
    %288 = vector.load %arg20[%c0_161, %c8_162] : memref<1x32xf32, #tpu.memory_space<vmem>>, vector<1x8xf32>
    %289 = vector.broadcast %288 : vector<1x8xf32> to vector<8x8xf32>
    %290 = arith.addf %287, %289 : vector<8x8xf32>
    %291 = arith.mulf %280, %8 : vector<8x8xf32>
    %c4_i32_163 = arith.constant 4 : i32
    %292 = tpu.dynamic_rotate %280 by %c4_i32_163 dim 1 : vector<8x8xf32>, i32 -> vector<8x8xf32>
    %293 = arith.mulf %292, %9 : vector<8x8xf32>
    %294 = arith.addf %291, %293 : vector<8x8xf32>
    %295 = arith.mulf %285, %8 : vector<8x8xf32>
    %c4_i32_164 = arith.constant 4 : i32
    %296 = tpu.dynamic_rotate %285 by %c4_i32_164 dim 1 : vector<8x8xf32>, i32 -> vector<8x8xf32>
    %297 = arith.mulf %296, %9 : vector<8x8xf32>
    %298 = arith.addf %295, %297 : vector<8x8xf32>
    %cst_165 = arith.constant 0.353553385 : f32
    %299 = vector.broadcast %cst_165 : f32 to vector<8x8xf32>
    %300 = arith.mulf %294, %299 : vector<8x8xf32>
    %301 = arith.truncf %300 : vector<8x8xf32> to vector<8x8xbf16>
    %302 = arith.truncf %298 : vector<8x8xf32> to vector<8x8xbf16>
    %cst_166 = arith.constant dense<0.000000e+00> : vector<8x8xf32>
    %303 = tpu.matmul %301, %302, %cst_166 {dimension_numbers = #tpu.dot_dimension_numbers<[1], [1], [0], [0], [0, 0, 1, 0], [], []>} : vector<8x8xbf16>, vector<8x8xbf16>, vector<8x8xf32> -> vector<8x8xf32>
    %304 = arith.addf %303, %228 : vector<8x8xf32>
    %cst_167 = arith.constant dense<0xFF800000> : vector<8xf32>
    %305 = vector.multi_reduction <maximumf>, %304, %cst_167 [1] : vector<8x8xf32> to vector<8xf32>
    %306 = vector.shape_cast %305 : vector<8xf32> to vector<8x1xf32>
    %307 = vector.broadcast %306 : vector<8x1xf32> to vector<8x8xf32>
    %308 = arith.subf %304, %307 : vector<8x8xf32>
    %309 = math.exp %308 : vector<8x8xf32>
    %cst_168 = arith.constant dense<0.000000e+00> : vector<8xf32>
    %310 = vector.multi_reduction <add>, %309, %cst_168 [1] : vector<8x8xf32> to vector<8xf32>
    %311 = vector.shape_cast %310 : vector<8xf32> to vector<8x1xf32>
    %312 = tpu.reciprocal %311 {approx = true} : vector<8x1xf32> -> vector<8x1xf32>
    %313 = vector.broadcast %312 : vector<8x1xf32> to vector<8x8xf32>
    %314 = arith.mulf %309, %313 : vector<8x8xf32>
    %315 = arith.truncf %314 : vector<8x8xf32> to vector<8x8xbf16>
    %316 = arith.truncf %290 : vector<8x8xf32> to vector<8x8xbf16>
    %cst_169 = arith.constant dense<0.000000e+00> : vector<8x8xf32>
    %317 = tpu.matmul %315, %316, %cst_169 {dimension_numbers = #tpu.dot_dimension_numbers<[1], [0], [0], [1], [0, 0, 1, 1], [], []>} : vector<8x8xbf16>, vector<8x8xbf16>, vector<8x8xf32> -> vector<8x8xf32>
    %318 = arith.truncf %317 : vector<8x8xf32> to vector<8x8xbf16>
    %c8_170 = arith.constant 8 : index
    %c0_171 = arith.constant 0 : index
    %319 = vector.load %arg21[%c8_170, %c0_171] : memref<32x32xbf16, #tpu.memory_space<vmem>>, vector<8x32xbf16>
    %cst_172 = arith.constant dense<0.000000e+00> : vector<8x32xf32>
    %320 = tpu.matmul %318, %319, %cst_172 {dimension_numbers = #tpu.dot_dimension_numbers<[1], [0], [0], [1], [0, 0, 1, 1], [], []>} : vector<8x8xbf16>, vector<8x32xbf16>, vector<8x32xf32> -> vector<8x32xf32>
    %321 = arith.addf %275, %320 : vector<8x32xf32>
    %c0_173 = arith.constant 0 : index
    %c16_174 = arith.constant 16 : index
    %322 = vector.load %arg15[%c0_173, %c16_174] : memref<32x32xbf16, #tpu.memory_space<vmem>>, vector<32x8xbf16>
    %cst_175 = arith.constant dense<0.000000e+00> : vector<8x8xf32>
    %323 = tpu.matmul %225, %322, %cst_175 {dimension_numbers = #tpu.dot_dimension_numbers<[1], [0], [0], [1], [0, 0, 1, 1], [], []>} : vector<8x32xbf16>, vector<32x8xbf16>, vector<8x8xf32> -> vector<8x8xf32>
    %c0_176 = arith.constant 0 : index
    %c16_177 = arith.constant 16 : index
    %324 = vector.load %arg16[%c0_176, %c16_177] : memref<1x32xf32, #tpu.memory_space<vmem>>, vector<1x8xf32>
    %325 = vector.broadcast %324 : vector<1x8xf32> to vector<8x8xf32>
    %326 = arith.addf %323, %325 : vector<8x8xf32>
    %c0_178 = arith.constant 0 : index
    %c16_179 = arith.constant 16 : index
    %327 = vector.load %arg17[%c0_178, %c16_179] : memref<32x32xbf16, #tpu.memory_space<vmem>>, vector<32x8xbf16>
    %cst_180 = arith.constant dense<0.000000e+00> : vector<8x8xf32>
    %328 = tpu.matmul %226, %327, %cst_180 {dimension_numbers = #tpu.dot_dimension_numbers<[1], [0], [0], [1], [0, 0, 1, 1], [], []>} : vector<8x32xbf16>, vector<32x8xbf16>, vector<8x8xf32> -> vector<8x8xf32>
    %c0_181 = arith.constant 0 : index
    %c16_182 = arith.constant 16 : index
    %329 = vector.load %arg18[%c0_181, %c16_182] : memref<1x32xf32, #tpu.memory_space<vmem>>, vector<1x8xf32>
    %330 = vector.broadcast %329 : vector<1x8xf32> to vector<8x8xf32>
    %331 = arith.addf %328, %330 : vector<8x8xf32>
    %c0_183 = arith.constant 0 : index
    %c16_184 = arith.constant 16 : index
    %332 = vector.load %arg19[%c0_183, %c16_184] : memref<32x32xbf16, #tpu.memory_space<vmem>>, vector<32x8xbf16>
    %cst_185 = arith.constant dense<0.000000e+00> : vector<8x8xf32>
    %333 = tpu.matmul %226, %332, %cst_185 {dimension_numbers = #tpu.dot_dimension_numbers<[1], [0], [0], [1], [0, 0, 1, 1], [], []>} : vector<8x32xbf16>, vector<32x8xbf16>, vector<8x8xf32> -> vector<8x8xf32>
    %c0_186 = arith.constant 0 : index
    %c16_187 = arith.constant 16 : index
    %334 = vector.load %arg20[%c0_186, %c16_187] : memref<1x32xf32, #tpu.memory_space<vmem>>, vector<1x8xf32>
    %335 = vector.broadcast %334 : vector<1x8xf32> to vector<8x8xf32>
    %336 = arith.addf %333, %335 : vector<8x8xf32>
    %337 = arith.mulf %326, %8 : vector<8x8xf32>
    %c4_i32_188 = arith.constant 4 : i32
    %338 = tpu.dynamic_rotate %326 by %c4_i32_188 dim 1 : vector<8x8xf32>, i32 -> vector<8x8xf32>
    %339 = arith.mulf %338, %9 : vector<8x8xf32>
    %340 = arith.addf %337, %339 : vector<8x8xf32>
    %341 = arith.mulf %331, %8 : vector<8x8xf32>
    %c4_i32_189 = arith.constant 4 : i32
    %342 = tpu.dynamic_rotate %331 by %c4_i32_189 dim 1 : vector<8x8xf32>, i32 -> vector<8x8xf32>
    %343 = arith.mulf %342, %9 : vector<8x8xf32>
    %344 = arith.addf %341, %343 : vector<8x8xf32>
    %cst_190 = arith.constant 0.353553385 : f32
    %345 = vector.broadcast %cst_190 : f32 to vector<8x8xf32>
    %346 = arith.mulf %340, %345 : vector<8x8xf32>
    %347 = arith.truncf %346 : vector<8x8xf32> to vector<8x8xbf16>
    %348 = arith.truncf %344 : vector<8x8xf32> to vector<8x8xbf16>
    %cst_191 = arith.constant dense<0.000000e+00> : vector<8x8xf32>
    %349 = tpu.matmul %347, %348, %cst_191 {dimension_numbers = #tpu.dot_dimension_numbers<[1], [1], [0], [0], [0, 0, 1, 0], [], []>} : vector<8x8xbf16>, vector<8x8xbf16>, vector<8x8xf32> -> vector<8x8xf32>
    %350 = arith.addf %349, %228 : vector<8x8xf32>
    %cst_192 = arith.constant dense<0xFF800000> : vector<8xf32>
    %351 = vector.multi_reduction <maximumf>, %350, %cst_192 [1] : vector<8x8xf32> to vector<8xf32>
    %352 = vector.shape_cast %351 : vector<8xf32> to vector<8x1xf32>
    %353 = vector.broadcast %352 : vector<8x1xf32> to vector<8x8xf32>
    %354 = arith.subf %350, %353 : vector<8x8xf32>
    %355 = math.exp %354 : vector<8x8xf32>
    %cst_193 = arith.constant dense<0.000000e+00> : vector<8xf32>
    %356 = vector.multi_reduction <add>, %355, %cst_193 [1] : vector<8x8xf32> to vector<8xf32>
    %357 = vector.shape_cast %356 : vector<8xf32> to vector<8x1xf32>
    %358 = tpu.reciprocal %357 {approx = true} : vector<8x1xf32> -> vector<8x1xf32>
    %359 = vector.broadcast %358 : vector<8x1xf32> to vector<8x8xf32>
    %360 = arith.mulf %355, %359 : vector<8x8xf32>
    %361 = arith.truncf %360 : vector<8x8xf32> to vector<8x8xbf16>
    %362 = arith.truncf %336 : vector<8x8xf32> to vector<8x8xbf16>
    %cst_194 = arith.constant dense<0.000000e+00> : vector<8x8xf32>
    %363 = tpu.matmul %361, %362, %cst_194 {dimension_numbers = #tpu.dot_dimension_numbers<[1], [0], [0], [1], [0, 0, 1, 1], [], []>} : vector<8x8xbf16>, vector<8x8xbf16>, vector<8x8xf32> -> vector<8x8xf32>
    %364 = arith.truncf %363 : vector<8x8xf32> to vector<8x8xbf16>
    %c16_195 = arith.constant 16 : index
    %c0_196 = arith.constant 0 : index
    %365 = vector.load %arg21[%c16_195, %c0_196] : memref<32x32xbf16, #tpu.memory_space<vmem>>, vector<8x32xbf16>
    %cst_197 = arith.constant dense<0.000000e+00> : vector<8x32xf32>
    %366 = tpu.matmul %364, %365, %cst_197 {dimension_numbers = #tpu.dot_dimension_numbers<[1], [0], [0], [1], [0, 0, 1, 1], [], []>} : vector<8x8xbf16>, vector<8x32xbf16>, vector<8x32xf32> -> vector<8x32xf32>
    %367 = arith.addf %321, %366 : vector<8x32xf32>
    %c0_198 = arith.constant 0 : index
    %c24_199 = arith.constant 24 : index
    %368 = vector.load %arg15[%c0_198, %c24_199] : memref<32x32xbf16, #tpu.memory_space<vmem>>, vector<32x8xbf16>
    %cst_200 = arith.constant dense<0.000000e+00> : vector<8x8xf32>
    %369 = tpu.matmul %225, %368, %cst_200 {dimension_numbers = #tpu.dot_dimension_numbers<[1], [0], [0], [1], [0, 0, 1, 1], [], []>} : vector<8x32xbf16>, vector<32x8xbf16>, vector<8x8xf32> -> vector<8x8xf32>
    %c0_201 = arith.constant 0 : index
    %c24_202 = arith.constant 24 : index
    %370 = vector.load %arg16[%c0_201, %c24_202] : memref<1x32xf32, #tpu.memory_space<vmem>>, vector<1x8xf32>
    %371 = vector.broadcast %370 : vector<1x8xf32> to vector<8x8xf32>
    %372 = arith.addf %369, %371 : vector<8x8xf32>
    %c0_203 = arith.constant 0 : index
    %c24_204 = arith.constant 24 : index
    %373 = vector.load %arg17[%c0_203, %c24_204] : memref<32x32xbf16, #tpu.memory_space<vmem>>, vector<32x8xbf16>
    %cst_205 = arith.constant dense<0.000000e+00> : vector<8x8xf32>
    %374 = tpu.matmul %226, %373, %cst_205 {dimension_numbers = #tpu.dot_dimension_numbers<[1], [0], [0], [1], [0, 0, 1, 1], [], []>} : vector<8x32xbf16>, vector<32x8xbf16>, vector<8x8xf32> -> vector<8x8xf32>
    %c0_206 = arith.constant 0 : index
    %c24_207 = arith.constant 24 : index
    %375 = vector.load %arg18[%c0_206, %c24_207] : memref<1x32xf32, #tpu.memory_space<vmem>>, vector<1x8xf32>
    %376 = vector.broadcast %375 : vector<1x8xf32> to vector<8x8xf32>
    %377 = arith.addf %374, %376 : vector<8x8xf32>
    %c0_208 = arith.constant 0 : index
    %c24_209 = arith.constant 24 : index
    %378 = vector.load %arg19[%c0_208, %c24_209] : memref<32x32xbf16, #tpu.memory_space<vmem>>, vector<32x8xbf16>
    %cst_210 = arith.constant dense<0.000000e+00> : vector<8x8xf32>
    %379 = tpu.matmul %226, %378, %cst_210 {dimension_numbers = #tpu.dot_dimension_numbers<[1], [0], [0], [1], [0, 0, 1, 1], [], []>} : vector<8x32xbf16>, vector<32x8xbf16>, vector<8x8xf32> -> vector<8x8xf32>
    %c0_211 = arith.constant 0 : index
    %c24_212 = arith.constant 24 : index
    %380 = vector.load %arg20[%c0_211, %c24_212] : memref<1x32xf32, #tpu.memory_space<vmem>>, vector<1x8xf32>
    %381 = vector.broadcast %380 : vector<1x8xf32> to vector<8x8xf32>
    %382 = arith.addf %379, %381 : vector<8x8xf32>
    %383 = arith.mulf %372, %8 : vector<8x8xf32>
    %c4_i32_213 = arith.constant 4 : i32
    %384 = tpu.dynamic_rotate %372 by %c4_i32_213 dim 1 : vector<8x8xf32>, i32 -> vector<8x8xf32>
    %385 = arith.mulf %384, %9 : vector<8x8xf32>
    %386 = arith.addf %383, %385 : vector<8x8xf32>
    %387 = arith.mulf %377, %8 : vector<8x8xf32>
    %c4_i32_214 = arith.constant 4 : i32
    %388 = tpu.dynamic_rotate %377 by %c4_i32_214 dim 1 : vector<8x8xf32>, i32 -> vector<8x8xf32>
    %389 = arith.mulf %388, %9 : vector<8x8xf32>
    %390 = arith.addf %387, %389 : vector<8x8xf32>
    %cst_215 = arith.constant 0.353553385 : f32
    %391 = vector.broadcast %cst_215 : f32 to vector<8x8xf32>
    %392 = arith.mulf %386, %391 : vector<8x8xf32>
    %393 = arith.truncf %392 : vector<8x8xf32> to vector<8x8xbf16>
    %394 = arith.truncf %390 : vector<8x8xf32> to vector<8x8xbf16>
    %cst_216 = arith.constant dense<0.000000e+00> : vector<8x8xf32>
    %395 = tpu.matmul %393, %394, %cst_216 {dimension_numbers = #tpu.dot_dimension_numbers<[1], [1], [0], [0], [0, 0, 1, 0], [], []>} : vector<8x8xbf16>, vector<8x8xbf16>, vector<8x8xf32> -> vector<8x8xf32>
    %396 = arith.addf %395, %228 : vector<8x8xf32>
    %cst_217 = arith.constant dense<0xFF800000> : vector<8xf32>
    %397 = vector.multi_reduction <maximumf>, %396, %cst_217 [1] : vector<8x8xf32> to vector<8xf32>
    %398 = vector.shape_cast %397 : vector<8xf32> to vector<8x1xf32>
    %399 = vector.broadcast %398 : vector<8x1xf32> to vector<8x8xf32>
    %400 = arith.subf %396, %399 : vector<8x8xf32>
    %401 = math.exp %400 : vector<8x8xf32>
    %cst_218 = arith.constant dense<0.000000e+00> : vector<8xf32>
    %402 = vector.multi_reduction <add>, %401, %cst_218 [1] : vector<8x8xf32> to vector<8xf32>
    %403 = vector.shape_cast %402 : vector<8xf32> to vector<8x1xf32>
    %404 = tpu.reciprocal %403 {approx = true} : vector<8x1xf32> -> vector<8x1xf32>
    %405 = vector.broadcast %404 : vector<8x1xf32> to vector<8x8xf32>
    %406 = arith.mulf %401, %405 : vector<8x8xf32>
    %407 = arith.truncf %406 : vector<8x8xf32> to vector<8x8xbf16>
    %408 = arith.truncf %382 : vector<8x8xf32> to vector<8x8xbf16>
    %cst_219 = arith.constant dense<0.000000e+00> : vector<8x8xf32>
    %409 = tpu.matmul %407, %408, %cst_219 {dimension_numbers = #tpu.dot_dimension_numbers<[1], [0], [0], [1], [0, 0, 1, 1], [], []>} : vector<8x8xbf16>, vector<8x8xbf16>, vector<8x8xf32> -> vector<8x8xf32>
    %410 = arith.truncf %409 : vector<8x8xf32> to vector<8x8xbf16>
    %c24_220 = arith.constant 24 : index
    %c0_221 = arith.constant 0 : index
    %411 = vector.load %arg21[%c24_220, %c0_221] : memref<32x32xbf16, #tpu.memory_space<vmem>>, vector<8x32xbf16>
    %cst_222 = arith.constant dense<0.000000e+00> : vector<8x32xf32>
    %412 = tpu.matmul %410, %411, %cst_222 {dimension_numbers = #tpu.dot_dimension_numbers<[1], [0], [0], [1], [0, 0, 1, 1], [], []>} : vector<8x8xbf16>, vector<8x32xbf16>, vector<8x32xf32> -> vector<8x32xf32>
    %413 = arith.addf %367, %412 : vector<8x32xf32>
    %c0_223 = arith.constant 0 : index
    %c0_224 = arith.constant 0 : index
    %414 = vector.load %arg22[%c0_223, %c0_224] : memref<1x32xf32, #tpu.memory_space<vmem>>, vector<1x32xf32>
    %415 = vector.broadcast %414 : vector<1x32xf32> to vector<8x32xf32>
    %416 = arith.addf %413, %415 : vector<8x32xf32>
    %417 = arith.addf %416, %224 : vector<8x32xf32>
    %cst_225 = arith.constant dense<0.000000e+00> : vector<8xf32>
    %418 = vector.multi_reduction <add>, %417, %cst_225 [1] : vector<8x32xf32> to vector<8xf32>
    %419 = vector.shape_cast %418 : vector<8xf32> to vector<8x1xf32>
    %cst_226 = arith.constant 3.200000e+01 : f32
    %420 = vector.broadcast %cst_226 : f32 to vector<8x1xf32>
    %421 = arith.divf %419, %420 : vector<8x1xf32>
    %422 = vector.broadcast %421 : vector<8x1xf32> to vector<8x32xf32>
    %423 = arith.subf %417, %422 : vector<8x32xf32>
    %424 = arith.mulf %423, %423 : vector<8x32xf32>
    %cst_227 = arith.constant dense<0.000000e+00> : vector<8xf32>
    %425 = vector.multi_reduction <add>, %424, %cst_227 [1] : vector<8x32xf32> to vector<8xf32>
    %426 = vector.shape_cast %425 : vector<8xf32> to vector<8x1xf32>
    %cst_228 = arith.constant 3.200000e+01 : f32
    %427 = vector.broadcast %cst_228 : f32 to vector<8x1xf32>
    %428 = arith.divf %426, %427 : vector<8x1xf32>
    %c0_229 = arith.constant 0 : index
    %c0_230 = arith.constant 0 : index
    %429 = vector.load %arg25[%c0_229, %c0_230] : memref<1x32xf32, #tpu.memory_space<vmem>>, vector<1x32xf32>
    %cst_231 = arith.constant 9.99999997E-7 : f32
    %430 = vector.broadcast %cst_231 : f32 to vector<8x1xf32>
    %431 = arith.addf %428, %430 : vector<8x1xf32>
    %432 = math.rsqrt %431 : vector<8x1xf32>
    %433 = vector.broadcast %432 : vector<8x1xf32> to vector<8x32xf32>
    %434 = arith.mulf %423, %433 : vector<8x32xf32>
    %435 = vector.broadcast %429 : vector<1x32xf32> to vector<8x32xf32>
    %436 = arith.mulf %435, %434 : vector<8x32xf32>
    %c0_232 = arith.constant 0 : index
    %c0_233 = arith.constant 0 : index
    %437 = vector.load %arg26[%c0_232, %c0_233] : memref<1x32xf32, #tpu.memory_space<vmem>>, vector<1x32xf32>
    %438 = vector.broadcast %437 : vector<1x32xf32> to vector<8x32xf32>
    %439 = arith.addf %436, %438 : vector<8x32xf32>
    %440 = arith.truncf %439 : vector<8x32xf32> to vector<8x32xbf16>
    %c0_234 = arith.constant 0 : index
    %c0_235 = arith.constant 0 : index
    %441 = vector.load %arg29[%c0_234, %c0_235] : memref<32x64xbf16, #tpu.memory_space<vmem>>, vector<32x64xbf16>
    %cst_236 = arith.constant dense<0.000000e+00> : vector<8x64xf32>
    %442 = tpu.matmul %440, %441, %cst_236 {dimension_numbers = #tpu.dot_dimension_numbers<[1], [0], [0], [1], [0, 0, 1, 1], [], []>} : vector<8x32xbf16>, vector<32x64xbf16>, vector<8x64xf32> -> vector<8x64xf32>
    %c0_237 = arith.constant 0 : index
    %c0_238 = arith.constant 0 : index
    %443 = vector.load %arg30[%c0_237, %c0_238] : memref<1x64xf32, #tpu.memory_space<vmem>>, vector<1x64xf32>
    %444 = vector.broadcast %443 : vector<1x64xf32> to vector<8x64xf32>
    %445 = arith.addf %442, %444 : vector<8x64xf32>
    %cst_239 = arith.constant 0.000000e+00 : f32
    %446 = vector.broadcast %cst_239 : f32 to vector<8x64xf32>
    %447 = arith.maximumf %445, %446 : vector<8x64xf32>
    %448 = arith.truncf %447 : vector<8x64xf32> to vector<8x64xbf16>
    %c0_240 = arith.constant 0 : index
    %c0_241 = arith.constant 0 : index
    %449 = vector.load %arg31[%c0_240, %c0_241] : memref<64x32xbf16, #tpu.memory_space<vmem>>, vector<64x32xbf16>
    %cst_242 = arith.constant dense<0.000000e+00> : vector<8x32xf32>
    %450 = tpu.matmul %448, %449, %cst_242 {dimension_numbers = #tpu.dot_dimension_numbers<[1], [0], [0], [1], [0, 0, 1, 1], [], []>} : vector<8x64xbf16>, vector<64x32xbf16>, vector<8x32xf32> -> vector<8x32xf32>
    %c0_243 = arith.constant 0 : index
    %c0_244 = arith.constant 0 : index
    %451 = vector.load %arg32[%c0_243, %c0_244] : memref<1x32xf32, #tpu.memory_space<vmem>>, vector<1x32xf32>
    %452 = vector.broadcast %451 : vector<1x32xf32> to vector<8x32xf32>
    %453 = arith.addf %450, %452 : vector<8x32xf32>
    %454 = arith.addf %453, %439 : vector<8x32xf32>
    %cst_245 = arith.constant dense<0.000000e+00> : vector<8xf32>
    %455 = vector.multi_reduction <add>, %454, %cst_245 [1] : vector<8x32xf32> to vector<8xf32>
    %456 = vector.shape_cast %455 : vector<8xf32> to vector<8x1xf32>
    %cst_246 = arith.constant 3.200000e+01 : f32
    %457 = vector.broadcast %cst_246 : f32 to vector<8x1xf32>
    %458 = arith.divf %456, %457 : vector<8x1xf32>
    %459 = vector.broadcast %458 : vector<8x1xf32> to vector<8x32xf32>
    %460 = arith.subf %454, %459 : vector<8x32xf32>
    %461 = arith.mulf %460, %460 : vector<8x32xf32>
    %cst_247 = arith.constant dense<0.000000e+00> : vector<8xf32>
    %462 = vector.multi_reduction <add>, %461, %cst_247 [1] : vector<8x32xf32> to vector<8xf32>
    %463 = vector.shape_cast %462 : vector<8xf32> to vector<8x1xf32>
    %cst_248 = arith.constant 3.200000e+01 : f32
    %464 = vector.broadcast %cst_248 : f32 to vector<8x1xf32>
    %465 = arith.divf %463, %464 : vector<8x1xf32>
    %c0_249 = arith.constant 0 : index
    %c0_250 = arith.constant 0 : index
    %466 = vector.load %arg27[%c0_249, %c0_250] : memref<1x32xf32, #tpu.memory_space<vmem>>, vector<1x32xf32>
    %cst_251 = arith.constant 9.99999997E-7 : f32
    %467 = vector.broadcast %cst_251 : f32 to vector<8x1xf32>
    %468 = arith.addf %465, %467 : vector<8x1xf32>
    %469 = math.rsqrt %468 : vector<8x1xf32>
    %470 = vector.broadcast %469 : vector<8x1xf32> to vector<8x32xf32>
    %471 = arith.mulf %460, %470 : vector<8x32xf32>
    %472 = vector.broadcast %466 : vector<1x32xf32> to vector<8x32xf32>
    %473 = arith.mulf %472, %471 : vector<8x32xf32>
    %c0_252 = arith.constant 0 : index
    %c0_253 = arith.constant 0 : index
    %474 = vector.load %arg28[%c0_252, %c0_253] : memref<1x32xf32, #tpu.memory_space<vmem>>, vector<1x32xf32>
    %475 = vector.broadcast %474 : vector<1x32xf32> to vector<8x32xf32>
    %476 = arith.addf %473, %475 : vector<8x32xf32>
    %c0_254 = arith.constant 0 : index
    %c0_255 = arith.constant 0 : index
    %c0_256 = arith.constant 0 : index
    %477 = vector.load %arg33[%c0_254, %c0_255, %c0_256] : memref<1x8x32xf32, #tpu.memory_space<vmem>>, vector<1x8x32xf32>
    %478 = vector.shape_cast %477 : vector<1x8x32xf32> to vector<8x32xf32>
    %479 = vector.shape_cast %476 : vector<8x32xf32> to vector<1x8x32xf32>
    tpu.vector_store %arg33[%c0_254, %c0_255, %c0_256], %479 {strides = array<i32>} : memref<1x8x32xf32, #tpu.memory_space<vmem>>, vector<1x8x32xf32>,
    return
  }
  func.func @transform_0(%arg0: i32) -> (i32, i32, i32) {
    %c0_i32 = arith.constant 0 : i32
    %c0_i32_0 = arith.constant 0 : i32
    %c0_i32_1 = arith.constant 0 : i32
    return %arg0, %c0_i32, %c0_i32_0 : i32, i32, i32
  }
  func.func @transform_1(%arg0: i32) -> (i32, i32, i32) {
    %c0_i32 = arith.constant 0 : i32
    %c0_i32_0 = arith.constant 0 : i32
    %c0_i32_1 = arith.constant 0 : i32
    return %arg0, %c0_i32, %c0_i32_0 : i32, i32, i32
  }
  func.func @transform_2(%arg0: i32) -> (i32, i32, i32) {
    %c0_i32 = arith.constant 0 : i32
    %c0_i32_0 = arith.constant 0 : i32
    %c0_i32_1 = arith.constant 0 : i32
    return %arg0, %c0_i32, %c0_i32_0 : i32, i32, i32
  }
  func.func @transform_3(%arg0: i32) -> (i32, i32, i32) {
    %c0_i32 = arith.constant 0 : i32
    %c0_i32_0 = arith.constant 0 : i32
    %c0_i32_1 = arith.constant 0 : i32
    return %arg0, %c0_i32, %c0_i32_0 : i32, i32, i32
  }
  func.func @transform_4(%arg0: i32) -> (i32, i32) {
    %c0_i32 = arith.constant 0 : i32
    %c0_i32_0 = arith.constant 0 : i32
    %c0_i32_1 = arith.constant 0 : i32
    return %c0_i32, %c0_i32_0 : i32, i32
  }
  func.func @transform_5(%arg0: i32) -> (i32, i32) {
    %c0_i32 = arith.constant 0 : i32
    %c0_i32_0 = arith.constant 0 : i32
    %c0_i32_1 = arith.constant 0 : i32
    return %c0_i32, %c0_i32_0 : i32, i32
  }
  func.func @transform_6(%arg0: i32) -> (i32, i32) {
    %c0_i32 = arith.constant 0 : i32
    %c0_i32_0 = arith.constant 0 : i32
    %c0_i32_1 = arith.constant 0 : i32
    return %c0_i32, %c0_i32_0 : i32, i32
  }
  func.func @transform_7(%arg0: i32) -> (i32, i32) {
    %c0_i32 = arith.constant 0 : i32
    %c0_i32_0 = arith.constant 0 : i32
    %c0_i32_1 = arith.constant 0 : i32
    return %c0_i32, %c0_i32_0 : i32, i32
  }
  func.func @transform_8(%arg0: i32) -> (i32, i32) {
    %c0_i32 = arith.constant 0 : i32
    %c0_i32_0 = arith.constant 0 : i32
    %c0_i32_1 = arith.constant 0 : i32
    return %c0_i32, %c0_i32_0 : i32, i32
  }
  func.func @transform_9(%arg0: i32) -> (i32, i32) {
    %c0_i32 = arith.constant 0 : i32
    %c0_i32_0 = arith.constant 0 : i32
    %c0_i32_1 = arith.constant 0 : i32
    return %c0_i32, %c0_i32_0 : i32, i32
  }
  func.func @transform_10(%arg0: i32) -> (i32, i32) {
    %c0_i32 = arith.constant 0 : i32
    %c0_i32_0 = arith.constant 0 : i32
    %c0_i32_1 = arith.constant 0 : i32
    return %c0_i32, %c0_i32_0 : i32, i32
  }
  func.func @transform_11(%arg0: i32) -> (i32, i32) {
    %c0_i32 = arith.constant 0 : i32
    %c0_i32_0 = arith.constant 0 : i32
    %c0_i32_1 = arith.constant 0 : i32
    return %c0_i32, %c0_i32_0 : i32, i32
  }
  func.func @transform_12(%arg0: i32) -> (i32, i32) {
    %c0_i32 = arith.constant 0 : i32
    %c0_i32_0 = arith.constant 0 : i32
    %c0_i32_1 = arith.constant 0 : i32
    return %c0_i32, %c0_i32_0 : i32, i32
  }
  func.func @transform_13(%arg0: i32) -> (i32, i32) {
    %c0_i32 = arith.constant 0 : i32
    %c0_i32_0 = arith.constant 0 : i32
    %c0_i32_1 = arith.constant 0 : i32
    return %c0_i32, %c0_i32_0 : i32, i32
  }
  func.func @transform_14(%arg0: i32) -> (i32, i32) {
    %c0_i32 = arith.constant 0 : i32
    %c0_i32_0 = arith.constant 0 : i32
    %c0_i32_1 = arith.constant 0 : i32
    return %c0_i32, %c0_i32_0 : i32, i32
  }
  func.func @transform_15(%arg0: i32) -> (i32, i32) {
    %c0_i32 = arith.constant 0 : i32
    %c0_i32_0 = arith.constant 0 : i32
    %c0_i32_1 = arith.constant 0 : i32
    return %c0_i32, %c0_i32_0 : i32, i32
  }
  func.func @transform_16(%arg0: i32) -> (i32, i32) {
    %c0_i32 = arith.constant 0 : i32
    %c0_i32_0 = arith.constant 0 : i32
    %c0_i32_1 = arith.constant 0 : i32
    return %c0_i32, %c0_i32_0 : i32, i32
  }
  func.func @transform_17(%arg0: i32) -> (i32, i32) {
    %c0_i32 = arith.constant 0 : i32
    %c0_i32_0 = arith.constant 0 : i32
    %c0_i32_1 = arith.constant 0 : i32
    return %c0_i32, %c0_i32_0 : i32, i32
  }
  func.func @transform_18(%arg0: i32) -> (i32, i32) {
    %c0_i32 = arith.constant 0 : i32
    %c0_i32_0 = arith.constant 0 : i32
    %c0_i32_1 = arith.constant 0 : i32
    return %c0_i32, %c0_i32_0 : i32, i32
  }
  func.func @transform_19(%arg0: i32) -> (i32, i32) {
    %c0_i32 = arith.constant 0 : i32
    %c0_i32_0 = arith.constant 0 : i32
    %c0_i32_1 = arith.constant 0 : i32
    return %c0_i32, %c0_i32_0 : i32, i32
  }
  func.func @transform_20(%arg0: i32) -> (i32, i32) {
    %c0_i32 = arith.constant 0 : i32
    %c0_i32_0 = arith.constant 0 : i32
    %c0_i32_1 = arith.constant 0 : i32
    return %c0_i32, %c0_i32_0 : i32, i32
  }
  func.func @transform_21(%arg0: i32) -> (i32, i32) {
    %c0_i32 = arith.constant 0 : i32
    %c0_i32_0 = arith.constant 0 : i32
    %c0_i32_1 = arith.constant 0 : i32
    return %c0_i32, %c0_i32_0 : i32, i32
  }
  func.func @transform_22(%arg0: i32) -> (i32, i32) {
    %c0_i32 = arith.constant 0 : i32
    %c0_i32_0 = arith.constant 0 : i32
    %c0_i32_1 = arith.constant 0 : i32
    return %c0_i32, %c0_i32_0 : i32, i32
  }
  func.func @transform_23(%arg0: i32) -> (i32, i32) {
    %c0_i32 = arith.constant 0 : i32
    %c0_i32_0 = arith.constant 0 : i32
    %c0_i32_1 = arith.constant 0 : i32
    return %c0_i32, %c0_i32_0 : i32, i32
  }
  func.func @transform_24(%arg0: i32) -> (i32, i32) {
    %c0_i32 = arith.constant 0 : i32
    %c0_i32_0 = arith.constant 0 : i32
    %c0_i32_1 = arith.constant 0 : i32
    return %c0_i32, %c0_i32_0 : i32, i32
  }
  func.func @transform_25(%arg0: i32) -> (i32, i32) {
    %c0_i32 = arith.constant 0 : i32
    %c0_i32_0 = arith.constant 0 : i32
    %c0_i32_1 = arith.constant 0 : i32
    return %c0_i32, %c0_i32_0 : i32, i32
  }
  func.func @transform_26(%arg0: i32) -> (i32, i32) {
    %c0_i32 = arith.constant 0 : i32
    %c0_i32_0 = arith.constant 0 : i32
    %c0_i32_1 = arith.constant 0 : i32
    return %c0_i32, %c0_i32_0 : i32, i32
  }
  func.func @transform_27(%arg0: i32) -> (i32, i32) {
    %c0_i32 = arith.constant 0 : i32
    %c0_i32_0 = arith.constant 0 : i32
    %c0_i32_1 = arith.constant 0 : i32
    return %c0_i32, %c0_i32_0 : i32, i32
  }
  func.func @transform_28(%arg0: i32) -> (i32, i32) {
    %c0_i32 = arith.constant 0 : i32
    %c0_i32_0 = arith.constant 0 : i32
    %c0_i32_1 = arith.constant 0 : i32
    return %c0_i32, %c0_i32_0 : i32, i32
  }
  func.func @transform_29(%arg0: i32) -> (i32, i32) {
    %c0_i32 = arith.constant 0 : i32
    %c0_i32_0 = arith.constant 0 : i32
    %c0_i32_1 = arith.constant 0 : i32
    return %c0_i32, %c0_i32_0 : i32, i32
  }
  func.func @transform_30(%arg0: i32) -> (i32, i32) {
    %c0_i32 = arith.constant 0 : i32
    %c0_i32_0 = arith.constant 0 : i32
    %c0_i32_1 = arith.constant 0 : i32
    return %c0_i32, %c0_i32_0 : i32, i32
  }
  func.func @transform_31(%arg0: i32) -> (i32, i32) {
    %c0_i32 = arith.constant 0 : i32
    %c0_i32_0 = arith.constant 0 : i32
    %c0_i32_1 = arith.constant 0 : i32
    return %c0_i32, %c0_i32_0 : i32, i32
  }
  func.func @transform_32(%arg0: i32) -> (i32, i32, i32) {
    %c0_i32 = arith.constant 0 : i32
    %c0_i32_0 = arith.constant 0 : i32
    %c0_i32_1 = arith.constant 0 : i32
    return %arg0, %c0_i32, %c0_i32_0 : i32, i32, i32
  }
}

</mosaic_0001>

<bundles_post_ra>
// kernel: tpu_custom_call.1
= control target key start
LH: loop header
LB: loop body
LE: loop exit
PB: predicated region body
PF: predicated region fallthrough
CT: control target
= control target key end

     0   :  { %s5890_s6 = smov 1   ;;  %s5891_s10 = smov 2   ;;  %s7155_s0 = inlined_call_operand.smem [shape: u32[33], index: -1, kind: input, shape index: {}] }
   0x1   :  { %s5955_s5 = sld [smem:[%s7155_s0]]   ;;  %s5892_s14 = smov 3  }
   0x2   :  { %s5960_s9 = sld [smem:[%s7155_s0 + %s5890_s6]]   ;;  %s5893_s18 = smov 4  }
   0x3   :  { %s5965_s13 = sld [smem:[%s7155_s0 + %s5891_s10]]   ;;  %s5894_s22 = smov 5  }
   0x4   :  { %s5970_s17 = sld [smem:[%s7155_s0 + %s5892_s14]]   ;;  %s5895_s26 = smov 6  }
   0x5   :  { %s5975_s21 = sld [smem:[%s7155_s0 + %s5893_s18]]   ;;  %s5896_s30 = smov 7  }
   0x6   :  { %s5980_s25 = sld [smem:[%s7155_s0 + %s5894_s22]]   ;;  %s5897_s4 = smov 8  }
   0x7   :  { %7182 = sst [smem:[#allocation36_spill]] %s5955_s5  ;;  %s5898_s10 = smov 9  }
   0x8   :  { %7183 = sst [smem:[#allocation37_spill]] %s5960_s9  ;;  %s5899_s15 = smov 10  }
   0x9   :  { %7184 = sst [smem:[#allocation38_spill]] %s5965_s13  ;;  %s5900_s20 = smov 11  }
   0xa   :  { %s5985_s29 = sld [smem:[%s7155_s0 + %s5895_s26]]   ;;  %s5901_s26 = smov 12  }
   0xb   :  { %7185 = sst [smem:[#allocation39_spill]] %s5975_s21  ;;  %s5902_s1 = smov 13  }
   0xc   :  { %7186 = sst [smem:[#allocation40_spill]] %s5980_s25  ;;  %s5903_s7 = smov 14  }
   0xd   :  { %s5990_s3 = sld [smem:[%s7155_s0 + %s5896_s30]]   ;;  %s5905_s22 = smov 16  }
   0xe   :  { %s5995_s8 = sld [smem:[%s7155_s0 + %s5897_s4]]   ;;  %s5906_s28 = smov 17  }
   0xf   :  { %s6000_s14 = sld [smem:[%s7155_s0 + %s5898_s10]]  }
  0x10   :  { %7187 = sst [smem:[#allocation41_spill]] %s5985_s29 }
  0x11   :  { %s6005_s19 = sld [smem:[%s7155_s0 + %s5899_s15]]   ;;  %s5904_s15 = smov 15  }
  0x12   :  { %s6010_s24 = sld [smem:[%s7155_s0 + %s5900_s20]]  }
  0x13   :  { %7188 = sst [smem:[#allocation42_spill]] %s5990_s3 }
  0x14   :  { %7189 = sst [smem:[#allocation43_spill]] %s5995_s8 }
  0x15   :  { %7190 = sst [smem:[#allocation44_spill]] %s6000_s14 }
  0x16   :  { %s6015_s30 = sld [smem:[%s7155_s0 + %s5901_s26]]  }
  0x17   :  { %7191 = sst [smem:[#allocation45_spill]] %s6005_s19 }
  0x18   :  { %s6020_s6 = sld [smem:[%s7155_s0 + %s5902_s1]]  }
  0x19   :  { %s6025_s12 = sld [smem:[%s7155_s0 + %s5903_s7]]   ;;  %s5907_s7 = smov 18  }
  0x1a   :  { %s6030_s20 = sld [smem:[%s7155_s0 + %s5904_s15]]   ;;  %s5908_s15 = smov 19  }
  0x1b   :  { %s6035_s27 = sld [smem:[%s7155_s0 + %s5905_s22]]   ;;  %s5909_s22 = smov 20  }
  0x1c   :  { %s6040_s4 = sld [smem:[%s7155_s0 + %s5906_s28]]   ;;  %s5910_s28 = smov 21  }
  0x1d   :  { %s6050_s9 = sld [smem:[%s7155_s0 + %s5908_s15]]   ;;  %s5912_s15 = smov 23  }
  0x1e   :  { %7192 = sst [smem:[#allocation46_spill]] %s6020_s6 }
  0x1f   :  { %7193 = sst [smem:[#allocation47_spill]] %s6025_s12 }
  0x20   :  { %s6045_s12 = sld [smem:[%s7155_s0 + %s5907_s7]]   ;;  %s5911_s7 = smov 22  }
  0x21   :  { %s6055_s19 = sld [smem:[%s7155_s0 + %s5909_s22]]   ;;  %s5913_s22 = smov 24  }
  0x22   :  { %7194 = sst [smem:[#allocation48_spill]] %s6040_s4 }
  0x23   :  { %7196 = sst [smem:[#allocation50_spill]] %s6050_s9 }
  0x24   :  { %s6060_s29 = sld [smem:[%s7155_s0 + %s5910_s28]]   ;;  %s5914_s28 = smov 25  }
  0x25   :  { %s6070_s9 = sld [smem:[%s7155_s0 + %s5912_s15]]   ;;  %s5916_s15 = smov 27  }
  0x26   :  { %7195 = sst [smem:[#allocation49_spill]] %s6045_s12 }
  0x27   :  { %s6065_s12 = sld [smem:[%s7155_s0 + %s5911_s7]]   ;;  %s5915_s7 = smov 26  }
  0x28   :  { %s6075_s5 = sld [smem:[%s7155_s0 + %s5913_s22]]   ;;  %s5917_s22 = smov 28  }
  0x2a   :  { %7197 = sst [smem:[#allocation51_spill]] %s6060_s29 }
  0x2b   :  { %7199 = sst [smem:[#allocation53_spill]] %s6070_s9 }
  0x2c   :  { %s6080_s29 = sld [smem:[%s7155_s0 + %s5914_s28]]   ;;  %s5918_s28 = smov 29  }
  0x2d   :  { %7198 = sst [smem:[#allocation52_spill]] %s6065_s12 }
  0x2e   :  { %7200 = sst [smem:[#allocation54_spill]] %s6075_s5 }
  0x2f   :  { %s6085_s12 = sld [smem:[%s7155_s0 + %s5915_s7]]   ;;  %s5919_s7 = smov 30  }
  0x30   :  { %s6090_s9 = sld [smem:[%s7155_s0 + %s5916_s15]]   ;;  %s5920_s15 = smov 31  }
  0x31   :  { %s6095_s5 = sld [smem:[%s7155_s0 + %s5917_s22]]   ;;  %s5921_s22 = smov 32  }
  0x32   :  { %7201 = sst [smem:[#allocation55_spill]] %s6080_s29 }
  0x33   :  { %s6100_s29 = sld [smem:[%s7155_s0 + %s5918_s28]]  }
  0x35   :  { %7202 = sst [smem:[#allocation56_spill]] %s6085_s12 }
  0x36   :  { %7203 = sst [smem:[#allocation57_spill]] %s6090_s9 }
  0x37   :  { %7204 = sst [smem:[#allocation58_spill]] %s6095_s5 }
  0x38   :  { %s6105_s12 = sld [smem:[%s7155_s0 + %s5919_s7]]  }
  0x39   :  { %s6110_s9 = sld [smem:[%s7155_s0 + %s5920_s15]]  }
  0x3a   :  { %s6115_s5 = sld [smem:[%s7155_s0 + %s5921_s22]]  }
  0x3f   :  { %7205 = sst [smem:[#allocation59_spill]] %s6110_s9 }
  0x40   :  { %7206 = sst [smem:[#allocation60_spill]] %s6115_s5 }
  0x41   :  { %70 = vsyncpa [#allocation3], 0 }
  0x42   :  { %72 = vsyncpa [#allocation3 + $0x1], 0 }
  0x43   :  { %73 = vsyncpa [#allocation6], 0 }
  0x44   :  { %75 = vsyncpa [#allocation6 + $0x1], 0 }
  0x45   :  { %76 = vsyncpa [#allocation9], 0 }
  0x46   :  { %77 = vsyncpa [#allocation12], 0 }
  0x47   :  { %78 = vsyncpa [#allocation15], 0 }
  0x48   :  { %79 = vsyncpa [#allocation18], 0 }
  0x49   :  { %80 = vsyncpa [#allocation21], 0 }
  0x4a   :  { %81 = vsyncpa [#allocation24], 0 }
  0x4b   :  { %82 = vsyncpa [#allocation4], 0 }
  0x4c   :  { %84 = vsyncpa [#allocation4 + $0x1], 0  ;;  %s6117_s28 = smov 0   ;;  %s6119_s1 = smov 0  }
  0x4d   :  { %s6121_s2 = smov 0   ;;  %s6123_s0 = smov 0  }
  0x4e LB: > { %s7207_s13 = sld [smem:[#allocation38_spill]]  ;;  %s7208_s14 = sld [smem:[#allocation44_spill]]  ;;  %s5888_s0 = sphi %s6123_s0, %s7267_s0   ;;  %s5884_s2 = sphi %s6121_s2, %s7266_s2   ;;  %s5880_s1 = sphi %s6119_s1, %s7265_s1   ;;  %s5876_s28 = sphi %s6117_s28, %s7264_s28  }
  0x4f   : > { %s7209_s8 = sld [smem:[#allocation43_spill]]  ;;  %s7210_s6 = sld [smem:[#allocation46_spill]] }
  0x50   : > { %s7211_s4 = sld [smem:[#allocation48_spill]]  ;;  %s7212_s3 = sld [smem:[#allocation42_spill]] }
  0x51   : > { %s7213_s25 = sld [smem:[#allocation40_spill]]  ;;  %s7214_s21 = sld [smem:[#allocation39_spill]] }
  0x52   : > { %s5922_s7 = smov [#allocation7]   ;;  %s6138_s11 = sadd.s32 4294967295, %s5888_s0  }
  0x53   : > { %s826_s10 = sshll.u32 %s5922_s7, 4  ;;  %p4516_p0 = scmp.ge.s32.totalorder %s5888_s0, 1  ;;  %s827_s10 = int_to_ptr.vmem [resolvable:$true] %s826_s10 }
  0x54   : > { %p7162_p1 = scmp.eq.s32.totalorder %s6138_s11, 0  ;;  %p813_p2 = scmp.lt.s32.totalorder %s5888_s0, 3 }
  0x55   : > { %s5923_s16 = smov [#allocation8]   ;;  %s5924_s22 = smov [#allocation11]  }
  0x56   : > { %p6143_p3 = pnand %p4516_p0, %p813_p2  ;;  %s837_s18 = sshll.u32 %s5923_s16, 4  ;;  %s6150_s18 = int_to_ptr.vmem [resolvable:$true] %s837_s18 }
  0x57   : > { %s861_s23 = sshll.u32 %s5924_s22, 4  ;;  %s5394_s7 = scalar_lea.hbm %s7214_s21, 128  ;;  %s6158_s23 = int_to_ptr.vmem [resolvable:$true] %s861_s23 }
  0x58   : > { %s7215_s15 = scalar_select %p6143_p3, 1, 0 }
  0x59   : > { %p5176_p5 = pneg %p6143_p3  ;;  %p5395_p7 = scmp.ne.s32.totalorder %s7214_s21, %s5394_s7 }
  0x5a   : > { %p5401_p11 = scmp.lt.u32.totalorder %s5394_s7, %s7214_s21 }
  0x5b   : > { %p6154_p6 = pnand %p5176_p5, %p7162_p1 }
  0x5d   : > { %p6164_p8 = pneg %p6154_p6 }
  0x5f   : > { %p5397_p9 = pnand %p6164_p8, %p5395_p7 }
  0x61   : > { %p5398_p10 = pneg %p5397_p9 }
  0x63   : > { %p5403_p12 = pnand %p5401_p11, %p5398_p10 }
  0x65   : > { %5406 = shalt.err (!%p5403_p12)
}
  0x66   : > { %s5407_s16 = scalar_lea.vmem %s827_s10, 128  ;;  %p5415_p5 = scmp.lt.s32.totalorder %s827_s10, %s827_s10 }
  0x67   : > { %p5408_p13 = scmp.ne.s32.totalorder %s827_s10, %s5407_s16  ;;  %p5416_p4 = scmp.lt.s32.totalorder %s5407_s16, %s5407_s16 }
  0x69   : > { %p5410_p0 = pnand %p5408_p13, %p6164_p8  ;;  %p5417_p1 = por %p5416_p4, %p5415_p5 }
  0x6b   : > { %p5411_p2 = pneg %p5410_p0 }
  0x6d   : > { %p5418_p3 = pnand %p5417_p1, %p5411_p2 }
  0x6f   : > { %5421 = shalt.err (!%p5418_p3)
}
  0x70   : > { %5179 = dma.hbm_to_vmem [thread:$0]  (!%p6154_p6), %s7214_s21, 128, %s827_s10, [#allocation6]  }
  0x71   : > { %s5422_s22 = scalar_lea.hbm %s7213_s25, 128 }
  0x72   : > { %p5423_p7 = scmp.ne.s32.totalorder %s7213_s25, %s5422_s22  ;;  %p5429_p11 = scmp.lt.u32.totalorder %s5422_s22, %s7213_s25 }
  0x74   : > { %p5425_p9 = pnand %p5423_p7, %p6164_p8 }
  0x76   : > { %p5426_p10 = pneg %p5425_p9 }
  0x78   : > { %p5431_p12 = pnand %p5429_p11, %p5426_p10 }
  0x7a   : > { %5434 = shalt.err (!%p5431_p12)
}
  0x7b   : > { %s5435_s7 = scalar_lea.vmem %s6150_s18, 128  ;;  %p5443_p13 = scmp.lt.s32.totalorder %s6150_s18, %s6150_s18 }
  0x7c   : > { %p5436_p1 = scmp.ne.s32.totalorder %s6150_s18, %s5435_s7  ;;  %p5444_p0 = scmp.lt.s32.totalorder %s5435_s7, %s5435_s7 }
  0x7e   : > { %p5438_p3 = pnand %p5436_p1, %p6164_p8  ;;  %p5445_p2 = por %p5444_p0, %p5443_p13 }
  0x80   : > { %p5439_p4 = pneg %p5438_p3 }
  0x82   : > { %p5446_p5 = pnand %p5445_p2, %p5439_p4 }
  0x84   : > { %5449 = shalt.err (!%p5446_p5)
}
  0x85   : > { %5182 = dma.hbm_to_vmem [thread:$0]  (!%p6154_p6), %s7213_s25, 128, %s6150_s18, [#allocation9]  }
  0x86   : > { %s5450_s10 = scalar_lea.hbm %s7209_s8, 256 }
  0x87   : > { %p5451_p7 = scmp.ne.s32.totalorder %s7209_s8, %s5450_s10  ;;  %p5457_p11 = scmp.lt.u32.totalorder %s5450_s10, %s7209_s8 }
  0x89   : > { %p5453_p9 = pnand %p5451_p7, %p6164_p8 }
  0x8b   : > { %p5454_p10 = pneg %p5453_p9 }
  0x8d   : > { %p5459_p12 = pnand %p5457_p11, %p5454_p10 }
  0x8f   : > { %5462 = shalt.err (!%p5459_p12)
}
  0x90   : > { %s5463_s16 = scalar_lea.vmem %s6158_s23, 256  ;;  %p5471_p13 = scmp.lt.s32.totalorder %s6158_s23, %s6158_s23 }
  0x91   : > { %p5464_p1 = scmp.ne.s32.totalorder %s6158_s23, %s5463_s16  ;;  %p5472_p0 = scmp.lt.s32.totalorder %s5463_s16, %s5463_s16 }
  0x93   : > { %p5466_p3 = pnand %p5464_p1, %p6164_p8  ;;  %p5473_p2 = por %p5472_p0, %p5471_p13 }
  0x95   : > { %p5467_p4 = pneg %p5466_p3 }
  0x97   : > { %p5474_p5 = pnand %p5473_p2, %p5467_p4 }
  0x99   : > { %5477 = shalt.err (!%p5474_p5)
}
  0x9a   : > { %s7166_s18 = smov 64   ;;  %s7168_s22 = smov 4  }
  0x9b   : > { %5188 = dma.hbm_to_vmem [thread:$0]  (!%p6154_p6), %s7209_s8, 256, %s6158_s23, [#allocation12], %s7166_s18, %s7166_s18, %s7168_s22  }
  0x9c   : > { %s5927_s7 = smov [#allocation14]   ;;  %s5928_s16 = smov [#allocation17]  }
  0x9d   : > { %s889_s10 = sshll.u32 %s5927_s7, 4  ;;  %s913_s21 = sshll.u32 %s5928_s16, 4  ;;  %s890_s10 = int_to_ptr.vmem [resolvable:$true] %s889_s10  ;;  %s914_s21 = int_to_ptr.vmem [resolvable:$true] %s913_s21 }
  0x9e   : > { %s5478_s25 = scalar_lea.hbm %s6010_s24, 16 }
  0x9f   : > { %p5479_p7 = scmp.ne.s32.totalorder %s6010_s24, %s5478_s25  ;;  %p5485_p11 = scmp.lt.u32.totalorder %s5478_s25, %s6010_s24 }
  0xa1   : > { %p5481_p9 = pnand %p5479_p7, %p6164_p8 }
  0xa3   : > { %p5482_p10 = pneg %p5481_p9 }
  0xa5   : > { %p5487_p12 = pnand %p5485_p11, %p5482_p10 }
  0xa7   : > { %5490 = shalt.err (!%p5487_p12)
}
  0xa8   : > { %s5491_s9 = scalar_lea.vmem %s890_s10, 16  ;;  %s5498_s23 = scalar_lea.vmem %s890_s10, 32 }
  0xa9   : > { %p5492_p1 = scmp.ne.s32.totalorder %s890_s10, %s5491_s9  ;;  %p5499_p13 = scmp.lt.s32.totalorder %s890_s10, %s890_s10 }
  0xaa   : > { %p5500_p0 = scmp.lt.s32.totalorder %s5498_s23, %s5491_s9 }
  0xab   : > { %p5494_p3 = pnand %p5492_p1, %p6164_p8 }
  0xac   : > { %p5501_p2 = por %p5500_p0, %p5499_p13 }
  0xad   : > { %p5495_p4 = pneg %p5494_p3 }
  0xaf   : > { %p5502_p5 = pnand %p5501_p2, %p5495_p4 }
  0xb1   : > { %5505 = shalt.err (!%p5502_p5)
}
  0xb2   : > { %5194 = dma.hbm_to_vmem [thread:$0]  (!%p6154_p6), %s6010_s24, 16, %s890_s10, [#allocation15]  }
  0xb3   : > { %s5506_s25 = scalar_lea.hbm %s7210_s6, 16 }
  0xb4   : > { %p5507_p7 = scmp.ne.s32.totalorder %s7210_s6, %s5506_s25  ;;  %p5513_p11 = scmp.lt.u32.totalorder %s5506_s25, %s7210_s6 }
  0xb6   : > { %p5509_p9 = pnand %p5507_p7, %p6164_p8 }
  0xb8   : > { %p5510_p10 = pneg %p5509_p9 }
  0xba   : > { %p5515_p12 = pnand %p5513_p11, %p5510_p10 }
  0xbc   : > { %5518 = shalt.err (!%p5515_p12)
}
  0xbd   : > { %s5519_s9 = scalar_lea.vmem %s914_s21, 16  ;;  %s5526_s7 = scalar_lea.vmem %s914_s21, 32 }
  0xbe   : > { %p5520_p1 = scmp.ne.s32.totalorder %s914_s21, %s5519_s9  ;;  %p5527_p13 = scmp.lt.s32.totalorder %s914_s21, %s914_s21 }
  0xbf   : > { %p5528_p0 = scmp.lt.s32.totalorder %s5526_s7, %s5519_s9 }
  0xc0   : > { %p5522_p3 = pnand %p5520_p1, %p6164_p8 }
  0xc1   : > { %p5529_p2 = por %p5528_p0, %p5527_p13 }
  0xc2   : > { %p5523_p4 = pneg %p5522_p3 }
  0xc4   : > { %p5530_p5 = pnand %p5529_p2, %p5523_p4 }
  0xc6   : > { %5533 = shalt.err (!%p5530_p5)
}
  0xc7   : > { %5200 = dma.hbm_to_vmem [thread:$0]  (!%p6154_p6), %s7210_s6, 16, %s914_s21, [#allocation18]  }
  0xc8   : > { %s5929_s10 = smov [#allocation20]   ;;  %s5930_s23 = smov [#allocation10]  }
  0xc9   : > { %s937_s16 = sshll.u32 %s5929_s10, 4  ;;  %s851_s25 = sshll.u32 %s5930_s23, 4  ;;  %s938_s16 = int_to_ptr.vmem [resolvable:$true] %s937_s16  ;;  %s852_s25 = int_to_ptr.vmem [resolvable:$true] %s851_s25 }
  0xca   : > { %s5534_s18 = scalar_lea.hbm %s6035_s27, 256 }
  0xcb   : > { %p5535_p7 = scmp.ne.s32.totalorder %s6035_s27, %s5534_s18  ;;  %p5541_p11 = scmp.lt.u32.totalorder %s5534_s18, %s6035_s27 }
  0xcd   : > { %p5537_p9 = pnand %p5535_p7, %p6164_p8 }
  0xcf   : > { %p5538_p10 = pneg %p5537_p9 }
  0xd1   : > { %p5543_p12 = pnand %p5541_p11, %p5538_p10 }
  0xd3   : > { %5546 = shalt.err (!%p5543_p12)
}
  0xd4   : > { %s5547_s9 = scalar_lea.vmem %s938_s16, 256  ;;  %p5555_p13 = scmp.lt.s32.totalorder %s938_s16, %s938_s16 }
  0xd5   : > { %p5548_p1 = scmp.ne.s32.totalorder %s938_s16, %s5547_s9  ;;  %p5556_p0 = scmp.lt.s32.totalorder %s5547_s9, %s5547_s9 }
  0xd7   : > { %p5550_p3 = pnand %p5548_p1, %p6164_p8  ;;  %p5557_p2 = por %p5556_p0, %p5555_p13 }
  0xd9   : > { %p5551_p4 = pneg %p5550_p3 }
  0xdb   : > { %p5558_p5 = pnand %p5557_p2, %p5551_p4 }
  0xdd   : > { %5561 = shalt.err (!%p5558_p5)
}
  0xde   : > { %s7218_s21 = smov 64   ;;  %s5562_s18 = scalar_lea.hbm %s7212_s3, 16 }
  0xdf   : > { %5206 = dma.hbm_to_vmem [thread:$0]  (!%p6154_p6), %s6035_s27, 256, %s938_s16, [#allocation21], %s7218_s21, %s7218_s21, %s7168_s22  }
  0xe0   : > { %p5563_p7 = scmp.ne.s32.totalorder %s7212_s3, %s5562_s18  ;;  %p5569_p11 = scmp.lt.u32.totalorder %s5562_s18, %s7212_s3 }
  0xe2   : > { %p5565_p9 = pnand %p5563_p7, %p6164_p8 }
  0xe4   : > { %p5566_p10 = pneg %p5565_p9 }
  0xe6   : > { %p5571_p12 = pnand %p5569_p11, %p5566_p10 }
  0xe8   : > { %5574 = shalt.err (!%p5571_p12)
}
  0xe9   : > { %s5575_s7 = scalar_lea.vmem %s852_s25, 16  ;;  %s5582_s10 = scalar_lea.vmem %s852_s25, 32 }
  0xea   : > { %p5576_p1 = scmp.ne.s32.totalorder %s852_s25, %s5575_s7  ;;  %p5583_p13 = scmp.lt.s32.totalorder %s852_s25, %s852_s25 }
  0xeb   : > { %p5584_p0 = scmp.lt.s32.totalorder %s5582_s10, %s5575_s7 }
  0xec   : > { %p5578_p3 = pnand %p5576_p1, %p6164_p8 }
  0xed   : > { %p5585_p2 = por %p5584_p0, %p5583_p13 }
  0xee   : > { %p5579_p4 = pneg %p5578_p3 }
  0xf0   : > { %p5586_p5 = pnand %p5585_p2, %p5579_p4 }
  0xf2   : > { %5589 = shalt.err (!%p5586_p5)
}
  0xf3   : > { %5185 = dma.hbm_to_vmem [thread:$0]  (!%p6154_p6), %s7212_s3, 16, %s852_s25, [#allocation9]  }
  0xf4   : > { %s5931_s16 = smov [#allocation13]   ;;  %s5932_s9 = smov [#allocation16]  }
  0xf5   : > { %s875_s23 = sshll.u32 %s5931_s16, 4  ;;  %s899_s18 = sshll.u32 %s5932_s9, 4  ;;  %s876_s23 = int_to_ptr.vmem [resolvable:$true] %s875_s23  ;;  %s900_s18 = int_to_ptr.vmem [resolvable:$true] %s899_s18 }
  0xf6   : > { %s5590_s22 = scalar_lea.hbm %s7208_s14, 16 }
  0xf7   : > { %p5591_p7 = scmp.ne.s32.totalorder %s7208_s14, %s5590_s22  ;;  %p5597_p11 = scmp.lt.u32.totalorder %s5590_s22, %s7208_s14 }
  0xf9   : > { %p5593_p9 = pnand %p5591_p7, %p6164_p8 }
  0xfb   : > { %p5594_p10 = pneg %p5593_p9 }
  0xfd   : > { %p5599_p12 = pnand %p5597_p11, %p5594_p10 }
  0xff   : > { %5602 = shalt.err (!%p5599_p12)
}
 0x100   : > { %s5603_s7 = scalar_lea.vmem %s876_s23, 16  ;;  %s5610_s25 = scalar_lea.vmem %s876_s23, 32 }
 0x101   : > { %p5604_p1 = scmp.ne.s32.totalorder %s876_s23, %s5603_s7  ;;  %p5611_p13 = scmp.lt.s32.totalorder %s876_s23, %s876_s23 }
 0x102   : > { %p5612_p0 = scmp.lt.s32.totalorder %s5610_s25, %s5603_s7 }
 0x103   : > { %p5606_p3 = pnand %p5604_p1, %p6164_p8 }
 0x104   : > { %p5613_p2 = por %p5612_p0, %p5611_p13 }
 0x105   : > { %p5607_p4 = pneg %p5606_p3 }
 0x107   : > { %p5614_p5 = pnand %p5613_p2, %p5607_p4 }
 0x109   : > { %5617 = shalt.err (!%p5614_p5)
}
 0x10a   : > { %5191 = dma.hbm_to_vmem [thread:$0]  (!%p6154_p6), %s7208_s14, 16, %s876_s23, [#allocation12]  }
 0x10b   : > { %s5618_s22 = scalar_lea.hbm %s6015_s30, 256 }
 0x10c   : > { %p5619_p7 = scmp.ne.s32.totalorder %s6015_s30, %s5618_s22  ;;  %p5625_p11 = scmp.lt.u32.totalorder %s5618_s22, %s6015_s30 }
 0x10e   : > { %p5621_p9 = pnand %p5619_p7, %p6164_p8 }
 0x110   : > { %p5622_p10 = pneg %p5621_p9 }
 0x112   : > { %p5627_p12 = pnand %p5625_p11, %p5622_p10 }
 0x114   : > { %5630 = shalt.err (!%p5627_p12)
}
 0x115   : > { %s5631_s10 = scalar_lea.vmem %s900_s18, 256  ;;  %p5639_p13 = scmp.lt.s32.totalorder %s900_s18, %s900_s18 }
 0x116   : > { %p5632_p1 = scmp.ne.s32.totalorder %s900_s18, %s5631_s10  ;;  %p5640_p0 = scmp.lt.s32.totalorder %s5631_s10, %s5631_s10 }
 0x118   : > { %p5634_p3 = pnand %p5632_p1, %p6164_p8  ;;  %p5641_p2 = por %p5640_p0, %p5639_p13 }
 0x11a   : > { %p5635_p4 = pneg %p5634_p3 }
 0x11c   : > { %p5642_p5 = pnand %p5641_p2, %p5635_p4 }
 0x11e   : > { %5645 = shalt.err (!%p5642_p5)
}
 0x11f   : > { %s7219_s16 = smov 4   ;;  %s5933_s23 = smov [#allocation19]  }
 0x120   : > { %5197 = dma.hbm_to_vmem [thread:$0]  (!%p6154_p6), %s6015_s30, 256, %s900_s18, [#allocation15], %s7218_s21, %s7218_s21, %s7219_s16  }
 0x121   : > { %s927_s9 = sshll.u32 %s5933_s23, 4  ;;  %s5934_s7 = smov [#allocation22]   ;;  %s928_s9 = int_to_ptr.vmem [resolvable:$true] %s927_s9 }
 0x122   : > { %s951_s25 = sshll.u32 %s5934_s7, 4  ;;  %s5646_s22 = scalar_lea.hbm %s6030_s20, 16  ;;  %s952_s25 = int_to_ptr.vmem [resolvable:$true] %s951_s25 }
 0x123   : > { %p5647_p7 = scmp.ne.s32.totalorder %s6030_s20, %s5646_s22  ;;  %p5653_p11 = scmp.lt.u32.totalorder %s5646_s22, %s6030_s20 }
 0x125   : > { %p5649_p9 = pnand %p5647_p7, %p6164_p8 }
 0x127   : > { %p5650_p10 = pneg %p5649_p9 }
 0x129   : > { %p5655_p12 = pnand %p5653_p11, %p5650_p10 }
 0x12b   : > { %5658 = shalt.err (!%p5655_p12)
}
 0x12c   : > { %s5659_s10 = scalar_lea.vmem %s928_s9, 16  ;;  %s5666_s18 = scalar_lea.vmem %s928_s9, 32 }
 0x12d   : > { %p5660_p1 = scmp.ne.s32.totalorder %s928_s9, %s5659_s10  ;;  %p5667_p13 = scmp.lt.s32.totalorder %s928_s9, %s928_s9 }
 0x12e   : > { %p5668_p0 = scmp.lt.s32.totalorder %s5666_s18, %s5659_s10 }
 0x12f   : > { %p5662_p3 = pnand %p5660_p1, %p6164_p8 }
 0x130   : > { %p5669_p2 = por %p5668_p0, %p5667_p13 }
 0x131   : > { %p5663_p4 = pneg %p5662_p3 }
 0x133   : > { %p5670_p5 = pnand %p5669_p2, %p5663_p4 }
 0x135   : > { %5673 = shalt.err (!%p5670_p5)
}
 0x136   : > { %5203 = dma.hbm_to_vmem [thread:$0]  (!%p6154_p6), %s6030_s20, 16, %s928_s9, [#allocation18]  }
 0x137   : > { %s5674_s23 = scalar_lea.hbm %s7211_s4, 16 }
 0x138   : > { %p5675_p7 = scmp.ne.s32.totalorder %s7211_s4, %s5674_s23  ;;  %p5681_p11 = scmp.lt.u32.totalorder %s5674_s23, %s7211_s4 }
 0x13a   : > { %p5677_p9 = pnand %p5675_p7, %p6164_p8 }
 0x13c   : > { %p5678_p10 = pneg %p5677_p9 }
 0x13e   : > { %p5683_p12 = pnand %p5681_p11, %p5678_p10 }
 0x140   : > { %5686 = shalt.err (!%p5683_p12)
}
 0x141   : > { %s5687_s7 = scalar_lea.vmem %s952_s25, 16  ;;  %s5694_s22 = scalar_lea.vmem %s952_s25, 32 }
 0x142   : > { %p5688_p1 = scmp.ne.s32.totalorder %s952_s25, %s5687_s7  ;;  %p5695_p13 = scmp.lt.s32.totalorder %s952_s25, %s952_s25 }
 0x143   : > { %p5696_p0 = scmp.lt.s32.totalorder %s5694_s22, %s5687_s7 }
 0x144   : > { %p5690_p3 = pnand %p5688_p1, %p6164_p8 }
 0x145   : > { %p5697_p2 = por %p5696_p0, %p5695_p13 }
 0x146   : > { %p5691_p4 = pneg %p5690_p3 }
 0x148   : > { %p5698_p5 = pnand %p5697_p2, %p5691_p4 }
 0x14a   : > { %5701 = shalt.err (!%p5698_p5)
}
 0x14b   : > { %5209 = dma.hbm_to_vmem [thread:$0]  (!%p6154_p6), %s7211_s4, 16, %s952_s25, [#allocation21]  }
 0x14c   : > { %s5935_s9 = smov [#allocation23]   ;;  %s5702_s18 = scalar_lea.hbm %s6055_s19, 256 }
 0x14d   : > { %s967_s10 = sshll.u32 %s5935_s9, 4  ;;  %p5703_p7 = scmp.ne.s32.totalorder %s6055_s19, %s5702_s18  ;;  %s968_s10 = int_to_ptr.vmem [resolvable:$true] %s967_s10 }
 0x14e   : > { %p5709_p11 = scmp.lt.u32.totalorder %s5702_s18, %s6055_s19 }
 0x14f   : > { %p5705_p9 = pnand %p5703_p7, %p6164_p8 }
 0x151   : > { %p5706_p10 = pneg %p5705_p9 }
 0x153   : > { %p5711_p12 = pnand %p5709_p11, %p5706_p10 }
 0x155   : > { %5714 = shalt.err (!%p5711_p12)
}
 0x156   : > { %s5715_s23 = scalar_lea.vmem %s968_s10, 256  ;;  %p5723_p13 = scmp.lt.s32.totalorder %s968_s10, %s968_s10 }
 0x157   : > { %p5716_p1 = scmp.ne.s32.totalorder %s968_s10, %s5715_s23  ;;  %p5724_p0 = scmp.lt.s32.totalorder %s5715_s23, %s5715_s23 }
 0x159   : > { %p5718_p3 = pnand %p5716_p1, %p6164_p8  ;;  %p5725_p2 = por %p5724_p0, %p5723_p13 }
 0x15b   : > { %p5719_p4 = pneg %p5718_p3 }
 0x15d   : > { %p5726_p5 = pnand %p5725_p2, %p5719_p4 }
 0x15f   : > { %5729 = shalt.err (!%p5726_p5)
}
 0x160   : > { %5212 = dma.hbm_to_vmem [thread:$0]  (!%p6154_p6), %s6055_s19, 256, %s968_s10, [#allocation24], %s7218_s21, %s7218_s21, %s7219_s16  }
 0x161   : > { %s4515_s5 = sadd.s32 4294967294, %s5888_s0   ;;  %s6310_s26 = sadd.s32 1, %s5888_s0  }
 0x162   : > { %s146_s25 = ssub.s32 %s5888_s0, %s6310_s26  ;;  %s149_s7 = sadd.s32 1, %s5884_s2 }
 0x163   : > { %p147_p8 = scmp.eq.s32.totalorder %s146_s25, 0  ;;  %p156_p7 = scmp.ne.s32.totalorder %s5884_s2, %s5880_s1 }
 0x164   : > { %p157_p9 = scmp.eq.s32.totalorder %s5888_s0, 0  ;;  %p162_p10 = scmp.ne.s32.totalorder %s5880_s1, %s5876_s28 }
 0x165   : > { %s6321_s22 = scalar_select %p147_p8, %s5884_s2, %s149_s7  }
 0x166   : > { %p6323_p11 = por %p157_p9, %p156_p7  ;;  %p7221_p6 = scmp.eq.s32.totalorder %s6138_s11, 0 }
 0x167   : > { %p800_p1 = scmp.eq.s32.totalorder %s6138_s11, 1  ;;  %p806_p3 = scmp.eq.s32.totalorder %s4515_s5, 1 }
 0x168   : > { %p6329_p12 = por %p7221_p6, %p162_p10  ;;  %p5236_p4 = scmp.lt.s32.totalorder %s5888_s0, 2 }
 0x169   : > { %s6336_s16 = sand.u32 1, %s5884_s2   ;;  %p6338_p13 = por %p800_p1, %p156_p7 }
 0x16a   : > { %s7222_s21 = scalar_select %p6329_p12, 1, 0 }
 0x16b   : > { %s7223_s10 = scalar_select %p6338_p13, 1, 0 }
 0x16c   : > { %p6342_p0 = por %p806_p3, %p162_p10  ;;  %s4530_s23 = sshll.u32 %s5888_s0, 4 }
 0x16d   : > { %s1031_s25 = scalar_lea.vmem [#allocation2], %s6336_s16  ;;  %s6349_s3 = scalar_lea.hbm %s7207_s13, %s4530_s23 }
 0x16e   : > { %s7224_s18 = scalar_select %p6342_p0, 1, 0 }
 0x16f   : > { %s1038_s7 = sshll.u32 %s1031_s25, 4  ;;  %p6355_p2 = pnand %p5236_p4, %p6323_p11  ;;  %s6351_s7 = int_to_ptr.vmem [resolvable:$true] %s1038_s7 }
 0x170   : > { %s6360_s4 = scalar_lea.hbm %s5970_s17, %s4530_s23  ;;  %s1029_s8 = scalar_lea.sflag [#allocation3], %s6336_s16 }
 0x171   : > { %s5730_s25 = scalar_lea.hbm %s6349_s3, 16  ;;  %p5732_p8 = pneg %p6355_p2 }
 0x172   : > { %p5731_p5 = scmp.ne.s32.totalorder %s6349_s3, %s5730_s25  ;;  %s5735_s14 = scalar_lea.hbm %s7207_s13, 32 }
 0x173   : > { %p5736_p10 = scmp.lt.u32.totalorder %s6349_s3, %s7207_s13  ;;  %p5737_p11 = scmp.lt.u32.totalorder %s5735_s14, %s5730_s25 }
 0x174   : > { %p5733_p7 = pnand %p5732_p8, %p5731_p5  ;;  %p5739_p1 = scmp.lt.u32.totalorder %s5730_s25, %s6349_s3 }
 0x175   : > { %p5738_p6 = por %p5737_p11, %p5736_p10 }
 0x176   : > { %p5734_p9 = pneg %p5733_p7 }
 0x177   : > { %p5740_p3 = por %p5739_p1, %p5738_p6 }
 0x179   : > { %p5741_p4 = pnand %p5740_p3, %p5734_p9 }
 0x17b   : > { %5744 = shalt.err (!%p5741_p4)
}
 0x17c   : > { %s5745_s9 = scalar_lea.vmem %s6351_s7, 16  ;;  %s5936_s23 = smov [#allocation2]  }
 0x17d   : > { %p5746_p0 = scmp.ne.s32.totalorder %s6351_s7, %s5745_s9  ;;  %s5750_s6 = sshll.u32 %s5936_s23, 4  ;;  %s5751_s6 = int_to_ptr.vmem [resolvable:$false] %s5750_s6 }
 0x17e   : > { %s5752_s13 = scalar_lea.vmem %s5751_s6, 32  ;;  %p5753_p5 = scmp.lt.s32.totalorder %s6351_s7, %s5751_s6 }
 0x17f   : > { %p5748_p13 = pnand %p5746_p0, %p5732_p8  ;;  %p5754_p7 = scmp.lt.s32.totalorder %s5752_s13, %s5745_s9 }
 0x181   : > { %p5749_p12 = pneg %p5748_p13  ;;  %p5755_p10 = por %p5754_p7, %p5753_p5 }
 0x183   : > { %p5756_p11 = pnand %p5755_p10, %p5749_p12 }
 0x185   : > { %5759 = shalt.err (!%p5756_p11)
}
 0x186   : > { %5216 = dma.hbm_to_vmem [thread:$0]  (!%p6355_p2), %s6349_s3, 16, %s6351_s7, %s1029_s8  }
 0x187   : > { %s1048_s14 = scalar_lea.vmem [#allocation5], %s6336_s16  ;;  %s7226_s13 = sand.u32 1, %s5888_s0  }
 0x188   : > { %s1055_s6 = sshll.u32 %s1048_s14, 4  ;;  %s1046_s25 = scalar_lea.sflag [#allocation6], %s7226_s13  ;;  %s1056_s6 = int_to_ptr.vmem [resolvable:$true] %s1055_s6 }
 0x189   : > { %s5760_s9 = scalar_lea.hbm %s6360_s4, 16  ;;  %s5765_s23 = scalar_lea.hbm %s5970_s17, 32 }
 0x18a   : > { %p5761_p12 = scmp.ne.s32.totalorder %s6360_s4, %s5760_s9  ;;  %p5766_p9 = scmp.lt.u32.totalorder %s6360_s4, %s5970_s17 }
 0x18b   : > { %p5767_p6 = scmp.lt.u32.totalorder %s5765_s23, %s5760_s9  ;;  %p5769_p3 = scmp.lt.u32.totalorder %s5760_s9, %s6360_s4 }
 0x18c   : > { %p5763_p13 = pnand %p5761_p12, %p5732_p8 }
 0x18d   : > { %p5768_p1 = por %p5767_p6, %p5766_p9 }
 0x18e   : > { %p5764_p0 = pneg %p5763_p13 }
 0x18f   : > { %p5770_p4 = por %p5769_p3, %p5768_p1 }
 0x191   : > { %p5771_p5 = pnand %p5770_p4, %p5764_p0 }
 0x193   : > { %5774 = shalt.err (!%p5771_p5)
}
 0x194   : > { %s5775_s3 = scalar_lea.vmem %s1056_s6, 16  ;;  %s5937_s8 = smov [#allocation5]  }
 0x195   : > { %p5776_p7 = scmp.ne.s32.totalorder %s1056_s6, %s5775_s3  ;;  %s5780_s16 = sshll.u32 %s5937_s8, 4  ;;  %s5781_s16 = int_to_ptr.vmem [resolvable:$false] %s5780_s16 }
 0x196   : > { %s5782_s7 = scalar_lea.vmem %s5781_s16, 32  ;;  %p5783_p12 = scmp.lt.s32.totalorder %s1056_s6, %s5781_s16 }
 0x197   : > { %p5778_p10 = pnand %p5776_p7, %p5732_p8  ;;  %p5784_p13 = scmp.lt.s32.totalorder %s5782_s7, %s5775_s3 }
 0x199   : > { %p5779_p11 = pneg %p5778_p10  ;;  %p5785_p6 = por %p5784_p13, %p5783_p12 }
 0x19b   : > { %p5786_p9 = pnand %p5785_p6, %p5779_p11 }
 0x19d   : > { %5789 = shalt.err (!%p5786_p9)
}
 0x19e   : > { %5219 = dma.hbm_to_vmem [thread:$0]  (!%p6355_p2), %s6360_s4, 16, %s1056_s6, %s1046_s25  }
 0x19f   : > { %p7227_p0 = scmp.ne.s32.totalorder %s7215_s15, 0 }
 0x1a0   : > { %s6406_s14 = sand.u32 (!%p7227_p0), 1, %s5880_s1   ;;  %p7228_p8 = scmp.ne.s32.totalorder (!%p7227_p0), %s7222_s21, 0 }
 0x1a1   : > { %1064 = sbr.rel (%p7227_p0) target bundleno = 12444 (0x309c), region = 148  ;;  %s1067_s13 = scalar_lea.sflag (!%p7227_p0), [#allocation3], %s6406_s14 }
 0x1a2   : > { %s1069_s9 = scalar_lea.vmem (!%p7227_p0), [#allocation2], %s6406_s14 }
 0x1a8   : > { %5835 = dma.done.wait (%p7228_p8), %s1067_s13, 16  }
 0x1a9   : > { %5837 = vsyncadd (%p7228_p8), %s1067_s13, 4294967280  ;;  %s1074_s4 = sand.u32 1, %s6138_s11   ;;  %s1077_s15 = scalar_lea.vmem [#allocation5], %s6406_s14 }
 0x1aa   : > { %s1075_s5 = scalar_lea.sflag [#allocation6], %s1074_s4 }
 0x1ab   : > { %5839 = dma.done.wait (%p7228_p8), %s1075_s5, 16  }
 0x1ac   : > { %5841 = vsyncadd (%p7228_p8), %s1075_s5, 4294967280  ;;  %p7229_p2 = scmp.eq.s32.totalorder %s6138_s11, 0 }
 0x1ae   : > { %5843 = dma.done.wait (%p7229_p2), [#allocation6], 128   ;;  %p7230_p1 = pmov %p7229_p2 }
 0x1b0   : > { %5845 = vsyncadd (%p7230_p1), [#allocation6], 4294967168  ;;  %p7231_p3 = pmov %p7230_p1 }
 0x1b1   : > { %p7232_p4 = pmov %p7230_p1 }
 0x1b2   : > { %5847 = dma.done.wait (%p7231_p3), [#allocation9], 144  }
 0x1b3   : > { %5849 = vsyncadd (%p7232_p4), [#allocation9], 4294967152  ;;  %p7233_p5 = pmov %p7230_p1 }
 0x1b4   : > { %p7234_p7 = pmov %p7230_p1 }
 0x1b5   : > { %5851 = dma.done.wait (%p7233_p5), [#allocation12], 272  }
 0x1b6   : > { %5853 = vsyncadd (%p7234_p7), [#allocation12], 4294967024  ;;  %p7235_p10 = pmov %p7230_p1 }
 0x1b7   : > { %p7236_p11 = pmov %p7230_p1 }
 0x1b8   : > { %5855 = dma.done.wait (%p7235_p10), [#allocation15], 272  }
 0x1b9   : > { %5857 = vsyncadd (%p7236_p11), [#allocation15], 4294967024  ;;  %p7237_p12 = pmov %p7230_p1 }
 0x1ba   : > { %p7238_p13 = pmov %p7230_p1 }
 0x1bb   : > { %5859 = dma.done.wait (%p7237_p12), [#allocation18], 32  }
 0x1bc   : > { %5861 = vsyncadd (%p7238_p13), [#allocation18], 4294967264  ;;  %p7239_p6 = pmov %p7230_p1 }
 0x1bd   : > { %p7240_p9 = pmov %p7230_p1 }
 0x1be   : > { %5863 = dma.done.wait (%p7239_p6), [#allocation21], 272  }
 0x1bf   : > { %5865 = vsyncadd (%p7240_p9), [#allocation21], 4294967024  ;;  %p7241_p0 = pmov %p7230_p1 }
 0x1c1   : > { %5867 = dma.done.wait (%p7241_p0), [#allocation24], 256   ;;  %p7242_p8 = pmov %p7241_p0 }
 0x1c2   : > { %s7243_s21 = sld [smem:[#allocation36_spill]]  ;;  %s7244_s6 = sld [smem:[#allocation41_spill]]  ;;  %v5938_v0 = vmov 0.0   ;;  %vm5939_vm0 = vmmov 0   ;;  %v6459_v1 = vld [vmem:[#allocation11] sm:$0xff]   ;;  %v6470_v3 = vld [vmem:[#allocation11 + $0x8] sm:$0xff]  }
 0x1c3   : > { %5869 = vsyncadd (%p7242_p8), [#allocation24], 4294967040  ;;  %p1217_p2 = scmp.lt.s32.totalorder %s6138_s11, 1  ;;  %4774 = vmatprep.subr.bf16.mxu1 %v5938_v0  ;;  %4766 = vmatprep.subr.bf16.mxu0 %v5938_v0  ;;  %vm1262_vm1 = vcmask 261120   ;;  %v6493_v7 = vld [vmem:[#allocation13] ss:$0 sm:$0xff] }
 0x1c4   : > { %4778 = vmatprep.mubr.msk.bf16.mxu1 %vm5939_vm0, %v5938_v0  ;;  %4770 = vmatprep.mubr.msk.bf16.mxu0 %vm5939_vm0, %v5938_v0  ;;  %v6495_v9 = vld [vmem:[#allocation10] ss:$0 sm:$0xff]  ;;  %s5940_s8 = smov 8   ;;  %vm1433_vm2 = vcmask 1047616   ;;  %v1231_v21 = vld [vmem:[#allocation8] sm:$0xff]  ;;  %s5941_s16 = smov 4  }
 0x1c5   : > { %s6454_s25 = scalar_select %p1217_p2, %s6138_s11, 1  ;;  %4775 = vmatpush3.bf16.msra.mxu1 %v6459_v1  ;;  %v6513_v31 = vld [vmem:[#allocation7] sm:$0xff]  ;;  %vm1466_vm3 = vcmask 64512   ;;  %v6538_v44 = vld [vmem:[%s1069_s9] ss:$0 sm:$0xff]  ;;  %vm1529_vm4 = vcmask 1043456  }
 0x1c6   : > { %4776 = vmatprep.subr.bf16.mxu1 %v5938_v0  ;;  %s5942_s7 = smov 124   ;;  %s7245_s13 = sld [smem:[#allocation45_spill]]  ;;  %v6549_v57 = vld [vmem:[#allocation14] ss:$0 sm:$0xff]  ;;  %vm4169_vm5 = vcmask 523264  }
 0x1c7   : > { %s4546_s23 = sshll.u32 %s6454_s25, 3  ;;  %s5943_s4 = smov 120  }
 0x1c8   : > { %s6464_s3 = scalar_lea.vmem %s7243_s21, %s4546_s23  ;;  %v6467_v2 = vld [vmem:[%s7244_s6] sm:$0xff]   ;;  %v6477_v5 = vld [vmem:[%s7244_s6 + $0x8] sm:$0xff]   ;;  %s5944_s9 = smov 112  }
 0x1c9   : > { %4767 = vmatpush3.bf16.msra.mxu0 %v6467_v2  ;;  %v1226_v4 = vld [vmem:[%s6464_s3] sm:$0xff]  ;;  %4777 = vmatpush3.bf16.msra.mxu1 %v6470_v3  ;;  %s7178_s5 = smov 104   ;;  %s7246_s21 = sld [smem:[#allocation37_spill]] }
 0x1ca   : > { %4768 = vmatprep.subr.bf16.mxu0 %v5938_v0  ;;  %v6479_v6 = vpack.c.bf16 %v1226_v4, %v1226_v4  ;;  %4790 = vmatprep.subr.bf16.mxu1 %v5938_v0  ;;  %s7248_s25 = sld [smem:[#allocation52_spill]]  ;;  %p7261_p3 = scmp.ne.s32.totalorder %s7223_s10, 0 }
 0x1cc   : > { %4779 = vmatmul.mubr.msk.bf16.vlgmr.msra.gmra.mrb[0].mxu1 %vm1262_vm1, %v6479_v6  ;;  %v6523_v42 = vld [vmem:[%s7245_s13] sm:$0xff]   ;;  %v6527_v43 = vld [vmem:[%s7245_s13 + $0x8] sm:$0xff]  }
 0x1cd   : > { %4769 = vmatpush3.bf16.msra.mxu0 %v6477_v5  ;;  %4792 = vmatprep.mubr.msk.bf16.mxu1 %vm5939_vm0, %v5938_v0 }
 0x1ce   : > { %4782 = vmatprep.subr.bf16.mxu0 %v5938_v0 }
 0x1d0   : > { %4771 = vmatmul.mubr.msk.bf16.vlgmr.msra.gmra.mrb[0].mxu0 %vm1262_vm1, %v6479_v6 }
 0x1d1   : > { %4786 = vmatprep.mubr.msk.bf16.mxu0 %vm5939_vm0, %v5938_v0  ;;  %4783 = vmatpush3.bf16.msra.mxu0 %v6523_v42 }
 0x1d2   : > { %4784 = vmatprep.subr.bf16.mxu0 %v5938_v0 }
 0x1d5   : > { %4785 = vmatpush3.bf16.msra.mxu0 %v6527_v43 }
 0x1d6   : > { %4796 = vmatprep.subr.bf16.mxu0 %v5938_v0 }
 0x1d8   : > { %4787 = vmatmul.mubr.msk.bf16.vlgmr.msra.gmra.mrb[4].mxu0 %vm1262_vm1, %v6479_v6 }
 0x1d9   : > { %4798 = vmatprep.mubr.msk.bf16.mxu0 %vm5939_vm0, %v5938_v0 }
 0x29f   : > { %v1363_v8 = vpop.f32.mrb[0].mxu1 }
 0x2a0   : > { %v1364_v10 = vadd.f32 %v6493_v7, %v1363_v8  ;;  %v4780_v11 = vpop.f32.mrb[1].mxu1 }
 0x2a1   : > { %v1366_v13 = vpop.f32.mrb[2].mxu1 }
 0x2a2   : > { %1451 = vrot.lane.b32.xlu0 %v1364_v10, %s5940_s8  ;;  %v4781_v15 = vpop.f32.mrb[3].mxu1  ;;  %v1450_v32 = vmul.f32 %v1364_v10, %v6513_v31 }
 0x2a3   : > { %v1300_v12 = vpop.f32.mrb[0].mxu0 }
 0x2a4   : > { %v4772_v14 = vpop.f32.mrb[1].mxu0  ;;  %v1301_v16 = vadd.f32 %v6495_v9, %v1300_v12 }
 0x2a5   : > { %v1303_v17 = vpop.f32.mrb[2].mxu0 }
 0x2a6   : > { %v4773_v18 = vpop.f32.mrb[3].mxu0  ;;  %1434 = vrot.lane.b32.xlu0 %v1301_v16, %s5940_s8  ;;  %v1432_v36 = vmul.f32 %v1301_v16, %v6513_v31 }
 0x2ab   : > { %v1426_v58 = vpop.f32.mrb[4].mxu0 }
 0x2ac   : > { %v1427_v59 = vadd.f32 %v6549_v57, %v1426_v58  ;;  %v4788_v60 = vpop.f32.mrb[5].mxu0 }
 0x2ad   : > { %v1429_v61 = vpop.f32.mrb[6].mxu0 }
 0x2ae   : > { %v1525_v62 = vpack.c.bf16 %v1427_v59, %v1427_v59  ;;  %v4789_v4 = vpop.f32.mrb[7].mxu0 }
 0x2b0   : > { %v1531_v8 = vsel %vm1529_vm4, %v1525_v62, 0 }
 0x2b1   : > { %4797 = vmatpush3.bf16.msra.mxu0 %v1531_v8 }
 0x2b2   : > { %4810 = vmatprep.subr.bf16.mxu0 %v5938_v0 }
 0x314   : > { %v1452_v19 = vpop.permute.xlu0 %1451 }
 0x315   : > { %v1453_v20 = vsel %vm1433_vm2, %v1452_v19, %v1364_v10 }
 0x316   : > { %1454 = vrot.lane.b32.xlu1 %v1453_v20, %s5940_s8 }
 0x318   : > { %v1435_v22 = vpop.permute.xlu0 %1434 }
 0x319   : > { %v1436_v23 = vsel %vm1433_vm2, %v1435_v22, %v1301_v16 }
 0x31a   : > { %1441 = vrot.lane.b32.xlu1 %v1231_v21, %s5941_s16  ;;  %1437 = vrot.lane.b32.xlu0 %v1436_v23, %s5940_s8  ;;  %s1224_s16 = scalar_lea.vmem %s7246_s21, %s4546_s23  ;;  %s7249_s23 = sld [smem:[#allocation53_spill]] }
 0x31b   : > { %s7256_s21 = sld [smem:[#allocation55_spill]] }
 0x388   : > { %v1455_v24 = vpop.permute.xlu1 %1454 }
 0x389   : > { %v1456_v25 = vsel %vm1433_vm2, %v1455_v24, %v1364_v10 }
 0x38c   : > { %v6506_v26 = vpop.permute.xlu1 %1441  ;;  %v1438_v27 = vpop.permute.xlu0 %1437 }
 0x38d   : > { %v1439_v28 = vsel %vm1433_vm2, %v1438_v27, %v1301_v16  ;;  %v1457_v29 = vmul.f32 %v1456_v25, %v6506_v26 }
 0x38e   : > { %v1444_v30 = vmul.f32 %v6506_v26, %v1439_v28 }
 0x38f   : > { %1459 = vrot.lane.b32.xlu1 %v1457_v29, %s5942_s7 }
 0x390   : > { %1446 = vrot.lane.b32.xlu0 %v1444_v30, %s5942_s7 }
 0x401   : > { %v1460_v33 = vpop.permute.xlu1 %1459 }
 0x402   : > { %v1462_v34 = vadd.f32 %v1460_v33, %v1450_v32  ;;  %v1447_v35 = vpop.permute.xlu0 %1446 }
 0x403   : > { %v1449_v38 = vadd.f32 %v1447_v35, %v1432_v36 }
 0x404   : > { %v1465_v37 = vpack.c.bf16 %v1462_v34, %v1462_v34 }
 0x405   : > { %v1463_v40 = vmul.f32 0.35355338, %v1449_v38 }
 0x406   : > { %v1471_v39 = vsel %vm1466_vm3, %v1465_v37, 0 }
 0x407   : > { %4791 = vmatpush3.bf16.xpose.msra.mxu1 %v1471_v39  ;;  %v1464_v41 = vpack.c.bf16 %v1463_v40, %v1463_v40 }
 0x408   : > { %4802 = vmatprep.subr.bf16.mxu1 %v5938_v0 }
 0x40e   : > { %4793 = vmatmul.mubr.msk.bf16.vlgmr.msra.gmra.mrb[4].mxu1 %vm1466_vm3, %v1464_v41 }
 0x40f   : > { %4806 = vmatprep.mubr.msk.bf16.mxu1 %vm5939_vm0, %v5938_v0 }
 0x4e1   : > { %v1507_v45 = vpop.f32.mrb[4].mxu1 }
 0x4e2   : > { %v1508_v46 = vadd.f32 %v6538_v44, %v1507_v45  ;;  %v4794_v47 = vpop.f32.mrb[5].mxu1 }
 0x4e3   : > { %v1510_v48 = vpop.f32.mrb[6].mxu1 }
 0x4e4   : > { %v4795_v49 = vpop.f32.mrb[7].mxu1  ;;  %v1513_v50 = vsel %vm1466_vm3, %v1508_v46, -inf }
 0x4e5   : > { %1514 = vmax.xlane.f32.xlu1 %v1513_v50 }
 0x4f6   : > { %1626 = vrot.lane.b32.xlu1 %v6470_v3, %s5943_s4 }
 0x4fa   : > { %1575 = vrot.lane.b32.xlu1 %v6467_v2, %s5943_s4 }
 0x4fe   : > { %1630 = vrot.lane.b32.xlu1 %v6493_v7, %s5943_s4 }
 0x572   : > { %v1515_v51 = vpop.xlane.xlu1 %1514 }
 0x573   : > { %v1516_v52 = vsub.f32 %v1508_v46, %v1515_v51 }
 0x575   : > { %v1517_v53 = vmul.f32 1.442695, %v1516_v52 }
 0x576   : > { %v1627_v56 = vpop.permute.xlu1 %1626 }
 0x577   : > { %5354 = vpow2.f32 %v1517_v53 }
 0x57a   : > { %v1576_v63 = vpop.permute.xlu1 %1575 }
 0x57b   : > { %4803 = vmatpush3.bf16.msra.mxu1 %v1576_v63 }
 0x57c   : > { %4804 = vmatprep.subr.bf16.mxu1 %v5938_v0 }
 0x57e   : > { %v1631_v27 = vpop.permute.xlu1 %1630 }
 0x581   : > { %v5355_v54 = vpop.eup %5354 }
 0x582   : > { %v1519_v55 = vsel %vm1466_vm3, %v5355_v54, 0.0 }
 0x583   : > { %1520 = vadd.xlane.f32.xlu0 %v1519_v55 }
 0x599   : > { %1624 = vrot.lane.b32.xlu0 %v6459_v1, %s5943_s4 }
 0x59d   : > { %1577 = vrot.lane.b32.xlu0 %v6477_v5, %s5943_s4 }
 0x5a1   : > { %1581 = vrot.lane.b32.xlu0 %v6495_v9, %s5943_s4 }
 0x610   : > { %v1521_v10 = vpop.xlane.xlu0 %1520 }
 0x611   : > { %5356 = vrcp.f32 %v1521_v10 }
 0x614   : > { %v1625_v11 = vpop.permute.xlu0 %1624 }
 0x618   : > { %v1578_v12 = vpop.permute.xlu0 %1577 }
 0x619   : > { %4805 = vmatpush3.bf16.msra.mxu1 %v1578_v12 }
 0x61a   : > { %4818 = vmatprep.subr.bf16.mxu1 %v5938_v0 }
 0x61b   : > { %v5357_v13 = vpop.eup %5356 }
 0x61c   : > { %4807 = vmatmul.mubr.msk.bf16.vlgmr.msra.gmra.mrb[8].mxu1 %vm1262_vm1, %v6479_v6  ;;  %v1523_v14 = vmul.f32 %v5357_v13, %v5355_v54  ;;  %v1582_v16 = vpop.permute.xlu0 %1581 }
 0x61d   : > { %4822 = vmatprep.mubr.msk.bf16.mxu1 %vm5939_vm0, %v5938_v0 }
 0x61e   : > { %v1524_v15 = vpack.c.bf16 %v1523_v14, %v1523_v14 }
 0x620   : > { %4799 = vmatmul.mubr.msk.bf16.vlgmr.msra.gmra.mrb[8].mxu0 %vm1466_vm3, %v1524_v15 }
 0x621   : > { %4811 = vmatpush3.bf16.msra.mxu0 %v1625_v11  ;;  %4814 = vmatprep.mubr.msk.bf16.mxu0 %vm5939_vm0, %v5938_v0 }
 0x622   : > { %4812 = vmatprep.subr.bf16.mxu0 %v5938_v0 }
 0x625   : > { %4813 = vmatpush3.bf16.msra.mxu0 %v1627_v56 }
 0x626   : > { %4826 = vmatprep.subr.bf16.mxu0 %v5938_v0 }
 0x628   : > { %4815 = vmatmul.mubr.msk.bf16.vlgmr.msra.gmra.mrb[12].mxu0 %vm1262_vm1, %v6479_v6 }
 0x629   : > { %4828 = vmatprep.mubr.msk.bf16.mxu0 %vm5939_vm0, %v5938_v0 }
 0x6ef   : > { %v1618_v17 = vpop.f32.mrb[8].mxu1 }
 0x6f0   : > { %v1619_v18 = vadd.f32 %v1618_v17, %v1582_v16  ;;  %v4808_v19 = vpop.f32.mrb[9].mxu1 }
 0x6f1   : > { %v1621_v20 = vpop.f32.mrb[10].mxu1  ;;  %v1857_v19 = vld [vmem:[#allocation16 + $0x4] sm:$0xf] }
 0x6f2   : > { %1723 = vrot.lane.b32.xlu0 %v1619_v18, %s5940_s8  ;;  %v4809_v21 = vpop.f32.mrb[11].mxu1  ;;  %v1722_v50 = vmul.f32 %v1619_v18, %v6513_v31  ;;  %v1862_v20 = vsel %vm1529_vm4, %v1857_v19, 0 }
 0x6f3   : > { %v6576_v22 = vpop.f32.mrb[8].mxu0 }
 0x6f4   : > { %v4800_v23 = vpop.f32.mrb[9].mxu0 }
 0x6f5   : > { %v1570_v24 = vpop.f32.mrb[10].mxu0 }
 0x6f6   : > { %v4801_v25 = vpop.f32.mrb[11].mxu0 }
 0x6fb   : > { %v1667_v28 = vpop.f32.mrb[12].mxu0 }
 0x6fc   : > { %v1668_v29 = vadd.f32 %v1667_v28, %v1631_v27  ;;  %v4816_v30 = vpop.f32.mrb[13].mxu0 }
 0x6fd   : > { %v1670_v32 = vpop.f32.mrb[14].mxu0 }
 0x6fe   : > { %1736 = vrot.lane.b32.xlu1 %v1668_v29, %s5940_s8  ;;  %v4817_v33 = vpop.f32.mrb[15].mxu0  ;;  %v1735_v47 = vmul.f32 %v1668_v29, %v6513_v31 }
 0x764   : > { %v1724_v34 = vpop.permute.xlu0 %1723 }
 0x765   : > { %v1725_v35 = vsel %vm1433_vm2, %v1724_v34, %v1619_v18 }
 0x766   : > { %1726 = vrot.lane.b32.xlu0 %v1725_v35, %s5940_s8  ;;  %v1573_v35 = vpack.c.bf16 %v6576_v22, %v6576_v22 }
 0x770   : > { %v1737_v36 = vpop.permute.xlu1 %1736 }
 0x771   : > { %v1738_v37 = vsel %vm1433_vm2, %v1737_v36, %v1668_v29 }
 0x772   : > { %1739 = vrot.lane.b32.xlu1 %v1738_v37, %s5940_s8 }
 0x7d8   : > { %v1727_v38 = vpop.permute.xlu0 %1726 }
 0x7d9   : > { %v1728_v39 = vsel %vm1433_vm2, %v1727_v38, %v1619_v18 }
 0x7da   : > { %v1729_v40 = vmul.f32 %v1728_v39, %v6506_v26 }
 0x7dc   : > { %1731 = vrot.lane.b32.xlu0 %v1729_v40, %s5942_s7 }
 0x7e0   : > { %1675 = vrot.lane.b32.xlu0 %v6527_v43, %s5943_s4 }
 0x7e4   : > { %v1740_v41 = vpop.permute.xlu1 %1739 }
 0x7e5   : > { %v1741_v45 = vsel %vm1433_vm2, %v1740_v41, %v1668_v29  ;;  %v1574_v29 = vld [vmem:[#allocation16] sm:$0xf] }
 0x7e6   : > { %v1742_v46 = vmul.f32 %v1741_v45, %v6506_v26  ;;  %v1908_v33 = vsel %vm1529_vm4, %v1574_v29, 0 }
 0x7e8   : > { %1744 = vrot.lane.b32.xlu1 %v1742_v46, %s5942_s7 }
 0x7ec   : > { %1673 = vrot.lane.b32.xlu1 %v6523_v42, %s5943_s4 }
 0x84e   : > { %v1732_v48 = vpop.permute.xlu0 %1731 }
 0x84f   : > { %v1734_v52 = vadd.f32 %v1732_v48, %v1722_v50 }
 0x851   : > { %v1748_v55 = vmul.f32 0.35355338, %v1734_v52 }
 0x852   : > { %v1676_v59 = vpop.permute.xlu0 %1675 }
 0x853   : > { %v1749_v56 = vpack.c.bf16 %v1748_v55, %v1748_v55 }
 0x85a   : > { %v1745_v49 = vpop.permute.xlu1 %1744 }
 0x85b   : > { %v1747_v51 = vadd.f32 %v1745_v49, %v1735_v47 }
 0x85d   : > { %v1750_v53 = vpack.c.bf16 %v1747_v51, %v1747_v51 }
 0x85e   : > { %v1674_v58 = vpop.permute.xlu1 %1673 }
 0x85f   : > { %v1755_v54 = vsel %vm1466_vm3, %v1750_v53, 0  ;;  %4819 = vmatpush3.bf16.msra.mxu1 %v1674_v58 }
 0x860   : > { %4827 = vmatpush3.bf16.xpose.msra.mxu0 %v1755_v54  ;;  %4820 = vmatprep.subr.bf16.mxu1 %v5938_v0 }
 0x861   : > { %4838 = vmatprep.subr.bf16.mxu0 %v5938_v0 }
 0x863   : > { %4821 = vmatpush3.bf16.msra.mxu1 %v1676_v59 }
 0x864   : > { %4832 = vmatprep.subr.bf16.mxu1 %v5938_v0 }
 0x866   : > { %4823 = vmatmul.mubr.msk.bf16.vlgmr.msra.gmra.mrb[12].mxu1 %vm1262_vm1, %v6479_v6 }
 0x867   : > { %4829 = vmatmul.mubr.msk.bf16.vlgmr.msra.gmra.mrb[16].mxu0 %vm1466_vm3, %v1749_v56  ;;  %4834 = vmatprep.mubr.msk.bf16.mxu1 %vm5939_vm0, %v5938_v0 }
 0x868   : > { %4840 = vmatprep.mubr.msk.bf16.mxu0 %vm5939_vm0, %v5938_v0  ;;  %4839 = vmatpush3.bf16.msra.mxu0 %v1862_v20 }
 0x869   : > { %4850 = vmatprep.subr.bf16.mxu0 %v5938_v0 }
 0x939   : > { %v1716_v15 = vpop.f32.mrb[12].mxu1 }
 0x93a   : > { %v1791_v60 = vpop.f32.mrb[16].mxu0  ;;  %v4824_v16 = vpop.f32.mrb[13].mxu1 }
 0x93b   : > { %v1792_v61 = vadd.f32 %v6538_v44, %v1791_v60  ;;  %v4830_v62 = vpop.f32.mrb[17].mxu0  ;;  %v1719_v17 = vpop.f32.mrb[14].mxu1 }
 0x93c   : > { %v1794_v63 = vpop.f32.mrb[18].mxu0  ;;  %v4825_v18 = vpop.f32.mrb[15].mxu1 }
 0x93d   : > { %v4831_v4 = vpop.f32.mrb[19].mxu0  ;;  %v1797_v8 = vsel %vm1466_vm3, %v1792_v61, -inf }
 0x93e   : > { %1798 = vmax.xlane.f32.xlu1 %v1797_v8 }
 0x94f   : > { %1999 = vrot.lane.b32.xlu1 %v6459_v1, %s5944_s9 }
 0x953   : > { %2001 = vrot.lane.b32.xlu1 %v6470_v3, %s5944_s9 }
 0x957   : > { %1952 = vrot.lane.b32.xlu1 %v6477_v5, %s5944_s9 }
 0x95b   : > { %1956 = vrot.lane.b32.xlu1 %v6495_v9, %s5944_s9 }
 0x9cb   : > { %v1799_v10 = vpop.xlane.xlu1 %1798 }
 0x9cc   : > { %v1800_v11 = vsub.f32 %v1792_v61, %v1799_v10 }
 0x9ce   : > { %v1801_v12 = vmul.f32 1.442695, %v1800_v11 }
 0x9cf   : > { %v2000_v34 = vpop.permute.xlu1 %1999 }
 0x9d0   : > { %5358 = vpow2.f32 %v1801_v12 }
 0x9d3   : > { %v2002_v36 = vpop.permute.xlu1 %2001 }
 0x9d7   : > { %v1953_v45 = vpop.permute.xlu1 %1952 }
 0x9da   : > { %v5359_v13 = vpop.eup %5358 }
 0x9db   : > { %v1803_v14 = vsel %vm1466_vm3, %v5359_v13, 0.0  ;;  %v1957_v4 = vpop.permute.xlu1 %1956 }
 0x9dc   : > { %1804 = vadd.xlane.f32.xlu0 %v1803_v14 }
 0x9f2   : > { %1679 = vrot.lane.b32.xlu0 %v6549_v57, %s5943_s4 }
 0x9f6   : > { %1950 = vrot.lane.b32.xlu0 %v6467_v2, %s5944_s9 }
 0x9fa   : > { %2005 = vrot.lane.b32.xlu0 %v6493_v7, %s5944_s9 }
 0xa69   : > { %v1805_v21 = vpop.xlane.xlu0 %1804 }
 0xa6a   : > { %5360 = vrcp.f32 %v1805_v21 }
 0xa6d   : > { %v1680_v23 = vpop.permute.xlu0 %1679 }
 0xa6e   : > { %v1717_v24 = vadd.f32 %v1716_v15, %v1680_v23 }
 0xa70   : > { %v1809_v25 = vpack.c.bf16 %v1717_v24, %v1717_v24 }
 0xa71   : > { %v1951_v39 = vpop.permute.xlu0 %1950 }
 0xa72   : > { %v1814_v27 = vsel %vm1529_vm4, %v1809_v25, 0 }
 0xa73   : > { %4833 = vmatpush3.bf16.msra.mxu1 %v1814_v27 }
 0xa74   : > { %v5361_v28 = vpop.eup %5360  ;;  %4844 = vmatprep.subr.bf16.mxu1 %v5938_v0 }
 0xa75   : > { %v1807_v30 = vmul.f32 %v5361_v28, %v5359_v13  ;;  %v2006_v50 = vpop.permute.xlu0 %2005 }
 0xa77   : > { %v1808_v32 = vpack.c.bf16 %v1807_v30, %v1807_v30 }
 0xa79   : > { %4835 = vmatmul.mubr.msk.bf16.vlgmr.msra.gmra.mrb[16].mxu1 %vm1466_vm3, %v1808_v32 }
 0xa7a   : > { %4845 = vmatpush3.bf16.msra.mxu1 %v1908_v33  ;;  %4846 = vmatprep.mubr.msk.bf16.mxu1 %vm5939_vm0, %v5938_v0 }
 0xa7b   : > { %4858 = vmatprep.subr.bf16.mxu1 %v5938_v0 }
 0xa81   : > { %4847 = vmatmul.mubr.msk.bf16.vlgmr.msra.gmra.mrb[20].mxu1 %vm1466_vm3, %v1573_v35 }
 0xa82   : > { %4859 = vmatpush3.bf16.msra.mxu1 %v2000_v34  ;;  %4862 = vmatprep.mubr.msk.bf16.mxu1 %vm5939_vm0, %v5938_v0 }
 0xa83   : > { %4860 = vmatprep.subr.bf16.mxu1 %v5938_v0 }
 0xa86   : > { %4861 = vmatpush3.bf16.msra.mxu1 %v2002_v36 }
 0xa87   : > { %4874 = vmatprep.subr.bf16.mxu1 %v5938_v0 }
 0xa89   : > { %4863 = vmatmul.mubr.msk.bf16.vlgmr.msra.gmra.mrb[24].mxu1 %vm1262_vm1, %v6479_v6 }
 0xa8a   : > { %4876 = vmatprep.mubr.msk.bf16.mxu1 %vm5939_vm0, %v5938_v0 }
 0xb4c   : > { %v1850_v37 = vpop.f32.mrb[16].mxu1 }
 0xb4d   : > { %v1856_v22 = vpack.c.bf16 %v1850_v37, %v1850_v37  ;;  %v4836_v38 = vpop.f32.mrb[17].mxu1 }
 0xb4e   : > { %v1853_v40 = vpop.f32.mrb[18].mxu1 }
 0xb4f   : > { %v4837_v41 = vpop.f32.mrb[19].mxu1  ;;  %4841 = vmatmul.mubr.msk.bf16.vlgmr.msra.gmra.mrb[20].mxu0 %vm1466_vm3, %v1856_v22 }
 0xb50   : > { %4851 = vmatpush3.bf16.msra.mxu0 %v1951_v39  ;;  %4854 = vmatprep.mubr.msk.bf16.mxu0 %vm5939_vm0, %v5938_v0 }
 0xb51   : > { %4852 = vmatprep.subr.bf16.mxu0 %v5938_v0 }
 0xb54   : > { %v1944_v46 = vpop.f32.mrb[20].mxu1  ;;  %4853 = vmatpush3.bf16.msra.mxu0 %v1953_v45 }
 0xb55   : > { %v4848_v47 = vpop.f32.mrb[21].mxu1  ;;  %4866 = vmatprep.subr.bf16.mxu0 %v5938_v0 }
 0xb56   : > { %v1947_v48 = vpop.f32.mrb[22].mxu1 }
 0xb57   : > { %v4849_v49 = vpop.f32.mrb[23].mxu1  ;;  %4855 = vmatmul.mubr.msk.bf16.vlgmr.msra.gmra.mrb[24].mxu0 %vm1262_vm1, %v6479_v6 }
 0xb58   : > { %4870 = vmatprep.mubr.msk.bf16.mxu0 %vm5939_vm0, %v5938_v0 }
 0xb5c   : > { %v2042_v51 = vpop.f32.mrb[24].mxu1 }
 0xb5d   : > { %v2043_v52 = vadd.f32 %v2042_v51, %v2006_v50  ;;  %v4864_v53 = vpop.f32.mrb[25].mxu1 }
 0xb5e   : > { %v2045_v54 = vpop.f32.mrb[26].mxu1 }
 0xb5f   : > { %2111 = vrot.lane.b32.xlu0 %v2043_v52, %s5940_s8  ;;  %v4865_v55 = vpop.f32.mrb[27].mxu1  ;;  %v2110_v19 = vmul.f32 %v2043_v52, %v6513_v31 }
 0xb60   : > { %v2232_v55 = vld [vmem:[#allocation16 + $0x8] sm:$0xf] }
 0xbd1   : > { %v2112_v56 = vpop.permute.xlu0 %2111 }
 0xbd2   : > { %v2113_v58 = vsel %vm1433_vm2, %v2112_v56, %v2043_v52 }
 0xbd3   : > { %2114 = vrot.lane.b32.xlu0 %v2113_v58, %s5940_s8 }
 0xc22   : > { %v1898_v59 = vpop.f32.mrb[20].mxu0 }
 0xc23   : > { %v6655_v60 = vadd.f32 %v1944_v46, %v1898_v59  ;;  %v4842_v61 = vpop.f32.mrb[21].mxu0 }
 0xc24   : > { %v1901_v62 = vpop.f32.mrb[22].mxu0 }
 0xc25   : > { %v4843_v63 = vpop.f32.mrb[23].mxu0 }
 0xc2a   : > { %v1993_v8 = vpop.f32.mrb[24].mxu0 }
 0xc2b   : > { %v1994_v10 = vadd.f32 %v1993_v8, %v1957_v4  ;;  %v4856_v11 = vpop.f32.mrb[25].mxu0 }
 0xc2c   : > { %v1996_v12 = vpop.f32.mrb[26].mxu0 }
 0xc2d   : > { %2098 = vrot.lane.b32.xlu1 %v1994_v10, %s5940_s8  ;;  %v4857_v13 = vpop.f32.mrb[27].mxu0  ;;  %v2097_v29 = vmul.f32 %v1994_v10, %v6513_v31 }
 0xc45   : > { %v2115_v14 = vpop.permute.xlu0 %2114 }
 0xc46   : > { %v2116_v15 = vsel %vm1433_vm2, %v2115_v14, %v2043_v52 }
 0xc47   : > { %v2117_v16 = vmul.f32 %v2116_v15, %v6506_v26 }
 0xc49   : > { %2119 = vrot.lane.b32.xlu0 %v2117_v16, %s5942_s7 }
 0xc4d   : > { %2048 = vrot.lane.b32.xlu0 %v6523_v42, %s5944_s9 }
 0xc9f   : > { %v2099_v17 = vpop.permute.xlu1 %2098 }
 0xca0   : > { %v2100_v18 = vsel %vm1433_vm2, %v2099_v17, %v1994_v10 }
 0xca1   : > { %2101 = vrot.lane.b32.xlu1 %v2100_v18, %s5940_s8 }
 0xcbb   : > { %v2120_v20 = vpop.permute.xlu0 %2119 }
 0xcbc   : > { %v2122_v21 = vadd.f32 %v2120_v20, %v2110_v19 }
 0xcbe   : > { %v2125_v23 = vpack.c.bf16 %v2122_v21, %v2122_v21 }
 0xcbf   : > { %v2049_v35 = vpop.permute.xlu0 %2048 }
 0xcc0   : > { %v2130_v24 = vsel %vm1466_vm3, %v2125_v23, 0  ;;  %4867 = vmatpush3.bf16.msra.mxu0 %v2049_v35 }
 0xcc1   : > { %4875 = vmatpush3.bf16.xpose.msra.mxu1 %v2130_v24  ;;  %4868 = vmatprep.subr.bf16.mxu0 %v5938_v0 }
 0xcc2   : > { %4886 = vmatprep.subr.bf16.mxu1 %v5938_v0 }
 0xd13   : > { %v2102_v25 = vpop.permute.xlu1 %2101 }
 0xd14   : > { %v2103_v27 = vsel %vm1433_vm2, %v2102_v25, %v1994_v10 }
 0xd15   : > { %v2104_v28 = vmul.f32 %v2103_v27, %v6506_v26 }
 0xd17   : > { %2106 = vrot.lane.b32.xlu1 %v2104_v28, %s5942_s7 }
 0xd1b   : > { %2050 = vrot.lane.b32.xlu1 %v6527_v43, %s5944_s9 }
 0xd89   : > { %v2107_v30 = vpop.permute.xlu1 %2106 }
 0xd8a   : > { %v2109_v32 = vadd.f32 %v2107_v30, %v2097_v29 }
 0xd8c   : > { %v2123_v33 = vmul.f32 0.35355338, %v2109_v32 }
 0xd8d   : > { %v2051_v36 = vpop.permute.xlu1 %2050 }
 0xd8e   : > { %v2124_v34 = vpack.c.bf16 %v2123_v33, %v2123_v33  ;;  %4869 = vmatpush3.bf16.msra.mxu0 %v2051_v36 }
 0xd8f   : > { %4880 = vmatprep.subr.bf16.mxu0 %v5938_v0 }
 0xd90   : > { %4877 = vmatmul.mubr.msk.bf16.vlgmr.msra.gmra.mrb[28].mxu1 %vm1466_vm3, %v2124_v34 }
 0xd91   : > { %4888 = vmatprep.mubr.msk.bf16.mxu1 %vm5939_vm0, %v5938_v0  ;;  %4871 = vmatmul.mubr.msk.bf16.vlgmr.msra.gmra.mrb[28].mxu0 %vm1262_vm1, %v6479_v6 }
 0xd92   : > { %4882 = vmatprep.mubr.msk.bf16.mxu0 %vm5939_vm0, %v5938_v0 }
 0xe63   : > { %v2166_v37 = vpop.f32.mrb[28].mxu1 }
 0xe64   : > { %v2167_v22 = vadd.f32 %v6538_v44, %v2166_v37  ;;  %v4878_v38 = vpop.f32.mrb[29].mxu1  ;;  %v2091_v50 = vpop.f32.mrb[28].mxu0 }
 0xe65   : > { %v2169_v39 = vpop.f32.mrb[30].mxu1  ;;  %v4872_v51 = vpop.f32.mrb[29].mxu0 }
 0xe66   : > { %v4879_v40 = vpop.f32.mrb[31].mxu1  ;;  %v2172_v41 = vsel %vm1466_vm3, %v2167_v22, -inf }
 0xe67   : > { %2173 = vmax.xlane.f32.xlu0 %v2172_v41 }
 0xe7d   : > { %2054 = vrot.lane.b32.xlu0 %v6549_v57, %s5944_s9 }
 0xe81   : > { %2331 = vrot.lane.b32.xlu0 %v6470_v3, %s7178_s5  ;;  %v2094_v3 = vpop.f32.mrb[30].mxu0 }
 0xe82   : > { %v4873_v52 = vpop.f32.mrb[31].mxu0 }
 0xe85   : > { %2282 = vrot.lane.b32.xlu0 %v6477_v5, %s7178_s5 }
 0xe89   : > { %2286 = vrot.lane.b32.xlu0 %v6495_v9, %s7178_s5 }
 0xef4   : > { %v2174_v45 = vpop.xlane.xlu0 %2173 }
 0xef5   : > { %v2175_v46 = vsub.f32 %v2167_v22, %v2174_v45 }
 0xef7   : > { %v2176_v47 = vmul.f32 1.442695, %v2175_v46 }
 0xef8   : > { %v2055_v5 = vpop.permute.xlu0 %2054 }
 0xef9   : > { %5362 = vpow2.f32 %v2176_v47  ;;  %v2092_v9 = vadd.f32 %v2091_v50, %v2055_v5 }
 0xefb   : > { %v2184_v53 = vpack.c.bf16 %v2092_v9, %v2092_v9 }
 0xefc   : > { %v2332_v61 = vpop.permute.xlu0 %2331 }
 0xefd   : > { %v2189_v54 = vsel %vm1529_vm4, %v2184_v53, 0 }
 0xefe   : > { %4881 = vmatpush3.bf16.msra.mxu0 %v2189_v54 }
 0xeff   : > { %4892 = vmatprep.subr.bf16.mxu0 %v5938_v0 }
 0xf03   : > { %v5363_v48 = vpop.eup %5362 }
 0xf04   : > { %v2178_v49 = vsel %vm1466_vm3, %v5363_v48, 0.0 }
 0xf05   : > { %2179 = vadd.xlane.f32.xlu1 %v2178_v49 }
 0xf16   : > { %2329 = vrot.lane.b32.xlu1 %v6459_v1, %s7178_s5  ;;  %v2237_v1 = vsel %vm1529_vm4, %v2232_v55, 0 }
 0xf17   : > { %4887 = vmatpush3.bf16.msra.mxu1 %v2237_v1 }
 0xf18   : > { %4900 = vmatprep.subr.bf16.mxu1 %v5938_v0 }
 0xf1a   : > { %2280 = vrot.lane.b32.xlu1 %v6467_v2, %s7178_s5 }
 0xf1e   : > { %2335 = vrot.lane.b32.xlu1 %v6493_v7, %s7178_s5  ;;  %v2283_v7 = vpop.permute.xlu0 %2282 }
 0xf22   : > { %v2287_v13 = vpop.permute.xlu0 %2286 }
 0xf92   : > { %v2180_v56 = vpop.xlane.xlu1 %2179 }
 0xf93   : > { %5364 = vrcp.f32 %v2180_v56 }
 0xf96   : > { %v2330_v2 = vpop.permute.xlu1 %2329 }
 0xf9a   : > { %v2281_v62 = vpop.permute.xlu1 %2280 }
 0xf9d   : > { %v5365_v58 = vpop.eup %5364 }
 0xf9e   : > { %v2182_v59 = vmul.f32 %v5365_v58, %v5363_v48  ;;  %v2336_v28 = vpop.permute.xlu1 %2335 }
 0xfa0   : > { %v2183_v63 = vpack.c.bf16 %v2182_v59, %v2182_v59 }
 0xfa2   : > { %4883 = vmatmul.mubr.msk.bf16.vlgmr.msra.gmra.mrb[32].mxu0 %vm1466_vm3, %v2183_v63 }
 0xfa3   : > { %4893 = vmatpush3.bf16.msra.mxu0 %v2281_v62  ;;  %4896 = vmatprep.mubr.msk.bf16.mxu0 %vm5939_vm0, %v5938_v0 }
 0xfa4   : > { %4894 = vmatprep.subr.bf16.mxu0 %v5938_v0 }
 0xfa7   : > { %4895 = vmatpush3.bf16.msra.mxu0 %v2283_v7 }
 0xfa8   : > { %4908 = vmatprep.subr.bf16.mxu0 %v5938_v0 }
 0xfaa   : > { %4897 = vmatmul.mubr.msk.bf16.vlgmr.msra.gmra.mrb[36].mxu0 %vm1262_vm1, %v6479_v6 }
 0xfab   : > { %4912 = vmatprep.mubr.msk.bf16.mxu0 %vm5939_vm0, %v5938_v0 }
0x1075   : > { %v2225_v4 = vpop.f32.mrb[32].mxu0 }
0x1076   : > { %v2231_v8 = vpack.c.bf16 %v2225_v4, %v2225_v4  ;;  %v4884_v10 = vpop.f32.mrb[33].mxu0 }
0x1077   : > { %v2228_v11 = vpop.f32.mrb[34].mxu0 }
0x1078   : > { %v4885_v12 = vpop.f32.mrb[35].mxu0  ;;  %4889 = vmatmul.mubr.msk.bf16.vlgmr.msra.gmra.mrb[32].mxu1 %vm1466_vm3, %v2231_v8 }
0x1079   : > { %4901 = vmatpush3.bf16.msra.mxu1 %v2330_v2  ;;  %4904 = vmatprep.mubr.msk.bf16.mxu1 %vm5939_vm0, %v5938_v0 }
0x107a   : > { %4902 = vmatprep.subr.bf16.mxu1 %v5938_v0 }
0x107d   : > { %v2323_v14 = vpop.f32.mrb[36].mxu0  ;;  %4903 = vmatpush3.bf16.msra.mxu1 %v2332_v61 }
0x107e   : > { %v2324_v15 = vadd.f32 %v2323_v14, %v2287_v13  ;;  %v4898_v16 = vpop.f32.mrb[37].mxu0  ;;  %4916 = vmatprep.subr.bf16.mxu1 %v5938_v0 }
0x107f   : > { %v2326_v17 = vpop.f32.mrb[38].mxu0 }
0x1080   : > { %4905 = vmatmul.mubr.msk.bf16.vlgmr.msra.gmra.mrb[36].mxu1 %vm1262_vm1, %v6479_v6  ;;  %2428 = vrot.lane.b32.xlu0 %v2324_v15, %s5940_s8  ;;  %v4899_v18 = vpop.f32.mrb[39].mxu0 }
0x1081   : > { %4918 = vmatprep.mubr.msk.bf16.mxu1 %vm5939_vm0, %v5938_v0 }
0x10f2   : > { %v2429_v19 = vpop.permute.xlu0 %2428 }
0x10f3   : > { %v2430_v20 = vsel %vm1433_vm2, %v2429_v19, %v2324_v15 }
0x10f4   : > { %2431 = vrot.lane.b32.xlu0 %v2430_v20, %s5940_s8 }
0x114b   : > { %v2273_v21 = vpop.f32.mrb[32].mxu1 }
0x114c   : > { %v6726_v23 = vadd.f32 %v2273_v21, %v6655_v60  ;;  %v4890_v24 = vpop.f32.mrb[33].mxu1 }
0x114d   : > { %v2276_v25 = vpop.f32.mrb[34].mxu1  ;;  %v4582_v24 = vld [vmem:[#allocation17] ss:$0 sm:$0xff] }
0x114e   : > { %v4891_v27 = vpop.f32.mrb[35].mxu1 }
0x1153   : > { %v2372_v29 = vpop.f32.mrb[36].mxu1 }
0x1154   : > { %v2373_v30 = vadd.f32 %v2372_v29, %v2336_v28  ;;  %v4906_v32 = vpop.f32.mrb[37].mxu1 }
0x1155   : > { %v2375_v33 = vpop.f32.mrb[38].mxu1  ;;  %v5392_v32 = vld [vmem:[%s6464_s3] sm:$0xff]  ;;  %s7250_s3 = sld [smem:[#allocation49_spill]] }
0x1156   : > { %2441 = vrot.lane.b32.xlu1 %v2373_v30, %s5940_s8  ;;  %v4907_v34 = vpop.f32.mrb[39].mxu1  ;;  %v2440_v41 = vmul.f32 %v2373_v30, %v6513_v31 }
0x1166   : > { %v2432_v35 = vpop.permute.xlu0 %2431 }
0x1167   : > { %v2433_v36 = vsel %vm1433_vm2, %v2432_v35, %v2324_v15  ;;  %v6772_v35 = vld [vmem:[#allocation20] sm:$0xff]  }
0x1168   : > { %v2434_v37 = vmul.f32 %v2433_v36, %v6506_v26  ;;  %v6778_v36 = vld [vmem:[#allocation20 + $0x8] sm:$0xff]  }
0x116a   : > { %2436 = vrot.lane.b32.xlu0 %v2434_v37, %s5942_s7 }
0x116e   : > { %2380 = vrot.lane.b32.xlu0 %v6527_v43, %s7178_s5  ;;  %v2427_v43 = vmul.f32 %v2324_v15, %v6513_v31 }
0x11c8   : > { %v2442_v60 = vpop.permute.xlu1 %2441 }
0x11c9   : > { %v2443_v22 = vsel %vm1433_vm2, %v2442_v60, %v2373_v30 }
0x11ca   : > { %2444 = vrot.lane.b32.xlu1 %v2443_v22, %s5940_s8 }
0x11dc   : > { %v2437_v45 = vpop.permute.xlu0 %2436 }
0x11dd   : > { %v2439_v48 = vadd.f32 %v2437_v45, %v2427_v43 }
0x11df   : > { %v2453_v51 = vmul.f32 0.35355338, %v2439_v48 }
0x11e0   : > { %v2381_v5 = vpop.permute.xlu0 %2380 }
0x11e1   : > { %v2454_v3 = vpack.c.bf16 %v2453_v51, %v2453_v51 }
0x123c   : > { %v2445_v38 = vpop.permute.xlu1 %2444 }
0x123d   : > { %v2446_v39 = vsel %vm1433_vm2, %v2445_v38, %v2373_v30 }
0x123e   : > { %v2447_v40 = vmul.f32 %v2446_v39, %v6506_v26 }
0x1240   : > { %2449 = vrot.lane.b32.xlu1 %v2447_v40, %s5942_s7 }
0x1244   : > { %2378 = vrot.lane.b32.xlu1 %v6523_v42, %s7178_s5 }
0x12b2   : > { %v2450_v46 = vpop.permute.xlu1 %2449 }
0x12b3   : > { %v2452_v47 = vadd.f32 %v2450_v46, %v2440_v41  ;;  %v6800_v46 = vld [vmem:[#allocation22] ss:$0 sm:$0xff] }
0x12b5   : > { %v2455_v49 = vpack.c.bf16 %v2452_v47, %v2452_v47 }
0x12b6   : > { %v2379_v42 = vpop.permute.xlu1 %2378 }
0x12b7   : > { %v2460_v50 = vsel %vm1466_vm3, %v2455_v49, 0  ;;  %4909 = vmatpush3.bf16.msra.mxu0 %v2379_v42 }
0x12b8   : > { %4917 = vmatpush3.bf16.xpose.msra.mxu1 %v2460_v50  ;;  %4910 = vmatprep.subr.bf16.mxu0 %v5938_v0 }
0x12b9   : > { %4928 = vmatprep.subr.bf16.mxu1 %v5938_v0 }
0x12bb   : > { %4911 = vmatpush3.bf16.msra.mxu0 %v2381_v5 }
0x12bc   : > { %4922 = vmatprep.subr.bf16.mxu0 %v5938_v0 }
0x12be   : > { %4913 = vmatmul.mubr.msk.bf16.vlgmr.msra.gmra.mrb[40].mxu0 %vm1262_vm1, %v6479_v6 }
0x12bf   : > { %4919 = vmatmul.mubr.msk.bf16.vlgmr.msra.gmra.mrb[40].mxu1 %vm1466_vm3, %v2454_v3  ;;  %4924 = vmatprep.mubr.msk.bf16.mxu0 %vm5939_vm0, %v5938_v0 }
0x12c0   : > { %4930 = vmatprep.mubr.msk.bf16.mxu1 %vm5939_vm0, %v5938_v0 }
0x1391   : > { %v2421_v6 = vpop.f32.mrb[40].mxu0 }
0x1392   : > { %v2496_v52 = vpop.f32.mrb[40].mxu1  ;;  %v4914_v62 = vpop.f32.mrb[41].mxu0 }
0x1393   : > { %v2497_v9 = vadd.f32 %v6538_v44, %v2496_v52  ;;  %v4920_v53 = vpop.f32.mrb[41].mxu1  ;;  %v2424_v63 = vpop.f32.mrb[42].mxu0  ;;  %v2562_v44 = vld [vmem:[#allocation16 + $0xc] sm:$0xf]  ;;  %v4583_v52 = vld [vmem:[%s7248_s25] ss:$0 sm:$0xff] }
0x1394   : > { %v2499_v54 = vpop.f32.mrb[42].mxu1  ;;  %v4915_v7 = vpop.f32.mrb[43].mxu0  ;;  %v2567_v4 = vsel %vm1529_vm4, %v2562_v44, 0  ;;  %v4584_v53 = vld [vmem:[%s7249_s23] ss:$0 sm:$0xff]  ;;  %s7258_s25 = sld [smem:[#allocation56_spill]] }
0x1395   : > { %v4921_v55 = vpop.f32.mrb[43].mxu1  ;;  %v2502_v1 = vsel %vm1466_vm3, %v2497_v9, -inf  ;;  %4929 = vmatpush3.bf16.msra.mxu1 %v2567_v4  ;;  %s7259_s23 = sld [smem:[#allocation57_spill]] }
0x1396   : > { %2503 = vmax.xlane.f32.xlu1 %v2502_v1  ;;  %4942 = vmatprep.subr.bf16.mxu1 %v5938_v0 }
0x1423   : > { %v2504_v56 = vpop.xlane.xlu1 %2503 }
0x1424   : > { %v2505_v2 = vsub.f32 %v2497_v9, %v2504_v56  ;;  %v6816_v56 = vld [vmem:[#allocation19] ss:$0 sm:$0xff] }
0x1426   : > { %v2506_v58 = vmul.f32 1.442695, %v2505_v2 }
0x1428   : > { %5366 = vpow2.f32 %v2506_v58 }
0x1432   : > { %v5367_v59 = vpop.eup %5366 }
0x1433   : > { %v2508_v61 = vsel %vm1466_vm3, %v5367_v59, 0.0 }
0x1434   : > { %2509 = vadd.xlane.f32.xlu0 %v2508_v61 }
0x144a   : > { %2384 = vrot.lane.b32.xlu0 %v6549_v57, %s7178_s5  ;;  %s7247_s5 = sld [smem:[#allocation47_spill]] }
0x1450   : > { %v6791_v41 = vld [vmem:[%s7247_s5] sm:$0xff]   ;;  %v6795_v45 = vld [vmem:[%s7247_s5 + $0x8] sm:$0xff]  }
0x14c1   : > { %v2510_v8 = vpop.xlane.xlu0 %2509 }
0x14c2   : > { %5368 = vrcp.f32 %v2510_v8 }
0x14c5   : > { %v2385_v10 = vpop.permute.xlu0 %2384 }
0x14c6   : > { %v2422_v11 = vadd.f32 %v2421_v6, %v2385_v10 }
0x14c8   : > { %v2514_v12 = vpack.c.bf16 %v2422_v11, %v2422_v11 }
0x14ca   : > { %v2519_v13 = vsel %vm1529_vm4, %v2514_v12, 0 }
0x14cb   : > { %4923 = vmatpush3.bf16.msra.mxu0 %v2519_v13 }
0x14cc   : > { %v5369_v14 = vpop.eup %5368  ;;  %4934 = vmatprep.subr.bf16.mxu0 %v5938_v0 }
0x14cd   : > { %v2512_v15 = vmul.f32 %v5369_v14, %v5367_v59 }
0x14cf   : > { %v2513_v16 = vpack.c.bf16 %v2512_v15, %v2512_v15 }
0x14d1   : > { %4925 = vmatmul.mubr.msk.bf16.vlgmr.msra.gmra.mrb[44].mxu0 %vm1466_vm3, %v2513_v16 }
0x14d2   : > { %4938 = vmatprep.mubr.msk.bf16.mxu0 %vm5939_vm0, %v5938_v0  ;;  %4935 = vmatpush3.bf16.msra.mxu0 %v6791_v41 }
0x14d3   : > { %4936 = vmatprep.subr.bf16.mxu0 %v5938_v0 }
0x14d6   : > { %4937 = vmatpush3.bf16.msra.mxu0 %v6795_v45 }
0x14d7   : > { %4950 = vmatprep.subr.bf16.mxu0 %v5938_v0 }
0x15a4   : > { %v2555_v57 = vpop.f32.mrb[44].mxu0 }
0x15a5   : > { %v2561_v17 = vpack.c.bf16 %v2555_v57, %v2555_v57  ;;  %v4926_v18 = vpop.f32.mrb[45].mxu0 }
0x15a6   : > { %v2558_v19 = vpop.f32.mrb[46].mxu0  ;;  %v6833_v18 = vld [vmem:[#allocation7] sm:$0xff] }
0x15a7   : > { %v4927_v20 = vpop.f32.mrb[47].mxu0  ;;  %4931 = vmatmul.mubr.msk.bf16.vlgmr.msra.gmra.mrb[44].mxu1 %vm1466_vm3, %v2561_v17 }
0x15a8   : > { %4946 = vmatprep.mubr.msk.bf16.mxu1 %vm5939_vm0, %v5938_v0  ;;  %4943 = vmatpush3.bf16.msra.mxu1 %v6772_v35 }
0x15a9   : > { %4944 = vmatprep.subr.bf16.mxu1 %v5938_v0 }
0x15ac   : > { %4945 = vmatpush3.bf16.msra.mxu1 %v6778_v36 }
0x15ad   : > { %4958 = vmatprep.subr.bf16.mxu1 %v5938_v0 }
0x167a   : > { %v2603_v21 = vpop.f32.mrb[44].mxu1 }
0x167b   : > { %v2609_v25 = vadd.f32 %v2603_v21, %v6726_v23  ;;  %v4932_v27 = vpop.f32.mrb[45].mxu1  ;;  %v1227_v23 = vld [vmem:[%s1224_s16] sm:$0xff]  ;;  %s7257_s16 = sld [smem:[#allocation59_spill]] }
0x167c   : > { %v2606_v28 = vpop.f32.mrb[46].mxu1  ;;  %v6781_v37 = vpack.c.bf16 %v1227_v23, %v1227_v23  ;;  %v6844_v27 = vld [vmem:[%s7250_s3 + $0x8] sm:$0xff]  }
0x167d   : > { %v2617_v29 = vadd.f32 %v4582_v24, %v2609_v25  ;;  %v4933_v30 = vpop.f32.mrb[47].mxu1  ;;  %v6855_v28 = vld [vmem:[%s1077_s15] ss:$0 sm:$0xff]  ;;  %s7251_s15 = sld [smem:[#allocation50_spill]] }
0x167e   : > { %4947 = vmatmul.mubr.msk.bf16.vlgmr.msra.gmra.mrb[48].mxu1 %vm1262_vm1, %v6781_v37 }
0x167f   : > { %v2618_v33 = vadd.f32 %v5392_v32, %v2617_v29  ;;  %4960 = vmatprep.mubr.msk.bf16.mxu1 %vm5939_vm0, %v5938_v0 }
0x1681   : > { %v2619_v34 = vsel %vm1262_vm1, %v2618_v33, 0.0 }
0x1682   : > { %2620 = vadd.xlane.f32.xlu1 %v2619_v34 }
0x170f   : > { %v2621_v60 = vpop.xlane.xlu1 %2620 }
0x1710   : > { %v2623_v22 = vmul.f32 0.03125, %v2621_v60 }
0x1712   : > { %v2624_v38 = vsub.f32 %v2618_v33, %v2623_v22 }
0x1714   : > { %v2625_v39 = vmul.f32 %v2624_v38, %v2624_v38 }
0x1716   : > { %v2626_v40 = vsel %vm1262_vm1, %v2625_v39, 0.0 }
0x1717   : > { %2627 = vadd.xlane.f32.xlu1 %v2626_v40 }
0x1751   : > { %v2783_v43 = vpop.f32.mrb[48].mxu1 }
0x1752   : > { %v2784_v47 = vadd.f32 %v6800_v46, %v2783_v43  ;;  %v4948_v48 = vpop.f32.mrb[49].mxu1 }
0x1753   : > { %v2786_v49 = vpop.f32.mrb[50].mxu1 }
0x1754   : > { %2866 = vrot.lane.b32.xlu1 %v2784_v47, %s5940_s8  ;;  %v4949_v50 = vpop.f32.mrb[51].mxu1  ;;  %v2865_v14 = vmul.f32 %v2784_v47, %v6513_v31  ;;  %v6840_v31 = vld [vmem:[%s7250_s3] sm:$0xff]   ;;  %s4245_s3 = scalar_lea.sflag [#allocation4], %s6406_s14 }
0x17a4   : > { %v2628_v51 = vpop.xlane.xlu1 %2627 }
0x17a5   : > { %v2629_v3 = vmul.f32 0.03125, %v2628_v51  ;;  %v6872_v51 = vld [vmem:[%s7251_s15] ss:$0 sm:$0xff]  ;;  %s7260_s15 = sld [smem:[#allocation60_spill]] }
0x17a7   : > { %v2631_v42 = vadd.f32 1e-06, %v2629_v3 }
0x17a9   : > { %5370 = vrsqrt.f32 %v2631_v42 }
0x17b3   : > { %v5371_v5 = vpop.eup %5370 }
0x17b4   : > { %v2633_v9 = vmul.f32 %v5371_v5, %v2624_v38 }
0x17b6   : > { %v2640_v54 = vmul.f32 %v4583_v52, %v2633_v9 }
0x17b8   : > { %v6806_v55 = vadd.f32 %v4584_v53, %v2640_v54 }
0x17ba   : > { %v6810_v1 = vpack.c.bf16 %v6806_v55, %v6806_v55 }
0x17bc   : > { %4939 = vmatmul.mubr.msk.bf16.vlgmr.msra.gmra.mrb[48].mxu0 %vm1262_vm1, %v6810_v1 }
0x17bd   : > { %4954 = vmatprep.mubr.msk.bf16.mxu0 %vm5939_vm0, %v5938_v0  ;;  %4951 = vmatpush3.bf16.msra.mxu0 %v6840_v31 }
0x17be   : > { %4952 = vmatprep.subr.bf16.mxu0 %v5938_v0 }
0x17c1   : > { %4953 = vmatpush3.bf16.msra.mxu0 %v6844_v27 }
0x17c2   : > { %4964 = vmatprep.subr.bf16.mxu0 %v5938_v0 }
0x17c4   : > { %4955 = vmatmul.mubr.msk.bf16.vlgmr.msra.gmra.mrb[52].mxu0 %vm1262_vm1, %v6781_v37 }
0x17c5   : > { %4966 = vmatprep.mubr.msk.bf16.mxu0 %vm5939_vm0, %v5938_v0 }
0x17c6   : > { %v2867_v6 = vpop.permute.xlu1 %2866 }
0x17c7   : > { %v2868_v63 = vsel %vm1433_vm2, %v2867_v6, %v2784_v47 }
0x188f   : > { %v2717_v2 = vpop.f32.mrb[48].mxu0 }
0x1890   : > { %v2718_v58 = vadd.f32 %v6816_v56, %v2717_v2  ;;  %v4940_v59 = vpop.f32.mrb[49].mxu0 }
0x1891   : > { %v2720_v61 = vpop.f32.mrb[50].mxu0 }
0x1892   : > { %2853 = vrot.lane.b32.xlu0 %v2718_v58, %s5940_s8  ;;  %v4941_v62 = vpop.f32.mrb[51].mxu0  ;;  %v2852_v19 = vmul.f32 %v6833_v18, %v2718_v58 }
0x1896   : > { %2869 = vrot.lane.b32.xlu0 %v2868_v63, %s5940_s8 }
0x1904   : > { %v2854_v7 = vpop.permute.xlu0 %2853 }
0x1905   : > { %v2855_v44 = vsel %vm1433_vm2, %v2854_v7, %v2718_v58 }
0x1906   : > { %2856 = vrot.lane.b32.xlu1 %v2855_v44, %s5940_s8 }
0x1908   : > { %v2870_v4 = vpop.permute.xlu0 %2869 }
0x1909   : > { %v2871_v8 = vsel %vm1433_vm2, %v2870_v4, %v2784_v47  ;;  %v2846_v47 = vpop.f32.mrb[52].mxu0 }
0x190a   : > { %v2872_v10 = vmul.f32 %v2871_v8, %v6506_v26  ;;  %v4956_v49 = vpop.f32.mrb[53].mxu0  ;;  %v2847_v42 = vadd.f32 %v6872_v51, %v2846_v47 }
0x190b   : > { %v2849_v50 = vpop.f32.mrb[54].mxu0 }
0x190c   : > { %2874 = vrot.lane.b32.xlu0 %v2872_v10, %s5942_s7  ;;  %v4957_v3 = vpop.f32.mrb[55].mxu0  ;;  %v2939_v5 = vpack.c.bf16 %v2847_v42, %v2847_v42 }
0x190e   : > { %v2944_v52 = vsel %vm1529_vm4, %v2939_v5, 0 }
0x190f   : > { %4965 = vmatpush3.bf16.msra.mxu0 %v2944_v52 }
0x1910   : > { %4978 = vmatprep.subr.bf16.mxu0 %v5938_v0 }
0x1978   : > { %v2857_v11 = vpop.permute.xlu1 %2856 }
0x1979   : > { %v2858_v12 = vsel %vm1433_vm2, %v2857_v11, %v2718_v58 }
0x197a   : > { %v2859_v13 = vmul.f32 %v2858_v12, %v6506_v26 }
0x197c   : > { %2861 = vrot.lane.b32.xlu1 %v2859_v13, %s5942_s7 }
0x197e   : > { %v2875_v15 = vpop.permute.xlu0 %2874 }
0x197f   : > { %v2877_v16 = vadd.f32 %v2875_v15, %v2865_v14 }
0x1981   : > { %v2880_v57 = vpack.c.bf16 %v2877_v16, %v2877_v16 }
0x1983   : > { %v2885_v17 = vsel %vm1466_vm3, %v2880_v57, 0 }
0x1984   : > { %4959 = vmatpush3.bf16.xpose.msra.mxu1 %v2885_v17 }
0x1985   : > { %4970 = vmatprep.subr.bf16.mxu1 %v5938_v0 }
0x19ee   : > { %v2862_v20 = vpop.permute.xlu1 %2861 }
0x19ef   : > { %v2864_v21 = vadd.f32 %v2862_v20, %v2852_v19 }
0x19f1   : > { %v2878_v24 = vmul.f32 0.35355338, %v2864_v21 }
0x19f3   : > { %v2879_v25 = vpack.c.bf16 %v2878_v24, %v2878_v24 }
0x19f5   : > { %4961 = vmatmul.mubr.msk.bf16.vlgmr.msra.gmra.mrb[52].mxu1 %vm1466_vm3, %v2879_v25 }
0x19f6   : > { %4974 = vmatprep.mubr.msk.bf16.mxu1 %vm5939_vm0, %v5938_v0 }
0x1ac8   : > { %v2921_v29 = vpop.f32.mrb[52].mxu1 }
0x1ac9   : > { %v2922_v30 = vadd.f32 %v6855_v28, %v2921_v29  ;;  %v4962_v32 = vpop.f32.mrb[53].mxu1 }
0x1aca   : > { %v2924_v33 = vpop.f32.mrb[54].mxu1 }
0x1acb   : > { %v4963_v34 = vpop.f32.mrb[55].mxu1  ;;  %v2927_v23 = vsel %vm1466_vm3, %v2922_v30, -inf }
0x1acc   : > { %2928 = vmax.xlane.f32.xlu0 %v2927_v23 }
0x1ae2   : > { %3037 = vrot.lane.b32.xlu0 %v6772_v35, %s5943_s4 }
0x1ae6   : > { %2988 = vrot.lane.b32.xlu0 %v6791_v41, %s5943_s4 }
0x1aea   : > { %3043 = vrot.lane.b32.xlu0 %v6800_v46, %s5943_s4 }
0x1b59   : > { %v2929_v60 = vpop.xlane.xlu0 %2928 }
0x1b5a   : > { %v2930_v22 = vsub.f32 %v2922_v30, %v2929_v60 }
0x1b5c   : > { %v2931_v38 = vmul.f32 1.442695, %v2930_v22 }
0x1b5d   : > { %v3038_v43 = vpop.permute.xlu0 %3037 }
0x1b5e   : > { %5372 = vpow2.f32 %v2931_v38 }
0x1b61   : > { %v2989_v48 = vpop.permute.xlu0 %2988 }
0x1b62   : > { %4971 = vmatpush3.bf16.msra.mxu1 %v2989_v48 }
0x1b63   : > { %4972 = vmatprep.subr.bf16.mxu1 %v5938_v0 }
0x1b65   : > { %v3044_v12 = vpop.permute.xlu0 %3043 }
0x1b68   : > { %v5373_v39 = vpop.eup %5372 }
0x1b69   : > { %v2933_v40 = vsel %vm1466_vm3, %v5373_v39, 0.0 }
0x1b6a   : > { %2934 = vadd.xlane.f32.xlu1 %v2933_v40 }
0x1b7b   : > { %3039 = vrot.lane.b32.xlu1 %v6778_v36, %s5943_s4 }
0x1b7f   : > { %2990 = vrot.lane.b32.xlu1 %v6795_v45, %s5943_s4 }
0x1b83   : > { %2994 = vrot.lane.b32.xlu1 %v6816_v56, %s5943_s4 }
0x1bf7   : > { %v2935_v9 = vpop.xlane.xlu1 %2934 }
0x1bf8   : > { %5374 = vrcp.f32 %v2935_v9 }
0x1bfb   : > { %v3040_v53 = vpop.permute.xlu1 %3039 }
0x1bff   : > { %v2991_v54 = vpop.permute.xlu1 %2990 }
0x1c00   : > { %4973 = vmatpush3.bf16.msra.mxu1 %v2991_v54 }
0x1c01   : > { %4986 = vmatprep.subr.bf16.mxu1 %v5938_v0 }
0x1c02   : > { %v5375_v2 = vpop.eup %5374 }
0x1c03   : > { %v2937_v58 = vmul.f32 %v5375_v2, %v5373_v39  ;;  %4975 = vmatmul.mubr.msk.bf16.vlgmr.msra.gmra.mrb[56].mxu1 %vm1262_vm1, %v6810_v1  ;;  %v2995_v61 = vpop.permute.xlu1 %2994 }
0x1c04   : > { %4990 = vmatprep.mubr.msk.bf16.mxu1 %vm5939_vm0, %v5938_v0 }
0x1c05   : > { %v2938_v59 = vpack.c.bf16 %v2937_v58, %v2937_v58 }
0x1c07   : > { %4967 = vmatmul.mubr.msk.bf16.vlgmr.msra.gmra.mrb[56].mxu0 %vm1466_vm3, %v2938_v59 }
0x1c08   : > { %4979 = vmatpush3.bf16.msra.mxu0 %v3038_v43  ;;  %4982 = vmatprep.mubr.msk.bf16.mxu0 %vm5939_vm0, %v5938_v0 }
0x1c09   : > { %4980 = vmatprep.subr.bf16.mxu0 %v5938_v0 }
0x1c0c   : > { %4981 = vmatpush3.bf16.msra.mxu0 %v3040_v53 }
0x1c0d   : > { %4994 = vmatprep.subr.bf16.mxu0 %v5938_v0 }
0x1c0f   : > { %4983 = vmatmul.mubr.msk.bf16.vlgmr.msra.gmra.mrb[60].mxu0 %vm1262_vm1, %v6781_v37 }
0x1c10   : > { %4996 = vmatprep.mubr.msk.bf16.mxu0 %vm5939_vm0, %v5938_v0 }
0x1cd6   : > { %v3031_v6 = vpop.f32.mrb[56].mxu1 }
0x1cd7   : > { %v3032_v62 = vadd.f32 %v3031_v6, %v2995_v61  ;;  %v4976_v63 = vpop.f32.mrb[57].mxu1 }
0x1cd8   : > { %v3034_v7 = vpop.f32.mrb[58].mxu1 }
0x1cd9   : > { %3136 = vrot.lane.b32.xlu1 %v3032_v62, %s5940_s8  ;;  %v4977_v44 = vpop.f32.mrb[59].mxu1  ;;  %v3135_v22 = vmul.f32 %v6833_v18, %v3032_v62 }
0x1cda   : > { %v6894_v4 = vpop.f32.mrb[56].mxu0 }
0x1cdb   : > { %v4968_v8 = vpop.f32.mrb[57].mxu0 }
0x1cdc   : > { %v2983_v10 = vpop.f32.mrb[58].mxu0 }
0x1cdd   : > { %v4969_v11 = vpop.f32.mrb[59].mxu0 }
0x1ce2   : > { %v3080_v13 = vpop.f32.mrb[60].mxu0 }
0x1ce3   : > { %v3081_v14 = vadd.f32 %v3080_v13, %v3044_v12  ;;  %v4984_v15 = vpop.f32.mrb[61].mxu0  ;;  %v3270_v12 = vld [vmem:[#allocation23 + $0x4] sm:$0xf] }
0x1ce4   : > { %v3083_v16 = vpop.f32.mrb[62].mxu0  ;;  %v3275_v13 = vsel %vm1529_vm4, %v3270_v12, 0 }
0x1ce5   : > { %3149 = vrot.lane.b32.xlu0 %v3081_v14, %s5940_s8  ;;  %v4985_v57 = vpop.f32.mrb[63].mxu0  ;;  %v3148_v34 = vmul.f32 %v6833_v18, %v3081_v14  ;;  %v2987_v16 = vld [vmem:[#allocation23] sm:$0xf] }
0x1d4b   : > { %v3137_v17 = vpop.permute.xlu1 %3136 }
0x1d4c   : > { %v3138_v19 = vsel %vm1433_vm2, %v3137_v17, %v3032_v62 }
0x1d4d   : > { %3139 = vrot.lane.b32.xlu1 %v3138_v19, %s5940_s8  ;;  %v3321_v19 = vsel %vm1529_vm4, %v2987_v16, 0 }
0x1d57   : > { %v3150_v20 = vpop.permute.xlu0 %3149 }
0x1d58   : > { %v3151_v21 = vsel %vm1433_vm2, %v3150_v20, %v3081_v14  ;;  %v2986_v20 = vpack.c.bf16 %v6894_v4, %v6894_v4 }
0x1d59   : > { %3152 = vrot.lane.b32.xlu0 %v3151_v21, %s5940_s8 }
0x1dbf   : > { %v3140_v24 = vpop.permute.xlu1 %3139 }
0x1dc0   : > { %v3141_v25 = vsel %vm1433_vm2, %v3140_v24, %v3032_v62 }
0x1dc1   : > { %v3142_v29 = vmul.f32 %v3141_v25, %v6506_v26 }
0x1dc3   : > { %3144 = vrot.lane.b32.xlu1 %v3142_v29, %s5942_s7 }
0x1dc7   : > { %3088 = vrot.lane.b32.xlu1 %v6844_v27, %s5943_s4 }
0x1dcb   : > { %v3153_v30 = vpop.permute.xlu0 %3152 }
0x1dcc   : > { %v3154_v32 = vsel %vm1433_vm2, %v3153_v30, %v3081_v14 }
0x1dcd   : > { %v3155_v33 = vmul.f32 %v3154_v32, %v6506_v26 }
0x1dcf   : > { %3157 = vrot.lane.b32.xlu0 %v3155_v33, %s5942_s7 }
0x1dd3   : > { %3086 = vrot.lane.b32.xlu0 %v6840_v31, %s5943_s4 }
0x1e35   : > { %v3145_v23 = vpop.permute.xlu1 %3144 }
0x1e36   : > { %v3147_v39 = vadd.f32 %v3145_v23, %v3135_v22 }
0x1e38   : > { %v3161_v47 = vmul.f32 0.35355338, %v3147_v39 }
0x1e39   : > { %v3089_v50 = vpop.permute.xlu1 %3088 }
0x1e3a   : > { %v3162_v48 = vpack.c.bf16 %v3161_v47, %v3161_v47 }
0x1e41   : > { %v3158_v60 = vpop.permute.xlu0 %3157 }
0x1e42   : > { %v3160_v38 = vadd.f32 %v3158_v60, %v3148_v34 }
0x1e44   : > { %v3163_v40 = vpack.c.bf16 %v3160_v38, %v3160_v38 }
0x1e45   : > { %v3087_v49 = vpop.permute.xlu0 %3086 }
0x1e46   : > { %v3168_v43 = vsel %vm1466_vm3, %v3163_v40, 0  ;;  %4987 = vmatpush3.bf16.msra.mxu1 %v3087_v49 }
0x1e47   : > { %4995 = vmatpush3.bf16.xpose.msra.mxu0 %v3168_v43  ;;  %4988 = vmatprep.subr.bf16.mxu1 %v5938_v0 }
0x1e48   : > { %5006 = vmatprep.subr.bf16.mxu0 %v5938_v0 }
0x1e4a   : > { %4989 = vmatpush3.bf16.msra.mxu1 %v3089_v50 }
0x1e4b   : > { %5000 = vmatprep.subr.bf16.mxu1 %v5938_v0 }
0x1e4d   : > { %4991 = vmatmul.mubr.msk.bf16.vlgmr.msra.gmra.mrb[60].mxu1 %vm1262_vm1, %v6781_v37 }
0x1e4e   : > { %4997 = vmatmul.mubr.msk.bf16.vlgmr.msra.gmra.mrb[64].mxu0 %vm1466_vm3, %v3162_v48  ;;  %5002 = vmatprep.mubr.msk.bf16.mxu1 %vm5939_vm0, %v5938_v0 }
0x1e4f   : > { %5008 = vmatprep.mubr.msk.bf16.mxu0 %vm5939_vm0, %v5938_v0  ;;  %5007 = vmatpush3.bf16.msra.mxu0 %v3275_v13 }
0x1e50   : > { %5018 = vmatprep.subr.bf16.mxu0 %v5938_v0 }
0x1f20   : > { %v3129_v6 = vpop.f32.mrb[60].mxu1 }
0x1f21   : > { %v3204_v3 = vpop.f32.mrb[64].mxu0  ;;  %v4992_v62 = vpop.f32.mrb[61].mxu1 }
0x1f22   : > { %v3205_v42 = vadd.f32 %v6855_v28, %v3204_v3  ;;  %v4998_v5 = vpop.f32.mrb[65].mxu0  ;;  %v3132_v63 = vpop.f32.mrb[62].mxu1 }
0x1f23   : > { %v3207_v52 = vpop.f32.mrb[66].mxu0  ;;  %v4993_v7 = vpop.f32.mrb[63].mxu1 }
0x1f24   : > { %v4999_v9 = vpop.f32.mrb[67].mxu0  ;;  %v3210_v53 = vsel %vm1466_vm3, %v3205_v42, -inf }
0x1f25   : > { %3211 = vmax.xlane.f32.xlu0 %v3210_v53 }
0x1f3b   : > { %3092 = vrot.lane.b32.xlu0 %v6872_v51, %s5943_s4  ;;  %s7252_s4 = smov 104  }
0x1f3f   : > { %3414 = vrot.lane.b32.xlu0 %v6778_v36, %s5944_s9 }
0x1f43   : > { %3365 = vrot.lane.b32.xlu0 %v6795_v45, %s5944_s9 }
0x1f47   : > { %3369 = vrot.lane.b32.xlu0 %v6816_v56, %s5944_s9 }
0x1fb2   : > { %v3212_v54 = vpop.xlane.xlu0 %3211 }
0x1fb3   : > { %v3213_v2 = vsub.f32 %v3205_v42, %v3212_v54 }
0x1fb5   : > { %v3214_v58 = vmul.f32 1.442695, %v3213_v2 }
0x1fb6   : > { %v3093_v44 = vpop.permute.xlu0 %3092 }
0x1fb7   : > { %5376 = vpow2.f32 %v3214_v58  ;;  %v3130_v8 = vadd.f32 %v3129_v6, %v3093_v44 }
0x1fb9   : > { %v3222_v10 = vpack.c.bf16 %v3130_v8, %v3130_v8 }
0x1fba   : > { %v3415_v24 = vpop.permute.xlu0 %3414 }
0x1fbb   : > { %v3227_v11 = vsel %vm1529_vm4, %v3222_v10, 0 }
0x1fbc   : > { %5001 = vmatpush3.bf16.msra.mxu1 %v3227_v11 }
0x1fbd   : > { %5012 = vmatprep.subr.bf16.mxu1 %v5938_v0 }
0x1fbe   : > { %v3366_v34 = vpop.permute.xlu0 %3365 }
0x1fc1   : > { %v5377_v59 = vpop.eup %5376 }
0x1fc2   : > { %v3216_v61 = vsel %vm1466_vm3, %v5377_v59, 0.0  ;;  %v3370_v54 = vpop.permute.xlu0 %3369 }
0x1fc3   : > { %3217 = vadd.xlane.f32.xlu1 %v3216_v61 }
0x1fd4   : > { %3412 = vrot.lane.b32.xlu1 %v6772_v35, %s5944_s9 }
0x1fd8   : > { %3363 = vrot.lane.b32.xlu1 %v6791_v41, %s5944_s9 }
0x1fdc   : > { %3418 = vrot.lane.b32.xlu1 %v6800_v46, %s5944_s9 }
0x2050   : > { %v3218_v14 = vpop.xlane.xlu1 %3217 }
0x2051   : > { %5378 = vrcp.f32 %v3218_v14 }
0x2054   : > { %v3413_v21 = vpop.permute.xlu1 %3412 }
0x2058   : > { %v3364_v30 = vpop.permute.xlu1 %3363 }
0x205b   : > { %v5379_v15 = vpop.eup %5378 }
0x205c   : > { %v3220_v57 = vmul.f32 %v5379_v15, %v5377_v59  ;;  %v3419_v39 = vpop.permute.xlu1 %3418 }
0x205e   : > { %v3221_v17 = vpack.c.bf16 %v3220_v57, %v3220_v57 }
0x2060   : > { %5003 = vmatmul.mubr.msk.bf16.vlgmr.msra.gmra.mrb[64].mxu1 %vm1466_vm3, %v3221_v17 }
0x2061   : > { %5013 = vmatpush3.bf16.msra.mxu1 %v3321_v19  ;;  %5014 = vmatprep.mubr.msk.bf16.mxu1 %vm5939_vm0, %v5938_v0 }
0x2062   : > { %5026 = vmatprep.subr.bf16.mxu1 %v5938_v0 }
0x2068   : > { %5015 = vmatmul.mubr.msk.bf16.vlgmr.msra.gmra.mrb[68].mxu1 %vm1466_vm3, %v2986_v20 }
0x2069   : > { %5027 = vmatpush3.bf16.msra.mxu1 %v3413_v21  ;;  %5030 = vmatprep.mubr.msk.bf16.mxu1 %vm5939_vm0, %v5938_v0 }
0x206a   : > { %5028 = vmatprep.subr.bf16.mxu1 %v5938_v0 }
0x206d   : > { %5029 = vmatpush3.bf16.msra.mxu1 %v3415_v24 }
0x206e   : > { %5042 = vmatprep.subr.bf16.mxu1 %v5938_v0 }
0x2070   : > { %5031 = vmatmul.mubr.msk.bf16.vlgmr.msra.gmra.mrb[72].mxu1 %vm1262_vm1, %v6781_v37 }
0x2071   : > { %5044 = vmatprep.mubr.msk.bf16.mxu1 %vm5939_vm0, %v5938_v0 }
0x2133   : > { %v3263_v4 = vpop.f32.mrb[64].mxu1 }
0x2134   : > { %v3269_v25 = vpack.c.bf16 %v3263_v4, %v3263_v4  ;;  %v5004_v29 = vpop.f32.mrb[65].mxu1 }
0x2135   : > { %v3266_v32 = vpop.f32.mrb[66].mxu1 }
0x2136   : > { %v5005_v33 = vpop.f32.mrb[67].mxu1  ;;  %5009 = vmatmul.mubr.msk.bf16.vlgmr.msra.gmra.mrb[68].mxu0 %vm1466_vm3, %v3269_v25 }
0x2137   : > { %5019 = vmatpush3.bf16.msra.mxu0 %v3364_v30  ;;  %5022 = vmatprep.mubr.msk.bf16.mxu0 %vm5939_vm0, %v5938_v0 }
0x2138   : > { %5020 = vmatprep.subr.bf16.mxu0 %v5938_v0 }
0x213b   : > { %v3357_v23 = vpop.f32.mrb[68].mxu1  ;;  %5021 = vmatpush3.bf16.msra.mxu0 %v3366_v34 }
0x213c   : > { %v5016_v60 = vpop.f32.mrb[69].mxu1  ;;  %5034 = vmatprep.subr.bf16.mxu0 %v5938_v0 }
0x213d   : > { %v3360_v22 = vpop.f32.mrb[70].mxu1 }
0x213e   : > { %v5017_v38 = vpop.f32.mrb[71].mxu1  ;;  %5023 = vmatmul.mubr.msk.bf16.vlgmr.msra.gmra.mrb[72].mxu0 %vm1262_vm1, %v6810_v1 }
0x213f   : > { %5038 = vmatprep.mubr.msk.bf16.mxu0 %vm5939_vm0, %v5938_v0 }
0x2143   : > { %v3455_v40 = vpop.f32.mrb[72].mxu1 }
0x2144   : > { %v3456_v43 = vadd.f32 %v3455_v40, %v3419_v39  ;;  %v5032_v47 = vpop.f32.mrb[73].mxu1 }
0x2145   : > { %v3458_v48 = vpop.f32.mrb[74].mxu1 }
0x2146   : > { %3524 = vrot.lane.b32.xlu1 %v3456_v43, %s5940_s8  ;;  %v5033_v49 = vpop.f32.mrb[75].mxu1  ;;  %v3523_v10 = vmul.f32 %v6833_v18, %v3456_v43 }
0x21b8   : > { %v3525_v50 = vpop.permute.xlu1 %3524 }
0x21b9   : > { %v3526_v3 = vsel %vm1433_vm2, %v3525_v50, %v3456_v43 }
0x21ba   : > { %3527 = vrot.lane.b32.xlu1 %v3526_v3, %s5940_s8 }
0x2209   : > { %v3311_v42 = vpop.f32.mrb[68].mxu0 }
0x220a   : > { %v6973_v5 = vadd.f32 %v3357_v23, %v3311_v42  ;;  %v5010_v52 = vpop.f32.mrb[69].mxu0 }
0x220b   : > { %v3314_v9 = vpop.f32.mrb[70].mxu0 }
0x220c   : > { %v5011_v53 = vpop.f32.mrb[71].mxu0 }
0x2211   : > { %v3406_v2 = vpop.f32.mrb[72].mxu0 }
0x2212   : > { %v3407_v58 = vadd.f32 %v3406_v2, %v3370_v54  ;;  %v5024_v59 = vpop.f32.mrb[73].mxu0 }
0x2213   : > { %v3409_v61 = vpop.f32.mrb[74].mxu0 }
0x2214   : > { %3511 = vrot.lane.b32.xlu0 %v3407_v58, %s5940_s8  ;;  %v5025_v6 = vpop.f32.mrb[75].mxu0  ;;  %v3510_v17 = vmul.f32 %v6833_v18, %v3407_v58 }
0x222c   : > { %v3528_v62 = vpop.permute.xlu1 %3527 }
0x222d   : > { %v3529_v63 = vsel %vm1433_vm2, %v3528_v62, %v3456_v43 }
0x222e   : > { %v3530_v7 = vmul.f32 %v3529_v63, %v6506_v26 }
0x2230   : > { %3532 = vrot.lane.b32.xlu1 %v3530_v7, %s5942_s7 }
0x2234   : > { %3461 = vrot.lane.b32.xlu1 %v6840_v31, %s5944_s9 }
0x2286   : > { %v3512_v44 = vpop.permute.xlu0 %3511 }
0x2287   : > { %v3513_v8 = vsel %vm1433_vm2, %v3512_v44, %v3407_v58 }
0x2288   : > { %3514 = vrot.lane.b32.xlu0 %v3513_v8, %s5940_s8 }
0x22a2   : > { %v3533_v11 = vpop.permute.xlu1 %3532 }
0x22a3   : > { %v3535_v12 = vadd.f32 %v3533_v11, %v3523_v10 }
0x22a5   : > { %v3538_v13 = vpack.c.bf16 %v3535_v12, %v3535_v12 }
0x22a6   : > { %v3462_v4 = vpop.permute.xlu1 %3461 }
0x22a7   : > { %v3543_v14 = vsel %vm1466_vm3, %v3538_v13, 0  ;;  %5035 = vmatpush3.bf16.msra.mxu0 %v3462_v4 }
0x22a8   : > { %5043 = vmatpush3.bf16.xpose.msra.mxu1 %v3543_v14  ;;  %5036 = vmatprep.subr.bf16.mxu0 %v5938_v0 }
0x22a9   : > { %5054 = vmatprep.subr.bf16.mxu1 %v5938_v0 }
0x22fa   : > { %v3515_v15 = vpop.permute.xlu0 %3514 }
0x22fb   : > { %v3516_v16 = vsel %vm1433_vm2, %v3515_v15, %v3407_v58 }
0x22fc   : > { %v3517_v57 = vmul.f32 %v3516_v16, %v6506_v26 }
0x22fe   : > { %3519 = vrot.lane.b32.xlu0 %v3517_v57, %s5942_s7 }
0x2302   : > { %3463 = vrot.lane.b32.xlu0 %v6844_v27, %s5944_s9 }
0x2370   : > { %v3520_v19 = vpop.permute.xlu0 %3519 }
0x2371   : > { %v3522_v20 = vadd.f32 %v3520_v19, %v3510_v17 }
0x2373   : > { %v3536_v21 = vmul.f32 0.35355338, %v3522_v20 }
0x2374   : > { %v3464_v25 = vpop.permute.xlu0 %3463 }
0x2375   : > { %v3537_v24 = vpack.c.bf16 %v3536_v21, %v3536_v21  ;;  %5037 = vmatpush3.bf16.msra.mxu0 %v3464_v25 }
0x2376   : > { %5048 = vmatprep.subr.bf16.mxu0 %v5938_v0 }
0x2377   : > { %5045 = vmatmul.mubr.msk.bf16.vlgmr.msra.gmra.mrb[76].mxu1 %vm1466_vm3, %v3537_v24 }
0x2378   : > { %5056 = vmatprep.mubr.msk.bf16.mxu1 %vm5939_vm0, %v5938_v0  ;;  %5039 = vmatmul.mubr.msk.bf16.vlgmr.msra.gmra.mrb[76].mxu0 %vm1262_vm1, %v6781_v37 }
0x2379   : > { %5050 = vmatprep.mubr.msk.bf16.mxu0 %vm5939_vm0, %v5938_v0 }
0x244a   : > { %v3579_v29 = vpop.f32.mrb[76].mxu1 }
0x244b   : > { %v3580_v30 = vadd.f32 %v6855_v28, %v3579_v29  ;;  %v5046_v32 = vpop.f32.mrb[77].mxu1  ;;  %v3504_v43 = vpop.f32.mrb[76].mxu0 }
0x244c   : > { %v3582_v33 = vpop.f32.mrb[78].mxu1  ;;  %v5040_v47 = vpop.f32.mrb[77].mxu0 }
0x244d   : > { %v5047_v34 = vpop.f32.mrb[79].mxu1  ;;  %v3585_v23 = vsel %vm1466_vm3, %v3580_v30, -inf }
0x244e   : > { %3586 = vmax.xlane.f32.xlu1 %v3585_v23 }
0x245f   : > { %3742 = vrot.lane.b32.xlu1 %v6772_v35, %s7252_s4  ;;  %v3507_v35 = vpop.f32.mrb[78].mxu0 }
0x2460   : > { %v5041_v48 = vpop.f32.mrb[79].mxu0 }
0x2463   : > { %3744 = vrot.lane.b32.xlu1 %v6778_v36, %s7252_s4  ;;  %v3645_v36 = vld [vmem:[#allocation23 + $0x8] sm:$0xf] }
0x2467   : > { %3695 = vrot.lane.b32.xlu1 %v6795_v45, %s7252_s4  ;;  %v3650_v45 = vsel %vm1529_vm4, %v3645_v36, 0 }
0x2468   : > { %5055 = vmatpush3.bf16.msra.mxu1 %v3650_v45 }
0x2469   : > { %5068 = vmatprep.subr.bf16.mxu1 %v5938_v0 }
0x246b   : > { %3699 = vrot.lane.b32.xlu1 %v6816_v56, %s7252_s4 }
0x24db   : > { %v3587_v60 = vpop.xlane.xlu1 %3586 }
0x24dc   : > { %v3588_v22 = vsub.f32 %v3580_v30, %v3587_v60 }
0x24de   : > { %v3589_v38 = vmul.f32 1.442695, %v3588_v22 }
0x24df   : > { %v3743_v3 = vpop.permute.xlu1 %3742 }
0x24e0   : > { %5380 = vpow2.f32 %v3589_v38 }
0x24ea   : > { %v5381_v39 = vpop.eup %5380 }
0x24eb   : > { %v3591_v40 = vsel %vm1466_vm3, %v5381_v39, 0.0 }
0x24ec   : > { %3592 = vadd.xlane.f32.xlu0 %v3591_v40 }
0x2502   : > { %3467 = vrot.lane.b32.xlu0 %v6872_v51, %s5944_s9  ;;  %s7255_s9 = sld [smem:[#allocation54_spill]] }
0x2506   : > { %3693 = vrot.lane.b32.xlu0 %v6791_v41, %s7252_s4 }
0x250a   : > { %3748 = vrot.lane.b32.xlu0 %v6800_v46, %s7252_s4  ;;  %v3745_v46 = vpop.permute.xlu1 %3744 }
0x250e   : > { %v3696_v2 = vpop.permute.xlu1 %3695 }
0x2512   : > { %v3700_v63 = vpop.permute.xlu1 %3699 }
0x2579   : > { %v3593_v56 = vpop.xlane.xlu0 %3592 }
0x257a   : > { %5382 = vrcp.f32 %v3593_v56 }
0x257d   : > { %v3468_v49 = vpop.permute.xlu0 %3467 }
0x257e   : > { %v3505_v50 = vadd.f32 %v3504_v43, %v3468_v49 }
0x2580   : > { %v3597_v42 = vpack.c.bf16 %v3505_v50, %v3505_v50 }
0x2581   : > { %v3694_v53 = vpop.permute.xlu0 %3693 }
0x2582   : > { %v3602_v52 = vsel %vm1529_vm4, %v3597_v42, 0 }
0x2583   : > { %5049 = vmatpush3.bf16.msra.mxu0 %v3602_v52 }
0x2584   : > { %v5383_v9 = vpop.eup %5382  ;;  %5060 = vmatprep.subr.bf16.mxu0 %v5938_v0 }
0x2585   : > { %v3595_v41 = vmul.f32 %v5383_v9, %v5381_v39  ;;  %v3749_v17 = vpop.permute.xlu0 %3748 }
0x2587   : > { %v3596_v54 = vpack.c.bf16 %v3595_v41, %v3595_v41 }
0x2589   : > { %5051 = vmatmul.mubr.msk.bf16.vlgmr.msra.gmra.mrb[80].mxu0 %vm1466_vm3, %v3596_v54 }
0x258a   : > { %5061 = vmatpush3.bf16.msra.mxu0 %v3694_v53  ;;  %5064 = vmatprep.mubr.msk.bf16.mxu0 %vm5939_vm0, %v5938_v0 }
0x258b   : > { %5062 = vmatprep.subr.bf16.mxu0 %v5938_v0 }
0x258e   : > { %5063 = vmatpush3.bf16.msra.mxu0 %v3696_v2 }
0x258f   : > { %5076 = vmatprep.subr.bf16.mxu0 %v5938_v0 }
0x2591   : > { %5065 = vmatmul.mubr.msk.bf16.vlgmr.msra.gmra.mrb[84].mxu0 %vm1262_vm1, %v6810_v1 }
0x2592   : > { %5080 = vmatprep.mubr.msk.bf16.mxu0 %vm5939_vm0, %v5938_v0 }
0x265c   : > { %v3638_v58 = vpop.f32.mrb[80].mxu0 }
0x265d   : > { %v3644_v59 = vpack.c.bf16 %v3638_v58, %v3638_v58  ;;  %v5052_v61 = vpop.f32.mrb[81].mxu0 }
0x265e   : > { %v3641_v6 = vpop.f32.mrb[82].mxu0 }
0x265f   : > { %v5053_v62 = vpop.f32.mrb[83].mxu0  ;;  %5057 = vmatmul.mubr.msk.bf16.vlgmr.msra.gmra.mrb[80].mxu1 %vm1466_vm3, %v3644_v59 }
0x2660   : > { %5069 = vmatpush3.bf16.msra.mxu1 %v3743_v3  ;;  %5072 = vmatprep.mubr.msk.bf16.mxu1 %vm5939_vm0, %v5938_v0 }
0x2661   : > { %5070 = vmatprep.subr.bf16.mxu1 %v5938_v0 }
0x2664   : > { %v3736_v7 = vpop.f32.mrb[84].mxu0  ;;  %5071 = vmatpush3.bf16.msra.mxu1 %v3745_v46 }
0x2665   : > { %v3737_v1 = vadd.f32 %v3736_v7, %v3700_v63  ;;  %v5066_v44 = vpop.f32.mrb[85].mxu0  ;;  %5084 = vmatprep.subr.bf16.mxu1 %v5938_v0 }
0x2666   : > { %v3739_v8 = vpop.f32.mrb[86].mxu0 }
0x2667   : > { %5073 = vmatmul.mubr.msk.bf16.vlgmr.msra.gmra.mrb[84].mxu1 %vm1262_vm1, %v6781_v37  ;;  %3841 = vrot.lane.b32.xlu1 %v3737_v1, %s5940_s8  ;;  %v5067_v10 = vpop.f32.mrb[87].mxu0 }
0x2668   : > { %5086 = vmatprep.mubr.msk.bf16.mxu1 %vm5939_vm0, %v5938_v0 }
0x26d9   : > { %v3842_v11 = vpop.permute.xlu1 %3841 }
0x26da   : > { %v3843_v12 = vsel %vm1433_vm2, %v3842_v11, %v3737_v1 }
0x26db   : > { %3844 = vrot.lane.b32.xlu1 %v3843_v12, %s5940_s8 }
0x2732   : > { %v3686_v13 = vpop.f32.mrb[80].mxu1 }
0x2733   : > { %v7044_v14 = vadd.f32 %v3686_v13, %v6973_v5  ;;  %v5058_v15 = vpop.f32.mrb[81].mxu1 }
0x2734   : > { %v3689_v16 = vpop.f32.mrb[82].mxu1 }
0x2735   : > { %v5059_v57 = vpop.f32.mrb[83].mxu1 }
0x273a   : > { %v3785_v19 = vpop.f32.mrb[84].mxu1 }
0x273b   : > { %v3786_v20 = vadd.f32 %v3785_v19, %v3749_v17  ;;  %v5074_v21 = vpop.f32.mrb[85].mxu1 }
0x273c   : > { %v3788_v24 = vpop.f32.mrb[86].mxu1 }
0x273d   : > { %3854 = vrot.lane.b32.xlu0 %v3786_v20, %s5940_s8  ;;  %v5075_v4 = vpop.f32.mrb[87].mxu1  ;;  %v3853_v60 = vmul.f32 %v6833_v18, %v3786_v20 }
0x274d   : > { %v3845_v25 = vpop.permute.xlu1 %3844 }
0x274e   : > { %v3846_v29 = vsel %vm1433_vm2, %v3845_v25, %v3737_v1 }
0x274f   : > { %v3847_v30 = vmul.f32 %v3846_v29, %v6506_v26 }
0x2751   : > { %3849 = vrot.lane.b32.xlu1 %v3847_v30, %s5942_s7 }
0x2755   : > { %3793 = vrot.lane.b32.xlu1 %v6844_v27, %s7252_s4  ;;  %v3840_v27 = vmul.f32 %v6833_v18, %v3737_v1 }
0x27af   : > { %v3855_v5 = vpop.permute.xlu0 %3854 }
0x27b0   : > { %v3856_v32 = vsel %vm1433_vm2, %v3855_v5, %v3786_v20 }
0x27b1   : > { %3857 = vrot.lane.b32.xlu0 %v3856_v32, %s5940_s8  ;;  %s7253_s8 = sld [smem:[#allocation51_spill]]  ;;  %v5351_v32 = vld [vmem:[%s6105_s12 + $0x8] sm:$0xff]  }
0x27b7   : > { %v4619_v13 = vld [vmem:[%s7253_s8] ss:$0 sm:$0xff]  ;;  %s4635_s8 = sshll.u32 %s6138_s11, 7  ;;  %s5946_s11 = smov [#allocation25]  }
0x27c3   : > { %v3850_v22 = vpop.permute.xlu1 %3849 }
0x27c4   : > { %v3852_v40 = vadd.f32 %v3850_v22, %v3840_v27  ;;  %v4620_v22 = vld [vmem:[%s7255_s9] ss:$0 sm:$0xff] }
0x27c5   : > { %v4621_v27 = vld [vmem:[%s7256_s21] ss:$0 sm:$0xff] }
0x27c6   : > { %v3866_v35 = vmul.f32 0.35355338, %v3852_v40 }
0x27c7   : > { %v3794_v18 = vpop.permute.xlu1 %3793 }
0x2823   : > { %v3858_v33 = vpop.permute.xlu0 %3857 }
0x2824   : > { %v3859_v34 = vsel %vm1433_vm2, %v3858_v33, %v3786_v20 }
0x2825   : > { %v3860_v23 = vmul.f32 %v3859_v34, %v6506_v26  ;;  %v3867_v26 = vpack.c.bf16 %v3866_v35, %v3866_v35  ;;  %v5353_v35 = vld [vmem:[%s6105_s12 + $0x18] sm:$0xff]  }
0x2827   : > { %3862 = vrot.lane.b32.xlu0 %v3860_v23, %s5942_s7  ;;  %s7254_s7 = sld [smem:[#allocation58_spill]] }
0x282b   : > { %3791 = vrot.lane.b32.xlu0 %v6840_v31, %s7252_s4 }
0x282d   : > { %v5349_v5 = vld [vmem:[%s7254_s7 + $0x8] sm:$0xff]  }
0x2899   : > { %v3863_v38 = vpop.permute.xlu0 %3862 }
0x289a   : > { %v3865_v39 = vadd.f32 %v3863_v38, %v3853_v60 }
0x289c   : > { %v3868_v43 = vpack.c.bf16 %v3865_v39, %v3865_v39 }
0x289d   : > { %v3792_v31 = vpop.permute.xlu0 %3791 }
0x289e   : > { %v3873_v47 = vsel %vm1466_vm3, %v3868_v43, 0  ;;  %5077 = vmatpush3.bf16.msra.mxu0 %v3792_v31 }
0x289f   : > { %5085 = vmatpush3.bf16.xpose.msra.mxu1 %v3873_v47  ;;  %5078 = vmatprep.subr.bf16.mxu0 %v5938_v0  ;;  %v5352_v47 = vld [vmem:[%s6105_s12 + $0x10] sm:$0xff]  }
0x28a0   : > { %5096 = vmatprep.subr.bf16.mxu1 %v5938_v0 }
0x28a2   : > { %5079 = vmatpush3.bf16.msra.mxu0 %v3794_v18 }
0x28a3   : > { %5090 = vmatprep.subr.bf16.mxu0 %v5938_v0 }
0x28a5   : > { %5081 = vmatmul.mubr.msk.bf16.vlgmr.msra.gmra.mrb[88].mxu0 %vm1262_vm1, %v6781_v37 }
0x28a6   : > { %5087 = vmatmul.mubr.msk.bf16.vlgmr.msra.gmra.mrb[88].mxu1 %vm1466_vm3, %v3867_v26  ;;  %5092 = vmatprep.mubr.msk.bf16.mxu0 %vm5939_vm0, %v5938_v0  ;;  %v4622_v26 = vld [vmem:[%s6100_s29] ss:$0 sm:$0xff] }
0x28a7   : > { %5098 = vmatprep.mubr.msk.bf16.mxu1 %vm5939_vm0, %v5938_v0 }
0x2978   : > { %v3834_v41 = vpop.f32.mrb[88].mxu0 }
0x2979   : > { %v3909_v48 = vpop.f32.mrb[88].mxu1  ;;  %v5082_v46 = vpop.f32.mrb[89].mxu0 }
0x297a   : > { %v3910_v36 = vadd.f32 %v6855_v28, %v3909_v48  ;;  %v5088_v45 = vpop.f32.mrb[89].mxu1  ;;  %v3837_v28 = vpop.f32.mrb[90].mxu0 }
0x297b   : > { %v3912_v56 = vpop.f32.mrb[90].mxu1  ;;  %v5083_v54 = vpop.f32.mrb[91].mxu0 }
0x297c   : > { %v5089_v49 = vpop.f32.mrb[91].mxu1  ;;  %v3915_v50 = vsel %vm1466_vm3, %v3910_v36, -inf }
0x297d   : > { %3916 = vmax.xlane.f32.xlu0 %v3915_v50  ;;  %v4626_v50 = vld [vmem:[%s7257_s16] ss:$0 sm:$0xff]  ;;  %s7114_s16 = scalar_lea.hbm %s7260_s15, %s4635_s8 }
0x2993   : > { %3797 = vrot.lane.b32.xlu0 %v6872_v51, %s7252_s4  ;;  %v3975_v51 = vld [vmem:[#allocation23 + $0xc] sm:$0xf]  ;;  %s4545_s4 = sshll.u32 %s6406_s14, 3 }
0x2994   : > { %v3980_v61 = vsel %vm1529_vm4, %v3975_v51, 0  ;;  %s1216_s9 = scalar_lea.vmem [#allocation25], %s4545_s4 }
0x2995   : > { %5097 = vmatpush3.bf16.msra.mxu1 %v3980_v61  ;;  %s4258_s21 = sshll.u32 %s1216_s9, 4  ;;  %s7116_s21 = int_to_ptr.vmem [resolvable:$true] %s4258_s21 }
0x2996   : > { %5110 = vmatprep.subr.bf16.mxu1 %v5938_v0  ;;  %s5790_s5 = scalar_lea.vmem %s7116_s21, 128 }
0x2997   : > { %p5791_p1 = scmp.ne.s32.totalorder %s7116_s21, %s5790_s5 }
0x2999   : > { %p5792_p4 = pnand %p5791_p1, %p7261_p3 }
0x299b   : > { %p5793_p5 = pneg %p5792_p4 }
0x2a0a   : > { %v3917_v3 = vpop.xlane.xlu0 %3916 }
0x2a0b   : > { %v3918_v42 = vsub.f32 %v3910_v36, %v3917_v3 }
0x2a0d   : > { %v3919_v52 = vmul.f32 1.442695, %v3918_v42 }
0x2a0e   : > { %v3798_v53 = vpop.permute.xlu0 %3797 }
0x2a0f   : > { %5384 = vpow2.f32 %v3919_v52  ;;  %v3835_v2 = vadd.f32 %v3834_v41, %v3798_v53 }
0x2a11   : > { %v3927_v58 = vpack.c.bf16 %v3835_v2, %v3835_v2 }
0x2a13   : > { %v3932_v59 = vsel %vm1529_vm4, %v3927_v58, 0 }
0x2a14   : > { %5091 = vmatpush3.bf16.msra.mxu0 %v3932_v59 }
0x2a15   : > { %5102 = vmatprep.subr.bf16.mxu0 %v5938_v0 }
0x2a19   : > { %v5385_v37 = vpop.eup %5384 }
0x2a1a   : > { %v3921_v9 = vsel %vm1466_vm3, %v5385_v37, 0.0 }
0x2a1b   : > { %3922 = vadd.xlane.f32.xlu1 %v3921_v9 }
0x2aa8   : > { %v3923_v6 = vpop.xlane.xlu1 %3922 }
0x2aa9   : > { %5386 = vrcp.f32 %v3923_v6  ;;  %v4632_v6 = vld [vmem:[%s7258_s25] ss:$0 sm:$0xff]  ;;  %s5794_s25 = sshll.u32 %s5946_s11, 4  ;;  %s5795_s25 = int_to_ptr.vmem [resolvable:$false] %s5794_s25 }
0x2aaa   : > { %p5797_p7 = scmp.lt.s32.totalorder %s7116_s21, %s5795_s25 }
0x2ab3   : > { %v5387_v62 = vpop.eup %5386 }
0x2ab4   : > { %v3925_v63 = vmul.f32 %v5387_v62, %v5385_v37 }
0x2ab6   : > { %v3926_v7 = vpack.c.bf16 %v3925_v63, %v3925_v63  ;;  %v4633_v63 = vld [vmem:[%s7259_s23] ss:$0 sm:$0xff]  ;;  %s5796_s23 = scalar_lea.vmem %s5795_s25, 256 }
0x2ab7   : > { %p5798_p10 = scmp.lt.s32.totalorder %s5796_s23, %s5790_s5 }
0x2ab8   : > { %5093 = vmatmul.mubr.msk.bf16.vlgmr.msra.gmra.mrb[92].mxu0 %vm1466_vm3, %v3926_v7 }
0x2ab9   : > { %5106 = vmatprep.mubr.msk.bf16.mxu0 %vm5939_vm0, %v5938_v0  ;;  %p5799_p11 = por %p5798_p10, %p5797_p7 }
0x2abb   : > { %p5800_p12 = pnand %p5799_p11, %p5793_p5 }
0x2b8b   : > { %v3968_v1 = vpop.f32.mrb[92].mxu0 }
0x2b8c   : > { %v3974_v44 = vpack.c.bf16 %v3968_v1, %v3968_v1  ;;  %v5094_v8 = vpop.f32.mrb[93].mxu0 }
0x2b8d   : > { %v3971_v10 = vpop.f32.mrb[94].mxu0 }
0x2b8e   : > { %v5095_v11 = vpop.f32.mrb[95].mxu0  ;;  %5099 = vmatmul.mubr.msk.bf16.vlgmr.msra.gmra.mrb[92].mxu1 %vm1466_vm3, %v3974_v44 }
0x2b8f   : > { %5118 = vmatprep.mubr.msk.bf16.mxu1 %vm5939_vm0, %v5938_v0 }
0x2c61   : > { %v4016_v12 = vpop.f32.mrb[92].mxu1 }
0x2c62   : > { %v4022_v15 = vadd.f32 %v4016_v12, %v7044_v14  ;;  %v5100_v16 = vpop.f32.mrb[93].mxu1  ;;  %v5348_v14 = vld [vmem:[%s7254_s7] sm:$0xff]  }
0x2c63   : > { %v4019_v57 = vpop.f32.mrb[94].mxu1  ;;  %5103 = vmatpush3.bf16.msra.mxu0 %v5348_v14 }
0x2c64   : > { %v4030_v17 = vadd.f32 %v4619_v13, %v4022_v15  ;;  %v5101_v19 = vpop.f32.mrb[95].mxu1  ;;  %5104 = vmatprep.subr.bf16.mxu0 %v5938_v0 }
0x2c66   : > { %v4031_v20 = vadd.f32 %v4030_v17, %v6806_v55  ;;  %v5350_v55 = vld [vmem:[%s6105_s12] sm:$0xff]  }
0x2c67   : > { %5105 = vmatpush3.bf16.msra.mxu0 %v5349_v5  ;;  %5111 = vmatpush3.bf16.msra.mxu1 %v5350_v55 }
0x2c68   : > { %v4032_v21 = vsel %vm1262_vm1, %v4031_v20, 0.0  ;;  %5112 = vmatprep.subr.bf16.mxu1 %v5938_v0 }
0x2c69   : > { %4033 = vadd.xlane.f32.xlu1 %v4032_v21 }
0x2c6b   : > { %5113 = vmatpush3.bf16.msra.mxu1 %v5351_v32 }
0x2c6c   : > { %5114 = vmatprep.subr.bf16.mxu1 %v5938_v0 }
0x2c6f   : > { %5115 = vmatpush3.bf16.msra.mxu1 %v5352_v47 }
0x2c70   : > { %5116 = vmatprep.subr.bf16.mxu1 %v5938_v0 }
0x2c73   : > { %5117 = vmatpush3.bf16.msra.mxu1 %v5353_v35 }
0x2cf6   : > { %v4034_v24 = vpop.xlane.xlu1 %4033 }
0x2cf7   : > { %v4035_v4 = vmul.f32 0.03125, %v4034_v24 }
0x2cf9   : > { %v4036_v25 = vsub.f32 %v4031_v20, %v4035_v4 }
0x2cfb   : > { %v4037_v29 = vmul.f32 %v4036_v25, %v4036_v25 }
0x2cfd   : > { %v4038_v30 = vsel %vm1262_vm1, %v4037_v29, 0.0 }
0x2cfe   : > { %4039 = vadd.xlane.f32.xlu1 %v4038_v30 }
0x2d8b   : > { %v4040_v33 = vpop.xlane.xlu1 %4039 }
0x2d8c   : > { %v4041_v34 = vmul.f32 0.03125, %v4040_v33 }
0x2d8e   : > { %v4043_v23 = vadd.f32 1e-06, %v4041_v34 }
0x2d90   : > { %5388 = vrsqrt.f32 %v4043_v23 }
0x2d9a   : > { %v5389_v60 = vpop.eup %5388 }
0x2d9b   : > { %v4045_v38 = vmul.f32 %v5389_v60, %v4036_v25 }
0x2d9d   : > { %v4052_v39 = vmul.f32 %v4620_v22, %v4045_v38 }
0x2d9f   : > { %v4060_v40 = vadd.f32 %v4621_v27, %v4052_v39 }
0x2da1   : > { %v4061_v43 = vpack.c.bf16 %v4060_v40, %v4060_v40 }
0x2da3   : > { %5107 = vmatmul.mubr.msk.bf16.vlgmr.msra.gmra.mrb[96].mxu0 %vm1262_vm1, %v4061_v43 }
0x2e76   : > { %v4122_v31 = vpop.f32.mrb[96].mxu0 }
0x2e77   : > { %v4123_v18 = vadd.f32 %v4622_v26, %v4122_v31  ;;  %v5108_v48 = vpop.f32.mrb[97].mxu0 }
0x2e78   : > { %v4125_v36 = vpop.f32.mrb[98].mxu0 }
0x2e79   : > { %v4128_v45 = vmax.f32 %v4123_v18, 0.0  ;;  %v5109_v56 = vpop.f32.mrb[99].mxu0 }
0x2e7b   : > { %v4129_v49 = vpack.c.bf16 %v4128_v45, %v4128_v45 }
0x2e7d   : > { %5119 = vmatmul.mubr.msk.bf16.vlgmr.msra.gmra.mrb[96].mxu1 %vm4169_vm5, %v4129_v49 }
0x2f50   : > { %v4207_v3 = vpop.f32.mrb[96].mxu1 }
0x2f51   : > { %v4208_v42 = vadd.f32 %v4626_v50, %v4207_v3  ;;  %v5120_v52 = vpop.f32.mrb[97].mxu1 }
0x2f52   : > { %v4210_v37 = vpop.f32.mrb[98].mxu1 }
0x2f53   : > { %v4213_v9 = vadd.f32 %v4208_v42, %v4060_v40  ;;  %v5121_v0 = vpop.f32.mrb[99].mxu1 }
0x2f55   : > { %v4214_v41 = vsel %vm1262_vm1, %v4213_v9, 0.0 }
0x2f56   : > { %4215 = vadd.xlane.f32.xlu1 %v4214_v41 }
0x2fe3   : > { %v4216_v46 = vpop.xlane.xlu1 %4215 }
0x2fe4   : > { %v4217_v28 = vmul.f32 0.03125, %v4216_v46 }
0x2fe6   : > { %v4218_v53 = vsub.f32 %v4213_v9, %v4217_v28 }
0x2fe8   : > { %v4219_v54 = vmul.f32 %v4218_v53, %v4218_v53 }
0x2fea   : > { %v4220_v2 = vsel %vm1262_vm1, %v4219_v54, 0.0 }
0x2feb   : > { %4221 = vadd.xlane.f32.xlu1 %v4220_v2 }
0x3078   : > { %v4222_v58 = vpop.xlane.xlu1 %4221 }
0x3079   : > { %v4223_v59 = vmul.f32 0.03125, %v4222_v58 }
0x307b   : > { %v4225_v51 = vadd.f32 1e-06, %v4223_v59 }
0x307d   : > { %5390 = vrsqrt.f32 %v4225_v51 }
0x3087   : > { %v5391_v61 = vpop.eup %5390 }
0x3088   : > { %v4227_v62 = vmul.f32 %v5391_v61, %v4218_v53 }
0x308a   : > { %v4234_v7 = vmul.f32 %v4632_v6, %v4227_v62 }
0x308c   : > { %v4242_v1 = vadd.f32 %v4633_v63, %v4234_v7 }
0x308e   : > { %4243 = vst.msk [vmem:[%s1216_s9] sm:$0xff] %vm1262_vm1, %v4242_v1 }
0x308f   : > { %5803 = shalt.err (!%p5800_p12)
}
0x3090   : > { %s5804_s14 = scalar_lea.hbm %s7114_s16, 128  ;;  %s5808_s4 = scalar_lea.hbm %s7260_s15, 256 }
0x3091   : > { %p5805_p13 = scmp.ne.s32.totalorder %s7114_s16, %s5804_s14  ;;  %p5809_p0 = scmp.lt.u32.totalorder %s7114_s16, %s7260_s15 }
0x3092   : > { %p5810_p8 = scmp.lt.u32.totalorder %s5808_s4, %s5804_s14  ;;  %p5812_p1 = scmp.lt.u32.totalorder %s5804_s14, %s7114_s16 }
0x3093   : > { %p5806_p6 = pnand %p5805_p13, %p7261_p3 }
0x3094   : > { %p5811_p2 = por %p5810_p8, %p5809_p0 }
0x3095   : > { %p5807_p9 = pneg %p5806_p6 }
0x3096   : > { %p5813_p4 = por %p5812_p1, %p5811_p2 }
0x3098   : > { %p5814_p5 = pnand %p5813_p4, %p5807_p9 }
0x309a   : > { %5817 = shalt.err (!%p5814_p5)
}
0x309b   : > { %5174 = dma.vmem_to_hbm [thread:$0]  (%p7261_p3), %s7116_s21, 128, %s7114_s16, %s4245_s3  }
0x309c PF: > { %s4270_s5 = sand.u32 1, %s5876_s28   ;;  %p7262_p7 = scmp.ne.s32.totalorder %s7224_s18, 0 }
0x309d   : > { %p7263_p10 = scmp.ge.s32.totalorder %s5888_s0, 2  ;;  %s4271_s8 = scalar_lea.sflag [#allocation4], %s4270_s5 }
0x309f   : > { %p5221_p11 = pnand %p7263_p10, %p7262_p7 }
0x30a1   : > { %5871 = dma.done.wait (!%p5221_p11), %s4271_s8, 128  }
0x30a2   : > { %5873 = vsyncadd (!%p5221_p11), %s4271_s8, 4294967168  ;;  %p87_p12 = scmp.ge.s32.totalorder %s6310_s26, 4   ;;  %s7264_s28 = smov %s5880_s1 }
0x30a3   : > { %s7265_s1 = smov %s5884_s2  ;;  %s7266_s2 = smov %s6321_s22 }
0x30a4   : > { %s7267_s0 = smov %s6310_s26  ;;  %89 = sbr.rel (!%p87_p12) target bundleno = 78 (0x4e), region = 292 }
0x30ab   :  { %4276 = vsyncpa [#allocation3], 1 }
0x30ac   :  { %4278 = vsyncpa [#allocation3 + $0x1], 1 }
0x30ad   :  { %4279 = vsyncpa [#allocation6], 1 }
0x30ae   :  { %4281 = vsyncpa [#allocation6 + $0x1], 1 }
0x30af   :  { %4282 = vsyncpa [#allocation9], 1 }
0x30b0   :  { %4283 = vsyncpa [#allocation12], 1 }
0x30b1   :  { %4284 = vsyncpa [#allocation15], 1 }
0x30b2   :  { %4285 = vsyncpa [#allocation18], 1 }
0x30b3   :  { %4286 = vsyncpa [#allocation21], 1 }
0x30b4   :  { %4287 = vsyncpa [#allocation24], 1 }
0x30b5   :  { %4288 = vsyncpa [#allocation4], 1 }
0x30b6   :  { %4290 = vsyncpa [#allocation4 + $0x1], 1 }

// kernel: tpu_custom_call.1
= control target key start
LH: loop header
LB: loop body
LE: loop exit
PB: predicated region body
PF: predicated region fallthrough
CT: control target
= control target key end

     0   :  { %s5890_s6 = smov 1   ;;  %s5891_s10 = smov 2   ;;  %s7155_s0 = inlined_call_operand.smem [shape: u32[33], index: -1, kind: input, shape index: {}] }
   0x1   :  { %s5955_s5 = sld [smem:[%s7155_s0]]   ;;  %s5892_s14 = smov 3  }
   0x2   :  { %s5960_s9 = sld [smem:[%s7155_s0 + %s5890_s6]]   ;;  %s5893_s18 = smov 4  }
   0x3   :  { %s5965_s13 = sld [smem:[%s7155_s0 + %s5891_s10]]   ;;  %s5894_s22 = smov 5  }
   0x4   :  { %s5970_s17 = sld [smem:[%s7155_s0 + %s5892_s14]]   ;;  %s5895_s26 = smov 6  }
   0x5   :  { %s5975_s21 = sld [smem:[%s7155_s0 + %s5893_s18]]   ;;  %s5896_s30 = smov 7  }
   0x6   :  { %s5980_s25 = sld [smem:[%s7155_s0 + %s5894_s22]]   ;;  %s5897_s4 = smov 8  }
   0x7   :  { %7182 = sst [smem:[#allocation36_spill]] %s5955_s5  ;;  %s5898_s10 = smov 9  }
   0x8   :  { %7183 = sst [smem:[#allocation37_spill]] %s5960_s9  ;;  %s5899_s15 = smov 10  }
   0x9   :  { %7184 = sst [smem:[#allocation38_spill]] %s5965_s13  ;;  %s5900_s20 = smov 11  }
   0xa   :  { %s5985_s29 = sld [smem:[%s7155_s0 + %s5895_s26]]   ;;  %s5901_s26 = smov 12  }
   0xb   :  { %7185 = sst [smem:[#allocation39_spill]] %s5975_s21  ;;  %s5902_s1 = smov 13  }
   0xc   :  { %7186 = sst [smem:[#allocation40_spill]] %s5980_s25  ;;  %s5903_s7 = smov 14  }
   0xd   :  { %s5990_s3 = sld [smem:[%s7155_s0 + %s5896_s30]]   ;;  %s5905_s22 = smov 16  }
   0xe   :  { %s5995_s8 = sld [smem:[%s7155_s0 + %s5897_s4]]   ;;  %s5906_s28 = smov 17  }
   0xf   :  { %s6000_s14 = sld [smem:[%s7155_s0 + %s5898_s10]]  }
  0x10   :  { %7187 = sst [smem:[#allocation41_spill]] %s5985_s29 }
  0x11   :  { %s6005_s19 = sld [smem:[%s7155_s0 + %s5899_s15]]   ;;  %s5904_s15 = smov 15  }
  0x12   :  { %s6010_s24 = sld [smem:[%s7155_s0 + %s5900_s20]]  }
  0x13   :  { %7188 = sst [smem:[#allocation42_spill]] %s5990_s3 }
  0x14   :  { %7189 = sst [smem:[#allocation43_spill]] %s5995_s8 }
  0x15   :  { %7190 = sst [smem:[#allocation44_spill]] %s6000_s14 }
  0x16   :  { %s6015_s30 = sld [smem:[%s7155_s0 + %s5901_s26]]  }
  0x17   :  { %7191 = sst [smem:[#allocation45_spill]] %s6005_s19 }
  0x18   :  { %s6020_s6 = sld [smem:[%s7155_s0 + %s5902_s1]]  }
  0x19   :  { %s6025_s12 = sld [smem:[%s7155_s0 + %s5903_s7]]   ;;  %s5907_s7 = smov 18  }
  0x1a   :  { %s6030_s20 = sld [smem:[%s7155_s0 + %s5904_s15]]   ;;  %s5908_s15 = smov 19  }
  0x1b   :  { %s6035_s27 = sld [smem:[%s7155_s0 + %s5905_s22]]   ;;  %s5909_s22 = smov 20  }
  0x1c   :  { %s6040_s4 = sld [smem:[%s7155_s0 + %s5906_s28]]   ;;  %s5910_s28 = smov 21  }
  0x1d   :  { %s6050_s9 = sld [smem:[%s7155_s0 + %s5908_s15]]   ;;  %s5912_s15 = smov 23  }
  0x1e   :  { %7192 = sst [smem:[#allocation46_spill]] %s6020_s6 }
  0x1f   :  { %7193 = sst [smem:[#allocation47_spill]] %s6025_s12 }
  0x20   :  { %s6045_s12 = sld [smem:[%s7155_s0 + %s5907_s7]]   ;;  %s5911_s7 = smov 22  }
  0x21   :  { %s6055_s19 = sld [smem:[%s7155_s0 + %s5909_s22]]   ;;  %s5913_s22 = smov 24  }
  0x22   :  { %7194 = sst [smem:[#allocation48_spill]] %s6040_s4 }
  0x23   :  { %7196 = sst [smem:[#allocation50_spill]] %s6050_s9 }
  0x24   :  { %s6060_s29 = sld [smem:[%s7155_s0 + %s5910_s28]]   ;;  %s5914_s28 = smov 25  }
  0x25   :  { %s6070_s9 = sld [smem:[%s7155_s0 + %s5912_s15]]   ;;  %s5916_s15 = smov 27  }
  0x26   :  { %7195 = sst [smem:[#allocation49_spill]] %s6045_s12 }
  0x27   :  { %s6065_s12 = sld [smem:[%s7155_s0 + %s5911_s7]]   ;;  %s5915_s7 = smov 26  }
  0x28   :  { %s6075_s5 = sld [smem:[%s7155_s0 + %s5913_s22]]   ;;  %s5917_s22 = smov 28  }
  0x2a   :  { %7197 = sst [smem:[#allocation51_spill]] %s6060_s29 }
  0x2b   :  { %7199 = sst [smem:[#allocation53_spill]] %s6070_s9 }
  0x2c   :  { %s6080_s29 = sld [smem:[%s7155_s0 + %s5914_s28]]   ;;  %s5918_s28 = smov 29  }
  0x2d   :  { %7198 = sst [smem:[#allocation52_spill]] %s6065_s12 }
  0x2e   :  { %7200 = sst [smem:[#allocation54_spill]] %s6075_s5 }
  0x2f   :  { %s6085_s12 = sld [smem:[%s7155_s0 + %s5915_s7]]   ;;  %s5919_s7 = smov 30  }
  0x30   :  { %s6090_s9 = sld [smem:[%s7155_s0 + %s5916_s15]]   ;;  %s5920_s15 = smov 31  }
  0x31   :  { %s6095_s5 = sld [smem:[%s7155_s0 + %s5917_s22]]   ;;  %s5921_s22 = smov 32  }
  0x32   :  { %7201 = sst [smem:[#allocation55_spill]] %s6080_s29 }
  0x33   :  { %s6100_s29 = sld [smem:[%s7155_s0 + %s5918_s28]]  }
  0x35   :  { %7202 = sst [smem:[#allocation56_spill]] %s6085_s12 }
  0x36   :  { %7203 = sst [smem:[#allocation57_spill]] %s6090_s9 }
  0x37   :  { %7204 = sst [smem:[#allocation58_spill]] %s6095_s5 }
  0x38   :  { %s6105_s12 = sld [smem:[%s7155_s0 + %s5919_s7]]  }
  0x39   :  { %s6110_s9 = sld [smem:[%s7155_s0 + %s5920_s15]]  }
  0x3a   :  { %s6115_s5 = sld [smem:[%s7155_s0 + %s5921_s22]]  }
  0x3f   :  { %7205 = sst [smem:[#allocation59_spill]] %s6110_s9 }
  0x40   :  { %7206 = sst [smem:[#allocation60_spill]] %s6115_s5 }
  0x41   :  { %70 = vsyncpa [#allocation3], 0 }
  0x42   :  { %72 = vsyncpa [#allocation3 + $0x1], 0 }
  0x43   :  { %73 = vsyncpa [#allocation6], 0 }
  0x44   :  { %75 = vsyncpa [#allocation6 + $0x1], 0 }
  0x45   :  { %76 = vsyncpa [#allocation9], 0 }
  0x46   :  { %77 = vsyncpa [#allocation12], 0 }
  0x47   :  { %78 = vsyncpa [#allocation15], 0 }
  0x48   :  { %79 = vsyncpa [#allocation18], 0 }
  0x49   :  { %80 = vsyncpa [#allocation21], 0 }
  0x4a   :  { %81 = vsyncpa [#allocation24], 0 }
  0x4b   :  { %82 = vsyncpa [#allocation4], 0 }
  0x4c   :  { %84 = vsyncpa [#allocation4 + $0x1], 0  ;;  %s6117_s28 = smov 0   ;;  %s6119_s1 = smov 0  }
  0x4d   :  { %s6121_s2 = smov 0   ;;  %s6123_s0 = smov 0  }
  0x4e LB: > { %s7207_s13 = sld [smem:[#allocation38_spill]]  ;;  %s7208_s14 = sld [smem:[#allocation44_spill]]  ;;  %s5888_s0 = sphi %s6123_s0, %s7267_s0   ;;  %s5884_s2 = sphi %s6121_s2, %s7266_s2   ;;  %s5880_s1 = sphi %s6119_s1, %s7265_s1   ;;  %s5876_s28 = sphi %s6117_s28, %s7264_s28  }
  0x4f   : > { %s7209_s8 = sld [smem:[#allocation43_spill]]  ;;  %s7210_s6 = sld [smem:[#allocation46_spill]] }
  0x50   : > { %s7211_s4 = sld [smem:[#allocation48_spill]]  ;;  %s7212_s3 = sld [smem:[#allocation42_spill]] }
  0x51   : > { %s7213_s25 = sld [smem:[#allocation40_spill]]  ;;  %s7214_s21 = sld [smem:[#allocation39_spill]] }
  0x52   : > { %s5922_s7 = smov [#allocation7]   ;;  %s6138_s11 = sadd.s32 4294967295, %s5888_s0  }
  0x53   : > { %s826_s10 = sshll.u32 %s5922_s7, 4  ;;  %p4516_p0 = scmp.ge.s32.totalorder %s5888_s0, 1  ;;  %s827_s10 = int_to_ptr.vmem [resolvable:$true] %s826_s10 }
  0x54   : > { %p7162_p1 = scmp.eq.s32.totalorder %s6138_s11, 0  ;;  %p813_p2 = scmp.lt.s32.totalorder %s5888_s0, 3 }
  0x55   : > { %s5923_s16 = smov [#allocation8]   ;;  %s5924_s22 = smov [#allocation11]  }
  0x56   : > { %p6143_p3 = pnand %p4516_p0, %p813_p2  ;;  %s837_s18 = sshll.u32 %s5923_s16, 4  ;;  %s6150_s18 = int_to_ptr.vmem [resolvable:$true] %s837_s18 }
  0x57   : > { %s861_s23 = sshll.u32 %s5924_s22, 4  ;;  %s5394_s7 = scalar_lea.hbm %s7214_s21, 128  ;;  %s6158_s23 = int_to_ptr.vmem [resolvable:$true] %s861_s23 }
  0x58   : > { %s7215_s15 = scalar_select %p6143_p3, 1, 0 }
  0x59   : > { %p5176_p5 = pneg %p6143_p3  ;;  %p5395_p7 = scmp.ne.s32.totalorder %s7214_s21, %s5394_s7 }
  0x5a   : > { %p5401_p11 = scmp.lt.u32.totalorder %s5394_s7, %s7214_s21 }
  0x5b   : > { %p6154_p6 = pnand %p5176_p5, %p7162_p1 }
  0x5d   : > { %p6164_p8 = pneg %p6154_p6 }
  0x5f   : > { %p5397_p9 = pnand %p6164_p8, %p5395_p7 }
  0x61   : > { %p5398_p10 = pneg %p5397_p9 }
  0x63   : > { %p5403_p12 = pnand %p5401_p11, %p5398_p10 }
  0x65   : > { %5406 = shalt.err (!%p5403_p12)
}
  0x66   : > { %s5407_s16 = scalar_lea.vmem %s827_s10, 128  ;;  %p5415_p5 = scmp.lt.s32.totalorder %s827_s10, %s827_s10 }
  0x67   : > { %p5408_p13 = scmp.ne.s32.totalorder %s827_s10, %s5407_s16  ;;  %p5416_p4 = scmp.lt.s32.totalorder %s5407_s16, %s5407_s16 }
  0x69   : > { %p5410_p0 = pnand %p5408_p13, %p6164_p8  ;;  %p5417_p1 = por %p5416_p4, %p5415_p5 }
  0x6b   : > { %p5411_p2 = pneg %p5410_p0 }
  0x6d   : > { %p5418_p3 = pnand %p5417_p1, %p5411_p2 }
  0x6f   : > { %5421 = shalt.err (!%p5418_p3)
}
  0x70   : > { %5179 = dma.hbm_to_vmem [thread:$0]  (!%p6154_p6), %s7214_s21, 128, %s827_s10, [#allocation6]  }
  0x71   : > { %s5422_s22 = scalar_lea.hbm %s7213_s25, 128 }
  0x72   : > { %p5423_p7 = scmp.ne.s32.totalorder %s7213_s25, %s5422_s22  ;;  %p5429_p11 = scmp.lt.u32.totalorder %s5422_s22, %s7213_s25 }
  0x74   : > { %p5425_p9 = pnand %p5423_p7, %p6164_p8 }
  0x76   : > { %p5426_p10 = pneg %p5425_p9 }
  0x78   : > { %p5431_p12 = pnand %p5429_p11, %p5426_p10 }
  0x7a   : > { %5434 = shalt.err (!%p5431_p12)
}
  0x7b   : > { %s5435_s7 = scalar_lea.vmem %s6150_s18, 128  ;;  %p5443_p13 = scmp.lt.s32.totalorder %s6150_s18, %s6150_s18 }
  0x7c   : > { %p5436_p1 = scmp.ne.s32.totalorder %s6150_s18, %s5435_s7  ;;  %p5444_p0 = scmp.lt.s32.totalorder %s5435_s7, %s5435_s7 }
  0x7e   : > { %p5438_p3 = pnand %p5436_p1, %p6164_p8  ;;  %p5445_p2 = por %p5444_p0, %p5443_p13 }
  0x80   : > { %p5439_p4 = pneg %p5438_p3 }
  0x82   : > { %p5446_p5 = pnand %p5445_p2, %p5439_p4 }
  0x84   : > { %5449 = shalt.err (!%p5446_p5)
}
  0x85   : > { %5182 = dma.hbm_to_vmem [thread:$0]  (!%p6154_p6), %s7213_s25, 128, %s6150_s18, [#allocation9]  }
  0x86   : > { %s5450_s10 = scalar_lea.hbm %s7209_s8, 256 }
  0x87   : > { %p5451_p7 = scmp.ne.s32.totalorder %s7209_s8, %s5450_s10  ;;  %p5457_p11 = scmp.lt.u32.totalorder %s5450_s10, %s7209_s8 }
  0x89   : > { %p5453_p9 = pnand %p5451_p7, %p6164_p8 }
  0x8b   : > { %p5454_p10 = pneg %p5453_p9 }
  0x8d   : > { %p5459_p12 = pnand %p5457_p11, %p5454_p10 }
  0x8f   : > { %5462 = shalt.err (!%p5459_p12)
}
  0x90   : > { %s5463_s16 = scalar_lea.vmem %s6158_s23, 256  ;;  %p5471_p13 = scmp.lt.s32.totalorder %s6158_s23, %s6158_s23 }
  0x91   : > { %p5464_p1 = scmp.ne.s32.totalorder %s6158_s23, %s5463_s16  ;;  %p5472_p0 = scmp.lt.s32.totalorder %s5463_s16, %s5463_s16 }
  0x93   : > { %p5466_p3 = pnand %p5464_p1, %p6164_p8  ;;  %p5473_p2 = por %p5472_p0, %p5471_p13 }
  0x95   : > { %p5467_p4 = pneg %p5466_p3 }
  0x97   : > { %p5474_p5 = pnand %p5473_p2, %p5467_p4 }
  0x99   : > { %5477 = shalt.err (!%p5474_p5)
}
  0x9a   : > { %s7166_s18 = smov 64   ;;  %s7168_s22 = smov 4  }
  0x9b   : > { %5188 = dma.hbm_to_vmem [thread:$0]  (!%p6154_p6), %s7209_s8, 256, %s6158_s23, [#allocation12], %s7166_s18, %s7166_s18, %s7168_s22  }
  0x9c   : > { %s5927_s7 = smov [#allocation14]   ;;  %s5928_s16 = smov [#allocation17]  }
  0x9d   : > { %s889_s10 = sshll.u32 %s5927_s7, 4  ;;  %s913_s21 = sshll.u32 %s5928_s16, 4  ;;  %s890_s10 = int_to_ptr.vmem [resolvable:$true] %s889_s10  ;;  %s914_s21 = int_to_ptr.vmem [resolvable:$true] %s913_s21 }
  0x9e   : > { %s5478_s25 = scalar_lea.hbm %s6010_s24, 16 }
  0x9f   : > { %p5479_p7 = scmp.ne.s32.totalorder %s6010_s24, %s5478_s25  ;;  %p5485_p11 = scmp.lt.u32.totalorder %s5478_s25, %s6010_s24 }
  0xa1   : > { %p5481_p9 = pnand %p5479_p7, %p6164_p8 }
  0xa3   : > { %p5482_p10 = pneg %p5481_p9 }
  0xa5   : > { %p5487_p12 = pnand %p5485_p11, %p5482_p10 }
  0xa7   : > { %5490 = shalt.err (!%p5487_p12)
}
  0xa8   : > { %s5491_s9 = scalar_lea.vmem %s890_s10, 16  ;;  %s5498_s23 = scalar_lea.vmem %s890_s10, 32 }
  0xa9   : > { %p5492_p1 = scmp.ne.s32.totalorder %s890_s10, %s5491_s9  ;;  %p5499_p13 = scmp.lt.s32.totalorder %s890_s10, %s890_s10 }
  0xaa   : > { %p5500_p0 = scmp.lt.s32.totalorder %s5498_s23, %s5491_s9 }
  0xab   : > { %p5494_p3 = pnand %p5492_p1, %p6164_p8 }
  0xac   : > { %p5501_p2 = por %p5500_p0, %p5499_p13 }
  0xad   : > { %p5495_p4 = pneg %p5494_p3 }
  0xaf   : > { %p5502_p5 = pnand %p5501_p2, %p5495_p4 }
  0xb1   : > { %5505 = shalt.err (!%p5502_p5)
}
  0xb2   : > { %5194 = dma.hbm_to_vmem [thread:$0]  (!%p6154_p6), %s6010_s24, 16, %s890_s10, [#allocation15]  }
  0xb3   : > { %s5506_s25 = scalar_lea.hbm %s7210_s6, 16 }
  0xb4   : > { %p5507_p7 = scmp.ne.s32.totalorder %s7210_s6, %s5506_s25  ;;  %p5513_p11 = scmp.lt.u32.totalorder %s5506_s25, %s7210_s6 }
  0xb6   : > { %p5509_p9 = pnand %p5507_p7, %p6164_p8 }
  0xb8   : > { %p5510_p10 = pneg %p5509_p9 }
  0xba   : > { %p5515_p12 = pnand %p5513_p11, %p5510_p10 }
  0xbc   : > { %5518 = shalt.err (!%p5515_p12)
}
  0xbd   : > { %s5519_s9 = scalar_lea.vmem %s914_s21, 16  ;;  %s5526_s7 = scalar_lea.vmem %s914_s21, 32 }
  0xbe   : > { %p5520_p1 = scmp.ne.s32.totalorder %s914_s21, %s5519_s9  ;;  %p5527_p13 = scmp.lt.s32.totalorder %s914_s21, %s914_s21 }
  0xbf   : > { %p5528_p0 = scmp.lt.s32.totalorder %s5526_s7, %s5519_s9 }
  0xc0   : > { %p5522_p3 = pnand %p5520_p1, %p6164_p8 }
  0xc1   : > { %p5529_p2 = por %p5528_p0, %p5527_p13 }
  0xc2   : > { %p5523_p4 = pneg %p5522_p3 }
  0xc4   : > { %p5530_p5 = pnand %p5529_p2, %p5523_p4 }
  0xc6   : > { %5533 = shalt.err (!%p5530_p5)
}
  0xc7   : > { %5200 = dma.hbm_to_vmem [thread:$0]  (!%p6154_p6), %s7210_s6, 16, %s914_s21, [#allocation18]  }
  0xc8   : > { %s5929_s10 = smov [#allocation20]   ;;  %s5930_s23 = smov [#allocation10]  }
  0xc9   : > { %s937_s16 = sshll.u32 %s5929_s10, 4  ;;  %s851_s25 = sshll.u32 %s5930_s23, 4  ;;  %s938_s16 = int_to_ptr.vmem [resolvable:$true] %s937_s16  ;;  %s852_s25 = int_to_ptr.vmem [resolvable:$true] %s851_s25 }
  0xca   : > { %s5534_s18 = scalar_lea.hbm %s6035_s27, 256 }
  0xcb   : > { %p5535_p7 = scmp.ne.s32.totalorder %s6035_s27, %s5534_s18  ;;  %p5541_p11 = scmp.lt.u32.totalorder %s5534_s18, %s6035_s27 }
  0xcd   : > { %p5537_p9 = pnand %p5535_p7, %p6164_p8 }
  0xcf   : > { %p5538_p10 = pneg %p5537_p9 }
  0xd1   : > { %p5543_p12 = pnand %p5541_p11, %p5538_p10 }
  0xd3   : > { %5546 = shalt.err (!%p5543_p12)
}
  0xd4   : > { %s5547_s9 = scalar_lea.vmem %s938_s16, 256  ;;  %p5555_p13 = scmp.lt.s32.totalorder %s938_s16, %s938_s16 }
  0xd5   : > { %p5548_p1 = scmp.ne.s32.totalorder %s938_s16, %s5547_s9  ;;  %p5556_p0 = scmp.lt.s32.totalorder %s5547_s9, %s5547_s9 }
  0xd7   : > { %p5550_p3 = pnand %p5548_p1, %p6164_p8  ;;  %p5557_p2 = por %p5556_p0, %p5555_p13 }
  0xd9   : > { %p5551_p4 = pneg %p5550_p3 }
  0xdb   : > { %p5558_p5 = pnand %p5557_p2, %p5551_p4 }
  0xdd   : > { %5561 = shalt.err (!%p5558_p5)
}
  0xde   : > { %s7218_s21 = smov 64   ;;  %s5562_s18 = scalar_lea.hbm %s7212_s3, 16 }
  0xdf   : > { %5206 = dma.hbm_to_vmem [thread:$0]  (!%p6154_p6), %s6035_s27, 256, %s938_s16, [#allocation21], %s7218_s21, %s7218_s21, %s7168_s22  }
  0xe0   : > { %p5563_p7 = scmp.ne.s32.totalorder %s7212_s3, %s5562_s18  ;;  %p5569_p11 = scmp.lt.u32.totalorder %s5562_s18, %s7212_s3 }
  0xe2   : > { %p5565_p9 = pnand %p5563_p7, %p6164_p8 }
  0xe4   : > { %p5566_p10 = pneg %p5565_p9 }
  0xe6   : > { %p5571_p12 = pnand %p5569_p11, %p5566_p10 }
  0xe8   : > { %5574 = shalt.err (!%p5571_p12)
}
  0xe9   : > { %s5575_s7 = scalar_lea.vmem %s852_s25, 16  ;;  %s5582_s10 = scalar_lea.vmem %s852_s25, 32 }
  0xea   : > { %p5576_p1 = scmp.ne.s32.totalorder %s852_s25, %s5575_s7  ;;  %p5583_p13 = scmp.lt.s32.totalorder %s852_s25, %s852_s25 }
  0xeb   : > { %p5584_p0 = scmp.lt.s32.totalorder %s5582_s10, %s5575_s7 }
  0xec   : > { %p5578_p3 = pnand %p5576_p1, %p6164_p8 }
  0xed   : > { %p5585_p2 = por %p5584_p0, %p5583_p13 }
  0xee   : > { %p5579_p4 = pneg %p5578_p3 }
  0xf0   : > { %p5586_p5 = pnand %p5585_p2, %p5579_p4 }
  0xf2   : > { %5589 = shalt.err (!%p5586_p5)
}
  0xf3   : > { %5185 = dma.hbm_to_vmem [thread:$0]  (!%p6154_p6), %s7212_s3, 16, %s852_s25, [#allocation9]  }
  0xf4   : > { %s5931_s16 = smov [#allocation13]   ;;  %s5932_s9 = smov [#allocation16]  }
  0xf5   : > { %s875_s23 = sshll.u32 %s5931_s16, 4  ;;  %s899_s18 = sshll.u32 %s5932_s9, 4  ;;  %s876_s23 = int_to_ptr.vmem [resolvable:$true] %s875_s23  ;;  %s900_s18 = int_to_ptr.vmem [resolvable:$true] %s899_s18 }
  0xf6   : > { %s5590_s22 = scalar_lea.hbm %s7208_s14, 16 }
  0xf7   : > { %p5591_p7 = scmp.ne.s32.totalorder %s7208_s14, %s5590_s22  ;;  %p5597_p11 = scmp.lt.u32.totalorder %s5590_s22, %s7208_s14 }
  0xf9   : > { %p5593_p9 = pnand %p5591_p7, %p6164_p8 }
  0xfb   : > { %p5594_p10 = pneg %p5593_p9 }
  0xfd   : > { %p5599_p12 = pnand %p5597_p11, %p5594_p10 }
  0xff   : > { %5602 = shalt.err (!%p5599_p12)
}
 0x100   : > { %s5603_s7 = scalar_lea.vmem %s876_s23, 16  ;;  %s5610_s25 = scalar_lea.vmem %s876_s23, 32 }
 0x101   : > { %p5604_p1 = scmp.ne.s32.totalorder %s876_s23, %s5603_s7  ;;  %p5611_p13 = scmp.lt.s32.totalorder %s876_s23, %s876_s23 }
 0x102   : > { %p5612_p0 = scmp.lt.s32.totalorder %s5610_s25, %s5603_s7 }
 0x103   : > { %p5606_p3 = pnand %p5604_p1, %p6164_p8 }
 0x104   : > { %p5613_p2 = por %p5612_p0, %p5611_p13 }
 0x105   : > { %p5607_p4 = pneg %p5606_p3 }
 0x107   : > { %p5614_p5 = pnand %p5613_p2, %p5607_p4 }
 0x109   : > { %5617 = shalt.err (!%p5614_p5)
}
 0x10a   : > { %5191 = dma.hbm_to_vmem [thread:$0]  (!%p6154_p6), %s7208_s14, 16, %s876_s23, [#allocation12]  }
 0x10b   : > { %s5618_s22 = scalar_lea.hbm %s6015_s30, 256 }
 0x10c   : > { %p5619_p7 = scmp.ne.s32.totalorder %s6015_s30, %s5618_s22  ;;  %p5625_p11 = scmp.lt.u32.totalorder %s5618_s22, %s6015_s30 }
 0x10e   : > { %p5621_p9 = pnand %p5619_p7, %p6164_p8 }
 0x110   : > { %p5622_p10 = pneg %p5621_p9 }
 0x112   : > { %p5627_p12 = pnand %p5625_p11, %p5622_p10 }
 0x114   : > { %5630 = shalt.err (!%p5627_p12)
}
 0x115   : > { %s5631_s10 = scalar_lea.vmem %s900_s18, 256  ;;  %p5639_p13 = scmp.lt.s32.totalorder %s900_s18, %s900_s18 }
 0x116   : > { %p5632_p1 = scmp.ne.s32.totalorder %s900_s18, %s5631_s10  ;;  %p5640_p0 = scmp.lt.s32.totalorder %s5631_s10, %s5631_s10 }
 0x118   : > { %p5634_p3 = pnand %p5632_p1, %p6164_p8  ;;  %p5641_p2 = por %p5640_p0, %p5639_p13 }
 0x11a   : > { %p5635_p4 = pneg %p5634_p3 }
 0x11c   : > { %p5642_p5 = pnand %p5641_p2, %p5635_p4 }
 0x11e   : > { %5645 = shalt.err (!%p5642_p5)
}
 0x11f   : > { %s7219_s16 = smov 4   ;;  %s5933_s23 = smov [#allocation19]  }
 0x120   : > { %5197 = dma.hbm_to_vmem [thread:$0]  (!%p6154_p6), %s6015_s30, 256, %s900_s18, [#allocation15], %s7218_s21, %s7218_s21, %s7219_s16  }
 0x121   : > { %s927_s9 = sshll.u32 %s5933_s23, 4  ;;  %s5934_s7 = smov [#allocation22]   ;;  %s928_s9 = int_to_ptr.vmem [resolvable:$true] %s927_s9 }
 0x122   : > { %s951_s25 = sshll.u32 %s5934_s7, 4  ;;  %s5646_s22 = scalar_lea.hbm %s6030_s20, 16  ;;  %s952_s25 = int_to_ptr.vmem [resolvable:$true] %s951_s25 }
 0x123   : > { %p5647_p7 = scmp.ne.s32.totalorder %s6030_s20, %s5646_s22  ;;  %p5653_p11 = scmp.lt.u32.totalorder %s5646_s22, %s6030_s20 }
 0x125   : > { %p5649_p9 = pnand %p5647_p7, %p6164_p8 }
 0x127   : > { %p5650_p10 = pneg %p5649_p9 }
 0x129   : > { %p5655_p12 = pnand %p5653_p11, %p5650_p10 }
 0x12b   : > { %5658 = shalt.err (!%p5655_p12)
}
 0x12c   : > { %s5659_s10 = scalar_lea.vmem %s928_s9, 16  ;;  %s5666_s18 = scalar_lea.vmem %s928_s9, 32 }
 0x12d   : > { %p5660_p1 = scmp.ne.s32.totalorder %s928_s9, %s5659_s10  ;;  %p5667_p13 = scmp.lt.s32.totalorder %s928_s9, %s928_s9 }
 0x12e   : > { %p5668_p0 = scmp.lt.s32.totalorder %s5666_s18, %s5659_s10 }
 0x12f   : > { %p5662_p3 = pnand %p5660_p1, %p6164_p8 }
 0x130   : > { %p5669_p2 = por %p5668_p0, %p5667_p13 }
 0x131   : > { %p5663_p4 = pneg %p5662_p3 }
 0x133   : > { %p5670_p5 = pnand %p5669_p2, %p5663_p4 }
 0x135   : > { %5673 = shalt.err (!%p5670_p5)
}
 0x136   : > { %5203 = dma.hbm_to_vmem [thread:$0]  (!%p6154_p6), %s6030_s20, 16, %s928_s9, [#allocation18]  }
 0x137   : > { %s5674_s23 = scalar_lea.hbm %s7211_s4, 16 }
 0x138   : > { %p5675_p7 = scmp.ne.s32.totalorder %s7211_s4, %s5674_s23  ;;  %p5681_p11 = scmp.lt.u32.totalorder %s5674_s23, %s7211_s4 }
 0x13a   : > { %p5677_p9 = pnand %p5675_p7, %p6164_p8 }
 0x13c   : > { %p5678_p10 = pneg %p5677_p9 }
 0x13e   : > { %p5683_p12 = pnand %p5681_p11, %p5678_p10 }
 0x140   : > { %5686 = shalt.err (!%p5683_p12)
}
 0x141   : > { %s5687_s7 = scalar_lea.vmem %s952_s25, 16  ;;  %s5694_s22 = scalar_lea.vmem %s952_s25, 32 }
 0x142   : > { %p5688_p1 = scmp.ne.s32.totalorder %s952_s25, %s5687_s7  ;;  %p5695_p13 = scmp.lt.s32.totalorder %s952_s25, %s952_s25 }
 0x143   : > { %p5696_p0 = scmp.lt.s32.totalorder %s5694_s22, %s5687_s7 }
 0x144   : > { %p5690_p3 = pnand %p5688_p1, %p6164_p8 }
 0x145   : > { %p5697_p2 = por %p5696_p0, %p5695_p13 }
 0x146   : > { %p5691_p4 = pneg %p5690_p3 }
 0x148   : > { %p5698_p5 = pnand %p5697_p2, %p5691_p4 }
 0x14a   : > { %5701 = shalt.err (!%p5698_p5)
}
 0x14b   : > { %5209 = dma.hbm_to_vmem [thread:$0]  (!%p6154_p6), %s7211_s4, 16, %s952_s25, [#allocation21]  }
 0x14c   : > { %s5935_s9 = smov [#allocation23]   ;;  %s5702_s18 = scalar_lea.hbm %s6055_s19, 256 }
 0x14d   : > { %s967_s10 = sshll.u32 %s5935_s9, 4  ;;  %p5703_p7 = scmp.ne.s32.totalorder %s6055_s19, %s5702_s18  ;;  %s968_s10 = int_to_ptr.vmem [resolvable:$true] %s967_s10 }
 0x14e   : > { %p5709_p11 = scmp.lt.u32.totalorder %s5702_s18, %s6055_s19 }
 0x14f   : > { %p5705_p9 = pnand %p5703_p7, %p6164_p8 }
 0x151   : > { %p5706_p10 = pneg %p5705_p9 }
 0x153   : > { %p5711_p12 = pnand %p5709_p11, %p5706_p10 }
 0x155   : > { %5714 = shalt.err (!%p5711_p12)
}
 0x156   : > { %s5715_s23 = scalar_lea.vmem %s968_s10, 256  ;;  %p5723_p13 = scmp.lt.s32.totalorder %s968_s10, %s968_s10 }
 0x157   : > { %p5716_p1 = scmp.ne.s32.totalorder %s968_s10, %s5715_s23  ;;  %p5724_p0 = scmp.lt.s32.totalorder %s5715_s23, %s5715_s23 }
 0x159   : > { %p5718_p3 = pnand %p5716_p1, %p6164_p8  ;;  %p5725_p2 = por %p5724_p0, %p5723_p13 }
 0x15b   : > { %p5719_p4 = pneg %p5718_p3 }
 0x15d   : > { %p5726_p5 = pnand %p5725_p2, %p5719_p4 }
 0x15f   : > { %5729 = shalt.err (!%p5726_p5)
}
 0x160   : > { %5212 = dma.hbm_to_vmem [thread:$0]  (!%p6154_p6), %s6055_s19, 256, %s968_s10, [#allocation24], %s7218_s21, %s7218_s21, %s7219_s16  }
 0x161   : > { %s4515_s5 = sadd.s32 4294967294, %s5888_s0   ;;  %s6310_s26 = sadd.s32 1, %s5888_s0  }
 0x162   : > { %s146_s25 = ssub.s32 %s5888_s0, %s6310_s26  ;;  %s149_s7 = sadd.s32 1, %s5884_s2 }
 0x163   : > { %p147_p8 = scmp.eq.s32.totalorder %s146_s25, 0  ;;  %p156_p7 = scmp.ne.s32.totalorder %s5884_s2, %s5880_s1 }
 0x164   : > { %p157_p9 = scmp.eq.s32.totalorder %s5888_s0, 0  ;;  %p162_p10 = scmp.ne.s32.totalorder %s5880_s1, %s5876_s28 }
 0x165   : > { %s6321_s22 = scalar_select %p147_p8, %s5884_s2, %s149_s7  }
 0x166   : > { %p6323_p11 = por %p157_p9, %p156_p7  ;;  %p7221_p6 = scmp.eq.s32.totalorder %s6138_s11, 0 }
 0x167   : > { %p800_p1 = scmp.eq.s32.totalorder %s6138_s11, 1  ;;  %p806_p3 = scmp.eq.s32.totalorder %s4515_s5, 1 }
 0x168   : > { %p6329_p12 = por %p7221_p6, %p162_p10  ;;  %p5236_p4 = scmp.lt.s32.totalorder %s5888_s0, 2 }
 0x169   : > { %s6336_s16 = sand.u32 1, %s5884_s2   ;;  %p6338_p13 = por %p800_p1, %p156_p7 }
 0x16a   : > { %s7222_s21 = scalar_select %p6329_p12, 1, 0 }
 0x16b   : > { %s7223_s10 = scalar_select %p6338_p13, 1, 0 }
 0x16c   : > { %p6342_p0 = por %p806_p3, %p162_p10  ;;  %s4530_s23 = sshll.u32 %s5888_s0, 4 }
 0x16d   : > { %s1031_s25 = scalar_lea.vmem [#allocation2], %s6336_s16  ;;  %s6349_s3 = scalar_lea.hbm %s7207_s13, %s4530_s23 }
 0x16e   : > { %s7224_s18 = scalar_select %p6342_p0, 1, 0 }
 0x16f   : > { %s1038_s7 = sshll.u32 %s1031_s25, 4  ;;  %p6355_p2 = pnand %p5236_p4, %p6323_p11  ;;  %s6351_s7 = int_to_ptr.vmem [resolvable:$true] %s1038_s7 }
 0x170   : > { %s6360_s4 = scalar_lea.hbm %s5970_s17, %s4530_s23  ;;  %s1029_s8 = scalar_lea.sflag [#allocation3], %s6336_s16 }
 0x171   : > { %s5730_s25 = scalar_lea.hbm %s6349_s3, 16  ;;  %p5732_p8 = pneg %p6355_p2 }
 0x172   : > { %p5731_p5 = scmp.ne.s32.totalorder %s6349_s3, %s5730_s25  ;;  %s5735_s14 = scalar_lea.hbm %s7207_s13, 32 }
 0x173   : > { %p5736_p10 = scmp.lt.u32.totalorder %s6349_s3, %s7207_s13  ;;  %p5737_p11 = scmp.lt.u32.totalorder %s5735_s14, %s5730_s25 }
 0x174   : > { %p5733_p7 = pnand %p5732_p8, %p5731_p5  ;;  %p5739_p1 = scmp.lt.u32.totalorder %s5730_s25, %s6349_s3 }
 0x175   : > { %p5738_p6 = por %p5737_p11, %p5736_p10 }
 0x176   : > { %p5734_p9 = pneg %p5733_p7 }
 0x177   : > { %p5740_p3 = por %p5739_p1, %p5738_p6 }
 0x179   : > { %p5741_p4 = pnand %p5740_p3, %p5734_p9 }
 0x17b   : > { %5744 = shalt.err (!%p5741_p4)
}
 0x17c   : > { %s5745_s9 = scalar_lea.vmem %s6351_s7, 16  ;;  %s5936_s23 = smov [#allocation2]  }
 0x17d   : > { %p5746_p0 = scmp.ne.s32.totalorder %s6351_s7, %s5745_s9  ;;  %s5750_s6 = sshll.u32 %s5936_s23, 4  ;;  %s5751_s6 = int_to_ptr.vmem [resolvable:$false] %s5750_s6 }
 0x17e   : > { %s5752_s13 = scalar_lea.vmem %s5751_s6, 32  ;;  %p5753_p5 = scmp.lt.s32.totalorder %s6351_s7, %s5751_s6 }
 0x17f   : > { %p5748_p13 = pnand %p5746_p0, %p5732_p8  ;;  %p5754_p7 = scmp.lt.s32.totalorder %s5752_s13, %s5745_s9 }
 0x181   : > { %p5749_p12 = pneg %p5748_p13  ;;  %p5755_p10 = por %p5754_p7, %p5753_p5 }
 0x183   : > { %p5756_p11 = pnand %p5755_p10, %p5749_p12 }
 0x185   : > { %5759 = shalt.err (!%p5756_p11)
}
 0x186   : > { %5216 = dma.hbm_to_vmem [thread:$0]  (!%p6355_p2), %s6349_s3, 16, %s6351_s7, %s1029_s8  }
 0x187   : > { %s1048_s14 = scalar_lea.vmem [#allocation5], %s6336_s16  ;;  %s7226_s13 = sand.u32 1, %s5888_s0  }
 0x188   : > { %s1055_s6 = sshll.u32 %s1048_s14, 4  ;;  %s1046_s25 = scalar_lea.sflag [#allocation6], %s7226_s13  ;;  %s1056_s6 = int_to_ptr.vmem [resolvable:$true] %s1055_s6 }
 0x189   : > { %s5760_s9 = scalar_lea.hbm %s6360_s4, 16  ;;  %s5765_s23 = scalar_lea.hbm %s5970_s17, 32 }
 0x18a   : > { %p5761_p12 = scmp.ne.s32.totalorder %s6360_s4, %s5760_s9  ;;  %p5766_p9 = scmp.lt.u32.totalorder %s6360_s4, %s5970_s17 }
 0x18b   : > { %p5767_p6 = scmp.lt.u32.totalorder %s5765_s23, %s5760_s9  ;;  %p5769_p3 = scmp.lt.u32.totalorder %s5760_s9, %s6360_s4 }
 0x18c   : > { %p5763_p13 = pnand %p5761_p12, %p5732_p8 }
 0x18d   : > { %p5768_p1 = por %p5767_p6, %p5766_p9 }
 0x18e   : > { %p5764_p0 = pneg %p5763_p13 }
 0x18f   : > { %p5770_p4 = por %p5769_p3, %p5768_p1 }
 0x191   : > { %p5771_p5 = pnand %p5770_p4, %p5764_p0 }
 0x193   : > { %5774 = shalt.err (!%p5771_p5)
}
 0x194   : > { %s5775_s3 = scalar_lea.vmem %s1056_s6, 16  ;;  %s5937_s8 = smov [#allocation5]  }
 0x195   : > { %p5776_p7 = scmp.ne.s32.totalorder %s1056_s6, %s5775_s3  ;;  %s5780_s16 = sshll.u32 %s5937_s8, 4  ;;  %s5781_s16 = int_to_ptr.vmem [resolvable:$false] %s5780_s16 }
 0x196   : > { %s5782_s7 = scalar_lea.vmem %s5781_s16, 32  ;;  %p5783_p12 = scmp.lt.s32.totalorder %s1056_s6, %s5781_s16 }
 0x197   : > { %p5778_p10 = pnand %p5776_p7, %p5732_p8  ;;  %p5784_p13 = scmp.lt.s32.totalorder %s5782_s7, %s5775_s3 }
 0x199   : > { %p5779_p11 = pneg %p5778_p10  ;;  %p5785_p6 = por %p5784_p13, %p5783_p12 }
 0x19b   : > { %p5786_p9 = pnand %p5785_p6, %p5779_p11 }
 0x19d   : > { %5789 = shalt.err (!%p5786_p9)
}
 0x19e   : > { %5219 = dma.hbm_to_vmem [thread:$0]  (!%p6355_p2), %s6360_s4, 16, %s1056_s6, %s1046_s25  }
 0x19f   : > { %p7227_p0 = scmp.ne.s32.totalorder %s7215_s15, 0 }
 0x1a0   : > { %s6406_s14 = sand.u32 (!%p7227_p0), 1, %s5880_s1   ;;  %p7228_p8 = scmp.ne.s32.totalorder (!%p7227_p0), %s7222_s21, 0 }
 0x1a1   : > { %1064 = sbr.rel (%p7227_p0) target bundleno = 12444 (0x309c), region = 148  ;;  %s1067_s13 = scalar_lea.sflag (!%p7227_p0), [#allocation3], %s6406_s14 }
 0x1a2   : > { %s1069_s9 = scalar_lea.vmem (!%p7227_p0), [#allocation2], %s6406_s14 }
 0x1a8   : > { %5835 = dma.done.wait (%p7228_p8), %s1067_s13, 16  }
 0x1a9   : > { %5837 = vsyncadd (%p7228_p8), %s1067_s13, 4294967280  ;;  %s1074_s4 = sand.u32 1, %s6138_s11   ;;  %s1077_s15 = scalar_lea.vmem [#allocation5], %s6406_s14 }
 0x1aa   : > { %s1075_s5 = scalar_lea.sflag [#allocation6], %s1074_s4 }
 0x1ab   : > { %5839 = dma.done.wait (%p7228_p8), %s1075_s5, 16  }
 0x1ac   : > { %5841 = vsyncadd (%p7228_p8), %s1075_s5, 4294967280  ;;  %p7229_p2 = scmp.eq.s32.totalorder %s6138_s11, 0 }
 0x1ae   : > { %5843 = dma.done.wait (%p7229_p2), [#allocation6], 128   ;;  %p7230_p1 = pmov %p7229_p2 }
 0x1b0   : > { %5845 = vsyncadd (%p7230_p1), [#allocation6], 4294967168  ;;  %p7231_p3 = pmov %p7230_p1 }
 0x1b1   : > { %p7232_p4 = pmov %p7230_p1 }
 0x1b2   : > { %5847 = dma.done.wait (%p7231_p3), [#allocation9], 144  }
 0x1b3   : > { %5849 = vsyncadd (%p7232_p4), [#allocation9], 4294967152  ;;  %p7233_p5 = pmov %p7230_p1 }
 0x1b4   : > { %p7234_p7 = pmov %p7230_p1 }
 0x1b5   : > { %5851 = dma.done.wait (%p7233_p5), [#allocation12], 272  }
 0x1b6   : > { %5853 = vsyncadd (%p7234_p7), [#allocation12], 4294967024  ;;  %p7235_p10 = pmov %p7230_p1 }
 0x1b7   : > { %p7236_p11 = pmov %p7230_p1 }
 0x1b8   : > { %5855 = dma.done.wait (%p7235_p10), [#allocation15], 272  }
 0x1b9   : > { %5857 = vsyncadd (%p7236_p11), [#allocation15], 4294967024  ;;  %p7237_p12 = pmov %p7230_p1 }
 0x1ba   : > { %p7238_p13 = pmov %p7230_p1 }
 0x1bb   : > { %5859 = dma.done.wait (%p7237_p12), [#allocation18], 32  }
 0x1bc   : > { %5861 = vsyncadd (%p7238_p13), [#allocation18], 4294967264  ;;  %p7239_p6 = pmov %p7230_p1 }
 0x1bd   : > { %p7240_p9 = pmov %p7230_p1 }
 0x1be   : > { %5863 = dma.done.wait (%p7239_p6), [#allocation21], 272  }
 0x1bf   : > { %5865 = vsyncadd (%p7240_p9), [#allocation21], 4294967024  ;;  %p7241_p0 = pmov %p7230_p1 }
 0x1c1   : > { %5867 = dma.done.wait (%p7241_p0), [#allocation24], 256   ;;  %p7242_p8 = pmov %p7241_p0 }
 0x1c2   : > { %s7243_s21 = sld [smem:[#allocation36_spill]]  ;;  %s7244_s6 = sld [smem:[#allocation41_spill]]  ;;  %v5938_v0 = vmov 0.0   ;;  %vm5939_vm0 = vmmov 0   ;;  %v6459_v1 = vld [vmem:[#allocation11] sm:$0xff]   ;;  %v6470_v3 = vld [vmem:[#allocation11 + $0x8] sm:$0xff]  }
 0x1c3   : > { %5869 = vsyncadd (%p7242_p8), [#allocation24], 4294967040  ;;  %p1217_p2 = scmp.lt.s32.totalorder %s6138_s11, 1  ;;  %4774 = vmatprep.subr.bf16.mxu1 %v5938_v0  ;;  %4766 = vmatprep.subr.bf16.mxu0 %v5938_v0  ;;  %vm1262_vm1 = vcmask 261120   ;;  %v6493_v7 = vld [vmem:[#allocation13] ss:$0 sm:$0xff] }
 0x1c4   : > { %4778 = vmatprep.mubr.msk.bf16.mxu1 %vm5939_vm0, %v5938_v0  ;;  %4770 = vmatprep.mubr.msk.bf16.mxu0 %vm5939_vm0, %v5938_v0  ;;  %v6495_v9 = vld [vmem:[#allocation10] ss:$0 sm:$0xff]  ;;  %s5940_s8 = smov 8   ;;  %vm1433_vm2 = vcmask 1047616   ;;  %v1231_v21 = vld [vmem:[#allocation8] sm:$0xff]  ;;  %s5941_s16 = smov 4  }
 0x1c5   : > { %s6454_s25 = scalar_select %p1217_p2, %s6138_s11, 1  ;;  %4775 = vmatpush3.bf16.msra.mxu1 %v6459_v1  ;;  %v6513_v31 = vld [vmem:[#allocation7] sm:$0xff]  ;;  %vm1466_vm3 = vcmask 64512   ;;  %v6538_v44 = vld [vmem:[%s1069_s9] ss:$0 sm:$0xff]  ;;  %vm1529_vm4 = vcmask 1043456  }
 0x1c6   : > { %4776 = vmatprep.subr.bf16.mxu1 %v5938_v0  ;;  %s5942_s7 = smov 124   ;;  %s7245_s13 = sld [smem:[#allocation45_spill]]  ;;  %v6549_v57 = vld [vmem:[#allocation14] ss:$0 sm:$0xff]  ;;  %vm4169_vm5 = vcmask 523264  }
 0x1c7   : > { %s4546_s23 = sshll.u32 %s6454_s25, 3  ;;  %s5943_s4 = smov 120  }
 0x1c8   : > { %s6464_s3 = scalar_lea.vmem %s7243_s21, %s4546_s23  ;;  %v6467_v2 = vld [vmem:[%s7244_s6] sm:$0xff]   ;;  %v6477_v5 = vld [vmem:[%s7244_s6 + $0x8] sm:$0xff]   ;;  %s5944_s9 = smov 112  }
 0x1c9   : > { %4767 = vmatpush3.bf16.msra.mxu0 %v6467_v2  ;;  %v1226_v4 = vld [vmem:[%s6464_s3] sm:$0xff]  ;;  %4777 = vmatpush3.bf16.msra.mxu1 %v6470_v3  ;;  %s7178_s5 = smov 104   ;;  %s7246_s21 = sld [smem:[#allocation37_spill]] }
 0x1ca   : > { %4768 = vmatprep.subr.bf16.mxu0 %v5938_v0  ;;  %v6479_v6 = vpack.c.bf16 %v1226_v4, %v1226_v4  ;;  %4790 = vmatprep.subr.bf16.mxu1 %v5938_v0  ;;  %s7248_s25 = sld [smem:[#allocation52_spill]]  ;;  %p7261_p3 = scmp.ne.s32.totalorder %s7223_s10, 0 }
 0x1cc   : > { %4779 = vmatmul.mubr.msk.bf16.vlgmr.msra.gmra.mrb[0].mxu1 %vm1262_vm1, %v6479_v6  ;;  %v6523_v42 = vld [vmem:[%s7245_s13] sm:$0xff]   ;;  %v6527_v43 = vld [vmem:[%s7245_s13 + $0x8] sm:$0xff]  }
 0x1cd   : > { %4769 = vmatpush3.bf16.msra.mxu0 %v6477_v5  ;;  %4792 = vmatprep.mubr.msk.bf16.mxu1 %vm5939_vm0, %v5938_v0 }
 0x1ce   : > { %4782 = vmatprep.subr.bf16.mxu0 %v5938_v0 }
 0x1d0   : > { %4771 = vmatmul.mubr.msk.bf16.vlgmr.msra.gmra.mrb[0].mxu0 %vm1262_vm1, %v6479_v6 }
 0x1d1   : > { %4786 = vmatprep.mubr.msk.bf16.mxu0 %vm5939_vm0, %v5938_v0  ;;  %4783 = vmatpush3.bf16.msra.mxu0 %v6523_v42 }
 0x1d2   : > { %4784 = vmatprep.subr.bf16.mxu0 %v5938_v0 }
 0x1d5   : > { %4785 = vmatpush3.bf16.msra.mxu0 %v6527_v43 }
 0x1d6   : > { %4796 = vmatprep.subr.bf16.mxu0 %v5938_v0 }
 0x1d8   : > { %4787 = vmatmul.mubr.msk.bf16.vlgmr.msra.gmra.mrb[4].mxu0 %vm1262_vm1, %v6479_v6 }
 0x1d9   : > { %4798 = vmatprep.mubr.msk.bf16.mxu0 %vm5939_vm0, %v5938_v0 }
 0x29f   : > { %v1363_v8 = vpop.f32.mrb[0].mxu1 }
 0x2a0   : > { %v1364_v10 = vadd.f32 %v6493_v7, %v1363_v8  ;;  %v4780_v11 = vpop.f32.mrb[1].mxu1 }
 0x2a1   : > { %v1366_v13 = vpop.f32.mrb[2].mxu1 }
 0x2a2   : > { %1451 = vrot.lane.b32.xlu0 %v1364_v10, %s5940_s8  ;;  %v4781_v15 = vpop.f32.mrb[3].mxu1  ;;  %v1450_v32 = vmul.f32 %v1364_v10, %v6513_v31 }
 0x2a3   : > { %v1300_v12 = vpop.f32.mrb[0].mxu0 }
 0x2a4   : > { %v4772_v14 = vpop.f32.mrb[1].mxu0  ;;  %v1301_v16 = vadd.f32 %v6495_v9, %v1300_v12 }
 0x2a5   : > { %v1303_v17 = vpop.f32.mrb[2].mxu0 }
 0x2a6   : > { %v4773_v18 = vpop.f32.mrb[3].mxu0  ;;  %1434 = vrot.lane.b32.xlu0 %v1301_v16, %s5940_s8  ;;  %v1432_v36 = vmul.f32 %v1301_v16, %v6513_v31 }
 0x2ab   : > { %v1426_v58 = vpop.f32.mrb[4].mxu0 }
 0x2ac   : > { %v1427_v59 = vadd.f32 %v6549_v57, %v1426_v58  ;;  %v4788_v60 = vpop.f32.mrb[5].mxu0 }
 0x2ad   : > { %v1429_v61 = vpop.f32.mrb[6].mxu0 }
 0x2ae   : > { %v1525_v62 = vpack.c.bf16 %v1427_v59, %v1427_v59  ;;  %v4789_v4 = vpop.f32.mrb[7].mxu0 }
 0x2b0   : > { %v1531_v8 = vsel %vm1529_vm4, %v1525_v62, 0 }
 0x2b1   : > { %4797 = vmatpush3.bf16.msra.mxu0 %v1531_v8 }
 0x2b2   : > { %4810 = vmatprep.subr.bf16.mxu0 %v5938_v0 }
 0x314   : > { %v1452_v19 = vpop.permute.xlu0 %1451 }
 0x315   : > { %v1453_v20 = vsel %vm1433_vm2, %v1452_v19, %v1364_v10 }
 0x316   : > { %1454 = vrot.lane.b32.xlu1 %v1453_v20, %s5940_s8 }
 0x318   : > { %v1435_v22 = vpop.permute.xlu0 %1434 }
 0x319   : > { %v1436_v23 = vsel %vm1433_vm2, %v1435_v22, %v1301_v16 }
 0x31a   : > { %1441 = vrot.lane.b32.xlu1 %v1231_v21, %s5941_s16  ;;  %1437 = vrot.lane.b32.xlu0 %v1436_v23, %s5940_s8  ;;  %s1224_s16 = scalar_lea.vmem %s7246_s21, %s4546_s23  ;;  %s7249_s23 = sld [smem:[#allocation53_spill]] }
 0x31b   : > { %s7256_s21 = sld [smem:[#allocation55_spill]] }
 0x388   : > { %v1455_v24 = vpop.permute.xlu1 %1454 }
 0x389   : > { %v1456_v25 = vsel %vm1433_vm2, %v1455_v24, %v1364_v10 }
 0x38c   : > { %v6506_v26 = vpop.permute.xlu1 %1441  ;;  %v1438_v27 = vpop.permute.xlu0 %1437 }
 0x38d   : > { %v1439_v28 = vsel %vm1433_vm2, %v1438_v27, %v1301_v16  ;;  %v1457_v29 = vmul.f32 %v1456_v25, %v6506_v26 }
 0x38e   : > { %v1444_v30 = vmul.f32 %v6506_v26, %v1439_v28 }
 0x38f   : > { %1459 = vrot.lane.b32.xlu1 %v1457_v29, %s5942_s7 }
 0x390   : > { %1446 = vrot.lane.b32.xlu0 %v1444_v30, %s5942_s7 }
 0x401   : > { %v1460_v33 = vpop.permute.xlu1 %1459 }
 0x402   : > { %v1462_v34 = vadd.f32 %v1460_v33, %v1450_v32  ;;  %v1447_v35 = vpop.permute.xlu0 %1446 }
 0x403   : > { %v1449_v38 = vadd.f32 %v1447_v35, %v1432_v36 }
 0x404   : > { %v1465_v37 = vpack.c.bf16 %v1462_v34, %v1462_v34 }
 0x405   : > { %v1463_v40 = vmul.f32 0.35355338, %v1449_v38 }
 0x406   : > { %v1471_v39 = vsel %vm1466_vm3, %v1465_v37, 0 }
 0x407   : > { %4791 = vmatpush3.bf16.xpose.msra.mxu1 %v1471_v39  ;;  %v1464_v41 = vpack.c.bf16 %v1463_v40, %v1463_v40 }
 0x408   : > { %4802 = vmatprep.subr.bf16.mxu1 %v5938_v0 }
 0x40e   : > { %4793 = vmatmul.mubr.msk.bf16.vlgmr.msra.gmra.mrb[4].mxu1 %vm1466_vm3, %v1464_v41 }
 0x40f   : > { %4806 = vmatprep.mubr.msk.bf16.mxu1 %vm5939_vm0, %v5938_v0 }
 0x4e1   : > { %v1507_v45 = vpop.f32.mrb[4].mxu1 }
 0x4e2   : > { %v1508_v46 = vadd.f32 %v6538_v44, %v1507_v45  ;;  %v4794_v47 = vpop.f32.mrb[5].mxu1 }
 0x4e3   : > { %v1510_v48 = vpop.f32.mrb[6].mxu1 }
 0x4e4   : > { %v4795_v49 = vpop.f32.mrb[7].mxu1  ;;  %v1513_v50 = vsel %vm1466_vm3, %v1508_v46, -inf }
 0x4e5   : > { %1514 = vmax.xlane.f32.xlu1 %v1513_v50 }
 0x4f6   : > { %1626 = vrot.lane.b32.xlu1 %v6470_v3, %s5943_s4 }
 0x4fa   : > { %1575 = vrot.lane.b32.xlu1 %v6467_v2, %s5943_s4 }
 0x4fe   : > { %1630 = vrot.lane.b32.xlu1 %v6493_v7, %s5943_s4 }
 0x572   : > { %v1515_v51 = vpop.xlane.xlu1 %1514 }
 0x573   : > { %v1516_v52 = vsub.f32 %v1508_v46, %v1515_v51 }
 0x575   : > { %v1517_v53 = vmul.f32 1.442695, %v1516_v52 }
 0x576   : > { %v1627_v56 = vpop.permute.xlu1 %1626 }
 0x577   : > { %5354 = vpow2.f32 %v1517_v53 }
 0x57a   : > { %v1576_v63 = vpop.permute.xlu1 %1575 }
 0x57b   : > { %4803 = vmatpush3.bf16.msra.mxu1 %v1576_v63 }
 0x57c   : > { %4804 = vmatprep.subr.bf16.mxu1 %v5938_v0 }
 0x57e   : > { %v1631_v27 = vpop.permute.xlu1 %1630 }
 0x581   : > { %v5355_v54 = vpop.eup %5354 }
 0x582   : > { %v1519_v55 = vsel %vm1466_vm3, %v5355_v54, 0.0 }
 0x583   : > { %1520 = vadd.xlane.f32.xlu0 %v1519_v55 }
 0x599   : > { %1624 = vrot.lane.b32.xlu0 %v6459_v1, %s5943_s4 }
 0x59d   : > { %1577 = vrot.lane.b32.xlu0 %v6477_v5, %s5943_s4 }
 0x5a1   : > { %1581 = vrot.lane.b32.xlu0 %v6495_v9, %s5943_s4 }
 0x610   : > { %v1521_v10 = vpop.xlane.xlu0 %1520 }
 0x611   : > { %5356 = vrcp.f32 %v1521_v10 }
 0x614   : > { %v1625_v11 = vpop.permute.xlu0 %1624 }
 0x618   : > { %v1578_v12 = vpop.permute.xlu0 %1577 }
 0x619   : > { %4805 = vmatpush3.bf16.msra.mxu1 %v1578_v12 }
 0x61a   : > { %4818 = vmatprep.subr.bf16.mxu1 %v5938_v0 }
 0x61b   : > { %v5357_v13 = vpop.eup %5356 }
 0x61c   : > { %4807 = vmatmul.mubr.msk.bf16.vlgmr.msra.gmra.mrb[8].mxu1 %vm1262_vm1, %v6479_v6  ;;  %v1523_v14 = vmul.f32 %v5357_v13, %v5355_v54  ;;  %v1582_v16 = vpop.permute.xlu0 %1581 }
 0x61d   : > { %4822 = vmatprep.mubr.msk.bf16.mxu1 %vm5939_vm0, %v5938_v0 }
 0x61e   : > { %v1524_v15 = vpack.c.bf16 %v1523_v14, %v1523_v14 }
 0x620   : > { %4799 = vmatmul.mubr.msk.bf16.vlgmr.msra.gmra.mrb[8].mxu0 %vm1466_vm3, %v1524_v15 }
 0x621   : > { %4811 = vmatpush3.bf16.msra.mxu0 %v1625_v11  ;;  %4814 = vmatprep.mubr.msk.bf16.mxu0 %vm5939_vm0, %v5938_v0 }
 0x622   : > { %4812 = vmatprep.subr.bf16.mxu0 %v5938_v0 }
 0x625   : > { %4813 = vmatpush3.bf16.msra.mxu0 %v1627_v56 }
 0x626   : > { %4826 = vmatprep.subr.bf16.mxu0 %v5938_v0 }
 0x628   : > { %4815 = vmatmul.mubr.msk.bf16.vlgmr.msra.gmra.mrb[12].mxu0 %vm1262_vm1, %v6479_v6 }
 0x629   : > { %4828 = vmatprep.mubr.msk.bf16.mxu0 %vm5939_vm0, %v5938_v0 }
 0x6ef   : > { %v1618_v17 = vpop.f32.mrb[8].mxu1 }
 0x6f0   : > { %v1619_v18 = vadd.f32 %v1618_v17, %v1582_v16  ;;  %v4808_v19 = vpop.f32.mrb[9].mxu1 }
 0x6f1   : > { %v1621_v20 = vpop.f32.mrb[10].mxu1  ;;  %v1857_v19 = vld [vmem:[#allocation16 + $0x4] sm:$0xf] }
 0x6f2   : > { %1723 = vrot.lane.b32.xlu0 %v1619_v18, %s5940_s8  ;;  %v4809_v21 = vpop.f32.mrb[11].mxu1  ;;  %v1722_v50 = vmul.f32 %v1619_v18, %v6513_v31  ;;  %v1862_v20 = vsel %vm1529_vm4, %v1857_v19, 0 }
 0x6f3   : > { %v6576_v22 = vpop.f32.mrb[8].mxu0 }
 0x6f4   : > { %v4800_v23 = vpop.f32.mrb[9].mxu0 }
 0x6f5   : > { %v1570_v24 = vpop.f32.mrb[10].mxu0 }
 0x6f6   : > { %v4801_v25 = vpop.f32.mrb[11].mxu0 }
 0x6fb   : > { %v1667_v28 = vpop.f32.mrb[12].mxu0 }
 0x6fc   : > { %v1668_v29 = vadd.f32 %v1667_v28, %v1631_v27  ;;  %v4816_v30 = vpop.f32.mrb[13].mxu0 }
 0x6fd   : > { %v1670_v32 = vpop.f32.mrb[14].mxu0 }
 0x6fe   : > { %1736 = vrot.lane.b32.xlu1 %v1668_v29, %s5940_s8  ;;  %v4817_v33 = vpop.f32.mrb[15].mxu0  ;;  %v1735_v47 = vmul.f32 %v1668_v29, %v6513_v31 }
 0x764   : > { %v1724_v34 = vpop.permute.xlu0 %1723 }
 0x765   : > { %v1725_v35 = vsel %vm1433_vm2, %v1724_v34, %v1619_v18 }
 0x766   : > { %1726 = vrot.lane.b32.xlu0 %v1725_v35, %s5940_s8  ;;  %v1573_v35 = vpack.c.bf16 %v6576_v22, %v6576_v22 }
 0x770   : > { %v1737_v36 = vpop.permute.xlu1 %1736 }
 0x771   : > { %v1738_v37 = vsel %vm1433_vm2, %v1737_v36, %v1668_v29 }
 0x772   : > { %1739 = vrot.lane.b32.xlu1 %v1738_v37, %s5940_s8 }
 0x7d8   : > { %v1727_v38 = vpop.permute.xlu0 %1726 }
 0x7d9   : > { %v1728_v39 = vsel %vm1433_vm2, %v1727_v38, %v1619_v18 }
 0x7da   : > { %v1729_v40 = vmul.f32 %v1728_v39, %v6506_v26 }
 0x7dc   : > { %1731 = vrot.lane.b32.xlu0 %v1729_v40, %s5942_s7 }
 0x7e0   : > { %1675 = vrot.lane.b32.xlu0 %v6527_v43, %s5943_s4 }
 0x7e4   : > { %v1740_v41 = vpop.permute.xlu1 %1739 }
 0x7e5   : > { %v1741_v45 = vsel %vm1433_vm2, %v1740_v41, %v1668_v29  ;;  %v1574_v29 = vld [vmem:[#allocation16] sm:$0xf] }
 0x7e6   : > { %v1742_v46 = vmul.f32 %v1741_v45, %v6506_v26  ;;  %v1908_v33 = vsel %vm1529_vm4, %v1574_v29, 0 }
 0x7e8   : > { %1744 = vrot.lane.b32.xlu1 %v1742_v46, %s5942_s7 }
 0x7ec   : > { %1673 = vrot.lane.b32.xlu1 %v6523_v42, %s5943_s4 }
 0x84e   : > { %v1732_v48 = vpop.permute.xlu0 %1731 }
 0x84f   : > { %v1734_v52 = vadd.f32 %v1732_v48, %v1722_v50 }
 0x851   : > { %v1748_v55 = vmul.f32 0.35355338, %v1734_v52 }
 0x852   : > { %v1676_v59 = vpop.permute.xlu0 %1675 }
 0x853   : > { %v1749_v56 = vpack.c.bf16 %v1748_v55, %v1748_v55 }
 0x85a   : > { %v1745_v49 = vpop.permute.xlu1 %1744 }
 0x85b   : > { %v1747_v51 = vadd.f32 %v1745_v49, %v1735_v47 }
 0x85d   : > { %v1750_v53 = vpack.c.bf16 %v1747_v51, %v1747_v51 }
 0x85e   : > { %v1674_v58 = vpop.permute.xlu1 %1673 }
 0x85f   : > { %v1755_v54 = vsel %vm1466_vm3, %v1750_v53, 0  ;;  %4819 = vmatpush3.bf16.msra.mxu1 %v1674_v58 }
 0x860   : > { %4827 = vmatpush3.bf16.xpose.msra.mxu0 %v1755_v54  ;;  %4820 = vmatprep.subr.bf16.mxu1 %v5938_v0 }
 0x861   : > { %4838 = vmatprep.subr.bf16.mxu0 %v5938_v0 }
 0x863   : > { %4821 = vmatpush3.bf16.msra.mxu1 %v1676_v59 }
 0x864   : > { %4832 = vmatprep.subr.bf16.mxu1 %v5938_v0 }
 0x866   : > { %4823 = vmatmul.mubr.msk.bf16.vlgmr.msra.gmra.mrb[12].mxu1 %vm1262_vm1, %v6479_v6 }
 0x867   : > { %4829 = vmatmul.mubr.msk.bf16.vlgmr.msra.gmra.mrb[16].mxu0 %vm1466_vm3, %v1749_v56  ;;  %4834 = vmatprep.mubr.msk.bf16.mxu1 %vm5939_vm0, %v5938_v0 }
 0x868   : > { %4840 = vmatprep.mubr.msk.bf16.mxu0 %vm5939_vm0, %v5938_v0  ;;  %4839 = vmatpush3.bf16.msra.mxu0 %v1862_v20 }
 0x869   : > { %4850 = vmatprep.subr.bf16.mxu0 %v5938_v0 }
 0x939   : > { %v1716_v15 = vpop.f32.mrb[12].mxu1 }
 0x93a   : > { %v1791_v60 = vpop.f32.mrb[16].mxu0  ;;  %v4824_v16 = vpop.f32.mrb[13].mxu1 }
 0x93b   : > { %v1792_v61 = vadd.f32 %v6538_v44, %v1791_v60  ;;  %v4830_v62 = vpop.f32.mrb[17].mxu0  ;;  %v1719_v17 = vpop.f32.mrb[14].mxu1 }
 0x93c   : > { %v1794_v63 = vpop.f32.mrb[18].mxu0  ;;  %v4825_v18 = vpop.f32.mrb[15].mxu1 }
 0x93d   : > { %v4831_v4 = vpop.f32.mrb[19].mxu0  ;;  %v1797_v8 = vsel %vm1466_vm3, %v1792_v61, -inf }
 0x93e   : > { %1798 = vmax.xlane.f32.xlu1 %v1797_v8 }
 0x94f   : > { %1999 = vrot.lane.b32.xlu1 %v6459_v1, %s5944_s9 }
 0x953   : > { %2001 = vrot.lane.b32.xlu1 %v6470_v3, %s5944_s9 }
 0x957   : > { %1952 = vrot.lane.b32.xlu1 %v6477_v5, %s5944_s9 }
 0x95b   : > { %1956 = vrot.lane.b32.xlu1 %v6495_v9, %s5944_s9 }
 0x9cb   : > { %v1799_v10 = vpop.xlane.xlu1 %1798 }
 0x9cc   : > { %v1800_v11 = vsub.f32 %v1792_v61, %v1799_v10 }
 0x9ce   : > { %v1801_v12 = vmul.f32 1.442695, %v1800_v11 }
 0x9cf   : > { %v2000_v34 = vpop.permute.xlu1 %1999 }
 0x9d0   : > { %5358 = vpow2.f32 %v1801_v12 }
 0x9d3   : > { %v2002_v36 = vpop.permute.xlu1 %2001 }
 0x9d7   : > { %v1953_v45 = vpop.permute.xlu1 %1952 }
 0x9da   : > { %v5359_v13 = vpop.eup %5358 }
 0x9db   : > { %v1803_v14 = vsel %vm1466_vm3, %v5359_v13, 0.0  ;;  %v1957_v4 = vpop.permute.xlu1 %1956 }
 0x9dc   : > { %1804 = vadd.xlane.f32.xlu0 %v1803_v14 }
 0x9f2   : > { %1679 = vrot.lane.b32.xlu0 %v6549_v57, %s5943_s4 }
 0x9f6   : > { %1950 = vrot.lane.b32.xlu0 %v6467_v2, %s5944_s9 }
 0x9fa   : > { %2005 = vrot.lane.b32.xlu0 %v6493_v7, %s5944_s9 }
 0xa69   : > { %v1805_v21 = vpop.xlane.xlu0 %1804 }
 0xa6a   : > { %5360 = vrcp.f32 %v1805_v21 }
 0xa6d   : > { %v1680_v23 = vpop.permute.xlu0 %1679 }
 0xa6e   : > { %v1717_v24 = vadd.f32 %v1716_v15, %v1680_v23 }
 0xa70   : > { %v1809_v25 = vpack.c.bf16 %v1717_v24, %v1717_v24 }
 0xa71   : > { %v1951_v39 = vpop.permute.xlu0 %1950 }
 0xa72   : > { %v1814_v27 = vsel %vm1529_vm4, %v1809_v25, 0 }
 0xa73   : > { %4833 = vmatpush3.bf16.msra.mxu1 %v1814_v27 }
 0xa74   : > { %v5361_v28 = vpop.eup %5360  ;;  %4844 = vmatprep.subr.bf16.mxu1 %v5938_v0 }
 0xa75   : > { %v1807_v30 = vmul.f32 %v5361_v28, %v5359_v13  ;;  %v2006_v50 = vpop.permute.xlu0 %2005 }
 0xa77   : > { %v1808_v32 = vpack.c.bf16 %v1807_v30, %v1807_v30 }
 0xa79   : > { %4835 = vmatmul.mubr.msk.bf16.vlgmr.msra.gmra.mrb[16].mxu1 %vm1466_vm3, %v1808_v32 }
 0xa7a   : > { %4845 = vmatpush3.bf16.msra.mxu1 %v1908_v33  ;;  %4846 = vmatprep.mubr.msk.bf16.mxu1 %vm5939_vm0, %v5938_v0 }
 0xa7b   : > { %4858 = vmatprep.subr.bf16.mxu1 %v5938_v0 }
 0xa81   : > { %4847 = vmatmul.mubr.msk.bf16.vlgmr.msra.gmra.mrb[20].mxu1 %vm1466_vm3, %v1573_v35 }
 0xa82   : > { %4859 = vmatpush3.bf16.msra.mxu1 %v2000_v34  ;;  %4862 = vmatprep.mubr.msk.bf16.mxu1 %vm5939_vm0, %v5938_v0 }
 0xa83   : > { %4860 = vmatprep.subr.bf16.mxu1 %v5938_v0 }
 0xa86   : > { %4861 = vmatpush3.bf16.msra.mxu1 %v2002_v36 }
 0xa87   : > { %4874 = vmatprep.subr.bf16.mxu1 %v5938_v0 }
 0xa89   : > { %4863 = vmatmul.mubr.msk.bf16.vlgmr.msra.gmra.mrb[24].mxu1 %vm1262_vm1, %v6479_v6 }
 0xa8a   : > { %4876 = vmatprep.mubr.msk.bf16.mxu1 %vm5939_vm0, %v5938_v0 }
 0xb4c   : > { %v1850_v37 = vpop.f32.mrb[16].mxu1 }
 0xb4d   : > { %v1856_v22 = vpack.c.bf16 %v1850_v37, %v1850_v37  ;;  %v4836_v38 = vpop.f32.mrb[17].mxu1 }
 0xb4e   : > { %v1853_v40 = vpop.f32.mrb[18].mxu1 }
 0xb4f   : > { %v4837_v41 = vpop.f32.mrb[19].mxu1  ;;  %4841 = vmatmul.mubr.msk.bf16.vlgmr.msra.gmra.mrb[20].mxu0 %vm1466_vm3, %v1856_v22 }
 0xb50   : > { %4851 = vmatpush3.bf16.msra.mxu0 %v1951_v39  ;;  %4854 = vmatprep.mubr.msk.bf16.mxu0 %vm5939_vm0, %v5938_v0 }
 0xb51   : > { %4852 = vmatprep.subr.bf16.mxu0 %v5938_v0 }
 0xb54   : > { %v1944_v46 = vpop.f32.mrb[20].mxu1  ;;  %4853 = vmatpush3.bf16.msra.mxu0 %v1953_v45 }
 0xb55   : > { %v4848_v47 = vpop.f32.mrb[21].mxu1  ;;  %4866 = vmatprep.subr.bf16.mxu0 %v5938_v0 }
 0xb56   : > { %v1947_v48 = vpop.f32.mrb[22].mxu1 }
 0xb57   : > { %v4849_v49 = vpop.f32.mrb[23].mxu1  ;;  %4855 = vmatmul.mubr.msk.bf16.vlgmr.msra.gmra.mrb[24].mxu0 %vm1262_vm1, %v6479_v6 }
 0xb58   : > { %4870 = vmatprep.mubr.msk.bf16.mxu0 %vm5939_vm0, %v5938_v0 }
 0xb5c   : > { %v2042_v51 = vpop.f32.mrb[24].mxu1 }
 0xb5d   : > { %v2043_v52 = vadd.f32 %v2042_v51, %v2006_v50  ;;  %v4864_v53 = vpop.f32.mrb[25].mxu1 }
 0xb5e   : > { %v2045_v54 = vpop.f32.mrb[26].mxu1 }
 0xb5f   : > { %2111 = vrot.lane.b32.xlu0 %v2043_v52, %s5940_s8  ;;  %v4865_v55 = vpop.f32.mrb[27].mxu1  ;;  %v2110_v19 = vmul.f32 %v2043_v52, %v6513_v31 }
 0xb60   : > { %v2232_v55 = vld [vmem:[#allocation16 + $0x8] sm:$0xf] }
 0xbd1   : > { %v2112_v56 = vpop.permute.xlu0 %2111 }
 0xbd2   : > { %v2113_v58 = vsel %vm1433_vm2, %v2112_v56, %v2043_v52 }
 0xbd3   : > { %2114 = vrot.lane.b32.xlu0 %v2113_v58, %s5940_s8 }
 0xc22   : > { %v1898_v59 = vpop.f32.mrb[20].mxu0 }
 0xc23   : > { %v6655_v60 = vadd.f32 %v1944_v46, %v1898_v59  ;;  %v4842_v61 = vpop.f32.mrb[21].mxu0 }
 0xc24   : > { %v1901_v62 = vpop.f32.mrb[22].mxu0 }
 0xc25   : > { %v4843_v63 = vpop.f32.mrb[23].mxu0 }
 0xc2a   : > { %v1993_v8 = vpop.f32.mrb[24].mxu0 }
 0xc2b   : > { %v1994_v10 = vadd.f32 %v1993_v8, %v1957_v4  ;;  %v4856_v11 = vpop.f32.mrb[25].mxu0 }
 0xc2c   : > { %v1996_v12 = vpop.f32.mrb[26].mxu0 }
 0xc2d   : > { %2098 = vrot.lane.b32.xlu1 %v1994_v10, %s5940_s8  ;;  %v4857_v13 = vpop.f32.mrb[27].mxu0  ;;  %v2097_v29 = vmul.f32 %v1994_v10, %v6513_v31 }
 0xc45   : > { %v2115_v14 = vpop.permute.xlu0 %2114 }
 0xc46   : > { %v2116_v15 = vsel %vm1433_vm2, %v2115_v14, %v2043_v52 }
 0xc47   : > { %v2117_v16 = vmul.f32 %v2116_v15, %v6506_v26 }
 0xc49   : > { %2119 = vrot.lane.b32.xlu0 %v2117_v16, %s5942_s7 }
 0xc4d   : > { %2048 = vrot.lane.b32.xlu0 %v6523_v42, %s5944_s9 }
 0xc9f   : > { %v2099_v17 = vpop.permute.xlu1 %2098 }
 0xca0   : > { %v2100_v18 = vsel %vm1433_vm2, %v2099_v17, %v1994_v10 }
 0xca1   : > { %2101 = vrot.lane.b32.xlu1 %v2100_v18, %s5940_s8 }
 0xcbb   : > { %v2120_v20 = vpop.permute.xlu0 %2119 }
 0xcbc   : > { %v2122_v21 = vadd.f32 %v2120_v20, %v2110_v19 }
 0xcbe   : > { %v2125_v23 = vpack.c.bf16 %v2122_v21, %v2122_v21 }
 0xcbf   : > { %v2049_v35 = vpop.permute.xlu0 %2048 }
 0xcc0   : > { %v2130_v24 = vsel %vm1466_vm3, %v2125_v23, 0  ;;  %4867 = vmatpush3.bf16.msra.mxu0 %v2049_v35 }
 0xcc1   : > { %4875 = vmatpush3.bf16.xpose.msra.mxu1 %v2130_v24  ;;  %4868 = vmatprep.subr.bf16.mxu0 %v5938_v0 }
 0xcc2   : > { %4886 = vmatprep.subr.bf16.mxu1 %v5938_v0 }
 0xd13   : > { %v2102_v25 = vpop.permute.xlu1 %2101 }
 0xd14   : > { %v2103_v27 = vsel %vm1433_vm2, %v2102_v25, %v1994_v10 }
 0xd15   : > { %v2104_v28 = vmul.f32 %v2103_v27, %v6506_v26 }
 0xd17   : > { %2106 = vrot.lane.b32.xlu1 %v2104_v28, %s5942_s7 }
 0xd1b   : > { %2050 = vrot.lane.b32.xlu1 %v6527_v43, %s5944_s9 }
 0xd89   : > { %v2107_v30 = vpop.permute.xlu1 %2106 }
 0xd8a   : > { %v2109_v32 = vadd.f32 %v2107_v30, %v2097_v29 }
 0xd8c   : > { %v2123_v33 = vmul.f32 0.35355338, %v2109_v32 }
 0xd8d   : > { %v2051_v36 = vpop.permute.xlu1 %2050 }
 0xd8e   : > { %v2124_v34 = vpack.c.bf16 %v2123_v33, %v2123_v33  ;;  %4869 = vmatpush3.bf16.msra.mxu0 %v2051_v36 }
 0xd8f   : > { %4880 = vmatprep.subr.bf16.mxu0 %v5938_v0 }
 0xd90   : > { %4877 = vmatmul.mubr.msk.bf16.vlgmr.msra.gmra.mrb[28].mxu1 %vm1466_vm3, %v2124_v34 }
 0xd91   : > { %4888 = vmatprep.mubr.msk.bf16.mxu1 %vm5939_vm0, %v5938_v0  ;;  %4871 = vmatmul.mubr.msk.bf16.vlgmr.msra.gmra.mrb[28].mxu0 %vm1262_vm1, %v6479_v6 }
 0xd92   : > { %4882 = vmatprep.mubr.msk.bf16.mxu0 %vm5939_vm0, %v5938_v0 }
 0xe63   : > { %v2166_v37 = vpop.f32.mrb[28].mxu1 }
 0xe64   : > { %v2167_v22 = vadd.f32 %v6538_v44, %v2166_v37  ;;  %v4878_v38 = vpop.f32.mrb[29].mxu1  ;;  %v2091_v50 = vpop.f32.mrb[28].mxu0 }
 0xe65   : > { %v2169_v39 = vpop.f32.mrb[30].mxu1  ;;  %v4872_v51 = vpop.f32.mrb[29].mxu0 }
 0xe66   : > { %v4879_v40 = vpop.f32.mrb[31].mxu1  ;;  %v2172_v41 = vsel %vm1466_vm3, %v2167_v22, -inf }
 0xe67   : > { %2173 = vmax.xlane.f32.xlu0 %v2172_v41 }
 0xe7d   : > { %2054 = vrot.lane.b32.xlu0 %v6549_v57, %s5944_s9 }
 0xe81   : > { %2331 = vrot.lane.b32.xlu0 %v6470_v3, %s7178_s5  ;;  %v2094_v3 = vpop.f32.mrb[30].mxu0 }
 0xe82   : > { %v4873_v52 = vpop.f32.mrb[31].mxu0 }
 0xe85   : > { %2282 = vrot.lane.b32.xlu0 %v6477_v5, %s7178_s5 }
 0xe89   : > { %2286 = vrot.lane.b32.xlu0 %v6495_v9, %s7178_s5 }
 0xef4   : > { %v2174_v45 = vpop.xlane.xlu0 %2173 }
 0xef5   : > { %v2175_v46 = vsub.f32 %v2167_v22, %v2174_v45 }
 0xef7   : > { %v2176_v47 = vmul.f32 1.442695, %v2175_v46 }
 0xef8   : > { %v2055_v5 = vpop.permute.xlu0 %2054 }
 0xef9   : > { %5362 = vpow2.f32 %v2176_v47  ;;  %v2092_v9 = vadd.f32 %v2091_v50, %v2055_v5 }
 0xefb   : > { %v2184_v53 = vpack.c.bf16 %v2092_v9, %v2092_v9 }
 0xefc   : > { %v2332_v61 = vpop.permute.xlu0 %2331 }
 0xefd   : > { %v2189_v54 = vsel %vm1529_vm4, %v2184_v53, 0 }
 0xefe   : > { %4881 = vmatpush3.bf16.msra.mxu0 %v2189_v54 }
 0xeff   : > { %4892 = vmatprep.subr.bf16.mxu0 %v5938_v0 }
 0xf03   : > { %v5363_v48 = vpop.eup %5362 }
 0xf04   : > { %v2178_v49 = vsel %vm1466_vm3, %v5363_v48, 0.0 }
 0xf05   : > { %2179 = vadd.xlane.f32.xlu1 %v2178_v49 }
 0xf16   : > { %2329 = vrot.lane.b32.xlu1 %v6459_v1, %s7178_s5  ;;  %v2237_v1 = vsel %vm1529_vm4, %v2232_v55, 0 }
 0xf17   : > { %4887 = vmatpush3.bf16.msra.mxu1 %v2237_v1 }
 0xf18   : > { %4900 = vmatprep.subr.bf16.mxu1 %v5938_v0 }
 0xf1a   : > { %2280 = vrot.lane.b32.xlu1 %v6467_v2, %s7178_s5 }
 0xf1e   : > { %2335 = vrot.lane.b32.xlu1 %v6493_v7, %s7178_s5  ;;  %v2283_v7 = vpop.permute.xlu0 %2282 }
 0xf22   : > { %v2287_v13 = vpop.permute.xlu0 %2286 }
 0xf92   : > { %v2180_v56 = vpop.xlane.xlu1 %2179 }
 0xf93   : > { %5364 = vrcp.f32 %v2180_v56 }
 0xf96   : > { %v2330_v2 = vpop.permute.xlu1 %2329 }
 0xf9a   : > { %v2281_v62 = vpop.permute.xlu1 %2280 }
 0xf9d   : > { %v5365_v58 = vpop.eup %5364 }
 0xf9e   : > { %v2182_v59 = vmul.f32 %v5365_v58, %v5363_v48  ;;  %v2336_v28 = vpop.permute.xlu1 %2335 }
 0xfa0   : > { %v2183_v63 = vpack.c.bf16 %v2182_v59, %v2182_v59 }
 0xfa2   : > { %4883 = vmatmul.mubr.msk.bf16.vlgmr.msra.gmra.mrb[32].mxu0 %vm1466_vm3, %v2183_v63 }
 0xfa3   : > { %4893 = vmatpush3.bf16.msra.mxu0 %v2281_v62  ;;  %4896 = vmatprep.mubr.msk.bf16.mxu0 %vm5939_vm0, %v5938_v0 }
 0xfa4   : > { %4894 = vmatprep.subr.bf16.mxu0 %v5938_v0 }
 0xfa7   : > { %4895 = vmatpush3.bf16.msra.mxu0 %v2283_v7 }
 0xfa8   : > { %4908 = vmatprep.subr.bf16.mxu0 %v5938_v0 }
 0xfaa   : > { %4897 = vmatmul.mubr.msk.bf16.vlgmr.msra.gmra.mrb[36].mxu0 %vm1262_vm1, %v6479_v6 }
 0xfab   : > { %4912 = vmatprep.mubr.msk.bf16.mxu0 %vm5939_vm0, %v5938_v0 }
0x1075   : > { %v2225_v4 = vpop.f32.mrb[32].mxu0 }
0x1076   : > { %v2231_v8 = vpack.c.bf16 %v2225_v4, %v2225_v4  ;;  %v4884_v10 = vpop.f32.mrb[33].mxu0 }
0x1077   : > { %v2228_v11 = vpop.f32.mrb[34].mxu0 }
0x1078   : > { %v4885_v12 = vpop.f32.mrb[35].mxu0  ;;  %4889 = vmatmul.mubr.msk.bf16.vlgmr.msra.gmra.mrb[32].mxu1 %vm1466_vm3, %v2231_v8 }
0x1079   : > { %4901 = vmatpush3.bf16.msra.mxu1 %v2330_v2  ;;  %4904 = vmatprep.mubr.msk.bf16.mxu1 %vm5939_vm0, %v5938_v0 }
0x107a   : > { %4902 = vmatprep.subr.bf16.mxu1 %v5938_v0 }
0x107d   : > { %v2323_v14 = vpop.f32.mrb[36].mxu0  ;;  %4903 = vmatpush3.bf16.msra.mxu1 %v2332_v61 }
0x107e   : > { %v2324_v15 = vadd.f32 %v2323_v14, %v2287_v13  ;;  %v4898_v16 = vpop.f32.mrb[37].mxu0  ;;  %4916 = vmatprep.subr.bf16.mxu1 %v5938_v0 }
0x107f   : > { %v2326_v17 = vpop.f32.mrb[38].mxu0 }
0x1080   : > { %4905 = vmatmul.mubr.msk.bf16.vlgmr.msra.gmra.mrb[36].mxu1 %vm1262_vm1, %v6479_v6  ;;  %2428 = vrot.lane.b32.xlu0 %v2324_v15, %s5940_s8  ;;  %v4899_v18 = vpop.f32.mrb[39].mxu0 }
0x1081   : > { %4918 = vmatprep.mubr.msk.bf16.mxu1 %vm5939_vm0, %v5938_v0 }
0x10f2   : > { %v2429_v19 = vpop.permute.xlu0 %2428 }
0x10f3   : > { %v2430_v20 = vsel %vm1433_vm2, %v2429_v19, %v2324_v15 }
0x10f4   : > { %2431 = vrot.lane.b32.xlu0 %v2430_v20, %s5940_s8 }
0x114b   : > { %v2273_v21 = vpop.f32.mrb[32].mxu1 }
0x114c   : > { %v6726_v23 = vadd.f32 %v2273_v21, %v6655_v60  ;;  %v4890_v24 = vpop.f32.mrb[33].mxu1 }
0x114d   : > { %v2276_v25 = vpop.f32.mrb[34].mxu1  ;;  %v4582_v24 = vld [vmem:[#allocation17] ss:$0 sm:$0xff] }
0x114e   : > { %v4891_v27 = vpop.f32.mrb[35].mxu1 }
0x1153   : > { %v2372_v29 = vpop.f32.mrb[36].mxu1 }
0x1154   : > { %v2373_v30 = vadd.f32 %v2372_v29, %v2336_v28  ;;  %v4906_v32 = vpop.f32.mrb[37].mxu1 }
0x1155   : > { %v2375_v33 = vpop.f32.mrb[38].mxu1  ;;  %v5392_v32 = vld [vmem:[%s6464_s3] sm:$0xff]  ;;  %s7250_s3 = sld [smem:[#allocation49_spill]] }
0x1156   : > { %2441 = vrot.lane.b32.xlu1 %v2373_v30, %s5940_s8  ;;  %v4907_v34 = vpop.f32.mrb[39].mxu1  ;;  %v2440_v41 = vmul.f32 %v2373_v30, %v6513_v31 }
0x1166   : > { %v2432_v35 = vpop.permute.xlu0 %2431 }
0x1167   : > { %v2433_v36 = vsel %vm1433_vm2, %v2432_v35, %v2324_v15  ;;  %v6772_v35 = vld [vmem:[#allocation20] sm:$0xff]  }
0x1168   : > { %v2434_v37 = vmul.f32 %v2433_v36, %v6506_v26  ;;  %v6778_v36 = vld [vmem:[#allocation20 + $0x8] sm:$0xff]  }
0x116a   : > { %2436 = vrot.lane.b32.xlu0 %v2434_v37, %s5942_s7 }
0x116e   : > { %2380 = vrot.lane.b32.xlu0 %v6527_v43, %s7178_s5  ;;  %v2427_v43 = vmul.f32 %v2324_v15, %v6513_v31 }
0x11c8   : > { %v2442_v60 = vpop.permute.xlu1 %2441 }
0x11c9   : > { %v2443_v22 = vsel %vm1433_vm2, %v2442_v60, %v2373_v30 }
0x11ca   : > { %2444 = vrot.lane.b32.xlu1 %v2443_v22, %s5940_s8 }
0x11dc   : > { %v2437_v45 = vpop.permute.xlu0 %2436 }
0x11dd   : > { %v2439_v48 = vadd.f32 %v2437_v45, %v2427_v43 }
0x11df   : > { %v2453_v51 = vmul.f32 0.35355338, %v2439_v48 }
0x11e0   : > { %v2381_v5 = vpop.permute.xlu0 %2380 }
0x11e1   : > { %v2454_v3 = vpack.c.bf16 %v2453_v51, %v2453_v51 }
0x123c   : > { %v2445_v38 = vpop.permute.xlu1 %2444 }
0x123d   : > { %v2446_v39 = vsel %vm1433_vm2, %v2445_v38, %v2373_v30 }
0x123e   : > { %v2447_v40 = vmul.f32 %v2446_v39, %v6506_v26 }
0x1240   : > { %2449 = vrot.lane.b32.xlu1 %v2447_v40, %s5942_s7 }
0x1244   : > { %2378 = vrot.lane.b32.xlu1 %v6523_v42, %s7178_s5 }
0x12b2   : > { %v2450_v46 = vpop.permute.xlu1 %2449 }
0x12b3   : > { %v2452_v47 = vadd.f32 %v2450_v46, %v2440_v41  ;;  %v6800_v46 = vld [vmem:[#allocation22] ss:$0 sm:$0xff] }
0x12b5   : > { %v2455_v49 = vpack.c.bf16 %v2452_v47, %v2452_v47 }
0x12b6   : > { %v2379_v42 = vpop.permute.xlu1 %2378 }
0x12b7   : > { %v2460_v50 = vsel %vm1466_vm3, %v2455_v49, 0  ;;  %4909 = vmatpush3.bf16.msra.mxu0 %v2379_v42 }
0x12b8   : > { %4917 = vmatpush3.bf16.xpose.msra.mxu1 %v2460_v50  ;;  %4910 = vmatprep.subr.bf16.mxu0 %v5938_v0 }
0x12b9   : > { %4928 = vmatprep.subr.bf16.mxu1 %v5938_v0 }
0x12bb   : > { %4911 = vmatpush3.bf16.msra.mxu0 %v2381_v5 }
0x12bc   : > { %4922 = vmatprep.subr.bf16.mxu0 %v5938_v0 }
0x12be   : > { %4913 = vmatmul.mubr.msk.bf16.vlgmr.msra.gmra.mrb[40].mxu0 %vm1262_vm1, %v6479_v6 }
0x12bf   : > { %4919 = vmatmul.mubr.msk.bf16.vlgmr.msra.gmra.mrb[40].mxu1 %vm1466_vm3, %v2454_v3  ;;  %4924 = vmatprep.mubr.msk.bf16.mxu0 %vm5939_vm0, %v5938_v0 }
0x12c0   : > { %4930 = vmatprep.mubr.msk.bf16.mxu1 %vm5939_vm0, %v5938_v0 }
0x1391   : > { %v2421_v6 = vpop.f32.mrb[40].mxu0 }
0x1392   : > { %v2496_v52 = vpop.f32.mrb[40].mxu1  ;;  %v4914_v62 = vpop.f32.mrb[41].mxu0 }
0x1393   : > { %v2497_v9 = vadd.f32 %v6538_v44, %v2496_v52  ;;  %v4920_v53 = vpop.f32.mrb[41].mxu1  ;;  %v2424_v63 = vpop.f32.mrb[42].mxu0  ;;  %v2562_v44 = vld [vmem:[#allocation16 + $0xc] sm:$0xf]  ;;  %v4583_v52 = vld [vmem:[%s7248_s25] ss:$0 sm:$0xff] }
0x1394   : > { %v2499_v54 = vpop.f32.mrb[42].mxu1  ;;  %v4915_v7 = vpop.f32.mrb[43].mxu0  ;;  %v2567_v4 = vsel %vm1529_vm4, %v2562_v44, 0  ;;  %v4584_v53 = vld [vmem:[%s7249_s23] ss:$0 sm:$0xff]  ;;  %s7258_s25 = sld [smem:[#allocation56_spill]] }
0x1395   : > { %v4921_v55 = vpop.f32.mrb[43].mxu1  ;;  %v2502_v1 = vsel %vm1466_vm3, %v2497_v9, -inf  ;;  %4929 = vmatpush3.bf16.msra.mxu1 %v2567_v4  ;;  %s7259_s23 = sld [smem:[#allocation57_spill]] }
0x1396   : > { %2503 = vmax.xlane.f32.xlu1 %v2502_v1  ;;  %4942 = vmatprep.subr.bf16.mxu1 %v5938_v0 }
0x1423   : > { %v2504_v56 = vpop.xlane.xlu1 %2503 }
0x1424   : > { %v2505_v2 = vsub.f32 %v2497_v9, %v2504_v56  ;;  %v6816_v56 = vld [vmem:[#allocation19] ss:$0 sm:$0xff] }
0x1426   : > { %v2506_v58 = vmul.f32 1.442695, %v2505_v2 }
0x1428   : > { %5366 = vpow2.f32 %v2506_v58 }
0x1432   : > { %v5367_v59 = vpop.eup %5366 }
0x1433   : > { %v2508_v61 = vsel %vm1466_vm3, %v5367_v59, 0.0 }
0x1434   : > { %2509 = vadd.xlane.f32.xlu0 %v2508_v61 }
0x144a   : > { %2384 = vrot.lane.b32.xlu0 %v6549_v57, %s7178_s5  ;;  %s7247_s5 = sld [smem:[#allocation47_spill]] }
0x1450   : > { %v6791_v41 = vld [vmem:[%s7247_s5] sm:$0xff]   ;;  %v6795_v45 = vld [vmem:[%s7247_s5 + $0x8] sm:$0xff]  }
0x14c1   : > { %v2510_v8 = vpop.xlane.xlu0 %2509 }
0x14c2   : > { %5368 = vrcp.f32 %v2510_v8 }
0x14c5   : > { %v2385_v10 = vpop.permute.xlu0 %2384 }
0x14c6   : > { %v2422_v11 = vadd.f32 %v2421_v6, %v2385_v10 }
0x14c8   : > { %v2514_v12 = vpack.c.bf16 %v2422_v11, %v2422_v11 }
0x14ca   : > { %v2519_v13 = vsel %vm1529_vm4, %v2514_v12, 0 }
0x14cb   : > { %4923 = vmatpush3.bf16.msra.mxu0 %v2519_v13 }
0x14cc   : > { %v5369_v14 = vpop.eup %5368  ;;  %4934 = vmatprep.subr.bf16.mxu0 %v5938_v0 }
0x14cd   : > { %v2512_v15 = vmul.f32 %v5369_v14, %v5367_v59 }
0x14cf   : > { %v2513_v16 = vpack.c.bf16 %v2512_v15, %v2512_v15 }
0x14d1   : > { %4925 = vmatmul.mubr.msk.bf16.vlgmr.msra.gmra.mrb[44].mxu0 %vm1466_vm3, %v2513_v16 }
0x14d2   : > { %4938 = vmatprep.mubr.msk.bf16.mxu0 %vm5939_vm0, %v5938_v0  ;;  %4935 = vmatpush3.bf16.msra.mxu0 %v6791_v41 }
0x14d3   : > { %4936 = vmatprep.subr.bf16.mxu0 %v5938_v0 }
0x14d6   : > { %4937 = vmatpush3.bf16.msra.mxu0 %v6795_v45 }
0x14d7   : > { %4950 = vmatprep.subr.bf16.mxu0 %v5938_v0 }
0x15a4   : > { %v2555_v57 = vpop.f32.mrb[44].mxu0 }
0x15a5   : > { %v2561_v17 = vpack.c.bf16 %v2555_v57, %v2555_v57  ;;  %v4926_v18 = vpop.f32.mrb[45].mxu0 }
0x15a6   : > { %v2558_v19 = vpop.f32.mrb[46].mxu0  ;;  %v6833_v18 = vld [vmem:[#allocation7] sm:$0xff] }
0x15a7   : > { %v4927_v20 = vpop.f32.mrb[47].mxu0  ;;  %4931 = vmatmul.mubr.msk.bf16.vlgmr.msra.gmra.mrb[44].mxu1 %vm1466_vm3, %v2561_v17 }
0x15a8   : > { %4946 = vmatprep.mubr.msk.bf16.mxu1 %vm5939_vm0, %v5938_v0  ;;  %4943 = vmatpush3.bf16.msra.mxu1 %v6772_v35 }
0x15a9   : > { %4944 = vmatprep.subr.bf16.mxu1 %v5938_v0 }
0x15ac   : > { %4945 = vmatpush3.bf16.msra.mxu1 %v6778_v36 }
0x15ad   : > { %4958 = vmatprep.subr.bf16.mxu1 %v5938_v0 }
0x167a   : > { %v2603_v21 = vpop.f32.mrb[44].mxu1 }
0x167b   : > { %v2609_v25 = vadd.f32 %v2603_v21, %v6726_v23  ;;  %v4932_v27 = vpop.f32.mrb[45].mxu1  ;;  %v1227_v23 = vld [vmem:[%s1224_s16] sm:$0xff]  ;;  %s7257_s16 = sld [smem:[#allocation59_spill]] }
0x167c   : > { %v2606_v28 = vpop.f32.mrb[46].mxu1  ;;  %v6781_v37 = vpack.c.bf16 %v1227_v23, %v1227_v23  ;;  %v6844_v27 = vld [vmem:[%s7250_s3 + $0x8] sm:$0xff]  }
0x167d   : > { %v2617_v29 = vadd.f32 %v4582_v24, %v2609_v25  ;;  %v4933_v30 = vpop.f32.mrb[47].mxu1  ;;  %v6855_v28 = vld [vmem:[%s1077_s15] ss:$0 sm:$0xff]  ;;  %s7251_s15 = sld [smem:[#allocation50_spill]] }
0x167e   : > { %4947 = vmatmul.mubr.msk.bf16.vlgmr.msra.gmra.mrb[48].mxu1 %vm1262_vm1, %v6781_v37 }
0x167f   : > { %v2618_v33 = vadd.f32 %v5392_v32, %v2617_v29  ;;  %4960 = vmatprep.mubr.msk.bf16.mxu1 %vm5939_vm0, %v5938_v0 }
0x1681   : > { %v2619_v34 = vsel %vm1262_vm1, %v2618_v33, 0.0 }
0x1682   : > { %2620 = vadd.xlane.f32.xlu1 %v2619_v34 }
0x170f   : > { %v2621_v60 = vpop.xlane.xlu1 %2620 }
0x1710   : > { %v2623_v22 = vmul.f32 0.03125, %v2621_v60 }
0x1712   : > { %v2624_v38 = vsub.f32 %v2618_v33, %v2623_v22 }
0x1714   : > { %v2625_v39 = vmul.f32 %v2624_v38, %v2624_v38 }
0x1716   : > { %v2626_v40 = vsel %vm1262_vm1, %v2625_v39, 0.0 }
0x1717   : > { %2627 = vadd.xlane.f32.xlu1 %v2626_v40 }
0x1751   : > { %v2783_v43 = vpop.f32.mrb[48].mxu1 }
0x1752   : > { %v2784_v47 = vadd.f32 %v6800_v46, %v2783_v43  ;;  %v4948_v48 = vpop.f32.mrb[49].mxu1 }
0x1753   : > { %v2786_v49 = vpop.f32.mrb[50].mxu1 }
0x1754   : > { %2866 = vrot.lane.b32.xlu1 %v2784_v47, %s5940_s8  ;;  %v4949_v50 = vpop.f32.mrb[51].mxu1  ;;  %v2865_v14 = vmul.f32 %v2784_v47, %v6513_v31  ;;  %v6840_v31 = vld [vmem:[%s7250_s3] sm:$0xff]   ;;  %s4245_s3 = scalar_lea.sflag [#allocation4], %s6406_s14 }
0x17a4   : > { %v2628_v51 = vpop.xlane.xlu1 %2627 }
0x17a5   : > { %v2629_v3 = vmul.f32 0.03125, %v2628_v51  ;;  %v6872_v51 = vld [vmem:[%s7251_s15] ss:$0 sm:$0xff]  ;;  %s7260_s15 = sld [smem:[#allocation60_spill]] }
0x17a7   : > { %v2631_v42 = vadd.f32 1e-06, %v2629_v3 }
0x17a9   : > { %5370 = vrsqrt.f32 %v2631_v42 }
0x17b3   : > { %v5371_v5 = vpop.eup %5370 }
0x17b4   : > { %v2633_v9 = vmul.f32 %v5371_v5, %v2624_v38 }
0x17b6   : > { %v2640_v54 = vmul.f32 %v4583_v52, %v2633_v9 }
0x17b8   : > { %v6806_v55 = vadd.f32 %v4584_v53, %v2640_v54 }
0x17ba   : > { %v6810_v1 = vpack.c.bf16 %v6806_v55, %v6806_v55 }
0x17bc   : > { %4939 = vmatmul.mubr.msk.bf16.vlgmr.msra.gmra.mrb[48].mxu0 %vm1262_vm1, %v6810_v1 }
0x17bd   : > { %4954 = vmatprep.mubr.msk.bf16.mxu0 %vm5939_vm0, %v5938_v0  ;;  %4951 = vmatpush3.bf16.msra.mxu0 %v6840_v31 }
0x17be   : > { %4952 = vmatprep.subr.bf16.mxu0 %v5938_v0 }
0x17c1   : > { %4953 = vmatpush3.bf16.msra.mxu0 %v6844_v27 }
0x17c2   : > { %4964 = vmatprep.subr.bf16.mxu0 %v5938_v0 }
0x17c4   : > { %4955 = vmatmul.mubr.msk.bf16.vlgmr.msra.gmra.mrb[52].mxu0 %vm1262_vm1, %v6781_v37 }
0x17c5   : > { %4966 = vmatprep.mubr.msk.bf16.mxu0 %vm5939_vm0, %v5938_v0 }
0x17c6   : > { %v2867_v6 = vpop.permute.xlu1 %2866 }
0x17c7   : > { %v2868_v63 = vsel %vm1433_vm2, %v2867_v6, %v2784_v47 }
0x188f   : > { %v2717_v2 = vpop.f32.mrb[48].mxu0 }
0x1890   : > { %v2718_v58 = vadd.f32 %v6816_v56, %v2717_v2  ;;  %v4940_v59 = vpop.f32.mrb[49].mxu0 }
0x1891   : > { %v2720_v61 = vpop.f32.mrb[50].mxu0 }
0x1892   : > { %2853 = vrot.lane.b32.xlu0 %v2718_v58, %s5940_s8  ;;  %v4941_v62 = vpop.f32.mrb[51].mxu0  ;;  %v2852_v19 = vmul.f32 %v6833_v18, %v2718_v58 }
0x1896   : > { %2869 = vrot.lane.b32.xlu0 %v2868_v63, %s5940_s8 }
0x1904   : > { %v2854_v7 = vpop.permute.xlu0 %2853 }
0x1905   : > { %v2855_v44 = vsel %vm1433_vm2, %v2854_v7, %v2718_v58 }
0x1906   : > { %2856 = vrot.lane.b32.xlu1 %v2855_v44, %s5940_s8 }
0x1908   : > { %v2870_v4 = vpop.permute.xlu0 %2869 }
0x1909   : > { %v2871_v8 = vsel %vm1433_vm2, %v2870_v4, %v2784_v47  ;;  %v2846_v47 = vpop.f32.mrb[52].mxu0 }
0x190a   : > { %v2872_v10 = vmul.f32 %v2871_v8, %v6506_v26  ;;  %v4956_v49 = vpop.f32.mrb[53].mxu0  ;;  %v2847_v42 = vadd.f32 %v6872_v51, %v2846_v47 }
0x190b   : > { %v2849_v50 = vpop.f32.mrb[54].mxu0 }
0x190c   : > { %2874 = vrot.lane.b32.xlu0 %v2872_v10, %s5942_s7  ;;  %v4957_v3 = vpop.f32.mrb[55].mxu0  ;;  %v2939_v5 = vpack.c.bf16 %v2847_v42, %v2847_v42 }
0x190e   : > { %v2944_v52 = vsel %vm1529_vm4, %v2939_v5, 0 }
0x190f   : > { %4965 = vmatpush3.bf16.msra.mxu0 %v2944_v52 }
0x1910   : > { %4978 = vmatprep.subr.bf16.mxu0 %v5938_v0 }
0x1978   : > { %v2857_v11 = vpop.permute.xlu1 %2856 }
0x1979   : > { %v2858_v12 = vsel %vm1433_vm2, %v2857_v11, %v2718_v58 }
0x197a   : > { %v2859_v13 = vmul.f32 %v2858_v12, %v6506_v26 }
0x197c   : > { %2861 = vrot.lane.b32.xlu1 %v2859_v13, %s5942_s7 }
0x197e   : > { %v2875_v15 = vpop.permute.xlu0 %2874 }
0x197f   : > { %v2877_v16 = vadd.f32 %v2875_v15, %v2865_v14 }
0x1981   : > { %v2880_v57 = vpack.c.bf16 %v2877_v16, %v2877_v16 }
0x1983   : > { %v2885_v17 = vsel %vm1466_vm3, %v2880_v57, 0 }
0x1984   : > { %4959 = vmatpush3.bf16.xpose.msra.mxu1 %v2885_v17 }
0x1985   : > { %4970 = vmatprep.subr.bf16.mxu1 %v5938_v0 }
0x19ee   : > { %v2862_v20 = vpop.permute.xlu1 %2861 }
0x19ef   : > { %v2864_v21 = vadd.f32 %v2862_v20, %v2852_v19 }
0x19f1   : > { %v2878_v24 = vmul.f32 0.35355338, %v2864_v21 }
0x19f3   : > { %v2879_v25 = vpack.c.bf16 %v2878_v24, %v2878_v24 }
0x19f5   : > { %4961 = vmatmul.mubr.msk.bf16.vlgmr.msra.gmra.mrb[52].mxu1 %vm1466_vm3, %v2879_v25 }
0x19f6   : > { %4974 = vmatprep.mubr.msk.bf16.mxu1 %vm5939_vm0, %v5938_v0 }
0x1ac8   : > { %v2921_v29 = vpop.f32.mrb[52].mxu1 }
0x1ac9   : > { %v2922_v30 = vadd.f32 %v6855_v28, %v2921_v29  ;;  %v4962_v32 = vpop.f32.mrb[53].mxu1 }
0x1aca   : > { %v2924_v33 = vpop.f32.mrb[54].mxu1 }
0x1acb   : > { %v4963_v34 = vpop.f32.mrb[55].mxu1  ;;  %v2927_v23 = vsel %vm1466_vm3, %v2922_v30, -inf }
0x1acc   : > { %2928 = vmax.xlane.f32.xlu0 %v2927_v23 }
0x1ae2   : > { %3037 = vrot.lane.b32.xlu0 %v6772_v35, %s5943_s4 }
0x1ae6   : > { %2988 = vrot.lane.b32.xlu0 %v6791_v41, %s5943_s4 }
0x1aea   : > { %3043 = vrot.lane.b32.xlu0 %v6800_v46, %s5943_s4 }
0x1b59   : > { %v2929_v60 = vpop.xlane.xlu0 %2928 }
0x1b5a   : > { %v2930_v22 = vsub.f32 %v2922_v30, %v2929_v60 }
0x1b5c   : > { %v2931_v38 = vmul.f32 1.442695, %v2930_v22 }
0x1b5d   : > { %v3038_v43 = vpop.permute.xlu0 %3037 }
0x1b5e   : > { %5372 = vpow2.f32 %v2931_v38 }
0x1b61   : > { %v2989_v48 = vpop.permute.xlu0 %2988 }
0x1b62   : > { %4971 = vmatpush3.bf16.msra.mxu1 %v2989_v48 }
0x1b63   : > { %4972 = vmatprep.subr.bf16.mxu1 %v5938_v0 }
0x1b65   : > { %v3044_v12 = vpop.permute.xlu0 %3043 }
0x1b68   : > { %v5373_v39 = vpop.eup %5372 }
0x1b69   : > { %v2933_v40 = vsel %vm1466_vm3, %v5373_v39, 0.0 }
0x1b6a   : > { %2934 = vadd.xlane.f32.xlu1 %v2933_v40 }
0x1b7b   : > { %3039 = vrot.lane.b32.xlu1 %v6778_v36, %s5943_s4 }
0x1b7f   : > { %2990 = vrot.lane.b32.xlu1 %v6795_v45, %s5943_s4 }
0x1b83   : > { %2994 = vrot.lane.b32.xlu1 %v6816_v56, %s5943_s4 }
0x1bf7   : > { %v2935_v9 = vpop.xlane.xlu1 %2934 }
0x1bf8   : > { %5374 = vrcp.f32 %v2935_v9 }
0x1bfb   : > { %v3040_v53 = vpop.permute.xlu1 %3039 }
0x1bff   : > { %v2991_v54 = vpop.permute.xlu1 %2990 }
0x1c00   : > { %4973 = vmatpush3.bf16.msra.mxu1 %v2991_v54 }
0x1c01   : > { %4986 = vmatprep.subr.bf16.mxu1 %v5938_v0 }
0x1c02   : > { %v5375_v2 = vpop.eup %5374 }
0x1c03   : > { %v2937_v58 = vmul.f32 %v5375_v2, %v5373_v39  ;;  %4975 = vmatmul.mubr.msk.bf16.vlgmr.msra.gmra.mrb[56].mxu1 %vm1262_vm1, %v6810_v1  ;;  %v2995_v61 = vpop.permute.xlu1 %2994 }
0x1c04   : > { %4990 = vmatprep.mubr.msk.bf16.mxu1 %vm5939_vm0, %v5938_v0 }
0x1c05   : > { %v2938_v59 = vpack.c.bf16 %v2937_v58, %v2937_v58 }
0x1c07   : > { %4967 = vmatmul.mubr.msk.bf16.vlgmr.msra.gmra.mrb[56].mxu0 %vm1466_vm3, %v2938_v59 }
0x1c08   : > { %4979 = vmatpush3.bf16.msra.mxu0 %v3038_v43  ;;  %4982 = vmatprep.mubr.msk.bf16.mxu0 %vm5939_vm0, %v5938_v0 }
0x1c09   : > { %4980 = vmatprep.subr.bf16.mxu0 %v5938_v0 }
0x1c0c   : > { %4981 = vmatpush3.bf16.msra.mxu0 %v3040_v53 }
0x1c0d   : > { %4994 = vmatprep.subr.bf16.mxu0 %v5938_v0 }
0x1c0f   : > { %4983 = vmatmul.mubr.msk.bf16.vlgmr.msra.gmra.mrb[60].mxu0 %vm1262_vm1, %v6781_v37 }
0x1c10   : > { %4996 = vmatprep.mubr.msk.bf16.mxu0 %vm5939_vm0, %v5938_v0 }
0x1cd6   : > { %v3031_v6 = vpop.f32.mrb[56].mxu1 }
0x1cd7   : > { %v3032_v62 = vadd.f32 %v3031_v6, %v2995_v61  ;;  %v4976_v63 = vpop.f32.mrb[57].mxu1 }
0x1cd8   : > { %v3034_v7 = vpop.f32.mrb[58].mxu1 }
0x1cd9   : > { %3136 = vrot.lane.b32.xlu1 %v3032_v62, %s5940_s8  ;;  %v4977_v44 = vpop.f32.mrb[59].mxu1  ;;  %v3135_v22 = vmul.f32 %v6833_v18, %v3032_v62 }
0x1cda   : > { %v6894_v4 = vpop.f32.mrb[56].mxu0 }
0x1cdb   : > { %v4968_v8 = vpop.f32.mrb[57].mxu0 }
0x1cdc   : > { %v2983_v10 = vpop.f32.mrb[58].mxu0 }
0x1cdd   : > { %v4969_v11 = vpop.f32.mrb[59].mxu0 }
0x1ce2   : > { %v3080_v13 = vpop.f32.mrb[60].mxu0 }
0x1ce3   : > { %v3081_v14 = vadd.f32 %v3080_v13, %v3044_v12  ;;  %v4984_v15 = vpop.f32.mrb[61].mxu0  ;;  %v3270_v12 = vld [vmem:[#allocation23 + $0x4] sm:$0xf] }
0x1ce4   : > { %v3083_v16 = vpop.f32.mrb[62].mxu0  ;;  %v3275_v13 = vsel %vm1529_vm4, %v3270_v12, 0 }
0x1ce5   : > { %3149 = vrot.lane.b32.xlu0 %v3081_v14, %s5940_s8  ;;  %v4985_v57 = vpop.f32.mrb[63].mxu0  ;;  %v3148_v34 = vmul.f32 %v6833_v18, %v3081_v14  ;;  %v2987_v16 = vld [vmem:[#allocation23] sm:$0xf] }
0x1d4b   : > { %v3137_v17 = vpop.permute.xlu1 %3136 }
0x1d4c   : > { %v3138_v19 = vsel %vm1433_vm2, %v3137_v17, %v3032_v62 }
0x1d4d   : > { %3139 = vrot.lane.b32.xlu1 %v3138_v19, %s5940_s8  ;;  %v3321_v19 = vsel %vm1529_vm4, %v2987_v16, 0 }
0x1d57   : > { %v3150_v20 = vpop.permute.xlu0 %3149 }
0x1d58   : > { %v3151_v21 = vsel %vm1433_vm2, %v3150_v20, %v3081_v14  ;;  %v2986_v20 = vpack.c.bf16 %v6894_v4, %v6894_v4 }
0x1d59   : > { %3152 = vrot.lane.b32.xlu0 %v3151_v21, %s5940_s8 }
0x1dbf   : > { %v3140_v24 = vpop.permute.xlu1 %3139 }
0x1dc0   : > { %v3141_v25 = vsel %vm1433_vm2, %v3140_v24, %v3032_v62 }
0x1dc1   : > { %v3142_v29 = vmul.f32 %v3141_v25, %v6506_v26 }
0x1dc3   : > { %3144 = vrot.lane.b32.xlu1 %v3142_v29, %s5942_s7 }
0x1dc7   : > { %3088 = vrot.lane.b32.xlu1 %v6844_v27, %s5943_s4 }
0x1dcb   : > { %v3153_v30 = vpop.permute.xlu0 %3152 }
0x1dcc   : > { %v3154_v32 = vsel %vm1433_vm2, %v3153_v30, %v3081_v14 }
0x1dcd   : > { %v3155_v33 = vmul.f32 %v3154_v32, %v6506_v26 }
0x1dcf   : > { %3157 = vrot.lane.b32.xlu0 %v3155_v33, %s5942_s7 }
0x1dd3   : > { %3086 = vrot.lane.b32.xlu0 %v6840_v31, %s5943_s4 }
0x1e35   : > { %v3145_v23 = vpop.permute.xlu1 %3144 }
0x1e36   : > { %v3147_v39 = vadd.f32 %v3145_v23, %v3135_v22 }
0x1e38   : > { %v3161_v47 = vmul.f32 0.35355338, %v3147_v39 }
0x1e39   : > { %v3089_v50 = vpop.permute.xlu1 %3088 }
0x1e3a   : > { %v3162_v48 = vpack.c.bf16 %v3161_v47, %v3161_v47 }
0x1e41   : > { %v3158_v60 = vpop.permute.xlu0 %3157 }
0x1e42   : > { %v3160_v38 = vadd.f32 %v3158_v60, %v3148_v34 }
0x1e44   : > { %v3163_v40 = vpack.c.bf16 %v3160_v38, %v3160_v38 }
0x1e45   : > { %v3087_v49 = vpop.permute.xlu0 %3086 }
0x1e46   : > { %v3168_v43 = vsel %vm1466_vm3, %v3163_v40, 0  ;;  %4987 = vmatpush3.bf16.msra.mxu1 %v3087_v49 }
0x1e47   : > { %4995 = vmatpush3.bf16.xpose.msra.mxu0 %v3168_v43  ;;  %4988 = vmatprep.subr.bf16.mxu1 %v5938_v0 }
0x1e48   : > { %5006 = vmatprep.subr.bf16.mxu0 %v5938_v0 }
0x1e4a   : > { %4989 = vmatpush3.bf16.msra.mxu1 %v3089_v50 }
0x1e4b   : > { %5000 = vmatprep.subr.bf16.mxu1 %v5938_v0 }
0x1e4d   : > { %4991 = vmatmul.mubr.msk.bf16.vlgmr.msra.gmra.mrb[60].mxu1 %vm1262_vm1, %v6781_v37 }
0x1e4e   : > { %4997 = vmatmul.mubr.msk.bf16.vlgmr.msra.gmra.mrb[64].mxu0 %vm1466_vm3, %v3162_v48  ;;  %5002 = vmatprep.mubr.msk.bf16.mxu1 %vm5939_vm0, %v5938_v0 }
0x1e4f   : > { %5008 = vmatprep.mubr.msk.bf16.mxu0 %vm5939_vm0, %v5938_v0  ;;  %5007 = vmatpush3.bf16.msra.mxu0 %v3275_v13 }
0x1e50   : > { %5018 = vmatprep.subr.bf16.mxu0 %v5938_v0 }
0x1f20   : > { %v3129_v6 = vpop.f32.mrb[60].mxu1 }
0x1f21   : > { %v3204_v3 = vpop.f32.mrb[64].mxu0  ;;  %v4992_v62 = vpop.f32.mrb[61].mxu1 }
0x1f22   : > { %v3205_v42 = vadd.f32 %v6855_v28, %v3204_v3  ;;  %v4998_v5 = vpop.f32.mrb[65].mxu0  ;;  %v3132_v63 = vpop.f32.mrb[62].mxu1 }
0x1f23   : > { %v3207_v52 = vpop.f32.mrb[66].mxu0  ;;  %v4993_v7 = vpop.f32.mrb[63].mxu1 }
0x1f24   : > { %v4999_v9 = vpop.f32.mrb[67].mxu0  ;;  %v3210_v53 = vsel %vm1466_vm3, %v3205_v42, -inf }
0x1f25   : > { %3211 = vmax.xlane.f32.xlu0 %v3210_v53 }
0x1f3b   : > { %3092 = vrot.lane.b32.xlu0 %v6872_v51, %s5943_s4  ;;  %s7252_s4 = smov 104  }
0x1f3f   : > { %3414 = vrot.lane.b32.xlu0 %v6778_v36, %s5944_s9 }
0x1f43   : > { %3365 = vrot.lane.b32.xlu0 %v6795_v45, %s5944_s9 }
0x1f47   : > { %3369 = vrot.lane.b32.xlu0 %v6816_v56, %s5944_s9 }
0x1fb2   : > { %v3212_v54 = vpop.xlane.xlu0 %3211 }
0x1fb3   : > { %v3213_v2 = vsub.f32 %v3205_v42, %v3212_v54 }
0x1fb5   : > { %v3214_v58 = vmul.f32 1.442695, %v3213_v2 }
0x1fb6   : > { %v3093_v44 = vpop.permute.xlu0 %3092 }
0x1fb7   : > { %5376 = vpow2.f32 %v3214_v58  ;;  %v3130_v8 = vadd.f32 %v3129_v6, %v3093_v44 }
0x1fb9   : > { %v3222_v10 = vpack.c.bf16 %v3130_v8, %v3130_v8 }
0x1fba   : > { %v3415_v24 = vpop.permute.xlu0 %3414 }
0x1fbb   : > { %v3227_v11 = vsel %vm1529_vm4, %v3222_v10, 0 }
0x1fbc   : > { %5001 = vmatpush3.bf16.msra.mxu1 %v3227_v11 }
0x1fbd   : > { %5012 = vmatprep.subr.bf16.mxu1 %v5938_v0 }
0x1fbe   : > { %v3366_v34 = vpop.permute.xlu0 %3365 }
0x1fc1   : > { %v5377_v59 = vpop.eup %5376 }
0x1fc2   : > { %v3216_v61 = vsel %vm1466_vm3, %v5377_v59, 0.0  ;;  %v3370_v54 = vpop.permute.xlu0 %3369 }
0x1fc3   : > { %3217 = vadd.xlane.f32.xlu1 %v3216_v61 }
0x1fd4   : > { %3412 = vrot.lane.b32.xlu1 %v6772_v35, %s5944_s9 }
0x1fd8   : > { %3363 = vrot.lane.b32.xlu1 %v6791_v41, %s5944_s9 }
0x1fdc   : > { %3418 = vrot.lane.b32.xlu1 %v6800_v46, %s5944_s9 }
0x2050   : > { %v3218_v14 = vpop.xlane.xlu1 %3217 }
0x2051   : > { %5378 = vrcp.f32 %v3218_v14 }
0x2054   : > { %v3413_v21 = vpop.permute.xlu1 %3412 }
0x2058   : > { %v3364_v30 = vpop.permute.xlu1 %3363 }
0x205b   : > { %v5379_v15 = vpop.eup %5378 }
0x205c   : > { %v3220_v57 = vmul.f32 %v5379_v15, %v5377_v59  ;;  %v3419_v39 = vpop.permute.xlu1 %3418 }
0x205e   : > { %v3221_v17 = vpack.c.bf16 %v3220_v57, %v3220_v57 }
0x2060   : > { %5003 = vmatmul.mubr.msk.bf16.vlgmr.msra.gmra.mrb[64].mxu1 %vm1466_vm3, %v3221_v17 }
0x2061   : > { %5013 = vmatpush3.bf16.msra.mxu1 %v3321_v19  ;;  %5014 = vmatprep.mubr.msk.bf16.mxu1 %vm5939_vm0, %v5938_v0 }
0x2062   : > { %5026 = vmatprep.subr.bf16.mxu1 %v5938_v0 }
0x2068   : > { %5015 = vmatmul.mubr.msk.bf16.vlgmr.msra.gmra.mrb[68].mxu1 %vm1466_vm3, %v2986_v20 }
0x2069   : > { %5027 = vmatpush3.bf16.msra.mxu1 %v3413_v21  ;;  %5030 = vmatprep.mubr.msk.bf16.mxu1 %vm5939_vm0, %v5938_v0 }
0x206a   : > { %5028 = vmatprep.subr.bf16.mxu1 %v5938_v0 }
0x206d   : > { %5029 = vmatpush3.bf16.msra.mxu1 %v3415_v24 }
0x206e   : > { %5042 = vmatprep.subr.bf16.mxu1 %v5938_v0 }
0x2070   : > { %5031 = vmatmul.mubr.msk.bf16.vlgmr.msra.gmra.mrb[72].mxu1 %vm1262_vm1, %v6781_v37 }
0x2071   : > { %5044 = vmatprep.mubr.msk.bf16.mxu1 %vm5939_vm0, %v5938_v0 }
0x2133   : > { %v3263_v4 = vpop.f32.mrb[64].mxu1 }
0x2134   : > { %v3269_v25 = vpack.c.bf16 %v3263_v4, %v3263_v4  ;;  %v5004_v29 = vpop.f32.mrb[65].mxu1 }
0x2135   : > { %v3266_v32 = vpop.f32.mrb[66].mxu1 }
0x2136   : > { %v5005_v33 = vpop.f32.mrb[67].mxu1  ;;  %5009 = vmatmul.mubr.msk.bf16.vlgmr.msra.gmra.mrb[68].mxu0 %vm1466_vm3, %v3269_v25 }
0x2137   : > { %5019 = vmatpush3.bf16.msra.mxu0 %v3364_v30  ;;  %5022 = vmatprep.mubr.msk.bf16.mxu0 %vm5939_vm0, %v5938_v0 }
0x2138   : > { %5020 = vmatprep.subr.bf16.mxu0 %v5938_v0 }
0x213b   : > { %v3357_v23 = vpop.f32.mrb[68].mxu1  ;;  %5021 = vmatpush3.bf16.msra.mxu0 %v3366_v34 }
0x213c   : > { %v5016_v60 = vpop.f32.mrb[69].mxu1  ;;  %5034 = vmatprep.subr.bf16.mxu0 %v5938_v0 }
0x213d   : > { %v3360_v22 = vpop.f32.mrb[70].mxu1 }
0x213e   : > { %v5017_v38 = vpop.f32.mrb[71].mxu1  ;;  %5023 = vmatmul.mubr.msk.bf16.vlgmr.msra.gmra.mrb[72].mxu0 %vm1262_vm1, %v6810_v1 }
0x213f   : > { %5038 = vmatprep.mubr.msk.bf16.mxu0 %vm5939_vm0, %v5938_v0 }
0x2143   : > { %v3455_v40 = vpop.f32.mrb[72].mxu1 }
0x2144   : > { %v3456_v43 = vadd.f32 %v3455_v40, %v3419_v39  ;;  %v5032_v47 = vpop.f32.mrb[73].mxu1 }
0x2145   : > { %v3458_v48 = vpop.f32.mrb[74].mxu1 }
0x2146   : > { %3524 = vrot.lane.b32.xlu1 %v3456_v43, %s5940_s8  ;;  %v5033_v49 = vpop.f32.mrb[75].mxu1  ;;  %v3523_v10 = vmul.f32 %v6833_v18, %v3456_v43 }
0x21b8   : > { %v3525_v50 = vpop.permute.xlu1 %3524 }
0x21b9   : > { %v3526_v3 = vsel %vm1433_vm2, %v3525_v50, %v3456_v43 }
0x21ba   : > { %3527 = vrot.lane.b32.xlu1 %v3526_v3, %s5940_s8 }
0x2209   : > { %v3311_v42 = vpop.f32.mrb[68].mxu0 }
0x220a   : > { %v6973_v5 = vadd.f32 %v3357_v23, %v3311_v42  ;;  %v5010_v52 = vpop.f32.mrb[69].mxu0 }
0x220b   : > { %v3314_v9 = vpop.f32.mrb[70].mxu0 }
0x220c   : > { %v5011_v53 = vpop.f32.mrb[71].mxu0 }
0x2211   : > { %v3406_v2 = vpop.f32.mrb[72].mxu0 }
0x2212   : > { %v3407_v58 = vadd.f32 %v3406_v2, %v3370_v54  ;;  %v5024_v59 = vpop.f32.mrb[73].mxu0 }
0x2213   : > { %v3409_v61 = vpop.f32.mrb[74].mxu0 }
0x2214   : > { %3511 = vrot.lane.b32.xlu0 %v3407_v58, %s5940_s8  ;;  %v5025_v6 = vpop.f32.mrb[75].mxu0  ;;  %v3510_v17 = vmul.f32 %v6833_v18, %v3407_v58 }
0x222c   : > { %v3528_v62 = vpop.permute.xlu1 %3527 }
0x222d   : > { %v3529_v63 = vsel %vm1433_vm2, %v3528_v62, %v3456_v43 }
0x222e   : > { %v3530_v7 = vmul.f32 %v3529_v63, %v6506_v26 }
0x2230   : > { %3532 = vrot.lane.b32.xlu1 %v3530_v7, %s5942_s7 }
0x2234   : > { %3461 = vrot.lane.b32.xlu1 %v6840_v31, %s5944_s9 }
0x2286   : > { %v3512_v44 = vpop.permute.xlu0 %3511 }
0x2287   : > { %v3513_v8 = vsel %vm1433_vm2, %v3512_v44, %v3407_v58 }
0x2288   : > { %3514 = vrot.lane.b32.xlu0 %v3513_v8, %s5940_s8 }
0x22a2   : > { %v3533_v11 = vpop.permute.xlu1 %3532 }
0x22a3   : > { %v3535_v12 = vadd.f32 %v3533_v11, %v3523_v10 }
0x22a5   : > { %v3538_v13 = vpack.c.bf16 %v3535_v12, %v3535_v12 }
0x22a6   : > { %v3462_v4 = vpop.permute.xlu1 %3461 }
0x22a7   : > { %v3543_v14 = vsel %vm1466_vm3, %v3538_v13, 0  ;;  %5035 = vmatpush3.bf16.msra.mxu0 %v3462_v4 }
0x22a8   : > { %5043 = vmatpush3.bf16.xpose.msra.mxu1 %v3543_v14  ;;  %5036 = vmatprep.subr.bf16.mxu0 %v5938_v0 }
0x22a9   : > { %5054 = vmatprep.subr.bf16.mxu1 %v5938_v0 }
0x22fa   : > { %v3515_v15 = vpop.permute.xlu0 %3514 }
0x22fb   : > { %v3516_v16 = vsel %vm1433_vm2, %v3515_v15, %v3407_v58 }
0x22fc   : > { %v3517_v57 = vmul.f32 %v3516_v16, %v6506_v26 }
0x22fe   : > { %3519 = vrot.lane.b32.xlu0 %v3517_v57, %s5942_s7 }
0x2302   : > { %3463 = vrot.lane.b32.xlu0 %v6844_v27, %s5944_s9 }
0x2370   : > { %v3520_v19 = vpop.permute.xlu0 %3519 }
0x2371   : > { %v3522_v20 = vadd.f32 %v3520_v19, %v3510_v17 }
0x2373   : > { %v3536_v21 = vmul.f32 0.35355338, %v3522_v20 }
0x2374   : > { %v3464_v25 = vpop.permute.xlu0 %3463 }
0x2375   : > { %v3537_v24 = vpack.c.bf16 %v3536_v21, %v3536_v21  ;;  %5037 = vmatpush3.bf16.msra.mxu0 %v3464_v25 }
0x2376   : > { %5048 = vmatprep.subr.bf16.mxu0 %v5938_v0 }
0x2377   : > { %5045 = vmatmul.mubr.msk.bf16.vlgmr.msra.gmra.mrb[76].mxu1 %vm1466_vm3, %v3537_v24 }
0x2378   : > { %5056 = vmatprep.mubr.msk.bf16.mxu1 %vm5939_vm0, %v5938_v0  ;;  %5039 = vmatmul.mubr.msk.bf16.vlgmr.msra.gmra.mrb[76].mxu0 %vm1262_vm1, %v6781_v37 }
0x2379   : > { %5050 = vmatprep.mubr.msk.bf16.mxu0 %vm5939_vm0, %v5938_v0 }
0x244a   : > { %v3579_v29 = vpop.f32.mrb[76].mxu1 }
0x244b   : > { %v3580_v30 = vadd.f32 %v6855_v28, %v3579_v29  ;;  %v5046_v32 = vpop.f32.mrb[77].mxu1  ;;  %v3504_v43 = vpop.f32.mrb[76].mxu0 }
0x244c   : > { %v3582_v33 = vpop.f32.mrb[78].mxu1  ;;  %v5040_v47 = vpop.f32.mrb[77].mxu0 }
0x244d   : > { %v5047_v34 = vpop.f32.mrb[79].mxu1  ;;  %v3585_v23 = vsel %vm1466_vm3, %v3580_v30, -inf }
0x244e   : > { %3586 = vmax.xlane.f32.xlu1 %v3585_v23 }
0x245f   : > { %3742 = vrot.lane.b32.xlu1 %v6772_v35, %s7252_s4  ;;  %v3507_v35 = vpop.f32.mrb[78].mxu0 }
0x2460   : > { %v5041_v48 = vpop.f32.mrb[79].mxu0 }
0x2463   : > { %3744 = vrot.lane.b32.xlu1 %v6778_v36, %s7252_s4  ;;  %v3645_v36 = vld [vmem:[#allocation23 + $0x8] sm:$0xf] }
0x2467   : > { %3695 = vrot.lane.b32.xlu1 %v6795_v45, %s7252_s4  ;;  %v3650_v45 = vsel %vm1529_vm4, %v3645_v36, 0 }
0x2468   : > { %5055 = vmatpush3.bf16.msra.mxu1 %v3650_v45 }
0x2469   : > { %5068 = vmatprep.subr.bf16.mxu1 %v5938_v0 }
0x246b   : > { %3699 = vrot.lane.b32.xlu1 %v6816_v56, %s7252_s4 }
0x24db   : > { %v3587_v60 = vpop.xlane.xlu1 %3586 }
0x24dc   : > { %v3588_v22 = vsub.f32 %v3580_v30, %v3587_v60 }
0x24de   : > { %v3589_v38 = vmul.f32 1.442695, %v3588_v22 }
0x24df   : > { %v3743_v3 = vpop.permute.xlu1 %3742 }
0x24e0   : > { %5380 = vpow2.f32 %v3589_v38 }
0x24ea   : > { %v5381_v39 = vpop.eup %5380 }
0x24eb   : > { %v3591_v40 = vsel %vm1466_vm3, %v5381_v39, 0.0 }
0x24ec   : > { %3592 = vadd.xlane.f32.xlu0 %v3591_v40 }
0x2502   : > { %3467 = vrot.lane.b32.xlu0 %v6872_v51, %s5944_s9  ;;  %s7255_s9 = sld [smem:[#allocation54_spill]] }
0x2506   : > { %3693 = vrot.lane.b32.xlu0 %v6791_v41, %s7252_s4 }
0x250a   : > { %3748 = vrot.lane.b32.xlu0 %v6800_v46, %s7252_s4  ;;  %v3745_v46 = vpop.permute.xlu1 %3744 }
0x250e   : > { %v3696_v2 = vpop.permute.xlu1 %3695 }
0x2512   : > { %v3700_v63 = vpop.permute.xlu1 %3699 }
0x2579   : > { %v3593_v56 = vpop.xlane.xlu0 %3592 }
0x257a   : > { %5382 = vrcp.f32 %v3593_v56 }
0x257d   : > { %v3468_v49 = vpop.permute.xlu0 %3467 }
0x257e   : > { %v3505_v50 = vadd.f32 %v3504_v43, %v3468_v49 }
0x2580   : > { %v3597_v42 = vpack.c.bf16 %v3505_v50, %v3505_v50 }
0x2581   : > { %v3694_v53 = vpop.permute.xlu0 %3693 }
0x2582   : > { %v3602_v52 = vsel %vm1529_vm4, %v3597_v42, 0 }
0x2583   : > { %5049 = vmatpush3.bf16.msra.mxu0 %v3602_v52 }
0x2584   : > { %v5383_v9 = vpop.eup %5382  ;;  %5060 = vmatprep.subr.bf16.mxu0 %v5938_v0 }
0x2585   : > { %v3595_v41 = vmul.f32 %v5383_v9, %v5381_v39  ;;  %v3749_v17 = vpop.permute.xlu0 %3748 }
0x2587   : > { %v3596_v54 = vpack.c.bf16 %v3595_v41, %v3595_v41 }
0x2589   : > { %5051 = vmatmul.mubr.msk.bf16.vlgmr.msra.gmra.mrb[80].mxu0 %vm1466_vm3, %v3596_v54 }
0x258a   : > { %5061 = vmatpush3.bf16.msra.mxu0 %v3694_v53  ;;  %5064 = vmatprep.mubr.msk.bf16.mxu0 %vm5939_vm0, %v5938_v0 }
0x258b   : > { %5062 = vmatprep.subr.bf16.mxu0 %v5938_v0 }
0x258e   : > { %5063 = vmatpush3.bf16.msra.mxu0 %v3696_v2 }
0x258f   : > { %5076 = vmatprep.subr.bf16.mxu0 %v5938_v0 }
0x2591   : > { %5065 = vmatmul.mubr.msk.bf16.vlgmr.msra.gmra.mrb[84].mxu0 %vm1262_vm1, %v6810_v1 }
0x2592   : > { %5080 = vmatprep.mubr.msk.bf16.mxu0 %vm5939_vm0, %v5938_v0 }
0x265c   : > { %v3638_v58 = vpop.f32.mrb[80].mxu0 }
0x265d   : > { %v3644_v59 = vpack.c.bf16 %v3638_v58, %v3638_v58  ;;  %v5052_v61 = vpop.f32.mrb[81].mxu0 }
0x265e   : > { %v3641_v6 = vpop.f32.mrb[82].mxu0 }
0x265f   : > { %v5053_v62 = vpop.f32.mrb[83].mxu0  ;;  %5057 = vmatmul.mubr.msk.bf16.vlgmr.msra.gmra.mrb[80].mxu1 %vm1466_vm3, %v3644_v59 }
0x2660   : > { %5069 = vmatpush3.bf16.msra.mxu1 %v3743_v3  ;;  %5072 = vmatprep.mubr.msk.bf16.mxu1 %vm5939_vm0, %v5938_v0 }
0x2661   : > { %5070 = vmatprep.subr.bf16.mxu1 %v5938_v0 }
0x2664   : > { %v3736_v7 = vpop.f32.mrb[84].mxu0  ;;  %5071 = vmatpush3.bf16.msra.mxu1 %v3745_v46 }
0x2665   : > { %v3737_v1 = vadd.f32 %v3736_v7, %v3700_v63  ;;  %v5066_v44 = vpop.f32.mrb[85].mxu0  ;;  %5084 = vmatprep.subr.bf16.mxu1 %v5938_v0 }
0x2666   : > { %v3739_v8 = vpop.f32.mrb[86].mxu0 }
0x2667   : > { %5073 = vmatmul.mubr.msk.bf16.vlgmr.msra.gmra.mrb[84].mxu1 %vm1262_vm1, %v6781_v37  ;;  %3841 = vrot.lane.b32.xlu1 %v3737_v1, %s5940_s8  ;;  %v5067_v10 = vpop.f32.mrb[87].mxu0 }
0x2668   : > { %5086 = vmatprep.mubr.msk.bf16.mxu1 %vm5939_vm0, %v5938_v0 }
0x26d9   : > { %v3842_v11 = vpop.permute.xlu1 %3841 }
0x26da   : > { %v3843_v12 = vsel %vm1433_vm2, %v3842_v11, %v3737_v1 }
0x26db   : > { %3844 = vrot.lane.b32.xlu1 %v3843_v12, %s5940_s8 }
0x2732   : > { %v3686_v13 = vpop.f32.mrb[80].mxu1 }
0x2733   : > { %v7044_v14 = vadd.f32 %v3686_v13, %v6973_v5  ;;  %v5058_v15 = vpop.f32.mrb[81].mxu1 }
0x2734   : > { %v3689_v16 = vpop.f32.mrb[82].mxu1 }
0x2735   : > { %v5059_v57 = vpop.f32.mrb[83].mxu1 }
0x273a   : > { %v3785_v19 = vpop.f32.mrb[84].mxu1 }
0x273b   : > { %v3786_v20 = vadd.f32 %v3785_v19, %v3749_v17  ;;  %v5074_v21 = vpop.f32.mrb[85].mxu1 }
0x273c   : > { %v3788_v24 = vpop.f32.mrb[86].mxu1 }
0x273d   : > { %3854 = vrot.lane.b32.xlu0 %v3786_v20, %s5940_s8  ;;  %v5075_v4 = vpop.f32.mrb[87].mxu1  ;;  %v3853_v60 = vmul.f32 %v6833_v18, %v3786_v20 }
0x274d   : > { %v3845_v25 = vpop.permute.xlu1 %3844 }
0x274e   : > { %v3846_v29 = vsel %vm1433_vm2, %v3845_v25, %v3737_v1 }
0x274f   : > { %v3847_v30 = vmul.f32 %v3846_v29, %v6506_v26 }
0x2751   : > { %3849 = vrot.lane.b32.xlu1 %v3847_v30, %s5942_s7 }
0x2755   : > { %3793 = vrot.lane.b32.xlu1 %v6844_v27, %s7252_s4  ;;  %v3840_v27 = vmul.f32 %v6833_v18, %v3737_v1 }
0x27af   : > { %v3855_v5 = vpop.permute.xlu0 %3854 }
0x27b0   : > { %v3856_v32 = vsel %vm1433_vm2, %v3855_v5, %v3786_v20 }
0x27b1   : > { %3857 = vrot.lane.b32.xlu0 %v3856_v32, %s5940_s8  ;;  %s7253_s8 = sld [smem:[#allocation51_spill]]  ;;  %v5351_v32 = vld [vmem:[%s6105_s12 + $0x8] sm:$0xff]  }
0x27b7   : > { %v4619_v13 = vld [vmem:[%s7253_s8] ss:$0 sm:$0xff]  ;;  %s4635_s8 = sshll.u32 %s6138_s11, 7  ;;  %s5946_s11 = smov [#allocation25]  }
0x27c3   : > { %v3850_v22 = vpop.permute.xlu1 %3849 }
0x27c4   : > { %v3852_v40 = vadd.f32 %v3850_v22, %v3840_v27  ;;  %v4620_v22 = vld [vmem:[%s7255_s9] ss:$0 sm:$0xff] }
0x27c5   : > { %v4621_v27 = vld [vmem:[%s7256_s21] ss:$0 sm:$0xff] }
0x27c6   : > { %v3866_v35 = vmul.f32 0.35355338, %v3852_v40 }
0x27c7   : > { %v3794_v18 = vpop.permute.xlu1 %3793 }
0x2823   : > { %v3858_v33 = vpop.permute.xlu0 %3857 }
0x2824   : > { %v3859_v34 = vsel %vm1433_vm2, %v3858_v33, %v3786_v20 }
0x2825   : > { %v3860_v23 = vmul.f32 %v3859_v34, %v6506_v26  ;;  %v3867_v26 = vpack.c.bf16 %v3866_v35, %v3866_v35  ;;  %v5353_v35 = vld [vmem:[%s6105_s12 + $0x18] sm:$0xff]  }
0x2827   : > { %3862 = vrot.lane.b32.xlu0 %v3860_v23, %s5942_s7  ;;  %s7254_s7 = sld [smem:[#allocation58_spill]] }
0x282b   : > { %3791 = vrot.lane.b32.xlu0 %v6840_v31, %s7252_s4 }
0x282d   : > { %v5349_v5 = vld [vmem:[%s7254_s7 + $0x8] sm:$0xff]  }
0x2899   : > { %v3863_v38 = vpop.permute.xlu0 %3862 }
0x289a   : > { %v3865_v39 = vadd.f32 %v3863_v38, %v3853_v60 }
0x289c   : > { %v3868_v43 = vpack.c.bf16 %v3865_v39, %v3865_v39 }
0x289d   : > { %v3792_v31 = vpop.permute.xlu0 %3791 }
0x289e   : > { %v3873_v47 = vsel %vm1466_vm3, %v3868_v43, 0  ;;  %5077 = vmatpush3.bf16.msra.mxu0 %v3792_v31 }
0x289f   : > { %5085 = vmatpush3.bf16.xpose.msra.mxu1 %v3873_v47  ;;  %5078 = vmatprep.subr.bf16.mxu0 %v5938_v0  ;;  %v5352_v47 = vld [vmem:[%s6105_s12 + $0x10] sm:$0xff]  }
0x28a0   : > { %5096 = vmatprep.subr.bf16.mxu1 %v5938_v0 }
0x28a2   : > { %5079 = vmatpush3.bf16.msra.mxu0 %v3794_v18 }
0x28a3   : > { %5090 = vmatprep.subr.bf16.mxu0 %v5938_v0 }
0x28a5   : > { %5081 = vmatmul.mubr.msk.bf16.vlgmr.msra.gmra.mrb[88].mxu0 %vm1262_vm1, %v6781_v37 }
0x28a6   : > { %5087 = vmatmul.mubr.msk.bf16.vlgmr.msra.gmra.mrb[88].mxu1 %vm1466_vm3, %v3867_v26  ;;  %5092 = vmatprep.mubr.msk.bf16.mxu0 %vm5939_vm0, %v5938_v0  ;;  %v4622_v26 = vld [vmem:[%s6100_s29] ss:$0 sm:$0xff] }
0x28a7   : > { %5098 = vmatprep.mubr.msk.bf16.mxu1 %vm5939_vm0, %v5938_v0 }
0x2978   : > { %v3834_v41 = vpop.f32.mrb[88].mxu0 }
0x2979   : > { %v3909_v48 = vpop.f32.mrb[88].mxu1  ;;  %v5082_v46 = vpop.f32.mrb[89].mxu0 }
0x297a   : > { %v3910_v36 = vadd.f32 %v6855_v28, %v3909_v48  ;;  %v5088_v45 = vpop.f32.mrb[89].mxu1  ;;  %v3837_v28 = vpop.f32.mrb[90].mxu0 }
0x297b   : > { %v3912_v56 = vpop.f32.mrb[90].mxu1  ;;  %v5083_v54 = vpop.f32.mrb[91].mxu0 }
0x297c   : > { %v5089_v49 = vpop.f32.mrb[91].mxu1  ;;  %v3915_v50 = vsel %vm1466_vm3, %v3910_v36, -inf }
0x297d   : > { %3916 = vmax.xlane.f32.xlu0 %v3915_v50  ;;  %v4626_v50 = vld [vmem:[%s7257_s16] ss:$0 sm:$0xff]  ;;  %s7114_s16 = scalar_lea.hbm %s7260_s15, %s4635_s8 }
0x2993   : > { %3797 = vrot.lane.b32.xlu0 %v6872_v51, %s7252_s4  ;;  %v3975_v51 = vld [vmem:[#allocation23 + $0xc] sm:$0xf]  ;;  %s4545_s4 = sshll.u32 %s6406_s14, 3 }
0x2994   : > { %v3980_v61 = vsel %vm1529_vm4, %v3975_v51, 0  ;;  %s1216_s9 = scalar_lea.vmem [#allocation25], %s4545_s4 }
0x2995   : > { %5097 = vmatpush3.bf16.msra.mxu1 %v3980_v61  ;;  %s4258_s21 = sshll.u32 %s1216_s9, 4  ;;  %s7116_s21 = int_to_ptr.vmem [resolvable:$true] %s4258_s21 }
0x2996   : > { %5110 = vmatprep.subr.bf16.mxu1 %v5938_v0  ;;  %s5790_s5 = scalar_lea.vmem %s7116_s21, 128 }
0x2997   : > { %p5791_p1 = scmp.ne.s32.totalorder %s7116_s21, %s5790_s5 }
0x2999   : > { %p5792_p4 = pnand %p5791_p1, %p7261_p3 }
0x299b   : > { %p5793_p5 = pneg %p5792_p4 }
0x2a0a   : > { %v3917_v3 = vpop.xlane.xlu0 %3916 }
0x2a0b   : > { %v3918_v42 = vsub.f32 %v3910_v36, %v3917_v3 }
0x2a0d   : > { %v3919_v52 = vmul.f32 1.442695, %v3918_v42 }
0x2a0e   : > { %v3798_v53 = vpop.permute.xlu0 %3797 }
0x2a0f   : > { %5384 = vpow2.f32 %v3919_v52  ;;  %v3835_v2 = vadd.f32 %v3834_v41, %v3798_v53 }
0x2a11   : > { %v3927_v58 = vpack.c.bf16 %v3835_v2, %v3835_v2 }
0x2a13   : > { %v3932_v59 = vsel %vm1529_vm4, %v3927_v58, 0 }
0x2a14   : > { %5091 = vmatpush3.bf16.msra.mxu0 %v3932_v59 }
0x2a15   : > { %5102 = vmatprep.subr.bf16.mxu0 %v5938_v0 }
0x2a19   : > { %v5385_v37 = vpop.eup %5384 }
0x2a1a   : > { %v3921_v9 = vsel %vm1466_vm3, %v5385_v37, 0.0 }
0x2a1b   : > { %3922 = vadd.xlane.f32.xlu1 %v3921_v9 }
0x2aa8   : > { %v3923_v6 = vpop.xlane.xlu1 %3922 }
0x2aa9   : > { %5386 = vrcp.f32 %v3923_v6  ;;  %v4632_v6 = vld [vmem:[%s7258_s25] ss:$0 sm:$0xff]  ;;  %s5794_s25 = sshll.u32 %s5946_s11, 4  ;;  %s5795_s25 = int_to_ptr.vmem [resolvable:$false] %s5794_s25 }
0x2aaa   : > { %p5797_p7 = scmp.lt.s32.totalorder %s7116_s21, %s5795_s25 }
0x2ab3   : > { %v5387_v62 = vpop.eup %5386 }
0x2ab4   : > { %v3925_v63 = vmul.f32 %v5387_v62, %v5385_v37 }
0x2ab6   : > { %v3926_v7 = vpack.c.bf16 %v3925_v63, %v3925_v63  ;;  %v4633_v63 = vld [vmem:[%s7259_s23] ss:$0 sm:$0xff]  ;;  %s5796_s23 = scalar_lea.vmem %s5795_s25, 256 }
0x2ab7   : > { %p5798_p10 = scmp.lt.s32.totalorder %s5796_s23, %s5790_s5 }
0x2ab8   : > { %5093 = vmatmul.mubr.msk.bf16.vlgmr.msra.gmra.mrb[92].mxu0 %vm1466_vm3, %v3926_v7 }
0x2ab9   : > { %5106 = vmatprep.mubr.msk.bf16.mxu0 %vm5939_vm0, %v5938_v0  ;;  %p5799_p11 = por %p5798_p10, %p5797_p7 }
0x2abb   : > { %p5800_p12 = pnand %p5799_p11, %p5793_p5 }
0x2b8b   : > { %v3968_v1 = vpop.f32.mrb[92].mxu0 }
0x2b8c   : > { %v3974_v44 = vpack.c.bf16 %v3968_v1, %v3968_v1  ;;  %v5094_v8 = vpop.f32.mrb[93].mxu0 }
0x2b8d   : > { %v3971_v10 = vpop.f32.mrb[94].mxu0 }
0x2b8e   : > { %v5095_v11 = vpop.f32.mrb[95].mxu0  ;;  %5099 = vmatmul.mubr.msk.bf16.vlgmr.msra.gmra.mrb[92].mxu1 %vm1466_vm3, %v3974_v44 }
0x2b8f   : > { %5118 = vmatprep.mubr.msk.bf16.mxu1 %vm5939_vm0, %v5938_v0 }
0x2c61   : > { %v4016_v12 = vpop.f32.mrb[92].mxu1 }
0x2c62   : > { %v4022_v15 = vadd.f32 %v4016_v12, %v7044_v14  ;;  %v5100_v16 = vpop.f32.mrb[93].mxu1  ;;  %v5348_v14 = vld [vmem:[%s7254_s7] sm:$0xff]  }
0x2c63   : > { %v4019_v57 = vpop.f32.mrb[94].mxu1  ;;  %5103 = vmatpush3.bf16.msra.mxu0 %v5348_v14 }
0x2c64   : > { %v4030_v17 = vadd.f32 %v4619_v13, %v4022_v15  ;;  %v5101_v19 = vpop.f32.mrb[95].mxu1  ;;  %5104 = vmatprep.subr.bf16.mxu0 %v5938_v0 }
0x2c66   : > { %v4031_v20 = vadd.f32 %v4030_v17, %v6806_v55  ;;  %v5350_v55 = vld [vmem:[%s6105_s12] sm:$0xff]  }
0x2c67   : > { %5105 = vmatpush3.bf16.msra.mxu0 %v5349_v5  ;;  %5111 = vmatpush3.bf16.msra.mxu1 %v5350_v55 }
0x2c68   : > { %v4032_v21 = vsel %vm1262_vm1, %v4031_v20, 0.0  ;;  %5112 = vmatprep.subr.bf16.mxu1 %v5938_v0 }
0x2c69   : > { %4033 = vadd.xlane.f32.xlu1 %v4032_v21 }
0x2c6b   : > { %5113 = vmatpush3.bf16.msra.mxu1 %v5351_v32 }
0x2c6c   : > { %5114 = vmatprep.subr.bf16.mxu1 %v5938_v0 }
0x2c6f   : > { %5115 = vmatpush3.bf16.msra.mxu1 %v5352_v47 }
0x2c70   : > { %5116 = vmatprep.subr.bf16.mxu1 %v5938_v0 }
0x2c73   : > { %5117 = vmatpush3.bf16.msra.mxu1 %v5353_v35 }
0x2cf6   : > { %v4034_v24 = vpop.xlane.xlu1 %4033 }
0x2cf7   : > { %v4035_v4 = vmul.f32 0.03125, %v4034_v24 }
0x2cf9   : > { %v4036_v25 = vsub.f32 %v4031_v20, %v4035_v4 }
0x2cfb   : > { %v4037_v29 = vmul.f32 %v4036_v25, %v4036_v25 }
0x2cfd   : > { %v4038_v30 = vsel %vm1262_vm1, %v4037_v29, 0.0 }
0x2cfe   : > { %4039 = vadd.xlane.f32.xlu1 %v4038_v30 }
0x2d8b   : > { %v4040_v33 = vpop.xlane.xlu1 %4039 }
0x2d8c   : > { %v4041_v34 = vmul.f32 0.03125, %v4040_v33 }
0x2d8e   : > { %v4043_v23 = vadd.f32 1e-06, %v4041_v34 }
0x2d90   : > { %5388 = vrsqrt.f32 %v4043_v23 }
0x2d9a   : > { %v5389_v60 = vpop.eup %5388 }
0x2d9b   : > { %v4045_v38 = vmul.f32 %v5389_v60, %v4036_v25 }
0x2d9d   : > { %v4052_v39 = vmul.f32 %v4620_v22, %v4045_v38 }
0x2d9f   : > { %v4060_v40 = vadd.f32 %v4621_v27, %v4052_v39 }
0x2da1   : > { %v4061_v43 = vpack.c.bf16 %v4060_v40, %v4060_v40 }
0x2da3   : > { %5107 = vmatmul.mubr.msk.bf16.vlgmr.msra.gmra.mrb[96].mxu0 %vm1262_vm1, %v4061_v43 }
0x2e76   : > { %v4122_v31 = vpop.f32.mrb[96].mxu0 }
0x2e77   : > { %v4123_v18 = vadd.f32 %v4622_v26, %v4122_v31  ;;  %v5108_v48 = vpop.f32.mrb[97].mxu0 }
0x2e78   : > { %v4125_v36 = vpop.f32.mrb[98].mxu0 }
0x2e79   : > { %v4128_v45 = vmax.f32 %v4123_v18, 0.0  ;;  %v5109_v56 = vpop.f32.mrb[99].mxu0 }
0x2e7b   : > { %v4129_v49 = vpack.c.bf16 %v4128_v45, %v4128_v45 }
0x2e7d   : > { %5119 = vmatmul.mubr.msk.bf16.vlgmr.msra.gmra.mrb[96].mxu1 %vm4169_vm5, %v4129_v49 }
0x2f50   : > { %v4207_v3 = vpop.f32.mrb[96].mxu1 }
0x2f51   : > { %v4208_v42 = vadd.f32 %v4626_v50, %v4207_v3  ;;  %v5120_v52 = vpop.f32.mrb[97].mxu1 }
0x2f52   : > { %v4210_v37 = vpop.f32.mrb[98].mxu1 }
0x2f53   : > { %v4213_v9 = vadd.f32 %v4208_v42, %v4060_v40  ;;  %v5121_v0 = vpop.f32.mrb[99].mxu1 }
0x2f55   : > { %v4214_v41 = vsel %vm1262_vm1, %v4213_v9, 0.0 }
0x2f56   : > { %4215 = vadd.xlane.f32.xlu1 %v4214_v41 }
0x2fe3   : > { %v4216_v46 = vpop.xlane.xlu1 %4215 }
0x2fe4   : > { %v4217_v28 = vmul.f32 0.03125, %v4216_v46 }
0x2fe6   : > { %v4218_v53 = vsub.f32 %v4213_v9, %v4217_v28 }
0x2fe8   : > { %v4219_v54 = vmul.f32 %v4218_v53, %v4218_v53 }
0x2fea   : > { %v4220_v2 = vsel %vm1262_vm1, %v4219_v54, 0.0 }
0x2feb   : > { %4221 = vadd.xlane.f32.xlu1 %v4220_v2 }
0x3078   : > { %v4222_v58 = vpop.xlane.xlu1 %4221 }
0x3079   : > { %v4223_v59 = vmul.f32 0.03125, %v4222_v58 }
0x307b   : > { %v4225_v51 = vadd.f32 1e-06, %v4223_v59 }
0x307d   : > { %5390 = vrsqrt.f32 %v4225_v51 }
0x3087   : > { %v5391_v61 = vpop.eup %5390 }
0x3088   : > { %v4227_v62 = vmul.f32 %v5391_v61, %v4218_v53 }
0x308a   : > { %v4234_v7 = vmul.f32 %v4632_v6, %v4227_v62 }
0x308c   : > { %v4242_v1 = vadd.f32 %v4633_v63, %v4234_v7 }
0x308e   : > { %4243 = vst.msk [vmem:[%s1216_s9] sm:$0xff] %vm1262_vm1, %v4242_v1 }
0x308f   : > { %5803 = shalt.err (!%p5800_p12)
}
0x3090   : > { %s5804_s14 = scalar_lea.hbm %s7114_s16, 128  ;;  %s5808_s4 = scalar_lea.hbm %s7260_s15, 256 }
0x3091   : > { %p5805_p13 = scmp.ne.s32.totalorder %s7114_s16, %s5804_s14  ;;  %p5809_p0 = scmp.lt.u32.totalorder %s7114_s16, %s7260_s15 }
0x3092   : > { %p5810_p8 = scmp.lt.u32.totalorder %s5808_s4, %s5804_s14  ;;  %p5812_p1 = scmp.lt.u32.totalorder %s5804_s14, %s7114_s16 }
0x3093   : > { %p5806_p6 = pnand %p5805_p13, %p7261_p3 }
0x3094   : > { %p5811_p2 = por %p5810_p8, %p5809_p0 }
0x3095   : > { %p5807_p9 = pneg %p5806_p6 }
0x3096   : > { %p5813_p4 = por %p5812_p1, %p5811_p2 }
0x3098   : > { %p5814_p5 = pnand %p5813_p4, %p5807_p9 }
0x309a   : > { %5817 = shalt.err (!%p5814_p5)
}
0x309b   : > { %5174 = dma.vmem_to_hbm [thread:$0]  (%p7261_p3), %s7116_s21, 128, %s7114_s16, %s4245_s3  }
0x309c PF: > { %s4270_s5 = sand.u32 1, %s5876_s28   ;;  %p7262_p7 = scmp.ne.s32.totalorder %s7224_s18, 0 }
0x309d   : > { %p7263_p10 = scmp.ge.s32.totalorder %s5888_s0, 2  ;;  %s4271_s8 = scalar_lea.sflag [#allocation4], %s4270_s5 }
0x309f   : > { %p5221_p11 = pnand %p7263_p10, %p7262_p7 }
0x30a1   : > { %5871 = dma.done.wait (!%p5221_p11), %s4271_s8, 128  }
0x30a2   : > { %5873 = vsyncadd (!%p5221_p11), %s4271_s8, 4294967168  ;;  %p87_p12 = scmp.ge.s32.totalorder %s6310_s26, 4   ;;  %s7264_s28 = smov %s5880_s1 }
0x30a3   : > { %s7265_s1 = smov %s5884_s2  ;;  %s7266_s2 = smov %s6321_s22 }
0x30a4   : > { %s7267_s0 = smov %s6310_s26  ;;  %89 = sbr.rel (!%p87_p12) target bundleno = 78 (0x4e), region = 292 }
0x30ab   :  { %4276 = vsyncpa [#allocation3], 1 }
0x30ac   :  { %4278 = vsyncpa [#allocation3 + $0x1], 1 }
0x30ad   :  { %4279 = vsyncpa [#allocation6], 1 }
0x30ae   :  { %4281 = vsyncpa [#allocation6 + $0x1], 1 }
0x30af   :  { %4282 = vsyncpa [#allocation9], 1 }
0x30b0   :  { %4283 = vsyncpa [#allocation12], 1 }
0x30b1   :  { %4284 = vsyncpa [#allocation15], 1 }
0x30b2   :  { %4285 = vsyncpa [#allocation18], 1 }
0x30b3   :  { %4286 = vsyncpa [#allocation21], 1 }
0x30b4   :  { %4287 = vsyncpa [#allocation24], 1 }
0x30b5   :  { %4288 = vsyncpa [#allocation4], 1 }
0x30b6   :  { %4290 = vsyncpa [#allocation4 + $0x1], 1 }

</bundles_post_ra>
